<compile_context>
chip_gen: v6e
topology: v6e:2x2x1
jax: 0.10.0
libtpu: 0.0.40
codegen_flags: <defaults>
</compile_context>

<pallas_src>
import jax
import jax.numpy as jnp
from jax.experimental import pallas as pl
from jax.experimental.pallas import tpu as pltpu


def _round_up(x, m):
    return (x + m - 1) // m * m


# ----------------------------------------------------------------------------
# Conv matmul kernels.
#   grid = (M tiles ["parallel"], K tiles ["arbitrary"]).
#   Inputs are bf16 (MXU native), accumulation in f32.
#   "stats" kernels emit per-M-tile sum / sum-of-squares (rows 0/1 of an
#   (8, NP) stats block) of the pre-bias accumulator for two-phase BatchNorm.
# ----------------------------------------------------------------------------
def _conv_stats_kernel_1k(x_ref, w_ref, y_ref, st_ref):
    acc = jnp.dot(x_ref[...], w_ref[...], preferred_element_type=jnp.float32)
    y_ref[...] = acc.astype(y_ref.dtype)
    st_ref[0:1, :] = jnp.sum(acc, axis=0, keepdims=True)
    st_ref[1:2, :] = jnp.sum(acc * acc, axis=0, keepdims=True)


def _conv_stats_kernel_nk(x_ref, w_ref, y_ref, st_ref, acc_ref):
    ki = pl.program_id(1)

    @pl.when(ki == 0)
    def _init():
        acc_ref[...] = jnp.zeros_like(acc_ref)

    acc_ref[...] += jnp.dot(x_ref[...], w_ref[...],
                            preferred_element_type=jnp.float32)

    @pl.when(ki == pl.num_programs(1) - 1)
    def _fin():
        acc = acc_ref[...]
        y_ref[...] = acc.astype(y_ref.dtype)
        st_ref[0:1, :] = jnp.sum(acc, axis=0, keepdims=True)
        st_ref[1:2, :] = jnp.sum(acc * acc, axis=0, keepdims=True)


def _conv_bias_relu_kernel_1k(x_ref, w_ref, b_ref, y_ref):
    acc = jnp.dot(x_ref[...], w_ref[...], preferred_element_type=jnp.float32)
    y_ref[...] = jnp.maximum(acc + b_ref[...], 0.0).astype(y_ref.dtype)


def _conv_bias_relu_kernel_nk(x_ref, w_ref, b_ref, y_ref, acc_ref):
    ki = pl.program_id(1)

    @pl.when(ki == 0)
    def _init():
        acc_ref[...] = jnp.zeros_like(acc_ref)

    acc_ref[...] += jnp.dot(x_ref[...], w_ref[...],
                            preferred_element_type=jnp.float32)

    @pl.when(ki == pl.num_programs(1) - 1)
    def _fin():
        y_ref[...] = jnp.maximum(acc_ref[...] + b_ref[...],
                                 0.0).astype(y_ref.dtype)


def conv_matmul(patches, w, bias=None, *, collect_stats, out_dtype):
    """patches: (M, KP) bf16, w: (KP, NP) bf16.

    collect_stats=True  -> returns (y[:M] (M, NP) out_dtype, sum (NP,) f32,
                            sumsq (NP,) f32) — pre-BN conv output + stats.
    collect_stats=False -> returns relu(patches @ w + bias)[:M] (M, NP).
    """
    M, KP = patches.shape
    KP_w, NP = w.shape
    assert KP == KP_w

    # K tiling: at most 256 deep per step (fills a 256-wide MXU pass).
    tk = KP if KP <= 256 else 256
    assert KP % tk == 0, (KP, tk)
    n_k = KP // tk

    # M tiling: 512-row tiles (bounded VMEM, pipelined, megacore-parallel);
    # tiny layers get a single tile.  Padded rows are zero patches -> they
    # contribute exactly 0 to the partial sums, so stats stay exact.
    M16 = _round_up(M, 16)
    tm = M16 if M16 <= 512 else 512
    n_m = pl.cdiv(M16, tm)
    Mp = n_m * tm
    if Mp != M:
        patches = jnp.pad(patches, ((0, Mp - M), (0, 0)))

    in_specs = [
        pl.BlockSpec((tm, tk), lambda mi, ki: (mi, ki)),   # patches
        pl.BlockSpec((tk, NP), lambda mi, ki: (ki, 0)),    # weights
    ]
    args = [patches, w]

    y_shape = jax.ShapeDtypeStruct((Mp, NP), out_dtype)
    y_spec = pl.BlockSpec((tm, NP), lambda mi, ki: (mi, 0))

    if collect_stats:
        out_shape = (y_shape,
                     jax.ShapeDtypeStruct((n_m * 8, NP), jnp.float32))
        out_specs = [y_spec, pl.BlockSpec((8, NP), lambda mi, ki: (mi, 0))]
        kernel = _conv_stats_kernel_nk if n_k > 1 else _conv_stats_kernel_1k
    else:
        assert bias is not None
        in_specs.append(pl.BlockSpec((1, NP), lambda mi, ki: (0, 0)))
        args.append(bias)
        out_shape = y_shape
        out_specs = y_spec
        kernel = (_conv_bias_relu_kernel_nk if n_k > 1
                  else _conv_bias_relu_kernel_1k)

    scratch = [pltpu.VMEM((tm, NP), jnp.float32)] if n_k > 1 else []

    out_item = jnp.dtype(out_dtype).itemsize
    est = (2 * (tm * tk * 2 + tk * NP * 2)          # double-buffered bf16 inputs
           + 2 * tm * NP * out_item                 # double-buffered output
           + 2 * 8 * NP * 4                         # stats / bias blocks
           + (tm * NP * 4 if n_k > 1 else 0))       # f32 accumulator scratch
    vmem_limit = int(min(40 * 1024 * 1024, max(8 * 1024 * 1024, 2 * est)))

    out = pl.pallas_call(
        kernel,
        out_shape=out_shape,
        grid=(n_m, n_k),
        in_specs=in_specs,
        out_specs=out_specs,
        scratch_shapes=scratch,
        compiler_params=pltpu.CompilerParams(
            dimension_semantics=("parallel", "arbitrary"),
            vmem_limit_bytes=vmem_limit,
        ),
    )(*args)

    if collect_stats:
        y, stats = out
        stats = stats.reshape(n_m, 8, NP)
        ssum = jnp.sum(stats[:, 0, :], axis=0)
        ssq = jnp.sum(stats[:, 1, :], axis=0)
        return y[:M], ssum, ssq
    return out[:M]


# ----------------------------------------------------------------------------
# Plain-JAX glue: im2col, maxpool, bilinear upsample.
# ----------------------------------------------------------------------------
def _im2col3x3(x_nhwc):
    """3x3, stride 1, pad 1.  Column ordering: (kh, kw) outer, channel inner."""
    N, H, W, C = x_nhwc.shape
    xp = jnp.pad(x_nhwc, ((0, 0), (1, 1), (1, 1), (0, 0)))
    cols = []
    for kh in range(3):
        for kw in range(3):
            cols.append(xp[:, kh:kh + H, kw:kw + W, :])
    return jnp.concatenate(cols, axis=-1).reshape(N * H * W, 9 * C)


def _maxpool2x2(x):
    N, H, W, C = x.shape
    return jnp.max(x.reshape(N, H // 2, 2, W // 2, 2, C), axis=(2, 4))


def _bilinear_upsample_x2(x):
    """nn.Upsample(scale_factor=2, mode='bilinear', align_corners=True), NHWC."""
    N, H, W, C = x.shape
    Ho, Wo = 2 * H, 2 * W

    def coords(n_in, n_out):
        if n_in == 1:
            z = jnp.zeros((n_out,), jnp.int32)
            return z, z, jnp.zeros((n_out,), jnp.float32)
        pos = jnp.arange(n_out, dtype=jnp.float32) * (n_in - 1) / (n_out - 1)
        lo = jnp.clip(jnp.floor(pos).astype(jnp.int32), 0, n_in - 2)
        return lo, lo + 1, pos - lo.astype(jnp.float32)

    y0, y1, fy = coords(H, Ho)
    x0, x1, fx = coords(W, Wo)
    top = x[:, y0, :, :].astype(jnp.float32)
    bot = x[:, y1, :, :].astype(jnp.float32)
    row = top * (1.0 - fy)[None, :, None, None] + bot * fy[None, :, None, None]
    left = row[:, :, x0, :]
    right = row[:, :, x1, :]
    out = left * (1.0 - fx)[None, None, :, None] + right * fx[None, None, :, None]
    return out.astype(x.dtype)


# ----------------------------------------------------------------------------
# Parameters (weights pre-transformed to padded (KP, NP) bf16 matrices).
# ----------------------------------------------------------------------------
def _make_conv_params(key, cin, cout, ksize, with_bn=True):
    K = ksize * ksize * cin
    KP = _round_up(K, 128)
    if KP > 256:
        KP = _round_up(KP, 256)          # keep KP divisible by the 256 K tile
    NP = _round_up(cout, 128)
    w = 0.05 * jax.random.normal(key, (cout, cin, ksize, ksize), jnp.float32)
    w_mat = jnp.transpose(w, (2, 3, 1, 0)).reshape(K, cout)     # (K, Cout)
    w_mat = jnp.pad(w_mat, ((0, KP - K), (0, NP - cout))).astype(jnp.bfloat16)
    p = {"w": w_mat, "cout": cout, "ksize": ksize}
    if with_bn:
        # Conv bias before BatchNorm is absorbed by train-mode batch stats.
        p["gamma"] = jnp.ones((cout,), jnp.float32)
        p["beta"] = jnp.zeros((cout,), jnp.float32)
    else:
        p["b"] = jnp.zeros((1, NP), jnp.float32)
    return p


def init_unet_params(key, n_channels, n_init):
    keys = iter(jax.random.split(key, 15))

    def dconv(cin, cout):
        return [_make_conv_params(next(keys), cin, cout, 3),
                _make_conv_params(next(keys), cout, cout, 3)]

    return {
        "inc":   dconv(n_channels, n_init),
        "down1": dconv(n_init, n_init * 2),
        "down2": dconv(n_init * 2, n_init * 4),
        "down3": dconv(n_init * 4, n_init * 8),
        "up2":   dconv(n_init * 8 + n_init * 4, n_init * 4),
        "up3":   dconv(n_init * 4 + n_init * 2, n_init * 2),
        "up4":   dconv(n_init * 2 + n_init, n_init),
        "outc":  [_make_conv_params(next(keys), n_init + 1, 1, 1, with_bn=False)],
    }


# ----------------------------------------------------------------------------
# UNet layers / forward.
# ----------------------------------------------------------------------------
def _make_patches(x_nhwc, p):
    N, H, W, C = x_nhwc.shape
    xb = x_nhwc.astype(jnp.bfloat16)
    if p["ksize"] == 1:
        patches = xb.reshape(N * H * W, C)
    else:
        patches = _im2col3x3(xb)
    KP = p["w"].shape[0]
    K = patches.shape[1]
    if KP > K:
        patches = jnp.pad(patches, ((0, 0), (0, KP - K)))
    return patches


def _conv_bn_relu_layer(x_nhwc, p, eps=1e-5):
    """Conv (Pallas matmul + per-tile stats) + train-mode BN + ReLU."""
    N, H, W, _ = x_nhwc.shape
    M = N * H * W
    cout = p["cout"]
    patches = _make_patches(x_nhwc, p)
    y, ssum, ssq = conv_matmul(patches, p["w"], collect_stats=True,
                               out_dtype=jnp.bfloat16)
    s = ssum[:cout]
    q = ssq[:cout]
    mean = s / M
    # NOTE: single-pass biased variance (E[x^2] - mean^2) on the *pre-bias*
    # accumulator in f32; clamped at 0 to guard against cancellation.
    var = jnp.maximum(q / M - mean * mean, 0.0)
    scale = p["gamma"] * jax.lax.rsqrt(var + eps)
    shift = p["beta"] - mean * scale
    yn = jnp.maximum(y[:, :cout].astype(jnp.float32) * scale + shift, 0.0)
    return yn.reshape(N, H, W, cout).astype(jnp.bfloat16)


def _conv_bias_relu_layer(x_nhwc, p):
    """1x1 conv + bias + ReLU, fully fused in the kernel epilogue."""
    N, H, W, _ = x_nhwc.shape
    M = N * H * W
    cout = p["cout"]
    patches = _make_patches(x_nhwc, p)
    y = conv_matmul(patches, p["w"], p["b"], collect_stats=False,
                    out_dtype=jnp.float32)
    return y[:, :cout].reshape(N, H, W, cout)


def _double_conv(x, convs):
    x = _conv_bn_relu_layer(x, convs[0])
    x = _conv_bn_relu_layer(x, convs[1])
    return x


def unet_forward(x_init_nchw, params):
    x0 = jnp.transpose(x_init_nchw, (0, 2, 3, 1)).astype(jnp.bfloat16)   # NHWC

    x1 = _double_conv(x0, params["inc"])
    x2 = _double_conv(_maxpool2x2(x1), params["down1"])
    x3 = _double_conv(_maxpool2x2(x2), params["down2"])
    x4 = _double_conv(_maxpool2x2(x3), params["down3"])

    xu2 = _double_conv(
        jnp.concatenate([x3, _bilinear_upsample_x2(x4)], axis=-1), params["up2"])
    xu3 = _double_conv(
        jnp.concatenate([x2, _bilinear_upsample_x2(xu2)], axis=-1), params["up3"])
    xu4 = _double_conv(
        jnp.concatenate([x1, _bilinear_upsample_x2(xu3)], axis=-1), params["up4"])

    # final: concat with the network input, 1x1 conv, ReLU (fused in epilogue).
    xx = _conv_bias_relu_layer(jnp.concatenate([xu4, x0], axis=-1),
                               params["outc"][0])

    def to_nchw_f32(t):
        return jnp.transpose(t.astype(jnp.float32), (0, 3, 1, 2))

    return (to_nchw_f32(xx), x_init_nchw, to_nchw_f32(xu2),
            to_nchw_f32(xu3), to_nchw_f32(xu4))


# ----------------------------------------------------------------------------
if __name__ == "__main__":
    key = jax.random.PRNGKey(0)
    k_x, k_p = jax.random.split(key)

    # n_channels must be 1 for the `final(n_init + 1, 1)` channel arithmetic.
    N, C_IN, H, W = 2, 1, 32, 32
    N_INIT = 8

    x_init = jax.random.normal(k_x, (N, C_IN, H, W), jnp.float32)
    params = init_unet_params(k_p, n_channels=C_IN, n_init=N_INIT)

    fwd = jax.jit(lambda xin: unet_forward(xin, params))
    outs = jax.block_until_ready(fwd(x_init))
    xx, x_ret, xu2, xu3, xu4 = outs

    assert xx.shape == (N, 1, H, W), xx.shape
    assert x_ret.shape == (N, C_IN, H, W), x_ret.shape
    assert xu2.shape == (N, N_INIT * 4, H // 4, W // 4), xu2.shape
    assert xu3.shape == (N, N_INIT * 2, H // 2, W // 2), xu3.shape
    assert xu4.shape == (N, N_INIT, H, W), xu4.shape
    for t in (xx, xu2, xu3, xu4):
        assert jnp.all(jnp.isfinite(t))
    assert jnp.all(xx >= 0)  # final ReLU

    print("KERNEL_OK")
</pallas_src>

<mosaic_0001>
module attributes {stable_mosaic.version = 11 : i64} {
  func.func @_conv_stats_kernel_1k(%arg0: i32, %arg1: i32, %arg2: memref<512x128xbf16, #tpu.memory_space<vmem>>, %arg3: memref<128x128xbf16, #tpu.memory_space<vmem>>, %arg4: memref<512x128xbf16, #tpu.memory_space<vmem>>, %arg5: memref<8x128xf32, #tpu.memory_space<vmem>>) attributes {dimension_semantics = [#tpu.dimension_semantics<parallel>, #tpu.dimension_semantics<arbitrary>], iteration_bounds = array<i64: 4, 1>, scalar_prefetch = 0 : i64, scratch_operands = 0 : i64, tpu.core_type = #tpu.core_type<tc>, window_params = [{transform_indices = @transform_0, window_bounds = array<i64: 512, 128>}, {transform_indices = @transform_1, window_bounds = array<i64: 128, 128>}, {transform_indices = @transform_2, window_bounds = array<i64: 512, 128>}, {transform_indices = @transform_3, window_bounds = array<i64: 8, 128>}]} {
    %c0 = arith.constant 0 : index
    %c0_0 = arith.constant 0 : index
    %0 = vector.load %arg2[%c0, %c0_0] : memref<512x128xbf16, #tpu.memory_space<vmem>>, vector<512x128xbf16>
    %c0_1 = arith.constant 0 : index
    %c0_2 = arith.constant 0 : index
    %1 = vector.load %arg3[%c0_1, %c0_2] : memref<128x128xbf16, #tpu.memory_space<vmem>>, vector<128x128xbf16>
    %cst = arith.constant dense<0.000000e+00> : vector<512x128xf32>
    %2 = tpu.matmul %0, %1, %cst {dimension_numbers = #tpu.dot_dimension_numbers<[1], [0], [0], [1], [0, 0, 1, 1], [], []>} : vector<512x128xbf16>, vector<128x128xbf16>, vector<512x128xf32> -> vector<512x128xf32>
    %3 = arith.truncf %2 : vector<512x128xf32> to vector<512x128xbf16>
    %c0_3 = arith.constant 0 : index
    %c0_4 = arith.constant 0 : index
    %4 = vector.load %arg4[%c0_3, %c0_4] : memref<512x128xbf16, #tpu.memory_space<vmem>>, vector<512x128xbf16>
    tpu.vector_store %arg4[%c0_3, %c0_4], %3 {strides = array<i32>} : memref<512x128xbf16, #tpu.memory_space<vmem>>, vector<512x128xbf16>,
    %cst_5 = arith.constant dense<0.000000e+00> : vector<128xf32>
    %5 = vector.multi_reduction <add>, %2, %cst_5 [0] : vector<512x128xf32> to vector<128xf32>
    %6 = vector.shape_cast %5 : vector<128xf32> to vector<1x128xf32>
    %c0_6 = arith.constant 0 : index
    %c0_7 = arith.constant 0 : index
    %7 = vector.load %arg5[%c0_6, %c0_7] : memref<8x128xf32, #tpu.memory_space<vmem>>, vector<1x128xf32>
    tpu.vector_store %arg5[%c0_6, %c0_7], %6 {strides = array<i32>} : memref<8x128xf32, #tpu.memory_space<vmem>>, vector<1x128xf32>,
    %8 = arith.mulf %2, %2 : vector<512x128xf32>
    %cst_8 = arith.constant dense<0.000000e+00> : vector<128xf32>
    %9 = vector.multi_reduction <add>, %8, %cst_8 [0] : vector<512x128xf32> to vector<128xf32>
    %10 = vector.shape_cast %9 : vector<128xf32> to vector<1x128xf32>
    %c1 = arith.constant 1 : index
    %c0_9 = arith.constant 0 : index
    %11 = vector.load %arg5[%c1, %c0_9] : memref<8x128xf32, #tpu.memory_space<vmem>>, vector<1x128xf32>
    tpu.vector_store %arg5[%c1, %c0_9], %10 {strides = array<i32>} : memref<8x128xf32, #tpu.memory_space<vmem>>, vector<1x128xf32>,
    return
  }
  func.func @transform_0(%arg0: i32, %arg1: i32) -> (i32, i32) {
    %c0_i32 = arith.constant 0 : i32
    return %arg0, %arg1 : i32, i32
  }
  func.func @transform_1(%arg0: i32, %arg1: i32) -> (i32, i32) {
    %c0_i32 = arith.constant 0 : i32
    %c0_i32_0 = arith.constant 0 : i32
    return %arg1, %c0_i32 : i32, i32
  }
  func.func @transform_2(%arg0: i32, %arg1: i32) -> (i32, i32) {
    %c0_i32 = arith.constant 0 : i32
    %c0_i32_0 = arith.constant 0 : i32
    return %arg0, %c0_i32 : i32, i32
  }
  func.func @transform_3(%arg0: i32, %arg1: i32) -> (i32, i32) {
    %c0_i32 = arith.constant 0 : i32
    %c0_i32_0 = arith.constant 0 : i32
    return %arg0, %c0_i32 : i32, i32
  }
}

module attributes {stable_mosaic.version = 11 : i64} {
  func.func @_conv_stats_kernel_1k(%arg0: i32, %arg1: i32, %arg2: memref<512x128xbf16, #tpu.memory_space<vmem>>, %arg3: memref<128x128xbf16, #tpu.memory_space<vmem>>, %arg4: memref<512x128xbf16, #tpu.memory_space<vmem>>, %arg5: memref<8x128xf32, #tpu.memory_space<vmem>>) attributes {dimension_semantics = [#tpu.dimension_semantics<parallel>, #tpu.dimension_semantics<arbitrary>], iteration_bounds = array<i64: 1, 1>, scalar_prefetch = 0 : i64, scratch_operands = 0 : i64, tpu.core_type = #tpu.core_type<tc>, window_params = [{transform_indices = @transform_0, window_bounds = array<i64: 512, 128>}, {transform_indices = @transform_1, window_bounds = array<i64: 128, 128>}, {transform_indices = @transform_2, window_bounds = array<i64: 512, 128>}, {transform_indices = @transform_3, window_bounds = array<i64: 8, 128>}]} {
    %c0 = arith.constant 0 : index
    %c0_0 = arith.constant 0 : index
    %0 = vector.load %arg2[%c0, %c0_0] : memref<512x128xbf16, #tpu.memory_space<vmem>>, vector<512x128xbf16>
    %c0_1 = arith.constant 0 : index
    %c0_2 = arith.constant 0 : index
    %1 = vector.load %arg3[%c0_1, %c0_2] : memref<128x128xbf16, #tpu.memory_space<vmem>>, vector<128x128xbf16>
    %cst = arith.constant dense<0.000000e+00> : vector<512x128xf32>
    %2 = tpu.matmul %0, %1, %cst {dimension_numbers = #tpu.dot_dimension_numbers<[1], [0], [0], [1], [0, 0, 1, 1], [], []>} : vector<512x128xbf16>, vector<128x128xbf16>, vector<512x128xf32> -> vector<512x128xf32>
    %3 = arith.truncf %2 : vector<512x128xf32> to vector<512x128xbf16>
    %c0_3 = arith.constant 0 : index
    %c0_4 = arith.constant 0 : index
    %4 = vector.load %arg4[%c0_3, %c0_4] : memref<512x128xbf16, #tpu.memory_space<vmem>>, vector<512x128xbf16>
    tpu.vector_store %arg4[%c0_3, %c0_4], %3 {strides = array<i32>} : memref<512x128xbf16, #tpu.memory_space<vmem>>, vector<512x128xbf16>,
    %cst_5 = arith.constant dense<0.000000e+00> : vector<128xf32>
    %5 = vector.multi_reduction <add>, %2, %cst_5 [0] : vector<512x128xf32> to vector<128xf32>
    %6 = vector.shape_cast %5 : vector<128xf32> to vector<1x128xf32>
    %c0_6 = arith.constant 0 : index
    %c0_7 = arith.constant 0 : index
    %7 = vector.load %arg5[%c0_6, %c0_7] : memref<8x128xf32, #tpu.memory_space<vmem>>, vector<1x128xf32>
    tpu.vector_store %arg5[%c0_6, %c0_7], %6 {strides = array<i32>} : memref<8x128xf32, #tpu.memory_space<vmem>>, vector<1x128xf32>,
    %8 = arith.mulf %2, %2 : vector<512x128xf32>
    %cst_8 = arith.constant dense<0.000000e+00> : vector<128xf32>
    %9 = vector.multi_reduction <add>, %8, %cst_8 [0] : vector<512x128xf32> to vector<128xf32>
    %10 = vector.shape_cast %9 : vector<128xf32> to vector<1x128xf32>
    %c1 = arith.constant 1 : index
    %c0_9 = arith.constant 0 : index
    %11 = vector.load %arg5[%c1, %c0_9] : memref<8x128xf32, #tpu.memory_space<vmem>>, vector<1x128xf32>
    tpu.vector_store %arg5[%c1, %c0_9], %10 {strides = array<i32>} : memref<8x128xf32, #tpu.memory_space<vmem>>, vector<1x128xf32>,
    return
  }
  func.func @transform_0(%arg0: i32, %arg1: i32) -> (i32, i32) {
    %c0_i32 = arith.constant 0 : i32
    return %arg0, %arg1 : i32, i32
  }
  func.func @transform_1(%arg0: i32, %arg1: i32) -> (i32, i32) {
    %c0_i32 = arith.constant 0 : i32
    %c0_i32_0 = arith.constant 0 : i32
    return %arg1, %c0_i32 : i32, i32
  }
  func.func @transform_2(%arg0: i32, %arg1: i32) -> (i32, i32) {
    %c0_i32 = arith.constant 0 : i32
    %c0_i32_0 = arith.constant 0 : i32
    return %arg0, %c0_i32 : i32, i32
  }
  func.func @transform_3(%arg0: i32, %arg1: i32) -> (i32, i32) {
    %c0_i32 = arith.constant 0 : i32
    %c0_i32_0 = arith.constant 0 : i32
    return %arg0, %c0_i32 : i32, i32
  }
}

module attributes {stable_mosaic.version = 11 : i64} {
  func.func @_conv_stats_kernel_1k(%arg0: i32, %arg1: i32, %arg2: memref<512x256xbf16, #tpu.memory_space<vmem>>, %arg3: memref<256x128xbf16, #tpu.memory_space<vmem>>, %arg4: memref<512x128xbf16, #tpu.memory_space<vmem>>, %arg5: memref<8x128xf32, #tpu.memory_space<vmem>>) attributes {dimension_semantics = [#tpu.dimension_semantics<parallel>, #tpu.dimension_semantics<arbitrary>], iteration_bounds = array<i64: 1, 1>, scalar_prefetch = 0 : i64, scratch_operands = 0 : i64, tpu.core_type = #tpu.core_type<tc>, window_params = [{transform_indices = @transform_0, window_bounds = array<i64: 512, 256>}, {transform_indices = @transform_1, window_bounds = array<i64: 256, 128>}, {transform_indices = @transform_2, window_bounds = array<i64: 512, 128>}, {transform_indices = @transform_3, window_bounds = array<i64: 8, 128>}]} {
    %c0 = arith.constant 0 : index
    %c0_0 = arith.constant 0 : index
    %0 = vector.load %arg2[%c0, %c0_0] : memref<512x256xbf16, #tpu.memory_space<vmem>>, vector<512x256xbf16>
    %c0_1 = arith.constant 0 : index
    %c0_2 = arith.constant 0 : index
    %1 = vector.load %arg3[%c0_1, %c0_2] : memref<256x128xbf16, #tpu.memory_space<vmem>>, vector<256x128xbf16>
    %cst = arith.constant dense<0.000000e+00> : vector<512x128xf32>
    %2 = tpu.matmul %0, %1, %cst {dimension_numbers = #tpu.dot_dimension_numbers<[1], [0], [0], [1], [0, 0, 1, 1], [], []>} : vector<512x256xbf16>, vector<256x128xbf16>, vector<512x128xf32> -> vector<512x128xf32>
    %3 = arith.truncf %2 : vector<512x128xf32> to vector<512x128xbf16>
    %c0_3 = arith.constant 0 : index
    %c0_4 = arith.constant 0 : index
    %4 = vector.load %arg4[%c0_3, %c0_4] : memref<512x128xbf16, #tpu.memory_space<vmem>>, vector<512x128xbf16>
    tpu.vector_store %arg4[%c0_3, %c0_4], %3 {strides = array<i32>} : memref<512x128xbf16, #tpu.memory_space<vmem>>, vector<512x128xbf16>,
    %cst_5 = arith.constant dense<0.000000e+00> : vector<128xf32>
    %5 = vector.multi_reduction <add>, %2, %cst_5 [0] : vector<512x128xf32> to vector<128xf32>
    %6 = vector.shape_cast %5 : vector<128xf32> to vector<1x128xf32>
    %c0_6 = arith.constant 0 : index
    %c0_7 = arith.constant 0 : index
    %7 = vector.load %arg5[%c0_6, %c0_7] : memref<8x128xf32, #tpu.memory_space<vmem>>, vector<1x128xf32>
    tpu.vector_store %arg5[%c0_6, %c0_7], %6 {strides = array<i32>} : memref<8x128xf32, #tpu.memory_space<vmem>>, vector<1x128xf32>,
    %8 = arith.mulf %2, %2 : vector<512x128xf32>
    %cst_8 = arith.constant dense<0.000000e+00> : vector<128xf32>
    %9 = vector.multi_reduction <add>, %8, %cst_8 [0] : vector<512x128xf32> to vector<128xf32>
    %10 = vector.shape_cast %9 : vector<128xf32> to vector<1x128xf32>
    %c1 = arith.constant 1 : index
    %c0_9 = arith.constant 0 : index
    %11 = vector.load %arg5[%c1, %c0_9] : memref<8x128xf32, #tpu.memory_space<vmem>>, vector<1x128xf32>
    tpu.vector_store %arg5[%c1, %c0_9], %10 {strides = array<i32>} : memref<8x128xf32, #tpu.memory_space<vmem>>, vector<1x128xf32>,
    return
  }
  func.func @transform_0(%arg0: i32, %arg1: i32) -> (i32, i32) {
    %c0_i32 = arith.constant 0 : i32
    return %arg0, %arg1 : i32, i32
  }
  func.func @transform_1(%arg0: i32, %arg1: i32) -> (i32, i32) {
    %c0_i32 = arith.constant 0 : i32
    %c0_i32_0 = arith.constant 0 : i32
    return %arg1, %c0_i32 : i32, i32
  }
  func.func @transform_2(%arg0: i32, %arg1: i32) -> (i32, i32) {
    %c0_i32 = arith.constant 0 : i32
    %c0_i32_0 = arith.constant 0 : i32
    return %arg0, %c0_i32 : i32, i32
  }
  func.func @transform_3(%arg0: i32, %arg1: i32) -> (i32, i32) {
    %c0_i32 = arith.constant 0 : i32
    %c0_i32_0 = arith.constant 0 : i32
    return %arg0, %c0_i32 : i32, i32
  }
}

module attributes {stable_mosaic.version = 11 : i64} {
  func.func @_conv_stats_kernel_1k(%arg0: i32, %arg1: i32, %arg2: memref<128x256xbf16, #tpu.memory_space<vmem>>, %arg3: memref<256x128xbf16, #tpu.memory_space<vmem>>, %arg4: memref<128x128xbf16, #tpu.memory_space<vmem>>, %arg5: memref<8x128xf32, #tpu.memory_space<vmem>>) attributes {dimension_semantics = [#tpu.dimension_semantics<parallel>, #tpu.dimension_semantics<arbitrary>], iteration_bounds = array<i64: 1, 1>, scalar_prefetch = 0 : i64, scratch_operands = 0 : i64, tpu.core_type = #tpu.core_type<tc>, window_params = [{transform_indices = @transform_0, window_bounds = array<i64: 128, 256>}, {transform_indices = @transform_1, window_bounds = array<i64: 256, 128>}, {transform_indices = @transform_2, window_bounds = array<i64: 128, 128>}, {transform_indices = @transform_3, window_bounds = array<i64: 8, 128>}]} {
    %c0 = arith.constant 0 : index
    %c0_0 = arith.constant 0 : index
    %0 = vector.load %arg2[%c0, %c0_0] : memref<128x256xbf16, #tpu.memory_space<vmem>>, vector<128x256xbf16>
    %c0_1 = arith.constant 0 : index
    %c0_2 = arith.constant 0 : index
    %1 = vector.load %arg3[%c0_1, %c0_2] : memref<256x128xbf16, #tpu.memory_space<vmem>>, vector<256x128xbf16>
    %cst = arith.constant dense<0.000000e+00> : vector<128x128xf32>
    %2 = tpu.matmul %0, %1, %cst {dimension_numbers = #tpu.dot_dimension_numbers<[1], [0], [0], [1], [0, 0, 1, 1], [], []>} : vector<128x256xbf16>, vector<256x128xbf16>, vector<128x128xf32> -> vector<128x128xf32>
    %3 = arith.truncf %2 : vector<128x128xf32> to vector<128x128xbf16>
    %c0_3 = arith.constant 0 : index
    %c0_4 = arith.constant 0 : index
    %4 = vector.load %arg4[%c0_3, %c0_4] : memref<128x128xbf16, #tpu.memory_space<vmem>>, vector<128x128xbf16>
    tpu.vector_store %arg4[%c0_3, %c0_4], %3 {strides = array<i32>} : memref<128x128xbf16, #tpu.memory_space<vmem>>, vector<128x128xbf16>,
    %cst_5 = arith.constant dense<0.000000e+00> : vector<128xf32>
    %5 = vector.multi_reduction <add>, %2, %cst_5 [0] : vector<128x128xf32> to vector<128xf32>
    %6 = vector.shape_cast %5 : vector<128xf32> to vector<1x128xf32>
    %c0_6 = arith.constant 0 : index
    %c0_7 = arith.constant 0 : index
    %7 = vector.load %arg5[%c0_6, %c0_7] : memref<8x128xf32, #tpu.memory_space<vmem>>, vector<1x128xf32>
    tpu.vector_store %arg5[%c0_6, %c0_7], %6 {strides = array<i32>} : memref<8x128xf32, #tpu.memory_space<vmem>>, vector<1x128xf32>,
    %8 = arith.mulf %2, %2 : vector<128x128xf32>
    %cst_8 = arith.constant dense<0.000000e+00> : vector<128xf32>
    %9 = vector.multi_reduction <add>, %8, %cst_8 [0] : vector<128x128xf32> to vector<128xf32>
    %10 = vector.shape_cast %9 : vector<128xf32> to vector<1x128xf32>
    %c1 = arith.constant 1 : index
    %c0_9 = arith.constant 0 : index
    %11 = vector.load %arg5[%c1, %c0_9] : memref<8x128xf32, #tpu.memory_space<vmem>>, vector<1x128xf32>
    tpu.vector_store %arg5[%c1, %c0_9], %10 {strides = array<i32>} : memref<8x128xf32, #tpu.memory_space<vmem>>, vector<1x128xf32>,
    return
  }
  func.func @transform_0(%arg0: i32, %arg1: i32) -> (i32, i32) {
    %c0_i32 = arith.constant 0 : i32
    return %arg0, %arg1 : i32, i32
  }
  func.func @transform_1(%arg0: i32, %arg1: i32) -> (i32, i32) {
    %c0_i32 = arith.constant 0 : i32
    %c0_i32_0 = arith.constant 0 : i32
    return %arg1, %c0_i32 : i32, i32
  }
  func.func @transform_2(%arg0: i32, %arg1: i32) -> (i32, i32) {
    %c0_i32 = arith.constant 0 : i32
    %c0_i32_0 = arith.constant 0 : i32
    return %arg0, %c0_i32 : i32, i32
  }
  func.func @transform_3(%arg0: i32, %arg1: i32) -> (i32, i32) {
    %c0_i32 = arith.constant 0 : i32
    %c0_i32_0 = arith.constant 0 : i32
    return %arg0, %c0_i32 : i32, i32
  }
}

module attributes {stable_mosaic.version = 11 : i64} {
  func.func @_conv_stats_kernel_nk(%arg0: i32, %arg1: i32, %arg2: memref<128x256xbf16, #tpu.memory_space<vmem>>, %arg3: memref<256x128xbf16, #tpu.memory_space<vmem>>, %arg4: memref<128x128xbf16, #tpu.memory_space<vmem>>, %arg5: memref<8x128xf32, #tpu.memory_space<vmem>>, %arg6: memref<128x128xf32, #tpu.memory_space<vmem>>) attributes {dimension_semantics = [#tpu.dimension_semantics<parallel>, #tpu.dimension_semantics<arbitrary>], iteration_bounds = array<i64: 1, 2>, scalar_prefetch = 0 : i64, scratch_operands = 1 : i64, tpu.core_type = #tpu.core_type<tc>, window_params = [{transform_indices = @transform_0, window_bounds = array<i64: 128, 256>}, {transform_indices = @transform_1, window_bounds = array<i64: 256, 128>}, {transform_indices = @transform_2, window_bounds = array<i64: 128, 128>}, {transform_indices = @transform_3, window_bounds = array<i64: 8, 128>}]} {
    %c0_i32 = arith.constant 0 : i32
    %0 = arith.cmpi eq, %arg1, %c0_i32 : i32
    %1 = arith.extui %0 : i1 to i32
    %c0_i32_0 = arith.constant 0 : i32
    %2 = arith.cmpi ne, %1, %c0_i32_0 : i32
    scf.if %2 {
      %cst_9 = arith.constant 0.000000e+00 : f32
      %12 = vector.broadcast %cst_9 : f32 to vector<128x128xf32>
      %c0_10 = arith.constant 0 : index
      %c0_11 = arith.constant 0 : index
      %13 = vector.load %arg6[%c0_10, %c0_11] : memref<128x128xf32, #tpu.memory_space<vmem>>, vector<128x128xf32>
      tpu.vector_store %arg6[%c0_10, %c0_11], %12 {strides = array<i32>} : memref<128x128xf32, #tpu.memory_space<vmem>>, vector<128x128xf32>,
    } else {
    }
    %c0 = arith.constant 0 : index
    %c0_1 = arith.constant 0 : index
    %3 = vector.load %arg6[%c0, %c0_1] : memref<128x128xf32, #tpu.memory_space<vmem>>, vector<128x128xf32>
    %c0_2 = arith.constant 0 : index
    %c0_3 = arith.constant 0 : index
    %4 = vector.load %arg2[%c0_2, %c0_3] : memref<128x256xbf16, #tpu.memory_space<vmem>>, vector<128x256xbf16>
    %c0_4 = arith.constant 0 : index
    %c0_5 = arith.constant 0 : index
    %5 = vector.load %arg3[%c0_4, %c0_5] : memref<256x128xbf16, #tpu.memory_space<vmem>>, vector<256x128xbf16>
    %cst = arith.constant dense<0.000000e+00> : vector<128x128xf32>
    %6 = tpu.matmul %4, %5, %cst {dimension_numbers = #tpu.dot_dimension_numbers<[1], [0], [0], [1], [0, 0, 1, 1], [], []>} : vector<128x256xbf16>, vector<256x128xbf16>, vector<128x128xf32> -> vector<128x128xf32>
    %7 = arith.addf %3, %6 : vector<128x128xf32>
    %c0_6 = arith.constant 0 : index
    %c0_7 = arith.constant 0 : index
    %8 = vector.load %arg6[%c0_6, %c0_7] : memref<128x128xf32, #tpu.memory_space<vmem>>, vector<128x128xf32>
    tpu.vector_store %arg6[%c0_6, %c0_7], %7 {strides = array<i32>} : memref<128x128xf32, #tpu.memory_space<vmem>>, vector<128x128xf32>,
    %c1_i32 = arith.constant 1 : i32
    %9 = arith.cmpi eq, %arg1, %c1_i32 : i32
    %10 = arith.extui %9 : i1 to i32
    %c0_i32_8 = arith.constant 0 : i32
    %11 = arith.cmpi ne, %10, %c0_i32_8 : i32
    scf.if %11 {
      %c0_9 = arith.constant 0 : index
      %c0_10 = arith.constant 0 : index
      %12 = vector.load %arg6[%c0_9, %c0_10] : memref<128x128xf32, #tpu.memory_space<vmem>>, vector<128x128xf32>
      %13 = arith.truncf %12 : vector<128x128xf32> to vector<128x128xbf16>
      %c0_11 = arith.constant 0 : index
      %c0_12 = arith.constant 0 : index
      %14 = vector.load %arg4[%c0_11, %c0_12] : memref<128x128xbf16, #tpu.memory_space<vmem>>, vector<128x128xbf16>
      tpu.vector_store %arg4[%c0_11, %c0_12], %13 {strides = array<i32>} : memref<128x128xbf16, #tpu.memory_space<vmem>>, vector<128x128xbf16>,
      %cst_13 = arith.constant dense<0.000000e+00> : vector<128xf32>
      %15 = vector.multi_reduction <add>, %12, %cst_13 [0] : vector<128x128xf32> to vector<128xf32>
      %16 = vector.shape_cast %15 : vector<128xf32> to vector<1x128xf32>
      %c0_14 = arith.constant 0 : index
      %c0_15 = arith.constant 0 : index
      %17 = vector.load %arg5[%c0_14, %c0_15] : memref<8x128xf32, #tpu.memory_space<vmem>>, vector<1x128xf32>
      tpu.vector_store %arg5[%c0_14, %c0_15], %16 {strides = array<i32>} : memref<8x128xf32, #tpu.memory_space<vmem>>, vector<1x128xf32>,
      %18 = arith.mulf %12, %12 : vector<128x128xf32>
      %cst_16 = arith.constant dense<0.000000e+00> : vector<128xf32>
      %19 = vector.multi_reduction <add>, %18, %cst_16 [0] : vector<128x128xf32> to vector<128xf32>
      %20 = vector.shape_cast %19 : vector<128xf32> to vector<1x128xf32>
      %c1 = arith.constant 1 : index
      %c0_17 = arith.constant 0 : index
      %21 = vector.load %arg5[%c1, %c0_17] : memref<8x128xf32, #tpu.memory_space<vmem>>, vector<1x128xf32>
      tpu.vector_store %arg5[%c1, %c0_17], %20 {strides = array<i32>} : memref<8x128xf32, #tpu.memory_space<vmem>>, vector<1x128xf32>,
    } else {
    }
    return
  }
  func.func @transform_0(%arg0: i32, %arg1: i32) -> (i32, i32) {
    %c0_i32 = arith.constant 0 : i32
    return %arg0, %arg1 : i32, i32
  }
  func.func @transform_1(%arg0: i32, %arg1: i32) -> (i32, i32) {
    %c0_i32 = arith.constant 0 : i32
    %c0_i32_0 = arith.constant 0 : i32
    return %arg1, %c0_i32 : i32, i32
  }
  func.func @transform_2(%arg0: i32, %arg1: i32) -> (i32, i32) {
    %c0_i32 = arith.constant 0 : i32
    %c0_i32_0 = arith.constant 0 : i32
    return %arg0, %c0_i32 : i32, i32
  }
  func.func @transform_3(%arg0: i32, %arg1: i32) -> (i32, i32) {
    %c0_i32 = arith.constant 0 : i32
    %c0_i32_0 = arith.constant 0 : i32
    return %arg0, %c0_i32 : i32, i32
  }
}

module attributes {stable_mosaic.version = 11 : i64} {
  func.func @_conv_stats_kernel_nk(%arg0: i32, %arg1: i32, %arg2: memref<32x256xbf16, #tpu.memory_space<vmem>>, %arg3: memref<256x128xbf16, #tpu.memory_space<vmem>>, %arg4: memref<32x128xbf16, #tpu.memory_space<vmem>>, %arg5: memref<8x128xf32, #tpu.memory_space<vmem>>, %arg6: memref<32x128xf32, #tpu.memory_space<vmem>>) attributes {dimension_semantics = [#tpu.dimension_semantics<parallel>, #tpu.dimension_semantics<arbitrary>], iteration_bounds = array<i64: 1, 2>, scalar_prefetch = 0 : i64, scratch_operands = 1 : i64, tpu.core_type = #tpu.core_type<tc>, window_params = [{transform_indices = @transform_0, window_bounds = array<i64: 32, 256>}, {transform_indices = @transform_1, window_bounds = array<i64: 256, 128>}, {transform_indices = @transform_2, window_bounds = array<i64: 32, 128>}, {transform_indices = @transform_3, window_bounds = array<i64: 8, 128>}]} {
    %c0_i32 = arith.constant 0 : i32
    %0 = arith.cmpi eq, %arg1, %c0_i32 : i32
    %1 = arith.extui %0 : i1 to i32
    %c0_i32_0 = arith.constant 0 : i32
    %2 = arith.cmpi ne, %1, %c0_i32_0 : i32
    scf.if %2 {
      %cst_9 = arith.constant 0.000000e+00 : f32
      %12 = vector.broadcast %cst_9 : f32 to vector<32x128xf32>
      %c0_10 = arith.constant 0 : index
      %c0_11 = arith.constant 0 : index
      %13 = vector.load %arg6[%c0_10, %c0_11] : memref<32x128xf32, #tpu.memory_space<vmem>>, vector<32x128xf32>
      tpu.vector_store %arg6[%c0_10, %c0_11], %12 {strides = array<i32>} : memref<32x128xf32, #tpu.memory_space<vmem>>, vector<32x128xf32>,
    } else {
    }
    %c0 = arith.constant 0 : index
    %c0_1 = arith.constant 0 : index
    %3 = vector.load %arg6[%c0, %c0_1] : memref<32x128xf32, #tpu.memory_space<vmem>>, vector<32x128xf32>
    %c0_2 = arith.constant 0 : index
    %c0_3 = arith.constant 0 : index
    %4 = vector.load %arg2[%c0_2, %c0_3] : memref<32x256xbf16, #tpu.memory_space<vmem>>, vector<32x256xbf16>
    %c0_4 = arith.constant 0 : index
    %c0_5 = arith.constant 0 : index
    %5 = vector.load %arg3[%c0_4, %c0_5] : memref<256x128xbf16, #tpu.memory_space<vmem>>, vector<256x128xbf16>
    %cst = arith.constant dense<0.000000e+00> : vector<32x128xf32>
    %6 = tpu.matmul %4, %5, %cst {dimension_numbers = #tpu.dot_dimension_numbers<[1], [0], [0], [1], [0, 0, 1, 1], [], []>} : vector<32x256xbf16>, vector<256x128xbf16>, vector<32x128xf32> -> vector<32x128xf32>
    %7 = arith.addf %3, %6 : vector<32x128xf32>
    %c0_6 = arith.constant 0 : index
    %c0_7 = arith.constant 0 : index
    %8 = vector.load %arg6[%c0_6, %c0_7] : memref<32x128xf32, #tpu.memory_space<vmem>>, vector<32x128xf32>
    tpu.vector_store %arg6[%c0_6, %c0_7], %7 {strides = array<i32>} : memref<32x128xf32, #tpu.memory_space<vmem>>, vector<32x128xf32>,
    %c1_i32 = arith.constant 1 : i32
    %9 = arith.cmpi eq, %arg1, %c1_i32 : i32
    %10 = arith.extui %9 : i1 to i32
    %c0_i32_8 = arith.constant 0 : i32
    %11 = arith.cmpi ne, %10, %c0_i32_8 : i32
    scf.if %11 {
      %c0_9 = arith.constant 0 : index
      %c0_10 = arith.constant 0 : index
      %12 = vector.load %arg6[%c0_9, %c0_10] : memref<32x128xf32, #tpu.memory_space<vmem>>, vector<32x128xf32>
      %13 = arith.truncf %12 : vector<32x128xf32> to vector<32x128xbf16>
      %c0_11 = arith.constant 0 : index
      %c0_12 = arith.constant 0 : index
      %14 = vector.load %arg4[%c0_11, %c0_12] : memref<32x128xbf16, #tpu.memory_space<vmem>>, vector<32x128xbf16>
      tpu.vector_store %arg4[%c0_11, %c0_12], %13 {strides = array<i32>} : memref<32x128xbf16, #tpu.memory_space<vmem>>, vector<32x128xbf16>,
      %cst_13 = arith.constant dense<0.000000e+00> : vector<128xf32>
      %15 = vector.multi_reduction <add>, %12, %cst_13 [0] : vector<32x128xf32> to vector<128xf32>
      %16 = vector.shape_cast %15 : vector<128xf32> to vector<1x128xf32>
      %c0_14 = arith.constant 0 : index
      %c0_15 = arith.constant 0 : index
      %17 = vector.load %arg5[%c0_14, %c0_15] : memref<8x128xf32, #tpu.memory_space<vmem>>, vector<1x128xf32>
      tpu.vector_store %arg5[%c0_14, %c0_15], %16 {strides = array<i32>} : memref<8x128xf32, #tpu.memory_space<vmem>>, vector<1x128xf32>,
      %18 = arith.mulf %12, %12 : vector<32x128xf32>
      %cst_16 = arith.constant dense<0.000000e+00> : vector<128xf32>
      %19 = vector.multi_reduction <add>, %18, %cst_16 [0] : vector<32x128xf32> to vector<128xf32>
      %20 = vector.shape_cast %19 : vector<128xf32> to vector<1x128xf32>
      %c1 = arith.constant 1 : index
      %c0_17 = arith.constant 0 : index
      %21 = vector.load %arg5[%c1, %c0_17] : memref<8x128xf32, #tpu.memory_space<vmem>>, vector<1x128xf32>
      tpu.vector_store %arg5[%c1, %c0_17], %20 {strides = array<i32>} : memref<8x128xf32, #tpu.memory_space<vmem>>, vector<1x128xf32>,
    } else {
    }
    return
  }
  func.func @transform_0(%arg0: i32, %arg1: i32) -> (i32, i32) {
    %c0_i32 = arith.constant 0 : i32
    return %arg0, %arg1 : i32, i32
  }
  func.func @transform_1(%arg0: i32, %arg1: i32) -> (i32, i32) {
    %c0_i32 = arith.constant 0 : i32
    %c0_i32_0 = arith.constant 0 : i32
    return %arg1, %c0_i32 : i32, i32
  }
  func.func @transform_2(%arg0: i32, %arg1: i32) -> (i32, i32) {
    %c0_i32 = arith.constant 0 : i32
    %c0_i32_0 = arith.constant 0 : i32
    return %arg0, %c0_i32 : i32, i32
  }
  func.func @transform_3(%arg0: i32, %arg1: i32) -> (i32, i32) {
    %c0_i32 = arith.constant 0 : i32
    %c0_i32_0 = arith.constant 0 : i32
    return %arg0, %c0_i32 : i32, i32
  }
}

module attributes {stable_mosaic.version = 11 : i64} {
  func.func @_conv_stats_kernel_nk(%arg0: i32, %arg1: i32, %arg2: memref<32x256xbf16, #tpu.memory_space<vmem>>, %arg3: memref<256x128xbf16, #tpu.memory_space<vmem>>, %arg4: memref<32x128xbf16, #tpu.memory_space<vmem>>, %arg5: memref<8x128xf32, #tpu.memory_space<vmem>>, %arg6: memref<32x128xf32, #tpu.memory_space<vmem>>) attributes {dimension_semantics = [#tpu.dimension_semantics<parallel>, #tpu.dimension_semantics<arbitrary>], iteration_bounds = array<i64: 1, 3>, scalar_prefetch = 0 : i64, scratch_operands = 1 : i64, tpu.core_type = #tpu.core_type<tc>, window_params = [{transform_indices = @transform_0, window_bounds = array<i64: 32, 256>}, {transform_indices = @transform_1, window_bounds = array<i64: 256, 128>}, {transform_indices = @transform_2, window_bounds = array<i64: 32, 128>}, {transform_indices = @transform_3, window_bounds = array<i64: 8, 128>}]} {
    %c0_i32 = arith.constant 0 : i32
    %0 = arith.cmpi eq, %arg1, %c0_i32 : i32
    %1 = arith.extui %0 : i1 to i32
    %c0_i32_0 = arith.constant 0 : i32
    %2 = arith.cmpi ne, %1, %c0_i32_0 : i32
    scf.if %2 {
      %cst_9 = arith.constant 0.000000e+00 : f32
      %12 = vector.broadcast %cst_9 : f32 to vector<32x128xf32>
      %c0_10 = arith.constant 0 : index
      %c0_11 = arith.constant 0 : index
      %13 = vector.load %arg6[%c0_10, %c0_11] : memref<32x128xf32, #tpu.memory_space<vmem>>, vector<32x128xf32>
      tpu.vector_store %arg6[%c0_10, %c0_11], %12 {strides = array<i32>} : memref<32x128xf32, #tpu.memory_space<vmem>>, vector<32x128xf32>,
    } else {
    }
    %c0 = arith.constant 0 : index
    %c0_1 = arith.constant 0 : index
    %3 = vector.load %arg6[%c0, %c0_1] : memref<32x128xf32, #tpu.memory_space<vmem>>, vector<32x128xf32>
    %c0_2 = arith.constant 0 : index
    %c0_3 = arith.constant 0 : index
    %4 = vector.load %arg2[%c0_2, %c0_3] : memref<32x256xbf16, #tpu.memory_space<vmem>>, vector<32x256xbf16>
    %c0_4 = arith.constant 0 : index
    %c0_5 = arith.constant 0 : index
    %5 = vector.load %arg3[%c0_4, %c0_5] : memref<256x128xbf16, #tpu.memory_space<vmem>>, vector<256x128xbf16>
    %cst = arith.constant dense<0.000000e+00> : vector<32x128xf32>
    %6 = tpu.matmul %4, %5, %cst {dimension_numbers = #tpu.dot_dimension_numbers<[1], [0], [0], [1], [0, 0, 1, 1], [], []>} : vector<32x256xbf16>, vector<256x128xbf16>, vector<32x128xf32> -> vector<32x128xf32>
    %7 = arith.addf %3, %6 : vector<32x128xf32>
    %c0_6 = arith.constant 0 : index
    %c0_7 = arith.constant 0 : index
    %8 = vector.load %arg6[%c0_6, %c0_7] : memref<32x128xf32, #tpu.memory_space<vmem>>, vector<32x128xf32>
    tpu.vector_store %arg6[%c0_6, %c0_7], %7 {strides = array<i32>} : memref<32x128xf32, #tpu.memory_space<vmem>>, vector<32x128xf32>,
    %c2_i32 = arith.constant 2 : i32
    %9 = arith.cmpi eq, %arg1, %c2_i32 : i32
    %10 = arith.extui %9 : i1 to i32
    %c0_i32_8 = arith.constant 0 : i32
    %11 = arith.cmpi ne, %10, %c0_i32_8 : i32
    scf.if %11 {
      %c0_9 = arith.constant 0 : index
      %c0_10 = arith.constant 0 : index
      %12 = vector.load %arg6[%c0_9, %c0_10] : memref<32x128xf32, #tpu.memory_space<vmem>>, vector<32x128xf32>
      %13 = arith.truncf %12 : vector<32x128xf32> to vector<32x128xbf16>
      %c0_11 = arith.constant 0 : index
      %c0_12 = arith.constant 0 : index
      %14 = vector.load %arg4[%c0_11, %c0_12] : memref<32x128xbf16, #tpu.memory_space<vmem>>, vector<32x128xbf16>
      tpu.vector_store %arg4[%c0_11, %c0_12], %13 {strides = array<i32>} : memref<32x128xbf16, #tpu.memory_space<vmem>>, vector<32x128xbf16>,
      %cst_13 = arith.constant dense<0.000000e+00> : vector<128xf32>
      %15 = vector.multi_reduction <add>, %12, %cst_13 [0] : vector<32x128xf32> to vector<128xf32>
      %16 = vector.shape_cast %15 : vector<128xf32> to vector<1x128xf32>
      %c0_14 = arith.constant 0 : index
      %c0_15 = arith.constant 0 : index
      %17 = vector.load %arg5[%c0_14, %c0_15] : memref<8x128xf32, #tpu.memory_space<vmem>>, vector<1x128xf32>
      tpu.vector_store %arg5[%c0_14, %c0_15], %16 {strides = array<i32>} : memref<8x128xf32, #tpu.memory_space<vmem>>, vector<1x128xf32>,
      %18 = arith.mulf %12, %12 : vector<32x128xf32>
      %cst_16 = arith.constant dense<0.000000e+00> : vector<128xf32>
      %19 = vector.multi_reduction <add>, %18, %cst_16 [0] : vector<32x128xf32> to vector<128xf32>
      %20 = vector.shape_cast %19 : vector<128xf32> to vector<1x128xf32>
      %c1 = arith.constant 1 : index
      %c0_17 = arith.constant 0 : index
      %21 = vector.load %arg5[%c1, %c0_17] : memref<8x128xf32, #tpu.memory_space<vmem>>, vector<1x128xf32>
      tpu.vector_store %arg5[%c1, %c0_17], %20 {strides = array<i32>} : memref<8x128xf32, #tpu.memory_space<vmem>>, vector<1x128xf32>,
    } else {
    }
    return
  }
  func.func @transform_0(%arg0: i32, %arg1: i32) -> (i32, i32) {
    %c0_i32 = arith.constant 0 : i32
    return %arg0, %arg1 : i32, i32
  }
  func.func @transform_1(%arg0: i32, %arg1: i32) -> (i32, i32) {
    %c0_i32 = arith.constant 0 : i32
    %c0_i32_0 = arith.constant 0 : i32
    return %arg1, %c0_i32 : i32, i32
  }
  func.func @transform_2(%arg0: i32, %arg1: i32) -> (i32, i32) {
    %c0_i32 = arith.constant 0 : i32
    %c0_i32_0 = arith.constant 0 : i32
    return %arg0, %c0_i32 : i32, i32
  }
  func.func @transform_3(%arg0: i32, %arg1: i32) -> (i32, i32) {
    %c0_i32 = arith.constant 0 : i32
    %c0_i32_0 = arith.constant 0 : i32
    return %arg0, %c0_i32 : i32, i32
  }
}

module attributes {stable_mosaic.version = 11 : i64} {
  func.func @_conv_stats_kernel_nk(%arg0: i32, %arg1: i32, %arg2: memref<128x256xbf16, #tpu.memory_space<vmem>>, %arg3: memref<256x128xbf16, #tpu.memory_space<vmem>>, %arg4: memref<128x128xbf16, #tpu.memory_space<vmem>>, %arg5: memref<8x128xf32, #tpu.memory_space<vmem>>, %arg6: memref<128x128xf32, #tpu.memory_space<vmem>>) attributes {dimension_semantics = [#tpu.dimension_semantics<parallel>, #tpu.dimension_semantics<arbitrary>], iteration_bounds = array<i64: 1, 4>, scalar_prefetch = 0 : i64, scratch_operands = 1 : i64, tpu.core_type = #tpu.core_type<tc>, window_params = [{transform_indices = @transform_0, window_bounds = array<i64: 128, 256>}, {transform_indices = @transform_1, window_bounds = array<i64: 256, 128>}, {transform_indices = @transform_2, window_bounds = array<i64: 128, 128>}, {transform_indices = @transform_3, window_bounds = array<i64: 8, 128>}]} {
    %c0_i32 = arith.constant 0 : i32
    %0 = arith.cmpi eq, %arg1, %c0_i32 : i32
    %1 = arith.extui %0 : i1 to i32
    %c0_i32_0 = arith.constant 0 : i32
    %2 = arith.cmpi ne, %1, %c0_i32_0 : i32
    scf.if %2 {
      %cst_9 = arith.constant 0.000000e+00 : f32
      %12 = vector.broadcast %cst_9 : f32 to vector<128x128xf32>
      %c0_10 = arith.constant 0 : index
      %c0_11 = arith.constant 0 : index
      %13 = vector.load %arg6[%c0_10, %c0_11] : memref<128x128xf32, #tpu.memory_space<vmem>>, vector<128x128xf32>
      tpu.vector_store %arg6[%c0_10, %c0_11], %12 {strides = array<i32>} : memref<128x128xf32, #tpu.memory_space<vmem>>, vector<128x128xf32>,
    } else {
    }
    %c0 = arith.constant 0 : index
    %c0_1 = arith.constant 0 : index
    %3 = vector.load %arg6[%c0, %c0_1] : memref<128x128xf32, #tpu.memory_space<vmem>>, vector<128x128xf32>
    %c0_2 = arith.constant 0 : index
    %c0_3 = arith.constant 0 : index
    %4 = vector.load %arg2[%c0_2, %c0_3] : memref<128x256xbf16, #tpu.memory_space<vmem>>, vector<128x256xbf16>
    %c0_4 = arith.constant 0 : index
    %c0_5 = arith.constant 0 : index
    %5 = vector.load %arg3[%c0_4, %c0_5] : memref<256x128xbf16, #tpu.memory_space<vmem>>, vector<256x128xbf16>
    %cst = arith.constant dense<0.000000e+00> : vector<128x128xf32>
    %6 = tpu.matmul %4, %5, %cst {dimension_numbers = #tpu.dot_dimension_numbers<[1], [0], [0], [1], [0, 0, 1, 1], [], []>} : vector<128x256xbf16>, vector<256x128xbf16>, vector<128x128xf32> -> vector<128x128xf32>
    %7 = arith.addf %3, %6 : vector<128x128xf32>
    %c0_6 = arith.constant 0 : index
    %c0_7 = arith.constant 0 : index
    %8 = vector.load %arg6[%c0_6, %c0_7] : memref<128x128xf32, #tpu.memory_space<vmem>>, vector<128x128xf32>
    tpu.vector_store %arg6[%c0_6, %c0_7], %7 {strides = array<i32>} : memref<128x128xf32, #tpu.memory_space<vmem>>, vector<128x128xf32>,
    %c3_i32 = arith.constant 3 : i32
    %9 = arith.cmpi eq, %arg1, %c3_i32 : i32
    %10 = arith.extui %9 : i1 to i32
    %c0_i32_8 = arith.constant 0 : i32
    %11 = arith.cmpi ne, %10, %c0_i32_8 : i32
    scf.if %11 {
      %c0_9 = arith.constant 0 : index
      %c0_10 = arith.constant 0 : index
      %12 = vector.load %arg6[%c0_9, %c0_10] : memref<128x128xf32, #tpu.memory_space<vmem>>, vector<128x128xf32>
      %13 = arith.truncf %12 : vector<128x128xf32> to vector<128x128xbf16>
      %c0_11 = arith.constant 0 : index
      %c0_12 = arith.constant 0 : index
      %14 = vector.load %arg4[%c0_11, %c0_12] : memref<128x128xbf16, #tpu.memory_space<vmem>>, vector<128x128xbf16>
      tpu.vector_store %arg4[%c0_11, %c0_12], %13 {strides = array<i32>} : memref<128x128xbf16, #tpu.memory_space<vmem>>, vector<128x128xbf16>,
      %cst_13 = arith.constant dense<0.000000e+00> : vector<128xf32>
      %15 = vector.multi_reduction <add>, %12, %cst_13 [0] : vector<128x128xf32> to vector<128xf32>
      %16 = vector.shape_cast %15 : vector<128xf32> to vector<1x128xf32>
      %c0_14 = arith.constant 0 : index
      %c0_15 = arith.constant 0 : index
      %17 = vector.load %arg5[%c0_14, %c0_15] : memref<8x128xf32, #tpu.memory_space<vmem>>, vector<1x128xf32>
      tpu.vector_store %arg5[%c0_14, %c0_15], %16 {strides = array<i32>} : memref<8x128xf32, #tpu.memory_space<vmem>>, vector<1x128xf32>,
      %18 = arith.mulf %12, %12 : vector<128x128xf32>
      %cst_16 = arith.constant dense<0.000000e+00> : vector<128xf32>
      %19 = vector.multi_reduction <add>, %18, %cst_16 [0] : vector<128x128xf32> to vector<128xf32>
      %20 = vector.shape_cast %19 : vector<128xf32> to vector<1x128xf32>
      %c1 = arith.constant 1 : index
      %c0_17 = arith.constant 0 : index
      %21 = vector.load %arg5[%c1, %c0_17] : memref<8x128xf32, #tpu.memory_space<vmem>>, vector<1x128xf32>
      tpu.vector_store %arg5[%c1, %c0_17], %20 {strides = array<i32>} : memref<8x128xf32, #tpu.memory_space<vmem>>, vector<1x128xf32>,
    } else {
    }
    return
  }
  func.func @transform_0(%arg0: i32, %arg1: i32) -> (i32, i32) {
    %c0_i32 = arith.constant 0 : i32
    return %arg0, %arg1 : i32, i32
  }
  func.func @transform_1(%arg0: i32, %arg1: i32) -> (i32, i32) {
    %c0_i32 = arith.constant 0 : i32
    %c0_i32_0 = arith.constant 0 : i32
    return %arg1, %c0_i32 : i32, i32
  }
  func.func @transform_2(%arg0: i32, %arg1: i32) -> (i32, i32) {
    %c0_i32 = arith.constant 0 : i32
    %c0_i32_0 = arith.constant 0 : i32
    return %arg0, %c0_i32 : i32, i32
  }
  func.func @transform_3(%arg0: i32, %arg1: i32) -> (i32, i32) {
    %c0_i32 = arith.constant 0 : i32
    %c0_i32_0 = arith.constant 0 : i32
    return %arg0, %c0_i32 : i32, i32
  }
}

module attributes {stable_mosaic.version = 11 : i64} {
  func.func @_conv_stats_kernel_nk(%arg0: i32, %arg1: i32, %arg2: memref<512x256xbf16, #tpu.memory_space<vmem>>, %arg3: memref<256x128xbf16, #tpu.memory_space<vmem>>, %arg4: memref<512x128xbf16, #tpu.memory_space<vmem>>, %arg5: memref<8x128xf32, #tpu.memory_space<vmem>>, %arg6: memref<512x128xf32, #tpu.memory_space<vmem>>) attributes {dimension_semantics = [#tpu.dimension_semantics<parallel>, #tpu.dimension_semantics<arbitrary>], iteration_bounds = array<i64: 1, 2>, scalar_prefetch = 0 : i64, scratch_operands = 1 : i64, tpu.core_type = #tpu.core_type<tc>, window_params = [{transform_indices = @transform_0, window_bounds = array<i64: 512, 256>}, {transform_indices = @transform_1, window_bounds = array<i64: 256, 128>}, {transform_indices = @transform_2, window_bounds = array<i64: 512, 128>}, {transform_indices = @transform_3, window_bounds = array<i64: 8, 128>}]} {
    %c0_i32 = arith.constant 0 : i32
    %0 = arith.cmpi eq, %arg1, %c0_i32 : i32
    %1 = arith.extui %0 : i1 to i32
    %c0_i32_0 = arith.constant 0 : i32
    %2 = arith.cmpi ne, %1, %c0_i32_0 : i32
    scf.if %2 {
      %cst_9 = arith.constant 0.000000e+00 : f32
      %12 = vector.broadcast %cst_9 : f32 to vector<512x128xf32>
      %c0_10 = arith.constant 0 : index
      %c0_11 = arith.constant 0 : index
      %13 = vector.load %arg6[%c0_10, %c0_11] : memref<512x128xf32, #tpu.memory_space<vmem>>, vector<512x128xf32>
      tpu.vector_store %arg6[%c0_10, %c0_11], %12 {strides = array<i32>} : memref<512x128xf32, #tpu.memory_space<vmem>>, vector<512x128xf32>,
    } else {
    }
    %c0 = arith.constant 0 : index
    %c0_1 = arith.constant 0 : index
    %3 = vector.load %arg6[%c0, %c0_1] : memref<512x128xf32, #tpu.memory_space<vmem>>, vector<512x128xf32>
    %c0_2 = arith.constant 0 : index
    %c0_3 = arith.constant 0 : index
    %4 = vector.load %arg2[%c0_2, %c0_3] : memref<512x256xbf16, #tpu.memory_space<vmem>>, vector<512x256xbf16>
    %c0_4 = arith.constant 0 : index
    %c0_5 = arith.constant 0 : index
    %5 = vector.load %arg3[%c0_4, %c0_5] : memref<256x128xbf16, #tpu.memory_space<vmem>>, vector<256x128xbf16>
    %cst = arith.constant dense<0.000000e+00> : vector<512x128xf32>
    %6 = tpu.matmul %4, %5, %cst {dimension_numbers = #tpu.dot_dimension_numbers<[1], [0], [0], [1], [0, 0, 1, 1], [], []>} : vector<512x256xbf16>, vector<256x128xbf16>, vector<512x128xf32> -> vector<512x128xf32>
    %7 = arith.addf %3, %6 : vector<512x128xf32>
    %c0_6 = arith.constant 0 : index
    %c0_7 = arith.constant 0 : index
    %8 = vector.load %arg6[%c0_6, %c0_7] : memref<512x128xf32, #tpu.memory_space<vmem>>, vector<512x128xf32>
    tpu.vector_store %arg6[%c0_6, %c0_7], %7 {strides = array<i32>} : memref<512x128xf32, #tpu.memory_space<vmem>>, vector<512x128xf32>,
    %c1_i32 = arith.constant 1 : i32
    %9 = arith.cmpi eq, %arg1, %c1_i32 : i32
    %10 = arith.extui %9 : i1 to i32
    %c0_i32_8 = arith.constant 0 : i32
    %11 = arith.cmpi ne, %10, %c0_i32_8 : i32
    scf.if %11 {
      %c0_9 = arith.constant 0 : index
      %c0_10 = arith.constant 0 : index
      %12 = vector.load %arg6[%c0_9, %c0_10] : memref<512x128xf32, #tpu.memory_space<vmem>>, vector<512x128xf32>
      %13 = arith.truncf %12 : vector<512x128xf32> to vector<512x128xbf16>
      %c0_11 = arith.constant 0 : index
      %c0_12 = arith.constant 0 : index
      %14 = vector.load %arg4[%c0_11, %c0_12] : memref<512x128xbf16, #tpu.memory_space<vmem>>, vector<512x128xbf16>
      tpu.vector_store %arg4[%c0_11, %c0_12], %13 {strides = array<i32>} : memref<512x128xbf16, #tpu.memory_space<vmem>>, vector<512x128xbf16>,
      %cst_13 = arith.constant dense<0.000000e+00> : vector<128xf32>
      %15 = vector.multi_reduction <add>, %12, %cst_13 [0] : vector<512x128xf32> to vector<128xf32>
      %16 = vector.shape_cast %15 : vector<128xf32> to vector<1x128xf32>
      %c0_14 = arith.constant 0 : index
      %c0_15 = arith.constant 0 : index
      %17 = vector.load %arg5[%c0_14, %c0_15] : memref<8x128xf32, #tpu.memory_space<vmem>>, vector<1x128xf32>
      tpu.vector_store %arg5[%c0_14, %c0_15], %16 {strides = array<i32>} : memref<8x128xf32, #tpu.memory_space<vmem>>, vector<1x128xf32>,
      %18 = arith.mulf %12, %12 : vector<512x128xf32>
      %cst_16 = arith.constant dense<0.000000e+00> : vector<128xf32>
      %19 = vector.multi_reduction <add>, %18, %cst_16 [0] : vector<512x128xf32> to vector<128xf32>
      %20 = vector.shape_cast %19 : vector<128xf32> to vector<1x128xf32>
      %c1 = arith.constant 1 : index
      %c0_17 = arith.constant 0 : index
      %21 = vector.load %arg5[%c1, %c0_17] : memref<8x128xf32, #tpu.memory_space<vmem>>, vector<1x128xf32>
      tpu.vector_store %arg5[%c1, %c0_17], %20 {strides = array<i32>} : memref<8x128xf32, #tpu.memory_space<vmem>>, vector<1x128xf32>,
    } else {
    }
    return
  }
  func.func @transform_0(%arg0: i32, %arg1: i32) -> (i32, i32) {
    %c0_i32 = arith.constant 0 : i32
    return %arg0, %arg1 : i32, i32
  }
  func.func @transform_1(%arg0: i32, %arg1: i32) -> (i32, i32) {
    %c0_i32 = arith.constant 0 : i32
    %c0_i32_0 = arith.constant 0 : i32
    return %arg1, %c0_i32 : i32, i32
  }
  func.func @transform_2(%arg0: i32, %arg1: i32) -> (i32, i32) {
    %c0_i32 = arith.constant 0 : i32
    %c0_i32_0 = arith.constant 0 : i32
    return %arg0, %c0_i32 : i32, i32
  }
  func.func @transform_3(%arg0: i32, %arg1: i32) -> (i32, i32) {
    %c0_i32 = arith.constant 0 : i32
    %c0_i32_0 = arith.constant 0 : i32
    return %arg0, %c0_i32 : i32, i32
  }
}

module attributes {stable_mosaic.version = 11 : i64} {
  func.func @_conv_stats_kernel_1k(%arg0: i32, %arg1: i32, %arg2: memref<512x256xbf16, #tpu.memory_space<vmem>>, %arg3: memref<256x128xbf16, #tpu.memory_space<vmem>>, %arg4: memref<512x128xbf16, #tpu.memory_space<vmem>>, %arg5: memref<8x128xf32, #tpu.memory_space<vmem>>) attributes {dimension_semantics = [#tpu.dimension_semantics<parallel>, #tpu.dimension_semantics<arbitrary>], iteration_bounds = array<i64: 4, 1>, scalar_prefetch = 0 : i64, scratch_operands = 0 : i64, tpu.core_type = #tpu.core_type<tc>, window_params = [{transform_indices = @transform_0, window_bounds = array<i64: 512, 256>}, {transform_indices = @transform_1, window_bounds = array<i64: 256, 128>}, {transform_indices = @transform_2, window_bounds = array<i64: 512, 128>}, {transform_indices = @transform_3, window_bounds = array<i64: 8, 128>}]} {
    %c0 = arith.constant 0 : index
    %c0_0 = arith.constant 0 : index
    %0 = vector.load %arg2[%c0, %c0_0] : memref<512x256xbf16, #tpu.memory_space<vmem>>, vector<512x256xbf16>
    %c0_1 = arith.constant 0 : index
    %c0_2 = arith.constant 0 : index
    %1 = vector.load %arg3[%c0_1, %c0_2] : memref<256x128xbf16, #tpu.memory_space<vmem>>, vector<256x128xbf16>
    %cst = arith.constant dense<0.000000e+00> : vector<512x128xf32>
    %2 = tpu.matmul %0, %1, %cst {dimension_numbers = #tpu.dot_dimension_numbers<[1], [0], [0], [1], [0, 0, 1, 1], [], []>} : vector<512x256xbf16>, vector<256x128xbf16>, vector<512x128xf32> -> vector<512x128xf32>
    %3 = arith.truncf %2 : vector<512x128xf32> to vector<512x128xbf16>
    %c0_3 = arith.constant 0 : index
    %c0_4 = arith.constant 0 : index
    %4 = vector.load %arg4[%c0_3, %c0_4] : memref<512x128xbf16, #tpu.memory_space<vmem>>, vector<512x128xbf16>
    tpu.vector_store %arg4[%c0_3, %c0_4], %3 {strides = array<i32>} : memref<512x128xbf16, #tpu.memory_space<vmem>>, vector<512x128xbf16>,
    %cst_5 = arith.constant dense<0.000000e+00> : vector<128xf32>
    %5 = vector.multi_reduction <add>, %2, %cst_5 [0] : vector<512x128xf32> to vector<128xf32>
    %6 = vector.shape_cast %5 : vector<128xf32> to vector<1x128xf32>
    %c0_6 = arith.constant 0 : index
    %c0_7 = arith.constant 0 : index
    %7 = vector.load %arg5[%c0_6, %c0_7] : memref<8x128xf32, #tpu.memory_space<vmem>>, vector<1x128xf32>
    tpu.vector_store %arg5[%c0_6, %c0_7], %6 {strides = array<i32>} : memref<8x128xf32, #tpu.memory_space<vmem>>, vector<1x128xf32>,
    %8 = arith.mulf %2, %2 : vector<512x128xf32>
    %cst_8 = arith.constant dense<0.000000e+00> : vector<128xf32>
    %9 = vector.multi_reduction <add>, %8, %cst_8 [0] : vector<512x128xf32> to vector<128xf32>
    %10 = vector.shape_cast %9 : vector<128xf32> to vector<1x128xf32>
    %c1 = arith.constant 1 : index
    %c0_9 = arith.constant 0 : index
    %11 = vector.load %arg5[%c1, %c0_9] : memref<8x128xf32, #tpu.memory_space<vmem>>, vector<1x128xf32>
    tpu.vector_store %arg5[%c1, %c0_9], %10 {strides = array<i32>} : memref<8x128xf32, #tpu.memory_space<vmem>>, vector<1x128xf32>,
    return
  }
  func.func @transform_0(%arg0: i32, %arg1: i32) -> (i32, i32) {
    %c0_i32 = arith.constant 0 : i32
    return %arg0, %arg1 : i32, i32
  }
  func.func @transform_1(%arg0: i32, %arg1: i32) -> (i32, i32) {
    %c0_i32 = arith.constant 0 : i32
    %c0_i32_0 = arith.constant 0 : i32
    return %arg1, %c0_i32 : i32, i32
  }
  func.func @transform_2(%arg0: i32, %arg1: i32) -> (i32, i32) {
    %c0_i32 = arith.constant 0 : i32
    %c0_i32_0 = arith.constant 0 : i32
    return %arg0, %c0_i32 : i32, i32
  }
  func.func @transform_3(%arg0: i32, %arg1: i32) -> (i32, i32) {
    %c0_i32 = arith.constant 0 : i32
    %c0_i32_0 = arith.constant 0 : i32
    return %arg0, %c0_i32 : i32, i32
  }
}

module attributes {stable_mosaic.version = 11 : i64} {
  func.func @_conv_bias_relu_kernel_1k(%arg0: i32, %arg1: i32, %arg2: memref<512x128xbf16, #tpu.memory_space<vmem>>, %arg3: memref<128x128xbf16, #tpu.memory_space<vmem>>, %arg4: memref<1x128xf32, #tpu.memory_space<vmem>>, %arg5: memref<512x128xf32, #tpu.memory_space<vmem>>) attributes {dimension_semantics = [#tpu.dimension_semantics<parallel>, #tpu.dimension_semantics<arbitrary>], iteration_bounds = array<i64: 4, 1>, scalar_prefetch = 0 : i64, scratch_operands = 0 : i64, tpu.core_type = #tpu.core_type<tc>, window_params = [{transform_indices = @transform_0, window_bounds = array<i64: 512, 128>}, {transform_indices = @transform_1, window_bounds = array<i64: 128, 128>}, {pipeline_mode = #tpu.pipeline_mode<synchronous>, transform_indices = @transform_2, window_bounds = array<i64: 1, 128>}, {transform_indices = @transform_3, window_bounds = array<i64: 512, 128>}]} {
    %c0 = arith.constant 0 : index
    %c0_0 = arith.constant 0 : index
    %0 = vector.load %arg2[%c0, %c0_0] : memref<512x128xbf16, #tpu.memory_space<vmem>>, vector<512x128xbf16>
    %c0_1 = arith.constant 0 : index
    %c0_2 = arith.constant 0 : index
    %1 = vector.load %arg3[%c0_1, %c0_2] : memref<128x128xbf16, #tpu.memory_space<vmem>>, vector<128x128xbf16>
    %cst = arith.constant dense<0.000000e+00> : vector<512x128xf32>
    %2 = tpu.matmul %0, %1, %cst {dimension_numbers = #tpu.dot_dimension_numbers<[1], [0], [0], [1], [0, 0, 1, 1], [], []>} : vector<512x128xbf16>, vector<128x128xbf16>, vector<512x128xf32> -> vector<512x128xf32>
    %c0_3 = arith.constant 0 : index
    %c0_4 = arith.constant 0 : index
    %3 = vector.load %arg4[%c0_3, %c0_4] : memref<1x128xf32, #tpu.memory_space<vmem>>, vector<1x128xf32>
    %4 = vector.broadcast %3 : vector<1x128xf32> to vector<512x128xf32>
    %5 = arith.addf %2, %4 : vector<512x128xf32>
    %cst_5 = arith.constant 0.000000e+00 : f32
    %6 = vector.broadcast %cst_5 : f32 to vector<512x128xf32>
    %7 = arith.maximumf %5, %6 : vector<512x128xf32>
    %c0_6 = arith.constant 0 : index
    %c0_7 = arith.constant 0 : index
    %8 = vector.load %arg5[%c0_6, %c0_7] : memref<512x128xf32, #tpu.memory_space<vmem>>, vector<512x128xf32>
    tpu.vector_store %arg5[%c0_6, %c0_7], %7 {strides = array<i32>} : memref<512x128xf32, #tpu.memory_space<vmem>>, vector<512x128xf32>,
    return
  }
  func.func @transform_0(%arg0: i32, %arg1: i32) -> (i32, i32) {
    %c0_i32 = arith.constant 0 : i32
    return %arg0, %arg1 : i32, i32
  }
  func.func @transform_1(%arg0: i32, %arg1: i32) -> (i32, i32) {
    %c0_i32 = arith.constant 0 : i32
    %c0_i32_0 = arith.constant 0 : i32
    return %arg1, %c0_i32 : i32, i32
  }
  func.func @transform_2(%arg0: i32, %arg1: i32) -> (i32, i32) {
    %c0_i32 = arith.constant 0 : i32
    %c0_i32_0 = arith.constant 0 : i32
    %c0_i32_1 = arith.constant 0 : i32
    return %c0_i32, %c0_i32_0 : i32, i32
  }
  func.func @transform_3(%arg0: i32, %arg1: i32) -> (i32, i32) {
    %c0_i32 = arith.constant 0 : i32
    %c0_i32_0 = arith.constant 0 : i32
    return %arg0, %c0_i32 : i32, i32
  }
}

</mosaic_0001>

<bundles_post_ra>
// kernel: _lambda_.15
= control target key start
LH: loop header
LB: loop body
LE: loop exit
PB: predicated region body
PF: predicated region fallthrough
CT: control target
= control target key end

     0   :  { %s2094_s12 = smov 0   ;;  %s2096_s13 = smov 0   ;;  %s2426_s0 = inlined_call_operand.vmem [shape: bf16[2048,128], index: 0, kind: input, shape index: {}]   ;;  %s2427_s1 = inlined_call_operand.vmem [shape: bf16[128,128], index: 1, kind: input, shape index: {}]   ;;  %s2428_s2 = inlined_call_operand.vmem [shape: bf16[2048,128], index: 2, kind: output, shape index: {0}]   ;;  %s2429_s3 = inlined_call_operand.vmem [shape: f32[32,128], index: 3, kind: output, shape index: {1}]  }
   0x1   :  { %s2098_s14 = smov 0  }
   0x2 LB: > { %s26_s15 = sadd.s32 1, %s2068_s13  ;;  %p1483_p0 = scmp.ge.s32.totalorder %s2072_s14, 1  ;;  %s2072_s14 = sphi %s2098_s14, %s14_s14   ;;  %s2068_s13 = sphi %s2096_s13, %s2431_s13   ;;  %s2064_s12 = sphi %s2094_s12, %s2430_s12  }
   0x3   : > { %p28_p1 = scmp.ge.s32.totalorder %s26_s15, 4  ;;  %p169_p2 = scmp.lt.s32.totalorder %s2072_s14, 5 }
   0x5   : > { %s2433_s15 = smov (%p28_p1, %s26_s15), 0  ;;  %p170_p3 = pnand %p1483_p0, %p169_p2 }
   0x6   : > { %s1484_s18 = sshll.u32 (!%p170_p3), %s2064_s12, 6  ;;  %p226_p5 = scmp.lt.s32.totalorder (!%p170_p3), %s2064_s12, 3 }
   0x7   : > { %173 = sbr.rel (%p170_p3) target bundleno = 385 (0x181), region = 28  ;;  %p206_p4 = scmp.lt.s32.totalorder (!%p170_p3), %s1484_s18, 255 }
   0xc   : > { %v2010_v0 = vld [vmem:[%s2427_s1 + $0x38] sm:$0xff]   ;;  %v2011_v1 = vld [vmem:[%s2427_s1 + $0x30] sm:$0xff]   ;;  %s2435_s18 = smov (!%p206_p4, %s1484_s18), 255  ;;  %v2012_v2 = vld [vmem:[%s2427_s1 + $0x28] sm:$0xff]   ;;  %s2437_s12 = smov (!%p226_p5, %s2064_s12), 3 }
   0xd   : > { %1890 = vmatprep.subr.bf16.mxu0 %v2010_v0  ;;  %1970 = vmatprep.subr.bf16.mxu1 %v2010_v0  ;;  %s1485_s23 = sshll.u32 %s2435_s18, 2  ;;  %v2013_v3 = vld [vmem:[%s2427_s1 + $0x20] sm:$0xff]   ;;  %v2014_v5 = vld [vmem:[%s2427_s1 + $0x18] sm:$0xff]   ;;  %v2015_v6 = vld [vmem:[%s2427_s1 + $0x10] sm:$0xff]   ;;  %s1488_s17 = sshll.u32 %s2437_s12, 3 }
   0xe   : > { %1891 = vmatpush3.bf16.msra.mxu0 %v2010_v0  ;;  %1978 = vmatpush3.bf16.msra.mxu1 %v2010_v0  ;;  %s2132_s26 = scalar_lea.vmem %s2426_s0, %s1485_s23  ;;  %v2016_v7 = vld [vmem:[%s2427_s1 + $0x8] sm:$0xff]   ;;  %v2017_v8 = vld [vmem:[%s2427_s1] sm:$0xff]   ;;  %s2190_s16 = scalar_lea.vmem %s2428_s2, %s1485_s23 }
   0xf   : > { %1892 = vmatprep.subr.bf16.mxu0 %v2011_v1  ;;  %1971 = vmatprep.subr.bf16.mxu1 %v2011_v1  ;;  %v2018_v4 = vld [vmem:[%s2132_s26] sm:$0xff]   ;;  %v2019_v10 = vld [vmem:[%s2132_s26 + $0x8] sm:$0xff]   ;;  %v2020_v11 = vld [vmem:[%s2132_s26 + $0x10] sm:$0xff]   ;;  %s229_s20 = scalar_lea.vmem %s2429_s3, %s1488_s17 }
  0x10   : > { %1906 = vmatprep.mubr.bf16.mxu0 %v2018_v4  ;;  %v2034_v9 = vld [vmem:[%s2132_s26 + $0x80] sm:$0xff]   ;;  %v2035_v12 = vld [vmem:[%s2132_s26 + $0x88] sm:$0xff]   ;;  %v2036_v13 = vld [vmem:[%s2132_s26 + $0x90] sm:$0xff]  }
  0x11   : > { %1938 = vmatprep.mubr.bf16.mxu1 %v2034_v9  ;;  %v2021_v14 = vld [vmem:[%s2132_s26 + $0x18] sm:$0xff]   ;;  %v2022_v15 = vld [vmem:[%s2132_s26 + $0x20] sm:$0xff]   ;;  %v2023_v18 = vld [vmem:[%s2132_s26 + $0x28] sm:$0xff]  }
  0x12   : > { %1893 = vmatpush3.bf16.msra.mxu0 %v2011_v1  ;;  %1979 = vmatpush3.bf16.msra.mxu1 %v2011_v1  ;;  %v2037_v16 = vld [vmem:[%s2132_s26 + $0x98] sm:$0xff]   ;;  %v2038_v17 = vld [vmem:[%s2132_s26 + $0xa0] sm:$0xff]   ;;  %v2039_v19 = vld [vmem:[%s2132_s26 + $0xa8] sm:$0xff]  }
  0x13   : > { %1894 = vmatprep.subr.bf16.mxu0 %v2012_v2  ;;  %1972 = vmatprep.subr.bf16.mxu1 %v2012_v2  ;;  %v2024_v20 = vld [vmem:[%s2132_s26 + $0x30] sm:$0xff]   ;;  %v2025_v22 = vld [vmem:[%s2132_s26 + $0x38] sm:$0xff]   ;;  %v2026_v24 = vld [vmem:[%s2132_s26 + $0x40] sm:$0xff]  }
  0x14   : > { %v2040_v21 = vld [vmem:[%s2132_s26 + $0xb0] sm:$0xff]   ;;  %v2041_v23 = vld [vmem:[%s2132_s26 + $0xb8] sm:$0xff]   ;;  %v2042_v25 = vld [vmem:[%s2132_s26 + $0xc0] sm:$0xff]  }
  0x15   : > { %v2027_v26 = vld [vmem:[%s2132_s26 + $0x48] sm:$0xff]   ;;  %v2028_v28 = vld [vmem:[%s2132_s26 + $0x50] sm:$0xff]   ;;  %v2029_v30 = vld [vmem:[%s2132_s26 + $0x58] sm:$0xff]  }
  0x16   : > { %1895 = vmatpush3.bf16.msra.mxu0 %v2012_v2  ;;  %1980 = vmatpush3.bf16.msra.mxu1 %v2012_v2  ;;  %v2043_v27 = vld [vmem:[%s2132_s26 + $0xc8] sm:$0xff]   ;;  %v2044_v29 = vld [vmem:[%s2132_s26 + $0xd0] sm:$0xff]   ;;  %v2045_v31 = vld [vmem:[%s2132_s26 + $0xd8] sm:$0xff]  }
  0x17   : > { %1896 = vmatprep.subr.bf16.mxu0 %v2013_v3  ;;  %1973 = vmatprep.subr.bf16.mxu1 %v2013_v3  ;;  %v2030_v32 = vld [vmem:[%s2132_s26 + $0x60] sm:$0xff]   ;;  %v2031_v34 = vld [vmem:[%s2132_s26 + $0x68] sm:$0xff]   ;;  %v2032_v36 = vld [vmem:[%s2132_s26 + $0x70] sm:$0xff]  }
  0x18   : > { %v2046_v33 = vld [vmem:[%s2132_s26 + $0xe0] sm:$0xff]   ;;  %v2047_v35 = vld [vmem:[%s2132_s26 + $0xe8] sm:$0xff]   ;;  %v2048_v37 = vld [vmem:[%s2132_s26 + $0xf0] sm:$0xff]  }
  0x19   : > { %v2033_v38 = vld [vmem:[%s2132_s26 + $0x78] sm:$0xff]  }
  0x1a   : > { %1897 = vmatpush3.bf16.msra.mxu0 %v2013_v3  ;;  %1981 = vmatpush3.bf16.msra.mxu1 %v2013_v3  ;;  %v2049_v39 = vld [vmem:[%s2132_s26 + $0xf8] sm:$0xff]  }
  0x1b   : > { %1898 = vmatprep.subr.bf16.mxu0 %v2014_v5  ;;  %1974 = vmatprep.subr.bf16.mxu1 %v2014_v5 }
  0x1e   : > { %1899 = vmatpush3.bf16.msra.mxu0 %v2014_v5  ;;  %1982 = vmatpush3.bf16.msra.mxu1 %v2014_v5 }
  0x1f   : > { %1900 = vmatprep.subr.bf16.mxu0 %v2015_v6  ;;  %1975 = vmatprep.subr.bf16.mxu1 %v2015_v6 }
  0x22   : > { %1901 = vmatpush3.bf16.msra.mxu0 %v2015_v6  ;;  %1983 = vmatpush3.bf16.msra.mxu1 %v2015_v6 }
  0x23   : > { %1902 = vmatprep.subr.bf16.mxu0 %v2016_v7  ;;  %1976 = vmatprep.subr.bf16.mxu1 %v2016_v7 }
  0x26   : > { %1903 = vmatpush3.bf16.msra.mxu0 %v2016_v7  ;;  %1984 = vmatpush3.bf16.msra.mxu1 %v2016_v7 }
  0x27   : > { %1904 = vmatprep.subr.bf16.mxu0 %v2017_v8  ;;  %1977 = vmatprep.subr.bf16.mxu1 %v2017_v8 }
  0x2a   : > { %1905 = vmatpush3.bf16.msra.mxu0 %v2017_v8  ;;  %1985 = vmatpush3.bf16.msra.mxu1 %v2017_v8 }
  0x2d   : > { %1907 = vmatmul.mubr.bf16.vlgmr.msra.gmra.mxu0 %v2019_v10  ;;  %1939 = vmatmul.mubr.bf16.vlgmr.msra.gmra.mxu1 %v2035_v12 }
  0x2e   : > { %1910 = vmatprep.mubr.bf16.mxu0 %v2020_v11  ;;  %1942 = vmatprep.mubr.bf16.mxu1 %v2036_v13 }
  0x35   : > { %1911 = vmatmul.mubr.bf16.gmra.mxu0 %v2021_v14  ;;  %1943 = vmatmul.mubr.bf16.gmra.mxu1 %v2037_v16 }
  0x36   : > { %1914 = vmatprep.mubr.bf16.mxu0 %v2022_v15  ;;  %1946 = vmatprep.mubr.bf16.mxu1 %v2038_v17 }
  0x3d   : > { %1915 = vmatmul.mubr.bf16.gmra.mxu0 %v2023_v18  ;;  %1947 = vmatmul.mubr.bf16.gmra.mxu1 %v2039_v19 }
  0x3e   : > { %1918 = vmatprep.mubr.bf16.mxu0 %v2024_v20  ;;  %1950 = vmatprep.mubr.bf16.mxu1 %v2040_v21 }
  0x45   : > { %1919 = vmatmul.mubr.bf16.gmra.mxu0 %v2025_v22  ;;  %1951 = vmatmul.mubr.bf16.gmra.mxu1 %v2041_v23 }
  0x46   : > { %1922 = vmatprep.mubr.bf16.mxu0 %v2026_v24  ;;  %1954 = vmatprep.mubr.bf16.mxu1 %v2042_v25 }
  0x4d   : > { %1923 = vmatmul.mubr.bf16.gmra.mxu0 %v2027_v26  ;;  %1955 = vmatmul.mubr.bf16.gmra.mxu1 %v2043_v27 }
  0x4e   : > { %1926 = vmatprep.mubr.bf16.mxu0 %v2028_v28  ;;  %1958 = vmatprep.mubr.bf16.mxu1 %v2044_v29 }
  0x55   : > { %1927 = vmatmul.mubr.bf16.gmra.mxu0 %v2029_v30  ;;  %1959 = vmatmul.mubr.bf16.gmra.mxu1 %v2045_v31 }
  0x56   : > { %1930 = vmatprep.mubr.bf16.mxu0 %v2030_v32  ;;  %1962 = vmatprep.mubr.bf16.mxu1 %v2046_v33 }
  0x5d   : > { %1931 = vmatmul.mubr.bf16.gmra.mxu0 %v2031_v34  ;;  %1963 = vmatmul.mubr.bf16.gmra.mxu1 %v2047_v35 }
  0x5e   : > { %1934 = vmatprep.mubr.bf16.mxu0 %v2032_v36  ;;  %1966 = vmatprep.mubr.bf16.mxu1 %v2048_v37 }
  0x65   : > { %1935 = vmatmul.mubr.bf16.gmra.mxu0 %v2033_v38  ;;  %1967 = vmatmul.mubr.bf16.gmra.mxu1 %v2049_v39 }
  0xed   : > { %v1908_v40 = vpop.f32.mrf.mxu0  ;;  %v2181_v41 = vpop.f32.mrf.mxu1 }
  0xee   : > { %v1232_v57 = vmul.f32 %v1908_v40, %v1908_v40 }
  0xef   : > { %v585_v42 = vpop.f32.mrf.mxu0  ;;  %v2183_v43 = vpop.f32.mrf.mxu1 }
  0xf0   : > { %v1230_v48 = vmul.f32 %v585_v42, %v585_v42 }
  0xf1   : > { %v1909_v44 = vpop.f32.mrf.mxu0  ;;  %v2192_v45 = vpop.f32.mrf.mxu1 }
  0xf2   : > { %v1667_v46 = vpack.c.bf16 %v1909_v44, %v1908_v40  ;;  %v1747_v47 = vpack.c.bf16 %v2192_v45, %v2181_v41  ;;  %v1233_v62 = vmul.f32 %v1909_v44, %v1909_v44 }
  0xf3   : > { %v588_v49 = vpop.f32.mrf.mxu0  ;;  %v2196_v50 = vpop.f32.mrf.mxu1 }
  0xf4   : > { %1819 = vst [vmem:[%s2190_s16 + $0x8] sm:$0xff] %v1667_v46   ;;  %v1662_v51 = vpack.c.bf16 %v588_v49, %v585_v42  ;;  %v1160_v52 = vadd.f32 %v588_v49, %v585_v42  ;;  %v1231_v53 = vmul.f32 %v588_v49, %v588_v49  ;;  %1835 = vst [vmem:[%s2190_s16 + $0x88] sm:$0xff] %v1747_v47  }
  0xf5   : > { %v1742_v54 = vpack.c.bf16 %v2196_v50, %v2183_v43  ;;  %v1912_v55 = vpop.f32.mrf.mxu0  ;;  %v2202_v56 = vpop.f32.mrf.mxu1 }
  0xf6   : > { %1663 = vst [vmem:[%s2190_s16] sm:$0xff] %v1662_v51   ;;  %v1161_v58 = vadd.f32 %v1908_v40, %v1160_v52  ;;  %v1294_v59 = vadd.f32 %v1231_v53, %v1230_v48  ;;  %v1236_v17 = vmul.f32 %v1912_v55, %v1912_v55 }
  0xf7   : > { %1834 = vst [vmem:[%s2190_s16 + $0x80] sm:$0xff] %v1742_v54   ;;  %v601_v60 = vpop.f32.mrf.mxu0  ;;  %v2206_v61 = vpop.f32.mrf.mxu1 }
  0xf8   : > { %v1295_v63 = vadd.f32 %v1294_v59, %v1232_v57  ;;  %v1162_v0 = vadd.f32 %v1909_v44, %v1161_v58  ;;  %v1234_v4 = vmul.f32 %v601_v60, %v601_v60 }
  0xf9   : > { %v1913_v1 = vpop.f32.mrf.mxu0  ;;  %v2208_v2 = vpop.f32.mrf.mxu1 }
  0xfa   : > { %v1163_v3 = vadd.f32 %v1162_v0, %v601_v60  ;;  %v1296_v5 = vadd.f32 %v1295_v63, %v1233_v62  ;;  %v1677_v6 = vpack.c.bf16 %v1913_v1, %v1912_v55  ;;  %v1757_v8 = vpack.c.bf16 %v2208_v2, %v2202_v56 }
  0xfb   : > { %v604_v7 = vpop.f32.mrf.mxu0  ;;  %v2212_v9 = vpop.f32.mrf.mxu1  ;;  %v1237_v22 = vmul.f32 %v1913_v1, %v1913_v1 }
  0xfc   : > { %v1297_v10 = vadd.f32 %v1296_v5, %v1234_v4  ;;  %1821 = vst [vmem:[%s2190_s16 + $0x18] sm:$0xff] %v1677_v6   ;;  %v1672_v11 = vpack.c.bf16 %v604_v7, %v601_v60  ;;  %v1164_v12 = vadd.f32 %v1163_v3, %v604_v7  ;;  %v1235_v13 = vmul.f32 %v604_v7, %v604_v7 }
  0xfd   : > { %v1916_v14 = vpop.f32.mrf.mxu0  ;;  %1837 = vst [vmem:[%s2190_s16 + $0x98] sm:$0xff] %v1757_v8   ;;  %v1752_v15 = vpack.c.bf16 %v2212_v9, %v2206_v61  ;;  %v2218_v16 = vpop.f32.mrf.mxu1 }
  0xfe   : > { %1820 = vst [vmem:[%s2190_s16 + $0x10] sm:$0xff] %v1672_v11   ;;  %v1165_v18 = vadd.f32 %v1912_v55, %v1164_v12  ;;  %v1298_v19 = vadd.f32 %v1297_v10, %v1235_v13  ;;  %v1240_v42 = vmul.f32 %v1916_v14, %v1916_v14 }
  0xff   : > { %v617_v20 = vpop.f32.mrf.mxu0  ;;  %1836 = vst [vmem:[%s2190_s16 + $0x90] sm:$0xff] %v1752_v15   ;;  %v2222_v21 = vpop.f32.mrf.mxu1 }
 0x100   : > { %v1299_v23 = vadd.f32 %v1298_v19, %v1236_v17  ;;  %v1166_v24 = vadd.f32 %v1913_v1, %v1165_v18  ;;  %v1238_v28 = vmul.f32 %v617_v20, %v617_v20 }
 0x101   : > { %v1917_v25 = vpop.f32.mrf.mxu0  ;;  %v2224_v26 = vpop.f32.mrf.mxu1 }
 0x102   : > { %v1167_v27 = vadd.f32 %v1166_v24, %v617_v20  ;;  %v1300_v29 = vadd.f32 %v1299_v23, %v1237_v22  ;;  %v1687_v30 = vpack.c.bf16 %v1917_v25, %v1916_v14  ;;  %v1767_v32 = vpack.c.bf16 %v2224_v26, %v2218_v16 }
 0x103   : > { %v620_v31 = vpop.f32.mrf.mxu0  ;;  %v2228_v33 = vpop.f32.mrf.mxu1  ;;  %v1241_v49 = vmul.f32 %v1917_v25, %v1917_v25 }
 0x104   : > { %v1301_v34 = vadd.f32 %v1300_v29, %v1238_v28  ;;  %1823 = vst [vmem:[%s2190_s16 + $0x28] sm:$0xff] %v1687_v30   ;;  %v1682_v35 = vpack.c.bf16 %v620_v31, %v617_v20  ;;  %v1168_v36 = vadd.f32 %v1167_v27, %v620_v31  ;;  %v1239_v37 = vmul.f32 %v620_v31, %v620_v31 }
 0x105   : > { %v1920_v38 = vpop.f32.mrf.mxu0  ;;  %1839 = vst [vmem:[%s2190_s16 + $0xa8] sm:$0xff] %v1767_v32   ;;  %v1762_v39 = vpack.c.bf16 %v2228_v33, %v2222_v21  ;;  %v2234_v40 = vpop.f32.mrf.mxu1 }
 0x106   : > { %1822 = vst [vmem:[%s2190_s16 + $0x20] sm:$0xff] %v1682_v35   ;;  %v1169_v44 = vadd.f32 %v1916_v14, %v1168_v36  ;;  %v1302_v46 = vadd.f32 %v1301_v34, %v1239_v37  ;;  %v1244_v8 = vmul.f32 %v1920_v38, %v1920_v38 }
 0x107   : > { %v633_v47 = vpop.f32.mrf.mxu0  ;;  %1838 = vst [vmem:[%s2190_s16 + $0xa0] sm:$0xff] %v1762_v39   ;;  %v2238_v48 = vpop.f32.mrf.mxu1 }
 0x108   : > { %v1303_v51 = vadd.f32 %v1302_v46, %v1240_v42  ;;  %v1170_v52 = vadd.f32 %v1917_v25, %v1169_v44  ;;  %v1242_v57 = vmul.f32 %v633_v47, %v633_v47 }
 0x109   : > { %v1921_v53 = vpop.f32.mrf.mxu0  ;;  %v2240_v54 = vpop.f32.mrf.mxu1 }
 0x10a   : > { %v1171_v55 = vadd.f32 %v1170_v52, %v633_v47  ;;  %v1304_v58 = vadd.f32 %v1303_v51, %v1241_v49  ;;  %v1697_v59 = vpack.c.bf16 %v1921_v53, %v1920_v38  ;;  %v1777_v62 = vpack.c.bf16 %v2240_v54, %v2234_v40 }
 0x10b   : > { %v636_v60 = vpop.f32.mrf.mxu0  ;;  %v2244_v63 = vpop.f32.mrf.mxu1  ;;  %v1245_v14 = vmul.f32 %v1921_v53, %v1921_v53 }
 0x10c   : > { %v1305_v0 = vadd.f32 %v1304_v58, %v1242_v57  ;;  %1825 = vst [vmem:[%s2190_s16 + $0x38] sm:$0xff] %v1697_v59   ;;  %v1692_v1 = vpack.c.bf16 %v636_v60, %v633_v47  ;;  %v1172_v3 = vadd.f32 %v1171_v55, %v636_v60  ;;  %v1243_v4 = vmul.f32 %v636_v60, %v636_v60 }
 0x10d   : > { %v1924_v5 = vpop.f32.mrf.mxu0  ;;  %1841 = vst [vmem:[%s2190_s16 + $0xb8] sm:$0xff] %v1777_v62   ;;  %v1772_v6 = vpack.c.bf16 %v2244_v63, %v2238_v48  ;;  %v2250_v7 = vpop.f32.mrf.mxu1 }
 0x10e   : > { %1824 = vst [vmem:[%s2190_s16 + $0x30] sm:$0xff] %v1692_v1   ;;  %v1173_v10 = vadd.f32 %v1920_v38, %v1172_v3  ;;  %v1306_v11 = vadd.f32 %v1305_v0, %v1243_v4  ;;  %v1248_v37 = vmul.f32 %v1924_v5, %v1924_v5 }
 0x10f   : > { %v649_v12 = vpop.f32.mrf.mxu0  ;;  %1840 = vst [vmem:[%s2190_s16 + $0xb0] sm:$0xff] %v1772_v6   ;;  %v2254_v13 = vpop.f32.mrf.mxu1 }
 0x110   : > { %v1307_v15 = vadd.f32 %v1306_v11, %v1244_v8  ;;  %v1174_v17 = vadd.f32 %v1921_v53, %v1173_v10  ;;  %v1246_v22 = vmul.f32 %v649_v12, %v649_v12 }
 0x111   : > { %v1925_v18 = vpop.f32.mrf.mxu0  ;;  %v2256_v19 = vpop.f32.mrf.mxu1 }
 0x112   : > { %v1175_v20 = vadd.f32 %v1174_v17, %v649_v12  ;;  %v1308_v23 = vadd.f32 %v1307_v15, %v1245_v14  ;;  %v1707_v24 = vpack.c.bf16 %v1925_v18, %v1924_v5  ;;  %v1787_v27 = vpack.c.bf16 %v2256_v19, %v2250_v7 }
 0x113   : > { %v652_v25 = vpop.f32.mrf.mxu0  ;;  %v2260_v28 = vpop.f32.mrf.mxu1  ;;  %v1249_v46 = vmul.f32 %v1925_v18, %v1925_v18 }
 0x114   : > { %v1309_v29 = vadd.f32 %v1308_v23, %v1246_v22  ;;  %1827 = vst [vmem:[%s2190_s16 + $0x48] sm:$0xff] %v1707_v24   ;;  %v1702_v30 = vpack.c.bf16 %v652_v25, %v649_v12  ;;  %v1176_v31 = vadd.f32 %v1175_v20, %v652_v25  ;;  %v1247_v32 = vmul.f32 %v652_v25, %v652_v25 }
 0x115   : > { %v1928_v34 = vpop.f32.mrf.mxu0  ;;  %1843 = vst [vmem:[%s2190_s16 + $0xc8] sm:$0xff] %v1787_v27   ;;  %v1782_v35 = vpack.c.bf16 %v2260_v28, %v2254_v13  ;;  %v2266_v36 = vpop.f32.mrf.mxu1 }
 0x116   : > { %1826 = vst [vmem:[%s2190_s16 + $0x40] sm:$0xff] %v1702_v30   ;;  %v1177_v38 = vadd.f32 %v1924_v5, %v1176_v31  ;;  %v1310_v39 = vadd.f32 %v1309_v29, %v1247_v32  ;;  %v1252_v10 = vmul.f32 %v1928_v34, %v1928_v34 }
 0x117   : > { %v665_v42 = vpop.f32.mrf.mxu0  ;;  %1842 = vst [vmem:[%s2190_s16 + $0xc0] sm:$0xff] %v1782_v35   ;;  %v2270_v44 = vpop.f32.mrf.mxu1 }
 0x118   : > { %v1311_v47 = vadd.f32 %v1310_v39, %v1248_v37  ;;  %v1178_v49 = vadd.f32 %v1925_v18, %v1177_v38  ;;  %v1250_v55 = vmul.f32 %v665_v42, %v665_v42 }
 0x119   : > { %v1929_v51 = vpop.f32.mrf.mxu0  ;;  %v2272_v52 = vpop.f32.mrf.mxu1 }
 0x11a   : > { %v1179_v53 = vadd.f32 %v1178_v49, %v665_v42  ;;  %v1312_v57 = vadd.f32 %v1311_v47, %v1249_v46  ;;  %v1717_v58 = vpack.c.bf16 %v1929_v51, %v1928_v34  ;;  %v1797_v60 = vpack.c.bf16 %v2272_v52, %v2266_v36 }
 0x11b   : > { %v668_v59 = vpop.f32.mrf.mxu0  ;;  %v2276_v62 = vpop.f32.mrf.mxu1  ;;  %v1253_v17 = vmul.f32 %v1929_v51, %v1929_v51 }
 0x11c   : > { %v1313_v0 = vadd.f32 %v1312_v57, %v1250_v55  ;;  %1829 = vst [vmem:[%s2190_s16 + $0x58] sm:$0xff] %v1717_v58   ;;  %v1712_v1 = vpack.c.bf16 %v668_v59, %v665_v42  ;;  %v1180_v3 = vadd.f32 %v1179_v53, %v668_v59  ;;  %v1251_v4 = vmul.f32 %v668_v59, %v668_v59 }
 0x11d   : > { %v1932_v5 = vpop.f32.mrf.mxu0  ;;  %1845 = vst [vmem:[%s2190_s16 + $0xd8] sm:$0xff] %v1797_v60   ;;  %v1792_v6 = vpack.c.bf16 %v2276_v62, %v2270_v44  ;;  %v2282_v8 = vpop.f32.mrf.mxu1 }
 0x11e   : > { %1828 = vst [vmem:[%s2190_s16 + $0x50] sm:$0xff] %v1712_v1   ;;  %v1181_v11 = vadd.f32 %v1928_v34, %v1180_v3  ;;  %v1314_v12 = vadd.f32 %v1313_v0, %v1251_v4  ;;  %v1256_v47 = vmul.f32 %v1932_v5, %v1932_v5 }
 0x11f   : > { %v681_v14 = vpop.f32.mrf.mxu0  ;;  %1844 = vst [vmem:[%s2190_s16 + $0xd0] sm:$0xff] %v1792_v6   ;;  %v2286_v15 = vpop.f32.mrf.mxu1 }
 0x120   : > { %v1315_v18 = vadd.f32 %v1314_v12, %v1252_v10  ;;  %v1182_v20 = vadd.f32 %v1929_v51, %v1181_v11  ;;  %v1254_v25 = vmul.f32 %v681_v14, %v681_v14 }
 0x121   : > { %v1933_v22 = vpop.f32.mrf.mxu0  ;;  %v2288_v23 = vpop.f32.mrf.mxu1 }
 0x122   : > { %v1183_v24 = vadd.f32 %v1182_v20, %v681_v14  ;;  %v1316_v27 = vadd.f32 %v1315_v18, %v1253_v17  ;;  %v1727_v29 = vpack.c.bf16 %v1933_v22, %v1932_v5  ;;  %v1807_v31 = vpack.c.bf16 %v2288_v23, %v2282_v8 }
 0x123   : > { %v684_v30 = vpop.f32.mrf.mxu0  ;;  %v2292_v32 = vpop.f32.mrf.mxu1  ;;  %v1257_v57 = vmul.f32 %v1933_v22, %v1933_v22 }
 0x124   : > { %v1317_v34 = vadd.f32 %v1316_v27, %v1254_v25  ;;  %1831 = vst [vmem:[%s2190_s16 + $0x68] sm:$0xff] %v1727_v29   ;;  %v1722_v35 = vpack.c.bf16 %v684_v30, %v681_v14  ;;  %v1184_v37 = vadd.f32 %v1183_v24, %v684_v30  ;;  %v1255_v38 = vmul.f32 %v684_v30, %v684_v30 }
 0x125   : > { %v1936_v39 = vpop.f32.mrf.mxu0  ;;  %1847 = vst [vmem:[%s2190_s16 + $0xe8] sm:$0xff] %v1807_v31   ;;  %v1802_v42 = vpack.c.bf16 %v2292_v32, %v2286_v15  ;;  %v2298_v46 = vpop.f32.mrf.mxu1  ;;  %v1262_v31 = vmul.f32 %v2183_v43, %v2183_v43 }
 0x126   : > { %1830 = vst [vmem:[%s2190_s16 + $0x60] sm:$0xff] %v1722_v35   ;;  %v1185_v49 = vadd.f32 %v1932_v5, %v1184_v37  ;;  %v1318_v51 = vadd.f32 %v1317_v34, %v1255_v38  ;;  %v1263_v38 = vmul.f32 %v2196_v50, %v2196_v50 }
 0x127   : > { %v697_v53 = vpop.f32.mrf.mxu0  ;;  %1846 = vst [vmem:[%s2190_s16 + $0xe0] sm:$0xff] %v1802_v42   ;;  %v2302_v55 = vpop.f32.mrf.mxu1 }
 0x128   : > { %v1319_v58 = vadd.f32 %v1318_v51, %v1256_v47  ;;  %v1186_v59 = vadd.f32 %v1933_v22, %v1185_v49  ;;  %v1258_v3 = vmul.f32 %v697_v53, %v697_v53  ;;  %v1260_v22 = vmul.f32 %v1936_v39, %v1936_v39 }
 0x129   : > { %v1937_v60 = vpop.f32.mrf.mxu0  ;;  %v2304_v0 = vpop.f32.mrf.mxu1  ;;  %v1265_v51 = vmul.f32 %v2192_v45, %v2192_v45 }
 0x12a   : > { %v1187_v1 = vadd.f32 %v1186_v59, %v697_v53  ;;  %v1320_v4 = vadd.f32 %v1319_v58, %v1257_v57  ;;  %v1737_v6 = vpack.c.bf16 %v1937_v60, %v1936_v39  ;;  %v1817_v10 = vpack.c.bf16 %v2304_v0, %v2298_v46 }
 0x12b   : > { %v700_v5 = vpop.f32.mrf.mxu0  ;;  %v2308_v11 = vpop.f32.mrf.mxu1  ;;  %v1261_v27 = vmul.f32 %v1937_v60, %v1937_v60  ;;  %v1266_v58 = vmul.f32 %v2206_v61, %v2206_v61 }
 0x12c   : > { %v1321_v12 = vadd.f32 %v1320_v4, %v1258_v3  ;;  %1833 = vst [vmem:[%s2190_s16 + $0x78] sm:$0xff] %v1737_v6   ;;  %v1732_v14 = vpack.c.bf16 %v700_v5, %v697_v53  ;;  %v1188_v17 = vadd.f32 %v1187_v1, %v700_v5  ;;  %v1259_v18 = vmul.f32 %v700_v5, %v700_v5 }
 0x12d   : > { %1849 = vst [vmem:[%s2190_s16 + $0xf8] sm:$0xff] %v1817_v10   ;;  %v1812_v20 = vpack.c.bf16 %v2308_v11, %v2302_v55  ;;  %v1267_v1 = vmul.f32 %v2212_v9, %v2212_v9  ;;  %v1270_v10 = vmul.f32 %v2222_v21, %v2222_v21 }
 0x12e   : > { %1832 = vst [vmem:[%s2190_s16 + $0x70] sm:$0xff] %v1732_v14   ;;  %v1189_v24 = vadd.f32 %v1936_v39, %v1188_v17  ;;  %v1322_v25 = vadd.f32 %v1321_v12, %v1259_v18  ;;  %v1264_v39 = vmul.f32 %v2181_v41, %v2181_v41  ;;  %v1271_v17 = vmul.f32 %v2228_v33, %v2228_v33 }
 0x12f   : > { %1848 = vst [vmem:[%s2190_s16 + $0xf0] sm:$0xff] %v1812_v20  }
 0x130   : > { %v1190_v29 = vadd.f32 %v1937_v60, %v1189_v24  ;;  %v1323_v30 = vadd.f32 %v1322_v25, %v1260_v22  ;;  %v1274_v25 = vmul.f32 %v2238_v48, %v2238_v48 }
 0x132   : > { %v1324_v34 = vadd.f32 %v1323_v30, %v1261_v27  ;;  %v1191_v35 = vadd.f32 %v1190_v29, %v2183_v43  ;;  %v1275_v30 = vmul.f32 %v2244_v63, %v2244_v63 }
 0x134   : > { %v1192_v37 = vadd.f32 %v1191_v35, %v2196_v50  ;;  %v1325_v42 = vadd.f32 %v1324_v34, %v1262_v31 }
 0x136   : > { %v1193_v47 = vadd.f32 %v2181_v41, %v1192_v37  ;;  %v1326_v49 = vadd.f32 %v1325_v42, %v1263_v38  ;;  %v1268_v41 = vmul.f32 %v2202_v56, %v2202_v56  ;;  %v1278_v38 = vmul.f32 %v2254_v13, %v2254_v13 }
 0x138   : > { %v1327_v53 = vadd.f32 %v1326_v49, %v1264_v39  ;;  %v1194_v57 = vadd.f32 %v2192_v45, %v1193_v47  ;;  %v1269_v45 = vmul.f32 %v2208_v2, %v2208_v2  ;;  %v1279_v47 = vmul.f32 %v2260_v28, %v2260_v28 }
 0x13a   : > { %v1195_v43 = vadd.f32 %v1194_v57, %v2206_v61  ;;  %v1328_v59 = vadd.f32 %v1327_v53, %v1265_v51 }
 0x13c   : > { %v1329_v50 = vadd.f32 %v1328_v59, %v1266_v58  ;;  %v1196_v60 = vadd.f32 %v1195_v43, %v2212_v9  ;;  %v1282_v43 = vmul.f32 %v2270_v44, %v2270_v44 }
 0x13e   : > { %v1197_v3 = vadd.f32 %v2202_v56, %v1196_v60  ;;  %v1330_v4 = vadd.f32 %v1329_v50, %v1267_v1  ;;  %v1272_v56 = vmul.f32 %v2218_v16, %v2218_v16  ;;  %v1283_v50 = vmul.f32 %v2276_v62, %v2276_v62 }
 0x140   : > { %v1331_v6 = vadd.f32 %v1330_v4, %v1268_v41  ;;  %v1198_v5 = vadd.f32 %v2208_v2, %v1197_v3  ;;  %v1273_v2 = vmul.f32 %v2224_v26, %v2224_v26  ;;  %v1286_v4 = vmul.f32 %v2286_v15, %v2286_v15 }
 0x142   : > { %v1199_v61 = vadd.f32 %v1198_v5, %v2222_v21  ;;  %v1332_v12 = vadd.f32 %v1331_v6, %v1269_v45  ;;  %v1287_v5 = vmul.f32 %v2292_v32, %v2292_v32 }
 0x144   : > { %v1333_v14 = vadd.f32 %v1332_v12, %v1270_v10  ;;  %v1200_v9 = vadd.f32 %v1199_v61, %v2228_v33 }
 0x146   : > { %v1201_v18 = vadd.f32 %v2218_v16, %v1200_v9  ;;  %v1334_v20 = vadd.f32 %v1333_v14, %v1271_v17  ;;  %v1276_v16 = vmul.f32 %v2234_v40, %v2234_v40  ;;  %v1290_v9 = vmul.f32 %v2302_v55, %v2302_v55 }
 0x148   : > { %v1335_v22 = vadd.f32 %v1334_v20, %v1272_v56  ;;  %v1202_v24 = vadd.f32 %v2224_v26, %v1201_v18  ;;  %v1277_v26 = vmul.f32 %v2240_v54, %v2240_v54  ;;  %v1292_v18 = vmul.f32 %v2298_v46, %v2298_v46 }
 0x14a   : > { %v1203_v21 = vadd.f32 %v1202_v24, %v2238_v48  ;;  %v1336_v27 = vadd.f32 %v1335_v22, %v1273_v2 }
 0x14c   : > { %v1337_v29 = vadd.f32 %v1336_v27, %v1274_v25  ;;  %v1204_v33 = vadd.f32 %v1203_v21, %v2244_v63 }
 0x14e   : > { %v1205_v31 = vadd.f32 %v2234_v40, %v1204_v33  ;;  %v1338_v34 = vadd.f32 %v1337_v29, %v1275_v30  ;;  %v1280_v40 = vmul.f32 %v2250_v7, %v2250_v7 }
 0x150   : > { %v1339_v35 = vadd.f32 %v1338_v34, %v1276_v16  ;;  %v1206_v37 = vadd.f32 %v2240_v54, %v1205_v31  ;;  %v1281_v54 = vmul.f32 %v2256_v19, %v2256_v19 }
 0x152   : > { %v1207_v48 = vadd.f32 %v1206_v37, %v2254_v13  ;;  %v1340_v42 = vadd.f32 %v1339_v35, %v1277_v26 }
 0x154   : > { %v1341_v39 = vadd.f32 %v1340_v42, %v1278_v38  ;;  %v1208_v63 = vadd.f32 %v1207_v48, %v2260_v28 }
 0x156   : > { %v1209_v49 = vadd.f32 %v2250_v7, %v1208_v63  ;;  %v1342_v51 = vadd.f32 %v1341_v39, %v1279_v47  ;;  %v1284_v7 = vmul.f32 %v2266_v36, %v2266_v36 }
 0x158   : > { %v1343_v53 = vadd.f32 %v1342_v51, %v1280_v40  ;;  %v1210_v57 = vadd.f32 %v2256_v19, %v1209_v49  ;;  %v1285_v19 = vmul.f32 %v2272_v52, %v2272_v52 }
 0x15a   : > { %v1211_v13 = vadd.f32 %v1210_v57, %v2270_v44  ;;  %v1344_v58 = vadd.f32 %v1343_v53, %v1281_v54 }
 0x15c   : > { %v1345_v59 = vadd.f32 %v1344_v58, %v1282_v43  ;;  %v1212_v28 = vadd.f32 %v1211_v13, %v2276_v62 }
 0x15e   : > { %v1213_v60 = vadd.f32 %v2266_v36, %v1212_v28  ;;  %v1346_v1 = vadd.f32 %v1345_v59, %v1283_v50  ;;  %v1288_v36 = vmul.f32 %v2282_v8, %v2282_v8 }
 0x160   : > { %v1347_v41 = vadd.f32 %v1346_v1, %v1284_v7  ;;  %v1214_v3 = vadd.f32 %v2272_v52, %v1213_v60  ;;  %v1289_v52 = vmul.f32 %v2288_v23, %v2288_v23 }
 0x162   : > { %v1215_v44 = vadd.f32 %v1214_v3, %v2286_v15  ;;  %v1348_v45 = vadd.f32 %v1347_v41, %v1285_v19 }
 0x164   : > { %v1349_v6 = vadd.f32 %v1348_v45, %v1286_v4  ;;  %v1216_v62 = vadd.f32 %v1215_v44, %v2292_v32 }
 0x166   : > { %v1217_v61 = vadd.f32 %v2282_v8, %v1216_v62  ;;  %v1350_v10 = vadd.f32 %v1349_v6, %v1287_v5  ;;  %v1291_v8 = vmul.f32 %v2308_v11, %v2308_v11 }
 0x168   : > { %v1351_v12 = vadd.f32 %v1350_v10, %v1288_v36  ;;  %v1218_v15 = vadd.f32 %v2288_v23, %v1217_v61  ;;  %v1293_v23 = vmul.f32 %v2304_v0, %v2304_v0 }
 0x16a   : > { %v1219_v14 = vadd.f32 %v1218_v15, %v2302_v55  ;;  %v1352_v32 = vadd.f32 %v1351_v12, %v1289_v52 }
 0x16c   : > { %v1353_v17 = vadd.f32 %v1352_v32, %v1290_v9  ;;  %v1220_v56 = vadd.f32 %v1219_v14, %v2308_v11 }
 0x16e   : > { %v1221_v20 = vadd.f32 %v2298_v46, %v1220_v56  ;;  %v1354_v2 = vadd.f32 %v1353_v17, %v1291_v8 }
 0x170   : > { %v1222_v22 = vadd.f32 %v2304_v0, %v1221_v20  ;;  %v1355_v55 = vadd.f32 %v1354_v2, %v1292_v18 }
 0x172   : > { %v1223_v24 = vrot.slane %v1222_v22, 4  ;;  %v1356_v21 = vadd.f32 %v1355_v55, %v1293_v23 }
 0x174   : > { %v1224_v25 = vadd.f32 %v1223_v24, %v1222_v22  ;;  %v1357_v27 = vrot.slane %v1356_v21, 4 }
 0x176   : > { %v1225_v29 = vrot.slane %v1224_v25, 2  ;;  %v1358_v11 = vadd.f32 %v1357_v27, %v1356_v21 }
 0x178   : > { %v1226_v33 = vadd.f32 %v1225_v29, %v1224_v25  ;;  %v1359_v30 = vrot.slane %v1358_v11, 2 }
 0x17a   : > { %v1227_v16 = vrot.slane %v1226_v33, 1  ;;  %v1360_v46 = vadd.f32 %v1359_v30, %v1358_v11 }
 0x17c   : > { %v1228_v31 = vadd.f32 %v1227_v16, %v1226_v33  ;;  %v1361_v34 = vrot.slane %v1360_v46, 1 }
 0x17e   : > { %1229 = vst [vmem:[%s229_s20] sm:$0x1] %v1228_v31  ;;  %v1362_v0 = vadd.f32 %v1361_v34, %v1360_v46 }
 0x180   : > { %1363 = vst [vmem:[%s229_s20 + $0x1] sm:$0x1] %v1362_v0 }
 0x181 PF: > { %s14_s14 = sadd.s32 1, %s2072_s14   ;;  %s2430_s12 = smov %s2068_s13 }
 0x182   : > { %p11_p6 = scmp.ge.s32.totalorder %s14_s14, 6   ;;  %s2431_s13 = smov %s2433_s15 }
 0x184   :  { %13 = sbr.rel (!%p11_p6) target bundleno = 2 (0x2), region = 73 }

// kernel: _lambda_.17
= control target key start
LH: loop header
LB: loop body
LE: loop exit
PB: predicated region body
PF: predicated region fallthrough
CT: control target
= control target key end

     0   :  { %s2124_s1 = inlined_call_operand.vmem [shape: bf16[128,128], index: 1, kind: input, shape index: {}]   ;;  %s2125_s0 = inlined_call_operand.vmem [shape: bf16[512,128], index: 0, kind: input, shape index: {}]   ;;  %s2126_s2 = inlined_call_operand.vmem [shape: bf16[512,128], index: 2, kind: output, shape index: {0}]   ;;  %s2127_s3 = inlined_call_operand.vmem [shape: f32[8,128], index: 3, kind: output, shape index: {1}]  }
   0x1   :  { %v1650_v0 = vld [vmem:[%s2124_s1 + $0x38] sm:$0xff]   ;;  %v1651_v1 = vld [vmem:[%s2124_s1 + $0x30] sm:$0xff]   ;;  %v1652_v2 = vld [vmem:[%s2124_s1 + $0x28] sm:$0xff]  }
   0x2   :  { %1554 = vmatprep.subr.bf16.mxu0 %v1650_v0  ;;  %1634 = vmatprep.subr.bf16.mxu1 %v1650_v0  ;;  %v1653_v3 = vld [vmem:[%s2124_s1 + $0x20] sm:$0xff]   ;;  %v1654_v5 = vld [vmem:[%s2124_s1 + $0x18] sm:$0xff]   ;;  %v1655_v6 = vld [vmem:[%s2124_s1 + $0x10] sm:$0xff]  }
   0x3   :  { %1555 = vmatpush3.bf16.msra.mxu0 %v1650_v0  ;;  %1642 = vmatpush3.bf16.msra.mxu1 %v1650_v0  ;;  %v1658_v4 = vld [vmem:[%s2125_s0] sm:$0xff]   ;;  %v1656_v7 = vld [vmem:[%s2124_s1 + $0x8] sm:$0xff]   ;;  %v1660_v11 = vld [vmem:[%s2125_s0 + $0x10] sm:$0xff]  }
   0x4   :  { %1556 = vmatprep.subr.bf16.mxu0 %v1651_v1  ;;  %1635 = vmatprep.subr.bf16.mxu1 %v1651_v1  ;;  %v1657_v8 = vld [vmem:[%s2124_s1] sm:$0xff]   ;;  %v1659_v10 = vld [vmem:[%s2125_s0 + $0x8] sm:$0xff]   ;;  %v1676_v13 = vld [vmem:[%s2125_s0 + $0x90] sm:$0xff]  }
   0x5   :  { %1570 = vmatprep.mubr.bf16.mxu0 %v1658_v4  ;;  %v1674_v9 = vld [vmem:[%s2125_s0 + $0x80] sm:$0xff]   ;;  %v1675_v12 = vld [vmem:[%s2125_s0 + $0x88] sm:$0xff]   ;;  %v1661_v14 = vld [vmem:[%s2125_s0 + $0x18] sm:$0xff]  }
   0x6   :  { %1602 = vmatprep.mubr.bf16.mxu1 %v1674_v9  ;;  %v1662_v15 = vld [vmem:[%s2125_s0 + $0x20] sm:$0xff]   ;;  %v1677_v16 = vld [vmem:[%s2125_s0 + $0x98] sm:$0xff]   ;;  %v1663_v18 = vld [vmem:[%s2125_s0 + $0x28] sm:$0xff]  }
   0x7   :  { %1557 = vmatpush3.bf16.msra.mxu0 %v1651_v1  ;;  %1643 = vmatpush3.bf16.msra.mxu1 %v1651_v1  ;;  %v1678_v17 = vld [vmem:[%s2125_s0 + $0xa0] sm:$0xff]   ;;  %v1679_v19 = vld [vmem:[%s2125_s0 + $0xa8] sm:$0xff]   ;;  %v1664_v20 = vld [vmem:[%s2125_s0 + $0x30] sm:$0xff]  }
   0x8   :  { %1558 = vmatprep.subr.bf16.mxu0 %v1652_v2  ;;  %1636 = vmatprep.subr.bf16.mxu1 %v1652_v2  ;;  %v1680_v21 = vld [vmem:[%s2125_s0 + $0xb0] sm:$0xff]   ;;  %v1665_v22 = vld [vmem:[%s2125_s0 + $0x38] sm:$0xff]   ;;  %v1666_v24 = vld [vmem:[%s2125_s0 + $0x40] sm:$0xff]  }
   0x9   :  { %v1681_v23 = vld [vmem:[%s2125_s0 + $0xb8] sm:$0xff]   ;;  %v1682_v25 = vld [vmem:[%s2125_s0 + $0xc0] sm:$0xff]   ;;  %v1667_v26 = vld [vmem:[%s2125_s0 + $0x48] sm:$0xff]  }
   0xa   :  { %v1683_v27 = vld [vmem:[%s2125_s0 + $0xc8] sm:$0xff]   ;;  %v1668_v28 = vld [vmem:[%s2125_s0 + $0x50] sm:$0xff]   ;;  %v1669_v30 = vld [vmem:[%s2125_s0 + $0x58] sm:$0xff]  }
   0xb   :  { %1559 = vmatpush3.bf16.msra.mxu0 %v1652_v2  ;;  %1644 = vmatpush3.bf16.msra.mxu1 %v1652_v2  ;;  %v1684_v29 = vld [vmem:[%s2125_s0 + $0xd0] sm:$0xff]   ;;  %v1685_v31 = vld [vmem:[%s2125_s0 + $0xd8] sm:$0xff]   ;;  %v1670_v32 = vld [vmem:[%s2125_s0 + $0x60] sm:$0xff]  }
   0xc   :  { %1560 = vmatprep.subr.bf16.mxu0 %v1653_v3  ;;  %1637 = vmatprep.subr.bf16.mxu1 %v1653_v3  ;;  %v1686_v33 = vld [vmem:[%s2125_s0 + $0xe0] sm:$0xff]   ;;  %v1671_v34 = vld [vmem:[%s2125_s0 + $0x68] sm:$0xff]   ;;  %v1672_v36 = vld [vmem:[%s2125_s0 + $0x70] sm:$0xff]  }
   0xd   :  { %v1687_v35 = vld [vmem:[%s2125_s0 + $0xe8] sm:$0xff]   ;;  %v1688_v37 = vld [vmem:[%s2125_s0 + $0xf0] sm:$0xff]   ;;  %v1673_v38 = vld [vmem:[%s2125_s0 + $0x78] sm:$0xff]  }
   0xe   :  { %v1689_v39 = vld [vmem:[%s2125_s0 + $0xf8] sm:$0xff]  }
   0xf   :  { %1561 = vmatpush3.bf16.msra.mxu0 %v1653_v3  ;;  %1645 = vmatpush3.bf16.msra.mxu1 %v1653_v3 }
  0x10   :  { %1562 = vmatprep.subr.bf16.mxu0 %v1654_v5  ;;  %1638 = vmatprep.subr.bf16.mxu1 %v1654_v5 }
  0x13   :  { %1563 = vmatpush3.bf16.msra.mxu0 %v1654_v5  ;;  %1646 = vmatpush3.bf16.msra.mxu1 %v1654_v5 }
  0x14   :  { %1564 = vmatprep.subr.bf16.mxu0 %v1655_v6  ;;  %1639 = vmatprep.subr.bf16.mxu1 %v1655_v6 }
  0x17   :  { %1565 = vmatpush3.bf16.msra.mxu0 %v1655_v6  ;;  %1647 = vmatpush3.bf16.msra.mxu1 %v1655_v6 }
  0x18   :  { %1566 = vmatprep.subr.bf16.mxu0 %v1656_v7  ;;  %1640 = vmatprep.subr.bf16.mxu1 %v1656_v7 }
  0x1b   :  { %1567 = vmatpush3.bf16.msra.mxu0 %v1656_v7  ;;  %1648 = vmatpush3.bf16.msra.mxu1 %v1656_v7 }
  0x1c   :  { %1568 = vmatprep.subr.bf16.mxu0 %v1657_v8  ;;  %1641 = vmatprep.subr.bf16.mxu1 %v1657_v8 }
  0x1f   :  { %1569 = vmatpush3.bf16.msra.mxu0 %v1657_v8  ;;  %1649 = vmatpush3.bf16.msra.mxu1 %v1657_v8 }
  0x22   :  { %1571 = vmatmul.mubr.bf16.vlgmr.msra.gmra.mxu0 %v1659_v10  ;;  %1603 = vmatmul.mubr.bf16.vlgmr.msra.gmra.mxu1 %v1675_v12 }
  0x23   :  { %1574 = vmatprep.mubr.bf16.mxu0 %v1660_v11  ;;  %1606 = vmatprep.mubr.bf16.mxu1 %v1676_v13 }
  0x2a   :  { %1575 = vmatmul.mubr.bf16.gmra.mxu0 %v1661_v14  ;;  %1607 = vmatmul.mubr.bf16.gmra.mxu1 %v1677_v16 }
  0x2b   :  { %1578 = vmatprep.mubr.bf16.mxu0 %v1662_v15  ;;  %1610 = vmatprep.mubr.bf16.mxu1 %v1678_v17 }
  0x32   :  { %1579 = vmatmul.mubr.bf16.gmra.mxu0 %v1663_v18  ;;  %1611 = vmatmul.mubr.bf16.gmra.mxu1 %v1679_v19 }
  0x33   :  { %1582 = vmatprep.mubr.bf16.mxu0 %v1664_v20  ;;  %1614 = vmatprep.mubr.bf16.mxu1 %v1680_v21 }
  0x3a   :  { %1583 = vmatmul.mubr.bf16.gmra.mxu0 %v1665_v22  ;;  %1615 = vmatmul.mubr.bf16.gmra.mxu1 %v1681_v23 }
  0x3b   :  { %1586 = vmatprep.mubr.bf16.mxu0 %v1666_v24  ;;  %1618 = vmatprep.mubr.bf16.mxu1 %v1682_v25 }
  0x42   :  { %1587 = vmatmul.mubr.bf16.gmra.mxu0 %v1667_v26  ;;  %1619 = vmatmul.mubr.bf16.gmra.mxu1 %v1683_v27 }
  0x43   :  { %1590 = vmatprep.mubr.bf16.mxu0 %v1668_v28  ;;  %1622 = vmatprep.mubr.bf16.mxu1 %v1684_v29 }
  0x4a   :  { %1591 = vmatmul.mubr.bf16.gmra.mxu0 %v1669_v30  ;;  %1623 = vmatmul.mubr.bf16.gmra.mxu1 %v1685_v31 }
  0x4b   :  { %1594 = vmatprep.mubr.bf16.mxu0 %v1670_v32  ;;  %1626 = vmatprep.mubr.bf16.mxu1 %v1686_v33 }
  0x52   :  { %1595 = vmatmul.mubr.bf16.gmra.mxu0 %v1671_v34  ;;  %1627 = vmatmul.mubr.bf16.gmra.mxu1 %v1687_v35 }
  0x53   :  { %1598 = vmatprep.mubr.bf16.mxu0 %v1672_v36  ;;  %1630 = vmatprep.mubr.bf16.mxu1 %v1688_v37 }
  0x5a   :  { %1599 = vmatmul.mubr.bf16.gmra.mxu0 %v1673_v38  ;;  %1631 = vmatmul.mubr.bf16.gmra.mxu1 %v1689_v39 }
  0xe2   :  { %v1572_v40 = vpop.f32.mrf.mxu0  ;;  %v1830_v41 = vpop.f32.mrf.mxu1 }
  0xe3   :  { %v1015_v57 = vmul.f32 %v1572_v40, %v1572_v40 }
  0xe4   :  { %v368_v42 = vpop.f32.mrf.mxu0  ;;  %v1832_v43 = vpop.f32.mrf.mxu1 }
  0xe5   :  { %v1013_v48 = vmul.f32 %v368_v42, %v368_v42 }
  0xe6   :  { %v1573_v44 = vpop.f32.mrf.mxu0  ;;  %v1834_v45 = vpop.f32.mrf.mxu1 }
  0xe7   :  { %v1331_v46 = vpack.c.bf16 %v1573_v44, %v1572_v40  ;;  %v1411_v47 = vpack.c.bf16 %v1834_v45, %v1830_v41  ;;  %v1016_v62 = vmul.f32 %v1573_v44, %v1573_v44 }
  0xe8   :  { %v371_v49 = vpop.f32.mrf.mxu0  ;;  %v1838_v50 = vpop.f32.mrf.mxu1 }
  0xe9   :  { %1483 = vst [vmem:[%s2126_s2 + $0x8] sm:$0xff] %v1331_v46   ;;  %v1326_v51 = vpack.c.bf16 %v371_v49, %v368_v42  ;;  %v943_v52 = vadd.f32 %v371_v49, %v368_v42  ;;  %v1014_v53 = vmul.f32 %v371_v49, %v371_v49  ;;  %1499 = vst [vmem:[%s2126_s2 + $0x88] sm:$0xff] %v1411_v47  }
  0xea   :  { %v1406_v54 = vpack.c.bf16 %v1838_v50, %v1832_v43  ;;  %v1576_v55 = vpop.f32.mrf.mxu0  ;;  %v1848_v56 = vpop.f32.mrf.mxu1 }
  0xeb   :  { %1327 = vst [vmem:[%s2126_s2] sm:$0xff] %v1326_v51   ;;  %v944_v58 = vadd.f32 %v1572_v40, %v943_v52  ;;  %v1077_v59 = vadd.f32 %v1014_v53, %v1013_v48  ;;  %v1019_v17 = vmul.f32 %v1576_v55, %v1576_v55 }
  0xec   :  { %1498 = vst [vmem:[%s2126_s2 + $0x80] sm:$0xff] %v1406_v54   ;;  %v384_v60 = vpop.f32.mrf.mxu0  ;;  %v1856_v61 = vpop.f32.mrf.mxu1 }
  0xed   :  { %v1078_v63 = vadd.f32 %v1077_v59, %v1015_v57  ;;  %v945_v0 = vadd.f32 %v1573_v44, %v944_v58  ;;  %v1017_v4 = vmul.f32 %v384_v60, %v384_v60 }
  0xee   :  { %v1577_v1 = vpop.f32.mrf.mxu0  ;;  %v1858_v2 = vpop.f32.mrf.mxu1 }
  0xef   :  { %v946_v3 = vadd.f32 %v945_v0, %v384_v60  ;;  %v1079_v5 = vadd.f32 %v1078_v63, %v1016_v62  ;;  %v1341_v6 = vpack.c.bf16 %v1577_v1, %v1576_v55  ;;  %v1421_v8 = vpack.c.bf16 %v1858_v2, %v1848_v56 }
  0xf0   :  { %v387_v7 = vpop.f32.mrf.mxu0  ;;  %v1862_v9 = vpop.f32.mrf.mxu1  ;;  %v1020_v22 = vmul.f32 %v1577_v1, %v1577_v1 }
  0xf1   :  { %v1080_v10 = vadd.f32 %v1079_v5, %v1017_v4  ;;  %1485 = vst [vmem:[%s2126_s2 + $0x18] sm:$0xff] %v1341_v6   ;;  %v1336_v11 = vpack.c.bf16 %v387_v7, %v384_v60  ;;  %v947_v12 = vadd.f32 %v946_v3, %v387_v7  ;;  %v1018_v13 = vmul.f32 %v387_v7, %v387_v7 }
  0xf2   :  { %v1580_v14 = vpop.f32.mrf.mxu0  ;;  %1501 = vst [vmem:[%s2126_s2 + $0x98] sm:$0xff] %v1421_v8   ;;  %v1416_v15 = vpack.c.bf16 %v1862_v9, %v1856_v61  ;;  %v1872_v16 = vpop.f32.mrf.mxu1 }
  0xf3   :  { %1484 = vst [vmem:[%s2126_s2 + $0x10] sm:$0xff] %v1336_v11   ;;  %v948_v18 = vadd.f32 %v1576_v55, %v947_v12  ;;  %v1081_v19 = vadd.f32 %v1080_v10, %v1018_v13  ;;  %v1023_v42 = vmul.f32 %v1580_v14, %v1580_v14 }
  0xf4   :  { %v400_v20 = vpop.f32.mrf.mxu0  ;;  %1500 = vst [vmem:[%s2126_s2 + $0x90] sm:$0xff] %v1416_v15   ;;  %v1880_v21 = vpop.f32.mrf.mxu1 }
  0xf5   :  { %v1082_v23 = vadd.f32 %v1081_v19, %v1019_v17  ;;  %v949_v24 = vadd.f32 %v1577_v1, %v948_v18  ;;  %v1021_v28 = vmul.f32 %v400_v20, %v400_v20 }
  0xf6   :  { %v1581_v25 = vpop.f32.mrf.mxu0  ;;  %v1882_v26 = vpop.f32.mrf.mxu1 }
  0xf7   :  { %v950_v27 = vadd.f32 %v949_v24, %v400_v20  ;;  %v1083_v29 = vadd.f32 %v1082_v23, %v1020_v22  ;;  %v1351_v30 = vpack.c.bf16 %v1581_v25, %v1580_v14  ;;  %v1431_v32 = vpack.c.bf16 %v1882_v26, %v1872_v16 }
  0xf8   :  { %v403_v31 = vpop.f32.mrf.mxu0  ;;  %v1886_v33 = vpop.f32.mrf.mxu1  ;;  %v1024_v49 = vmul.f32 %v1581_v25, %v1581_v25 }
  0xf9   :  { %v1084_v34 = vadd.f32 %v1083_v29, %v1021_v28  ;;  %1487 = vst [vmem:[%s2126_s2 + $0x28] sm:$0xff] %v1351_v30   ;;  %v1346_v35 = vpack.c.bf16 %v403_v31, %v400_v20  ;;  %v951_v36 = vadd.f32 %v950_v27, %v403_v31  ;;  %v1022_v37 = vmul.f32 %v403_v31, %v403_v31 }
  0xfa   :  { %v1584_v38 = vpop.f32.mrf.mxu0  ;;  %1503 = vst [vmem:[%s2126_s2 + $0xa8] sm:$0xff] %v1431_v32   ;;  %v1426_v39 = vpack.c.bf16 %v1886_v33, %v1880_v21  ;;  %v1896_v40 = vpop.f32.mrf.mxu1 }
  0xfb   :  { %1486 = vst [vmem:[%s2126_s2 + $0x20] sm:$0xff] %v1346_v35   ;;  %v952_v44 = vadd.f32 %v1580_v14, %v951_v36  ;;  %v1085_v46 = vadd.f32 %v1084_v34, %v1022_v37  ;;  %v1027_v8 = vmul.f32 %v1584_v38, %v1584_v38 }
  0xfc   :  { %v416_v47 = vpop.f32.mrf.mxu0  ;;  %1502 = vst [vmem:[%s2126_s2 + $0xa0] sm:$0xff] %v1426_v39   ;;  %v1904_v48 = vpop.f32.mrf.mxu1 }
  0xfd   :  { %v1086_v51 = vadd.f32 %v1085_v46, %v1023_v42  ;;  %v953_v52 = vadd.f32 %v1581_v25, %v952_v44  ;;  %v1025_v57 = vmul.f32 %v416_v47, %v416_v47 }
  0xfe   :  { %v1585_v53 = vpop.f32.mrf.mxu0  ;;  %v1906_v54 = vpop.f32.mrf.mxu1 }
  0xff   :  { %v954_v55 = vadd.f32 %v953_v52, %v416_v47  ;;  %v1087_v58 = vadd.f32 %v1086_v51, %v1024_v49  ;;  %v1361_v59 = vpack.c.bf16 %v1585_v53, %v1584_v38  ;;  %v1441_v62 = vpack.c.bf16 %v1906_v54, %v1896_v40 }
 0x100   :  { %v419_v60 = vpop.f32.mrf.mxu0  ;;  %v1910_v63 = vpop.f32.mrf.mxu1  ;;  %v1028_v14 = vmul.f32 %v1585_v53, %v1585_v53 }
 0x101   :  { %v1088_v0 = vadd.f32 %v1087_v58, %v1025_v57  ;;  %1489 = vst [vmem:[%s2126_s2 + $0x38] sm:$0xff] %v1361_v59   ;;  %v1356_v1 = vpack.c.bf16 %v419_v60, %v416_v47  ;;  %v955_v3 = vadd.f32 %v954_v55, %v419_v60  ;;  %v1026_v4 = vmul.f32 %v419_v60, %v419_v60 }
 0x102   :  { %v1588_v5 = vpop.f32.mrf.mxu0  ;;  %1505 = vst [vmem:[%s2126_s2 + $0xb8] sm:$0xff] %v1441_v62   ;;  %v1436_v6 = vpack.c.bf16 %v1910_v63, %v1904_v48  ;;  %v1920_v7 = vpop.f32.mrf.mxu1 }
 0x103   :  { %1488 = vst [vmem:[%s2126_s2 + $0x30] sm:$0xff] %v1356_v1   ;;  %v956_v10 = vadd.f32 %v1584_v38, %v955_v3  ;;  %v1089_v11 = vadd.f32 %v1088_v0, %v1026_v4  ;;  %v1031_v37 = vmul.f32 %v1588_v5, %v1588_v5 }
 0x104   :  { %v432_v12 = vpop.f32.mrf.mxu0  ;;  %1504 = vst [vmem:[%s2126_s2 + $0xb0] sm:$0xff] %v1436_v6   ;;  %v1928_v13 = vpop.f32.mrf.mxu1 }
 0x105   :  { %v1090_v15 = vadd.f32 %v1089_v11, %v1027_v8  ;;  %v957_v17 = vadd.f32 %v1585_v53, %v956_v10  ;;  %v1029_v22 = vmul.f32 %v432_v12, %v432_v12 }
 0x106   :  { %v1589_v18 = vpop.f32.mrf.mxu0  ;;  %v1930_v19 = vpop.f32.mrf.mxu1 }
 0x107   :  { %v958_v20 = vadd.f32 %v957_v17, %v432_v12  ;;  %v1091_v23 = vadd.f32 %v1090_v15, %v1028_v14  ;;  %v1371_v24 = vpack.c.bf16 %v1589_v18, %v1588_v5  ;;  %v1451_v27 = vpack.c.bf16 %v1930_v19, %v1920_v7 }
 0x108   :  { %v435_v25 = vpop.f32.mrf.mxu0  ;;  %v1934_v28 = vpop.f32.mrf.mxu1  ;;  %v1032_v46 = vmul.f32 %v1589_v18, %v1589_v18 }
 0x109   :  { %v1092_v29 = vadd.f32 %v1091_v23, %v1029_v22  ;;  %1491 = vst [vmem:[%s2126_s2 + $0x48] sm:$0xff] %v1371_v24   ;;  %v1366_v30 = vpack.c.bf16 %v435_v25, %v432_v12  ;;  %v959_v31 = vadd.f32 %v958_v20, %v435_v25  ;;  %v1030_v32 = vmul.f32 %v435_v25, %v435_v25 }
 0x10a   :  { %v1592_v34 = vpop.f32.mrf.mxu0  ;;  %1507 = vst [vmem:[%s2126_s2 + $0xc8] sm:$0xff] %v1451_v27   ;;  %v1446_v35 = vpack.c.bf16 %v1934_v28, %v1928_v13  ;;  %v1944_v36 = vpop.f32.mrf.mxu1 }
 0x10b   :  { %1490 = vst [vmem:[%s2126_s2 + $0x40] sm:$0xff] %v1366_v30   ;;  %v960_v38 = vadd.f32 %v1588_v5, %v959_v31  ;;  %v1093_v39 = vadd.f32 %v1092_v29, %v1030_v32  ;;  %v1035_v10 = vmul.f32 %v1592_v34, %v1592_v34 }
 0x10c   :  { %v448_v42 = vpop.f32.mrf.mxu0  ;;  %1506 = vst [vmem:[%s2126_s2 + $0xc0] sm:$0xff] %v1446_v35   ;;  %v1952_v44 = vpop.f32.mrf.mxu1 }
 0x10d   :  { %v1094_v47 = vadd.f32 %v1093_v39, %v1031_v37  ;;  %v961_v49 = vadd.f32 %v1589_v18, %v960_v38  ;;  %v1033_v55 = vmul.f32 %v448_v42, %v448_v42 }
 0x10e   :  { %v1593_v51 = vpop.f32.mrf.mxu0  ;;  %v1954_v52 = vpop.f32.mrf.mxu1 }
 0x10f   :  { %v962_v53 = vadd.f32 %v961_v49, %v448_v42  ;;  %v1095_v57 = vadd.f32 %v1094_v47, %v1032_v46  ;;  %v1381_v58 = vpack.c.bf16 %v1593_v51, %v1592_v34  ;;  %v1461_v60 = vpack.c.bf16 %v1954_v52, %v1944_v36 }
 0x110   :  { %v451_v59 = vpop.f32.mrf.mxu0  ;;  %v1958_v62 = vpop.f32.mrf.mxu1  ;;  %v1036_v17 = vmul.f32 %v1593_v51, %v1593_v51 }
 0x111   :  { %v1096_v0 = vadd.f32 %v1095_v57, %v1033_v55  ;;  %1493 = vst [vmem:[%s2126_s2 + $0x58] sm:$0xff] %v1381_v58   ;;  %v1376_v1 = vpack.c.bf16 %v451_v59, %v448_v42  ;;  %v963_v3 = vadd.f32 %v962_v53, %v451_v59  ;;  %v1034_v4 = vmul.f32 %v451_v59, %v451_v59 }
 0x112   :  { %v1596_v5 = vpop.f32.mrf.mxu0  ;;  %1509 = vst [vmem:[%s2126_s2 + $0xd8] sm:$0xff] %v1461_v60   ;;  %v1456_v6 = vpack.c.bf16 %v1958_v62, %v1952_v44  ;;  %v1968_v8 = vpop.f32.mrf.mxu1 }
 0x113   :  { %1492 = vst [vmem:[%s2126_s2 + $0x50] sm:$0xff] %v1376_v1   ;;  %v964_v11 = vadd.f32 %v1592_v34, %v963_v3  ;;  %v1097_v12 = vadd.f32 %v1096_v0, %v1034_v4  ;;  %v1039_v47 = vmul.f32 %v1596_v5, %v1596_v5 }
 0x114   :  { %v464_v14 = vpop.f32.mrf.mxu0  ;;  %1508 = vst [vmem:[%s2126_s2 + $0xd0] sm:$0xff] %v1456_v6   ;;  %v1976_v15 = vpop.f32.mrf.mxu1 }
 0x115   :  { %v1098_v18 = vadd.f32 %v1097_v12, %v1035_v10  ;;  %v965_v20 = vadd.f32 %v1593_v51, %v964_v11  ;;  %v1037_v25 = vmul.f32 %v464_v14, %v464_v14 }
 0x116   :  { %v1597_v22 = vpop.f32.mrf.mxu0  ;;  %v1978_v23 = vpop.f32.mrf.mxu1 }
 0x117   :  { %v966_v24 = vadd.f32 %v965_v20, %v464_v14  ;;  %v1099_v27 = vadd.f32 %v1098_v18, %v1036_v17  ;;  %v1391_v29 = vpack.c.bf16 %v1597_v22, %v1596_v5  ;;  %v1471_v31 = vpack.c.bf16 %v1978_v23, %v1968_v8 }
 0x118   :  { %v467_v30 = vpop.f32.mrf.mxu0  ;;  %v1982_v32 = vpop.f32.mrf.mxu1  ;;  %v1040_v57 = vmul.f32 %v1597_v22, %v1597_v22 }
 0x119   :  { %v1100_v34 = vadd.f32 %v1099_v27, %v1037_v25  ;;  %1495 = vst [vmem:[%s2126_s2 + $0x68] sm:$0xff] %v1391_v29   ;;  %v1386_v35 = vpack.c.bf16 %v467_v30, %v464_v14  ;;  %v967_v37 = vadd.f32 %v966_v24, %v467_v30  ;;  %v1038_v38 = vmul.f32 %v467_v30, %v467_v30 }
 0x11a   :  { %v1600_v39 = vpop.f32.mrf.mxu0  ;;  %1511 = vst [vmem:[%s2126_s2 + $0xe8] sm:$0xff] %v1471_v31   ;;  %v1466_v42 = vpack.c.bf16 %v1982_v32, %v1976_v15  ;;  %v1992_v46 = vpop.f32.mrf.mxu1  ;;  %v1045_v31 = vmul.f32 %v1832_v43, %v1832_v43 }
 0x11b   :  { %1494 = vst [vmem:[%s2126_s2 + $0x60] sm:$0xff] %v1386_v35   ;;  %v968_v49 = vadd.f32 %v1596_v5, %v967_v37  ;;  %v1101_v51 = vadd.f32 %v1100_v34, %v1038_v38  ;;  %v1046_v38 = vmul.f32 %v1838_v50, %v1838_v50 }
 0x11c   :  { %v480_v53 = vpop.f32.mrf.mxu0  ;;  %1510 = vst [vmem:[%s2126_s2 + $0xe0] sm:$0xff] %v1466_v42   ;;  %v2000_v55 = vpop.f32.mrf.mxu1  ;;  %v1047_v42 = vmul.f32 %v1830_v41, %v1830_v41 }
 0x11d   :  { %v1102_v58 = vadd.f32 %v1101_v51, %v1039_v47  ;;  %v969_v59 = vadd.f32 %v1597_v22, %v968_v49  ;;  %v1041_v3 = vmul.f32 %v480_v53, %v480_v53  ;;  %v1043_v22 = vmul.f32 %v1600_v39, %v1600_v39 }
 0x11e   :  { %v1601_v60 = vpop.f32.mrf.mxu0  ;;  %v2002_v0 = vpop.f32.mrf.mxu1  ;;  %v1048_v51 = vmul.f32 %v1834_v45, %v1834_v45 }
 0x11f   :  { %v970_v1 = vadd.f32 %v969_v59, %v480_v53  ;;  %v1103_v4 = vadd.f32 %v1102_v58, %v1040_v57  ;;  %v1401_v6 = vpack.c.bf16 %v1601_v60, %v1600_v39  ;;  %v1481_v5 = vpack.c.bf16 %v2002_v0, %v1992_v46 }
 0x120   :  { %v483_v10 = vpop.f32.mrf.mxu0  ;;  %v2006_v11 = vpop.f32.mrf.mxu1  ;;  %v1044_v27 = vmul.f32 %v1601_v60, %v1601_v60  ;;  %v1049_v58 = vmul.f32 %v1856_v61, %v1856_v61 }
 0x121   :  { %v1104_v12 = vadd.f32 %v1103_v4, %v1041_v3  ;;  %1497 = vst [vmem:[%s2126_s2 + $0x78] sm:$0xff] %v1401_v6   ;;  %v1396_v14 = vpack.c.bf16 %v483_v10, %v480_v53  ;;  %v971_v17 = vadd.f32 %v970_v1, %v483_v10  ;;  %v1042_v18 = vmul.f32 %v483_v10, %v483_v10 }
 0x122   :  { %1513 = vst [vmem:[%s2126_s2 + $0xf8] sm:$0xff] %v1481_v5   ;;  %v1476_v20 = vpack.c.bf16 %v2006_v11, %v2000_v55  ;;  %v1050_v1 = vmul.f32 %v1862_v9, %v1862_v9  ;;  %v1053_v5 = vmul.f32 %v1880_v21, %v1880_v21 }
 0x123   :  { %1496 = vst [vmem:[%s2126_s2 + $0x70] sm:$0xff] %v1396_v14   ;;  %v972_v24 = vadd.f32 %v1600_v39, %v971_v17  ;;  %v1105_v25 = vadd.f32 %v1104_v12, %v1042_v18  ;;  %v1054_v17 = vmul.f32 %v1886_v33, %v1886_v33 }
 0x124   :  { %1512 = vst [vmem:[%s2126_s2 + $0xf0] sm:$0xff] %v1476_v20  }
 0x125   :  { %v973_v29 = vadd.f32 %v1601_v60, %v972_v24  ;;  %v1106_v30 = vadd.f32 %v1105_v25, %v1043_v22  ;;  %v1057_v25 = vmul.f32 %v1904_v48, %v1904_v48 }
 0x127   :  { %v1107_v34 = vadd.f32 %v1106_v30, %v1044_v27  ;;  %v974_v35 = vadd.f32 %v973_v29, %v1832_v43  ;;  %v1058_v30 = vmul.f32 %v1910_v63, %v1910_v63 }
 0x129   :  { %v975_v37 = vadd.f32 %v974_v35, %v1838_v50  ;;  %v1108_v39 = vadd.f32 %v1107_v34, %v1045_v31 }
 0x12b   :  { %v976_v47 = vadd.f32 %v1830_v41, %v975_v37  ;;  %v1109_v49 = vadd.f32 %v1108_v39, %v1046_v38  ;;  %v1051_v41 = vmul.f32 %v1848_v56, %v1848_v56  ;;  %v1061_v38 = vmul.f32 %v1928_v13, %v1928_v13 }
 0x12d   :  { %v1110_v53 = vadd.f32 %v1109_v49, %v1047_v42  ;;  %v977_v57 = vadd.f32 %v1834_v45, %v976_v47  ;;  %v1052_v45 = vmul.f32 %v1858_v2, %v1858_v2  ;;  %v1062_v47 = vmul.f32 %v1934_v28, %v1934_v28 }
 0x12f   :  { %v978_v43 = vadd.f32 %v977_v57, %v1856_v61  ;;  %v1111_v59 = vadd.f32 %v1110_v53, %v1048_v51 }
 0x131   :  { %v1112_v50 = vadd.f32 %v1111_v59, %v1049_v58  ;;  %v979_v60 = vadd.f32 %v978_v43, %v1862_v9  ;;  %v1065_v43 = vmul.f32 %v1952_v44, %v1952_v44 }
 0x133   :  { %v980_v3 = vadd.f32 %v1848_v56, %v979_v60  ;;  %v1113_v4 = vadd.f32 %v1112_v50, %v1050_v1  ;;  %v1055_v56 = vmul.f32 %v1872_v16, %v1872_v16  ;;  %v1066_v50 = vmul.f32 %v1958_v62, %v1958_v62 }
 0x135   :  { %v1114_v6 = vadd.f32 %v1113_v4, %v1051_v41  ;;  %v981_v10 = vadd.f32 %v1858_v2, %v980_v3  ;;  %v1056_v2 = vmul.f32 %v1882_v26, %v1882_v26  ;;  %v1069_v4 = vmul.f32 %v1976_v15, %v1976_v15 }
 0x137   :  { %v982_v61 = vadd.f32 %v981_v10, %v1880_v21  ;;  %v1115_v12 = vadd.f32 %v1114_v6, %v1052_v45  ;;  %v1070_v10 = vmul.f32 %v1982_v32, %v1982_v32 }
 0x139   :  { %v1116_v14 = vadd.f32 %v1115_v12, %v1053_v5  ;;  %v983_v9 = vadd.f32 %v982_v61, %v1886_v33 }
 0x13b   :  { %v984_v18 = vadd.f32 %v1872_v16, %v983_v9  ;;  %v1117_v20 = vadd.f32 %v1116_v14, %v1054_v17  ;;  %v1059_v16 = vmul.f32 %v1896_v40, %v1896_v40  ;;  %v1073_v9 = vmul.f32 %v2000_v55, %v2000_v55 }
 0x13d   :  { %v1118_v22 = vadd.f32 %v1117_v20, %v1055_v56  ;;  %v985_v24 = vadd.f32 %v1882_v26, %v984_v18  ;;  %v1060_v26 = vmul.f32 %v1906_v54, %v1906_v54  ;;  %v1074_v18 = vmul.f32 %v2006_v11, %v2006_v11 }
 0x13f   :  { %v986_v21 = vadd.f32 %v985_v24, %v1904_v48  ;;  %v1119_v27 = vadd.f32 %v1118_v22, %v1056_v2 }
 0x141   :  { %v1120_v29 = vadd.f32 %v1119_v27, %v1057_v25  ;;  %v987_v33 = vadd.f32 %v986_v21, %v1910_v63 }
 0x143   :  { %v988_v31 = vadd.f32 %v1896_v40, %v987_v33  ;;  %v1121_v34 = vadd.f32 %v1120_v29, %v1058_v30  ;;  %v1063_v40 = vmul.f32 %v1920_v7, %v1920_v7 }
 0x145   :  { %v1122_v35 = vadd.f32 %v1121_v34, %v1059_v16  ;;  %v989_v37 = vadd.f32 %v1906_v54, %v988_v31  ;;  %v1064_v54 = vmul.f32 %v1930_v19, %v1930_v19 }
 0x147   :  { %v990_v48 = vadd.f32 %v989_v37, %v1928_v13  ;;  %v1123_v39 = vadd.f32 %v1122_v35, %v1060_v26 }
 0x149   :  { %v1124_v42 = vadd.f32 %v1123_v39, %v1061_v38  ;;  %v991_v63 = vadd.f32 %v990_v48, %v1934_v28 }
 0x14b   :  { %v992_v49 = vadd.f32 %v1920_v7, %v991_v63  ;;  %v1125_v51 = vadd.f32 %v1124_v42, %v1062_v47  ;;  %v1067_v7 = vmul.f32 %v1944_v36, %v1944_v36 }
 0x14d   :  { %v1126_v53 = vadd.f32 %v1125_v51, %v1063_v40  ;;  %v993_v57 = vadd.f32 %v1930_v19, %v992_v49  ;;  %v1068_v19 = vmul.f32 %v1954_v52, %v1954_v52 }
 0x14f   :  { %v994_v13 = vadd.f32 %v993_v57, %v1952_v44  ;;  %v1127_v58 = vadd.f32 %v1126_v53, %v1064_v54 }
 0x151   :  { %v1128_v59 = vadd.f32 %v1127_v58, %v1065_v43  ;;  %v995_v28 = vadd.f32 %v994_v13, %v1958_v62 }
 0x153   :  { %v996_v60 = vadd.f32 %v1944_v36, %v995_v28  ;;  %v1129_v1 = vadd.f32 %v1128_v59, %v1066_v50  ;;  %v1071_v36 = vmul.f32 %v1968_v8, %v1968_v8 }
 0x155   :  { %v1130_v41 = vadd.f32 %v1129_v1, %v1067_v7  ;;  %v997_v3 = vadd.f32 %v1954_v52, %v996_v60  ;;  %v1072_v52 = vmul.f32 %v1978_v23, %v1978_v23 }
 0x157   :  { %v998_v44 = vadd.f32 %v997_v3, %v1976_v15  ;;  %v1131_v45 = vadd.f32 %v1130_v41, %v1068_v19 }
 0x159   :  { %v1132_v6 = vadd.f32 %v1131_v45, %v1069_v4  ;;  %v999_v62 = vadd.f32 %v998_v44, %v1982_v32 }
 0x15b   :  { %v1000_v61 = vadd.f32 %v1968_v8, %v999_v62  ;;  %v1133_v5 = vadd.f32 %v1132_v6, %v1070_v10  ;;  %v1075_v8 = vmul.f32 %v1992_v46, %v1992_v46 }
 0x15d   :  { %v1134_v12 = vadd.f32 %v1133_v5, %v1071_v36  ;;  %v1001_v14 = vadd.f32 %v1978_v23, %v1000_v61  ;;  %v1076_v23 = vmul.f32 %v2002_v0, %v2002_v0 }
 0x15f   :  { %v1002_v15 = vadd.f32 %v1001_v14, %v2000_v55  ;;  %v1135_v17 = vadd.f32 %v1134_v12, %v1072_v52 }
 0x161   :  { %v1136_v56 = vadd.f32 %v1135_v17, %v1073_v9  ;;  %v1003_v32 = vadd.f32 %v1002_v15, %v2006_v11 }
 0x163   :  { %v1004_v20 = vadd.f32 %v1992_v46, %v1003_v32  ;;  %v1137_v2 = vadd.f32 %v1136_v56, %v1074_v18 }
 0x165   :  { %v1005_v22 = vadd.f32 %v2002_v0, %v1004_v20  ;;  %v1138_v24 = vadd.f32 %v1137_v2, %v1075_v8 }
 0x167   :  { %v1006_v55 = vrot.slane %v1005_v22, 4  ;;  %v1139_v21 = vadd.f32 %v1138_v24, %v1076_v23 }
 0x169   :  { %v1007_v25 = vadd.f32 %v1006_v55, %v1005_v22  ;;  %v1140_v27 = vrot.slane %v1139_v21, 4 }
 0x16b   :  { %v1008_v29 = vrot.slane %v1007_v25, 2  ;;  %v1141_v33 = vadd.f32 %v1140_v27, %v1139_v21 }
 0x16d   :  { %v1009_v30 = vadd.f32 %v1008_v29, %v1007_v25  ;;  %v1142_v11 = vrot.slane %v1141_v33, 2 }
 0x16f   :  { %v1010_v16 = vrot.slane %v1009_v30, 1  ;;  %v1143_v31 = vadd.f32 %v1142_v11, %v1141_v33 }
 0x171   :  { %v1011_v34 = vadd.f32 %v1010_v16, %v1009_v30  ;;  %v1144_v26 = vrot.slane %v1143_v31, 1 }
 0x173   :  { %1012 = vst [vmem:[%s2127_s3] sm:$0x1] %v1011_v34  ;;  %v1145_v46 = vadd.f32 %v1144_v26, %v1143_v31 }
 0x175   :  { %1146 = vst [vmem:[%s2127_s3 + $0x1] sm:$0x1] %v1145_v46 }

// kernel: _lambda_.18
= control target key start
LH: loop header
LB: loop body
LE: loop exit
PB: predicated region body
PF: predicated region fallthrough
CT: control target
= control target key end

     0   :  { %v1891_v0 = vmov 0   ;;  %s2610_s1 = inlined_call_operand.vmem [shape: bf16[256,128], index: 1, kind: input, shape index: {}]   ;;  %s2611_s0 = inlined_call_operand.vmem [shape: bf16[512,256], index: 0, kind: input, shape index: {}]   ;;  %s2612_s2 = inlined_call_operand.vmem [shape: bf16[512,128], index: 2, kind: output, shape index: {0}]   ;;  %s2613_s3 = inlined_call_operand.vmem [shape: f32[8,128], index: 3, kind: output, shape index: {1}]  }
   0x1   :  { %526 = vmatprep.subr.bf16.mxu0 %v1891_v0  ;;  %v1779_v1 = vld [vmem:[%s2610_s1 + $0x38] sm:$0xff]   ;;  %1746 = vmatprep.subr.bf16.mxu1 %v1891_v0  ;;  %v1780_v2 = vld [vmem:[%s2610_s1 + $0x30] sm:$0xff]   ;;  %v1781_v3 = vld [vmem:[%s2610_s1 + $0x28] sm:$0xff]  }
   0x2   :  { %527 = vmatpush1.bf16.msra.mxu0 %v1779_v1  ;;  %1762 = vmatpush1.bf16.msra.mxu1 %v1779_v1  ;;  %v1782_v4 = vld [vmem:[%s2610_s1 + $0x20] sm:$0xff]   ;;  %v1783_v5 = vld [vmem:[%s2610_s1 + $0x18] sm:$0xff]   ;;  %v1784_v7 = vld [vmem:[%s2610_s1 + $0x10] sm:$0xff]  }
   0x3   :  { %528 = vmatprep.subr.bf16.mxu0 %v1891_v0  ;;  %1747 = vmatprep.subr.bf16.mxu1 %v1891_v0  ;;  %v1797_v6 = vld [vmem:[%s2611_s0 + $0x4] ss:$8 sps:$4 sm:$0xff]   ;;  %v1787_v11 = vld [vmem:[%s2610_s1 + $0x78] sm:$0xff]   ;;  %v1788_v12 = vld [vmem:[%s2610_s1 + $0x70] sm:$0xff]  }
   0x4   :  { %558 = vmatprep.mubr.bf16.mxu0 %v1797_v6  ;;  %v1785_v8 = vld [vmem:[%s2610_s1 + $0x8] sm:$0xff]   ;;  %v1786_v9 = vld [vmem:[%s2610_s1] sm:$0xff]   ;;  %v1791_v15 = vld [vmem:[%s2610_s1 + $0x58] sm:$0xff]  }
   0x5   :  { %v1821_v10 = vld [vmem:[%s2611_s0 + $0x104] ss:$8 sps:$4 sm:$0xff]   ;;  %v1792_v16 = vld [vmem:[%s2610_s1 + $0x50] sm:$0xff]   ;;  %v1795_v19 = vld [vmem:[%s2611_s0] ss:$8 sps:$4 sm:$0xff]  }
   0x6   :  { %529 = vmatpush1.bf16.msra.mxu0 %v1780_v2  ;;  %1763 = vmatpush1.bf16.msra.mxu1 %v1780_v2  ;;  %v1789_v13 = vld [vmem:[%s2610_s1 + $0x68] sm:$0xff]   ;;  %v1790_v14 = vld [vmem:[%s2610_s1 + $0x60] sm:$0xff]   ;;  %v1798_v21 = vld [vmem:[%s2611_s0 + $0x14] ss:$8 sps:$4 sm:$0xff]  }
   0x7   :  { %530 = vmatprep.subr.bf16.mxu0 %v1891_v0  ;;  %1748 = vmatprep.subr.bf16.mxu1 %v1891_v0  ;;  %v1793_v17 = vld [vmem:[%s2610_s1 + $0x48] sm:$0xff]   ;;  %v1794_v18 = vld [vmem:[%s2610_s1 + $0x40] sm:$0xff]   ;;  %v1825_v22 = vld [vmem:[%s2611_s0 + $0x114] ss:$8 sps:$4 sm:$0xff]  }
   0x8   :  { %686 = vmatprep.mubr.bf16.mxu1 %v1821_v10  ;;  %v1819_v20 = vld [vmem:[%s2611_s0 + $0x100] ss:$8 sps:$4 sm:$0xff]   ;;  %v1800_v23 = vld [vmem:[%s2611_s0 + $0x10] ss:$8 sps:$4 sm:$0xff]   ;;  %v1801_v25 = vld [vmem:[%s2611_s0 + $0x24] ss:$8 sps:$4 sm:$0xff]  }
   0x9   :  { %v1827_v24 = vld [vmem:[%s2611_s0 + $0x110] ss:$8 sps:$4 sm:$0xff]   ;;  %v1831_v26 = vld [vmem:[%s2611_s0 + $0x124] ss:$8 sps:$4 sm:$0xff]   ;;  %v1803_v27 = vld [vmem:[%s2611_s0 + $0x20] ss:$8 sps:$4 sm:$0xff]  }
   0xa   :  { %531 = vmatpush1.bf16.msra.mxu0 %v1781_v3  ;;  %1764 = vmatpush1.bf16.msra.mxu1 %v1781_v3  ;;  %v1833_v28 = vld [vmem:[%s2611_s0 + $0x120] ss:$8 sps:$4 sm:$0xff]   ;;  %v1804_v29 = vld [vmem:[%s2611_s0 + $0x34] ss:$8 sps:$4 sm:$0xff]   ;;  %v1806_v31 = vld [vmem:[%s2611_s0 + $0x30] ss:$8 sps:$4 sm:$0xff]  }
   0xb   :  { %532 = vmatprep.subr.bf16.mxu0 %v1891_v0  ;;  %1749 = vmatprep.subr.bf16.mxu1 %v1891_v0  ;;  %v1837_v30 = vld [vmem:[%s2611_s0 + $0x134] ss:$8 sps:$4 sm:$0xff]   ;;  %v1839_v32 = vld [vmem:[%s2611_s0 + $0x130] ss:$8 sps:$4 sm:$0xff]   ;;  %v1807_v33 = vld [vmem:[%s2611_s0 + $0x44] ss:$8 sps:$4 sm:$0xff]  }
   0xc   :  { %v1843_v34 = vld [vmem:[%s2611_s0 + $0x144] ss:$8 sps:$4 sm:$0xff]   ;;  %v1809_v35 = vld [vmem:[%s2611_s0 + $0x40] ss:$8 sps:$4 sm:$0xff]   ;;  %v1810_v37 = vld [vmem:[%s2611_s0 + $0x54] ss:$8 sps:$4 sm:$0xff]  }
   0xd   :  { %v1845_v36 = vld [vmem:[%s2611_s0 + $0x140] ss:$8 sps:$4 sm:$0xff]   ;;  %v1849_v38 = vld [vmem:[%s2611_s0 + $0x154] ss:$8 sps:$4 sm:$0xff]   ;;  %v1812_v39 = vld [vmem:[%s2611_s0 + $0x50] ss:$8 sps:$4 sm:$0xff]  }
   0xe   :  { %533 = vmatpush1.bf16.msra.mxu0 %v1782_v4  ;;  %1765 = vmatpush1.bf16.msra.mxu1 %v1782_v4  ;;  %v1851_v40 = vld [vmem:[%s2611_s0 + $0x150] ss:$8 sps:$4 sm:$0xff]   ;;  %v1813_v41 = vld [vmem:[%s2611_s0 + $0x64] ss:$8 sps:$4 sm:$0xff]   ;;  %v1815_v43 = vld [vmem:[%s2611_s0 + $0x60] ss:$8 sps:$4 sm:$0xff]  }
   0xf   :  { %534 = vmatprep.subr.bf16.mxu0 %v1891_v0  ;;  %1750 = vmatprep.subr.bf16.mxu1 %v1891_v0  ;;  %v1855_v42 = vld [vmem:[%s2611_s0 + $0x164] ss:$8 sps:$4 sm:$0xff]   ;;  %v1857_v44 = vld [vmem:[%s2611_s0 + $0x160] ss:$8 sps:$4 sm:$0xff]   ;;  %v1816_v45 = vld [vmem:[%s2611_s0 + $0x74] ss:$8 sps:$4 sm:$0xff]  }
  0x10   :  { %v1861_v46 = vld [vmem:[%s2611_s0 + $0x174] ss:$8 sps:$4 sm:$0xff]   ;;  %v1818_v47 = vld [vmem:[%s2611_s0 + $0x70] ss:$8 sps:$4 sm:$0xff]   ;;  %v1822_v49 = vld [vmem:[%s2611_s0 + $0x84] ss:$8 sps:$4 sm:$0xff]  }
  0x11   :  { %v1863_v48 = vld [vmem:[%s2611_s0 + $0x170] ss:$8 sps:$4 sm:$0xff]   ;;  %v1867_v50 = vld [vmem:[%s2611_s0 + $0x184] ss:$8 sps:$4 sm:$0xff]   ;;  %v1824_v51 = vld [vmem:[%s2611_s0 + $0x80] ss:$8 sps:$4 sm:$0xff]  }
  0x12   :  { %535 = vmatpush1.bf16.msra.mxu0 %v1783_v5  ;;  %1766 = vmatpush1.bf16.msra.mxu1 %v1783_v5  ;;  %v1869_v52 = vld [vmem:[%s2611_s0 + $0x180] ss:$8 sps:$4 sm:$0xff]   ;;  %v1828_v53 = vld [vmem:[%s2611_s0 + $0x94] ss:$8 sps:$4 sm:$0xff]   ;;  %v1830_v55 = vld [vmem:[%s2611_s0 + $0x90] ss:$8 sps:$4 sm:$0xff]  }
  0x13   :  { %536 = vmatprep.subr.bf16.mxu0 %v1891_v0  ;;  %1751 = vmatprep.subr.bf16.mxu1 %v1891_v0  ;;  %v1870_v54 = vld [vmem:[%s2611_s0 + $0x194] ss:$8 sps:$4 sm:$0xff]   ;;  %v1872_v56 = vld [vmem:[%s2611_s0 + $0x190] ss:$8 sps:$4 sm:$0xff]   ;;  %v1834_v57 = vld [vmem:[%s2611_s0 + $0xa4] ss:$8 sps:$4 sm:$0xff]  }
  0x14   :  { %v1873_v58 = vld [vmem:[%s2611_s0 + $0x1a4] ss:$8 sps:$4 sm:$0xff]   ;;  %v1836_v59 = vld [vmem:[%s2611_s0 + $0xa0] ss:$8 sps:$4 sm:$0xff]   ;;  %v1840_v61 = vld [vmem:[%s2611_s0 + $0xb4] ss:$8 sps:$4 sm:$0xff]  }
  0x15   :  { %v1875_v60 = vld [vmem:[%s2611_s0 + $0x1a0] ss:$8 sps:$4 sm:$0xff]   ;;  %v1876_v62 = vld [vmem:[%s2611_s0 + $0x1b4] ss:$8 sps:$4 sm:$0xff]   ;;  %v1842_v63 = vld [vmem:[%s2611_s0 + $0xb0] ss:$8 sps:$4 sm:$0xff]  }
  0x16   :  { %537 = vmatpush1.bf16.msra.mxu0 %v1784_v7  ;;  %1767 = vmatpush1.bf16.msra.mxu1 %v1784_v7  ;;  %v1846_v1 = vld [vmem:[%s2611_s0 + $0xc4] ss:$8 sps:$4 sm:$0xff]   ;;  %v1848_v3 = vld [vmem:[%s2611_s0 + $0xc0] ss:$8 sps:$4 sm:$0xff]   ;;  %v1852_v5 = vld [vmem:[%s2611_s0 + $0xd4] ss:$8 sps:$4 sm:$0xff]  }
  0x17   :  { %538 = vmatprep.subr.bf16.mxu0 %v1891_v0  ;;  %1752 = vmatprep.subr.bf16.mxu1 %v1891_v0  ;;  %v1879_v2 = vld [vmem:[%s2611_s0 + $0x1c4] ss:$8 sps:$4 sm:$0xff]   ;;  %v1881_v4 = vld [vmem:[%s2611_s0 + $0x1c0] ss:$8 sps:$4 sm:$0xff]   ;;  %v1882_v6 = vld [vmem:[%s2611_s0 + $0x1d4] ss:$8 sps:$4 sm:$0xff]  }
  0x18   :  { %v1854_v7 = vld [vmem:[%s2611_s0 + $0xd0] ss:$8 sps:$4 sm:$0xff]   ;;  %v1885_v10 = vld [vmem:[%s2611_s0 + $0x1e4] ss:$8 sps:$4 sm:$0xff]  }
  0x1a   :  { %539 = vmatpush1.bf16.msra.mxu0 %v1785_v8  ;;  %1768 = vmatpush1.bf16.msra.mxu1 %v1785_v8  ;;  %v1884_v8 = vld [vmem:[%s2611_s0 + $0x1d0] ss:$8 sps:$4 sm:$0xff]  }
  0x1b   :  { %540 = vmatprep.subr.bf16.mxu0 %v1891_v0  ;;  %1753 = vmatprep.subr.bf16.mxu1 %v1891_v0 }
  0x1e   :  { %541 = vmatpush1.bf16.msra.mxu0 %v1786_v9  ;;  %1769 = vmatpush1.bf16.msra.mxu1 %v1786_v9  ;;  %v1858_v9 = vld [vmem:[%s2611_s0 + $0xe4] ss:$8 sps:$4 sm:$0xff]  }
  0x1f   :  { %542 = vmatprep.subr.bf16.mxu0 %v1891_v0  ;;  %1754 = vmatprep.subr.bf16.mxu1 %v1891_v0 }
  0x22   :  { %543 = vmatpush2.bf16.msra.mxu0 %v1787_v11  ;;  %1770 = vmatpush2.bf16.msra.mxu1 %v1787_v11  ;;  %v1860_v11 = vld [vmem:[%s2611_s0 + $0xe0] ss:$8 sps:$4 sm:$0xff]  }
  0x23   :  { %544 = vmatprep.subr.bf16.mxu0 %v1891_v0  ;;  %1755 = vmatprep.subr.bf16.mxu1 %v1891_v0 }
  0x26   :  { %545 = vmatpush2.bf16.msra.mxu0 %v1788_v12  ;;  %1771 = vmatpush2.bf16.msra.mxu1 %v1788_v12  ;;  %v1887_v12 = vld [vmem:[%s2611_s0 + $0x1e0] ss:$8 sps:$4 sm:$0xff]  }
  0x27   :  { %546 = vmatprep.subr.bf16.mxu0 %v1891_v0  ;;  %1756 = vmatprep.subr.bf16.mxu1 %v1891_v0 }
  0x2a   :  { %547 = vmatpush2.bf16.msra.mxu0 %v1789_v13  ;;  %1772 = vmatpush2.bf16.msra.mxu1 %v1789_v13  ;;  %v1864_v13 = vld [vmem:[%s2611_s0 + $0xf4] ss:$8 sps:$4 sm:$0xff]  }
  0x2b   :  { %548 = vmatprep.subr.bf16.mxu0 %v1891_v0  ;;  %1757 = vmatprep.subr.bf16.mxu1 %v1891_v0 }
  0x2e   :  { %549 = vmatpush2.bf16.msra.mxu0 %v1790_v14  ;;  %1773 = vmatpush2.bf16.msra.mxu1 %v1790_v14  ;;  %v1888_v14 = vld [vmem:[%s2611_s0 + $0x1f4] ss:$8 sps:$4 sm:$0xff]  }
  0x2f   :  { %550 = vmatprep.subr.bf16.mxu0 %v1891_v0  ;;  %1758 = vmatprep.subr.bf16.mxu1 %v1891_v0 }
  0x32   :  { %551 = vmatpush2.bf16.msra.mxu0 %v1791_v15  ;;  %1774 = vmatpush2.bf16.msra.mxu1 %v1791_v15  ;;  %v1866_v15 = vld [vmem:[%s2611_s0 + $0xf0] ss:$8 sps:$4 sm:$0xff]  }
  0x33   :  { %552 = vmatprep.subr.bf16.mxu0 %v1891_v0  ;;  %1759 = vmatprep.subr.bf16.mxu1 %v1891_v0 }
  0x36   :  { %553 = vmatpush2.bf16.msra.mxu0 %v1792_v16  ;;  %1775 = vmatpush2.bf16.msra.mxu1 %v1792_v16  ;;  %v1890_v16 = vld [vmem:[%s2611_s0 + $0x1f0] ss:$8 sps:$4 sm:$0xff]  }
  0x37   :  { %554 = vmatprep.subr.bf16.mxu0 %v1891_v0  ;;  %1760 = vmatprep.subr.bf16.mxu1 %v1891_v0 }
  0x3a   :  { %555 = vmatpush2.bf16.msra.mxu0 %v1793_v17  ;;  %1776 = vmatpush2.bf16.msra.mxu1 %v1793_v17 }
  0x3b   :  { %556 = vmatprep.subr.bf16.mxu0 %v1891_v0  ;;  %1761 = vmatprep.subr.bf16.mxu1 %v1891_v0  ;;  %v1878_v0 = vld [vmem:[%s2611_s0 + $0x1b0] ss:$8 sps:$4 sm:$0xff]  }
  0x3e   :  { %557 = vmatpush2.bf16.msra.mxu0 %v1794_v18  ;;  %1777 = vmatpush2.bf16.msra.mxu1 %v1794_v18 }
  0x41   :  { %559 = vmatmul.mubr.bf16.vlgmr.msra.gmra.mxu0 %v1795_v19  ;;  %687 = vmatmul.mubr.bf16.vlgmr.msra.gmra.mxu1 %v1819_v20 }
  0x42   :  { %566 = vmatprep.mubr.bf16.mxu0 %v1798_v21  ;;  %694 = vmatprep.mubr.bf16.mxu1 %v1825_v22 }
  0x49   :  { %567 = vmatmul.mubr.bf16.gmra.mxu0 %v1800_v23  ;;  %695 = vmatmul.mubr.bf16.gmra.mxu1 %v1827_v24 }
  0x4a   :  { %574 = vmatprep.mubr.bf16.mxu0 %v1801_v25  ;;  %702 = vmatprep.mubr.bf16.mxu1 %v1831_v26 }
  0x51   :  { %575 = vmatmul.mubr.bf16.gmra.mxu0 %v1803_v27  ;;  %703 = vmatmul.mubr.bf16.gmra.mxu1 %v1833_v28 }
  0x52   :  { %582 = vmatprep.mubr.bf16.mxu0 %v1804_v29  ;;  %710 = vmatprep.mubr.bf16.mxu1 %v1837_v30 }
  0x59   :  { %583 = vmatmul.mubr.bf16.gmra.mxu0 %v1806_v31  ;;  %711 = vmatmul.mubr.bf16.gmra.mxu1 %v1839_v32 }
  0x5a   :  { %590 = vmatprep.mubr.bf16.mxu0 %v1807_v33  ;;  %718 = vmatprep.mubr.bf16.mxu1 %v1843_v34 }
  0x61   :  { %591 = vmatmul.mubr.bf16.gmra.mxu0 %v1809_v35  ;;  %719 = vmatmul.mubr.bf16.gmra.mxu1 %v1845_v36 }
  0x62   :  { %598 = vmatprep.mubr.bf16.mxu0 %v1810_v37  ;;  %726 = vmatprep.mubr.bf16.mxu1 %v1849_v38 }
  0x69   :  { %599 = vmatmul.mubr.bf16.gmra.mxu0 %v1812_v39  ;;  %727 = vmatmul.mubr.bf16.gmra.mxu1 %v1851_v40 }
  0x6a   :  { %606 = vmatprep.mubr.bf16.mxu0 %v1813_v41  ;;  %734 = vmatprep.mubr.bf16.mxu1 %v1855_v42 }
  0x71   :  { %607 = vmatmul.mubr.bf16.gmra.mxu0 %v1815_v43  ;;  %735 = vmatmul.mubr.bf16.gmra.mxu1 %v1857_v44 }
  0x72   :  { %614 = vmatprep.mubr.bf16.mxu0 %v1816_v45  ;;  %742 = vmatprep.mubr.bf16.mxu1 %v1861_v46 }
  0x79   :  { %615 = vmatmul.mubr.bf16.gmra.mxu0 %v1818_v47  ;;  %743 = vmatmul.mubr.bf16.gmra.mxu1 %v1863_v48 }
  0x7a   :  { %622 = vmatprep.mubr.bf16.mxu0 %v1822_v49  ;;  %750 = vmatprep.mubr.bf16.mxu1 %v1867_v50 }
  0x81   :  { %623 = vmatmul.mubr.bf16.gmra.mxu0 %v1824_v51  ;;  %751 = vmatmul.mubr.bf16.gmra.mxu1 %v1869_v52 }
  0x82   :  { %630 = vmatprep.mubr.bf16.mxu0 %v1828_v53  ;;  %758 = vmatprep.mubr.bf16.mxu1 %v1870_v54 }
  0x89   :  { %631 = vmatmul.mubr.bf16.gmra.mxu0 %v1830_v55  ;;  %759 = vmatmul.mubr.bf16.gmra.mxu1 %v1872_v56 }
  0x8a   :  { %638 = vmatprep.mubr.bf16.mxu0 %v1834_v57  ;;  %766 = vmatprep.mubr.bf16.mxu1 %v1873_v58 }
  0x91   :  { %639 = vmatmul.mubr.bf16.gmra.mxu0 %v1836_v59  ;;  %767 = vmatmul.mubr.bf16.gmra.mxu1 %v1875_v60 }
  0x92   :  { %646 = vmatprep.mubr.bf16.mxu0 %v1840_v61  ;;  %774 = vmatprep.mubr.bf16.mxu1 %v1876_v62 }
  0x99   :  { %647 = vmatmul.mubr.bf16.gmra.mxu0 %v1842_v63  ;;  %775 = vmatmul.mubr.bf16.gmra.mxu1 %v1878_v0 }
  0x9a   :  { %654 = vmatprep.mubr.bf16.mxu0 %v1846_v1  ;;  %782 = vmatprep.mubr.bf16.mxu1 %v1879_v2 }
  0xa1   :  { %655 = vmatmul.mubr.bf16.gmra.mxu0 %v1848_v3  ;;  %783 = vmatmul.mubr.bf16.gmra.mxu1 %v1881_v4 }
  0xa2   :  { %662 = vmatprep.mubr.bf16.mxu0 %v1852_v5  ;;  %790 = vmatprep.mubr.bf16.mxu1 %v1882_v6 }
  0xa9   :  { %663 = vmatmul.mubr.bf16.gmra.mxu0 %v1854_v7  ;;  %791 = vmatmul.mubr.bf16.gmra.mxu1 %v1884_v8 }
  0xaa   :  { %670 = vmatprep.mubr.bf16.mxu0 %v1858_v9  ;;  %798 = vmatprep.mubr.bf16.mxu1 %v1885_v10 }
  0xb1   :  { %671 = vmatmul.mubr.bf16.gmra.mxu0 %v1860_v11  ;;  %799 = vmatmul.mubr.bf16.gmra.mxu1 %v1887_v12 }
  0xb2   :  { %678 = vmatprep.mubr.bf16.mxu0 %v1864_v13  ;;  %806 = vmatprep.mubr.bf16.mxu1 %v1888_v14 }
  0xb9   :  { %679 = vmatmul.mubr.bf16.gmra.mxu0 %v1866_v15  ;;  %807 = vmatmul.mubr.bf16.gmra.mxu1 %v1890_v16 }
 0x101   :  { %v2184_v17 = vpop.f32.mrf.mxu0  ;;  %v2186_v18 = vpop.f32.mrf.mxu1 }
 0x103   :  { %v562_v19 = vpop.f32.mrf.mxu0  ;;  %v690_v20 = vpop.f32.mrf.mxu1 }
 0x105   :  { %v2188_v21 = vpop.f32.mrf.mxu0  ;;  %v2190_v22 = vpop.f32.mrf.mxu1 }
 0x106   :  { %v1558_v23 = vpack.c.bf16 %v2188_v21, %v2184_v17  ;;  %v1638_v24 = vpack.c.bf16 %v2190_v22, %v2186_v18 }
 0x107   :  { %v565_v25 = vpop.f32.mrf.mxu0  ;;  %v693_v26 = vpop.f32.mrf.mxu1 }
 0x108   :  { %1559 = vst [vmem:[%s2612_s2] sm:$0xff] %v1558_v23   ;;  %1730 = vst [vmem:[%s2612_s2 + $0x80] sm:$0xff] %v1638_v24  }
 0x109   :  { %v2202_v27 = vpop.f32.mrf.mxu0  ;;  %v2204_v28 = vpop.f32.mrf.mxu1 }
 0x10b   :  { %v570_v29 = vpop.f32.mrf.mxu0  ;;  %v698_v30 = vpop.f32.mrf.mxu1 }
 0x10d   :  { %v2206_v31 = vpop.f32.mrf.mxu0  ;;  %v2208_v32 = vpop.f32.mrf.mxu1 }
 0x10e   :  { %v1563_v33 = vpack.c.bf16 %v2206_v31, %v2202_v27  ;;  %v1643_v34 = vpack.c.bf16 %v2208_v32, %v2204_v28 }
 0x10f   :  { %v573_v35 = vpop.f32.mrf.mxu0  ;;  %v701_v36 = vpop.f32.mrf.mxu1 }
 0x110   :  { %1715 = vst [vmem:[%s2612_s2 + $0x8] sm:$0xff] %v1563_v33   ;;  %1731 = vst [vmem:[%s2612_s2 + $0x88] sm:$0xff] %v1643_v34  }
 0x111   :  { %v2220_v37 = vpop.f32.mrf.mxu0  ;;  %v2222_v38 = vpop.f32.mrf.mxu1 }
 0x113   :  { %v578_v39 = vpop.f32.mrf.mxu0  ;;  %v706_v40 = vpop.f32.mrf.mxu1 }
 0x115   :  { %v2224_v41 = vpop.f32.mrf.mxu0  ;;  %v2226_v42 = vpop.f32.mrf.mxu1 }
 0x116   :  { %v1568_v43 = vpack.c.bf16 %v2224_v41, %v2220_v37  ;;  %v1648_v44 = vpack.c.bf16 %v2226_v42, %v2222_v38 }
 0x117   :  { %v581_v45 = vpop.f32.mrf.mxu0  ;;  %v709_v46 = vpop.f32.mrf.mxu1 }
 0x118   :  { %1716 = vst [vmem:[%s2612_s2 + $0x10] sm:$0xff] %v1568_v43   ;;  %1732 = vst [vmem:[%s2612_s2 + $0x90] sm:$0xff] %v1648_v44   ;;  %v1206_v43 = vmul.f32 %v2188_v21, %v2188_v21  ;;  %v1205_v46 = vmul.f32 %v2184_v17, %v2184_v17 }
 0x119   :  { %v2238_v47 = vpop.f32.mrf.mxu0  ;;  %v2240_v48 = vpop.f32.mrf.mxu1 }
 0x11b   :  { %v586_v49 = vpop.f32.mrf.mxu0  ;;  %v714_v50 = vpop.f32.mrf.mxu1 }
 0x11c   :  { %v1207_v49 = vmul.f32 %v2202_v27, %v2202_v27 }
 0x11d   :  { %v2242_v51 = vpop.f32.mrf.mxu0  ;;  %v2244_v52 = vpop.f32.mrf.mxu1 }
 0x11e   :  { %v1573_v53 = vpack.c.bf16 %v2242_v51, %v2238_v47  ;;  %v1653_v54 = vpack.c.bf16 %v2244_v52, %v2240_v48 }
 0x11f   :  { %v589_v55 = vpop.f32.mrf.mxu0  ;;  %v717_v56 = vpop.f32.mrf.mxu1 }
 0x120   :  { %1717 = vst [vmem:[%s2612_s2 + $0x18] sm:$0xff] %v1573_v53   ;;  %1733 = vst [vmem:[%s2612_s2 + $0x98] sm:$0xff] %v1653_v54   ;;  %v1135_v54 = vadd.f32 %v2188_v21, %v2184_v17  ;;  %v1269_v55 = vadd.f32 %v1206_v43, %v1205_v46  ;;  %v1208_v56 = vmul.f32 %v2206_v31, %v2206_v31 }
 0x121   :  { %v2256_v57 = vpop.f32.mrf.mxu0  ;;  %v2258_v58 = vpop.f32.mrf.mxu1 }
 0x123   :  { %v594_v59 = vpop.f32.mrf.mxu0  ;;  %v722_v60 = vpop.f32.mrf.mxu1 }
 0x125   :  { %v2260_v61 = vpop.f32.mrf.mxu0  ;;  %v2262_v62 = vpop.f32.mrf.mxu1 }
 0x126   :  { %v1578_v63 = vpack.c.bf16 %v2260_v61, %v2256_v57  ;;  %v1658_v0 = vpack.c.bf16 %v2262_v62, %v2258_v58 }
 0x127   :  { %v597_v1 = vpop.f32.mrf.mxu0  ;;  %v725_v2 = vpop.f32.mrf.mxu1 }
 0x128   :  { %1718 = vst [vmem:[%s2612_s2 + $0x20] sm:$0xff] %v1578_v63   ;;  %1734 = vst [vmem:[%s2612_s2 + $0xa0] sm:$0xff] %v1658_v0   ;;  %v1136_v63 = vadd.f32 %v1135_v54, %v2202_v27  ;;  %v1270_v0 = vadd.f32 %v1269_v55, %v1207_v49  ;;  %v1209_v1 = vmul.f32 %v2220_v37, %v2220_v37 }
 0x129   :  { %v2274_v3 = vpop.f32.mrf.mxu0  ;;  %v2276_v4 = vpop.f32.mrf.mxu1  ;;  %v1210_v27 = vmul.f32 %v2224_v41, %v2224_v41 }
 0x12b   :  { %v602_v5 = vpop.f32.mrf.mxu0  ;;  %v730_v6 = vpop.f32.mrf.mxu1 }
 0x12c   :  { %v1137_v6 = vadd.f32 %v1136_v63, %v2206_v31 }
 0x12d   :  { %v2278_v7 = vpop.f32.mrf.mxu0  ;;  %v2280_v8 = vpop.f32.mrf.mxu1 }
 0x12e   :  { %v1583_v9 = vpack.c.bf16 %v2278_v7, %v2274_v3  ;;  %v1663_v10 = vpack.c.bf16 %v2280_v8, %v2276_v4 }
 0x12f   :  { %v605_v11 = vpop.f32.mrf.mxu0  ;;  %v733_v12 = vpop.f32.mrf.mxu1 }
 0x130   :  { %1719 = vst [vmem:[%s2612_s2 + $0x28] sm:$0xff] %v1583_v9   ;;  %1735 = vst [vmem:[%s2612_s2 + $0xa8] sm:$0xff] %v1663_v10   ;;  %v1271_v9 = vadd.f32 %v1270_v0, %v1208_v56  ;;  %v1138_v12 = vadd.f32 %v1137_v6, %v2220_v37  ;;  %v1212_v37 = vmul.f32 %v2242_v51, %v2242_v51 }
 0x131   :  { %v2292_v13 = vpop.f32.mrf.mxu0  ;;  %v2294_v14 = vpop.f32.mrf.mxu1 }
 0x132   :  { %v1272_v31 = vadd.f32 %v1271_v9, %v1209_v1 }
 0x133   :  { %v610_v15 = vpop.f32.mrf.mxu0  ;;  %v738_v16 = vpop.f32.mrf.mxu1 }
 0x134   :  { %v1211_v15 = vmul.f32 %v2238_v47, %v2238_v47 }
 0x135   :  { %v2296_v19 = vpop.f32.mrf.mxu0  ;;  %v2298_v20 = vpop.f32.mrf.mxu1 }
 0x136   :  { %v1588_v23 = vpack.c.bf16 %v2296_v19, %v2292_v13  ;;  %v1668_v24 = vpack.c.bf16 %v2298_v20, %v2294_v14 }
 0x137   :  { %v613_v25 = vpop.f32.mrf.mxu0  ;;  %v741_v26 = vpop.f32.mrf.mxu1 }
 0x138   :  { %1720 = vst [vmem:[%s2612_s2 + $0x30] sm:$0xff] %v1588_v23   ;;  %1736 = vst [vmem:[%s2612_s2 + $0xb0] sm:$0xff] %v1668_v24   ;;  %v1139_v24 = vadd.f32 %v1138_v12, %v2224_v41  ;;  %v1273_v25 = vadd.f32 %v1272_v31, %v1210_v27  ;;  %v1217_v27 = vmul.f32 %v2292_v13, %v2292_v13 }
 0x139   :  { %v2310_v29 = vpop.f32.mrf.mxu0  ;;  %v2312_v30 = vpop.f32.mrf.mxu1 }
 0x13b   :  { %v618_v33 = vpop.f32.mrf.mxu0  ;;  %v746_v34 = vpop.f32.mrf.mxu1 }
 0x13c   :  { %v1140_v34 = vadd.f32 %v1139_v24, %v2238_v47  ;;  %v1214_v47 = vmul.f32 %v2260_v61, %v2260_v61 }
 0x13d   :  { %v2314_v35 = vpop.f32.mrf.mxu0  ;;  %v2316_v36 = vpop.f32.mrf.mxu1 }
 0x13e   :  { %v1593_v39 = vpack.c.bf16 %v2314_v35, %v2310_v29  ;;  %v1673_v40 = vpack.c.bf16 %v2316_v36, %v2312_v30 }
 0x13f   :  { %v621_v44 = vpop.f32.mrf.mxu0  ;;  %v749_v45 = vpop.f32.mrf.mxu1 }
 0x140   :  { %1721 = vst [vmem:[%s2612_s2 + $0x38] sm:$0xff] %v1593_v39   ;;  %1737 = vst [vmem:[%s2612_s2 + $0xb8] sm:$0xff] %v1673_v40   ;;  %v1274_v39 = vadd.f32 %v1273_v25, %v1211_v15  ;;  %v1213_v40 = vmul.f32 %v2256_v57, %v2256_v57  ;;  %v1141_v45 = vadd.f32 %v1140_v34, %v2242_v51 }
 0x141   :  { %v2334_v50 = vpop.f32.mrf.mxu0  ;;  %v2336_v53 = vpop.f32.mrf.mxu1 }
 0x142   :  { %v1275_v49 = vadd.f32 %v1274_v39, %v1212_v37  ;;  %v1142_v56 = vadd.f32 %v1141_v45, %v2256_v57  ;;  %v1216_v57 = vmul.f32 %v2278_v7, %v2278_v7 }
 0x143   :  { %v626_v59 = vpop.f32.mrf.mxu0  ;;  %v754_v60 = vpop.f32.mrf.mxu1 }
 0x144   :  { %v1276_v51 = vadd.f32 %v1275_v49, %v1213_v40  ;;  %v1215_v59 = vmul.f32 %v2274_v3, %v2274_v3  ;;  %v1143_v0 = vadd.f32 %v1142_v56, %v2260_v61 }
 0x145   :  { %v2345_v2 = vpop.f32.mrf.mxu0  ;;  %v2347_v5 = vpop.f32.mrf.mxu1 }
 0x146   :  { %v1598_v17 = vpack.c.bf16 %v2345_v2, %v2334_v50  ;;  %v1678_v21 = vpack.c.bf16 %v2347_v5, %v2336_v53  ;;  %v1277_v1 = vadd.f32 %v1276_v51, %v1214_v47  ;;  %v1221_v47 = vmul.f32 %v2334_v50, %v2334_v50 }
 0x147   :  { %v629_v10 = vpop.f32.mrf.mxu0  ;;  %v757_v11 = vpop.f32.mrf.mxu1 }
 0x148   :  { %1722 = vst [vmem:[%s2612_s2 + $0x40] sm:$0xff] %v1598_v17   ;;  %1738 = vst [vmem:[%s2612_s2 + $0xc0] sm:$0xff] %v1678_v21   ;;  %v1144_v21 = vadd.f32 %v1143_v0, %v2274_v3  ;;  %v1278_v9 = vadd.f32 %v1277_v1, %v1215_v59  ;;  %v1218_v3 = vmul.f32 %v2296_v19, %v2296_v19 }
 0x149   :  { %v2365_v16 = vpop.f32.mrf.mxu0  ;;  %v2367_v23 = vpop.f32.mrf.mxu1  ;;  %v1222_v0 = vmul.f32 %v2345_v2, %v2345_v2 }
 0x14a   :  { %v1145_v12 = vadd.f32 %v1144_v21, %v2278_v7  ;;  %v1279_v15 = vadd.f32 %v1278_v9, %v1216_v57 }
 0x14b   :  { %v634_v26 = vpop.f32.mrf.mxu0  ;;  %v762_v33 = vpop.f32.mrf.mxu1 }
 0x14c   :  { %v1146_v37 = vadd.f32 %v1145_v12, %v2292_v13  ;;  %v1280_v7 = vadd.f32 %v1279_v15, %v1217_v27  ;;  %v1219_v26 = vmul.f32 %v2310_v29, %v2310_v29  ;;  %v1220_v13 = vmul.f32 %v2314_v35, %v2314_v35 }
 0x14d   :  { %v2375_v43 = vpop.f32.mrf.mxu0  ;;  %v2377_v44 = vpop.f32.mrf.mxu1 }
 0x14e   :  { %v1603_v41 = vpack.c.bf16 %v2375_v43, %v2365_v16  ;;  %v1683_v46 = vpack.c.bf16 %v2377_v44, %v2367_v23  ;;  %v1147_v39 = vadd.f32 %v1146_v37, %v2296_v19  ;;  %v1281_v40 = vadd.f32 %v1280_v7, %v1218_v3 }
 0x14f   :  { %v637_v54 = vpop.f32.mrf.mxu0  ;;  %v765_v55 = vpop.f32.mrf.mxu1 }
 0x150   :  { %1723 = vst [vmem:[%s2612_s2 + $0x48] sm:$0xff] %v1603_v41   ;;  %1739 = vst [vmem:[%s2612_s2 + $0xc8] sm:$0xff] %v1683_v46   ;;  %v1148_v46 = vadd.f32 %v1147_v39, %v2310_v29  ;;  %v1282_v49 = vadd.f32 %v1281_v40, %v1219_v26 }
 0x151   :  { %v2395_v60 = vpop.f32.mrf.mxu0  ;;  %v2397_v63 = vpop.f32.mrf.mxu1 }
 0x152   :  { %v1149_v56 = vadd.f32 %v1148_v46, %v2314_v35  ;;  %v1283_v59 = vadd.f32 %v1282_v49, %v1220_v13  ;;  %v1225_v3 = vmul.f32 %v2395_v60, %v2395_v60 }
 0x153   :  { %v642_v6 = vpop.f32.mrf.mxu0  ;;  %v770_v17 = vpop.f32.mrf.mxu1 }
 0x154   :  { %v1150_v29 = vadd.f32 %v1149_v56, %v2334_v50  ;;  %v1284_v35 = vadd.f32 %v1283_v59, %v1221_v47  ;;  %v1223_v6 = vmul.f32 %v2365_v16, %v2365_v16  ;;  %v1224_v50 = vmul.f32 %v2375_v43, %v2375_v43 }
 0x155   :  { %v2405_v10 = vpop.f32.mrf.mxu0  ;;  %v2407_v11 = vpop.f32.mrf.mxu1 }
 0x156   :  { %v1608_v61 = vpack.c.bf16 %v2405_v10, %v2395_v60  ;;  %v1688_v31 = vpack.c.bf16 %v2407_v11, %v2397_v63  ;;  %v1151_v9 = vadd.f32 %v1150_v29, %v2345_v2  ;;  %v1285_v27 = vadd.f32 %v1284_v35, %v1222_v0 }
 0x157   :  { %v645_v24 = vpop.f32.mrf.mxu0  ;;  %v773_v25 = vpop.f32.mrf.mxu1  ;;  %v1226_v39 = vmul.f32 %v2405_v10, %v2405_v10 }
 0x158   :  { %1724 = vst [vmem:[%s2612_s2 + $0x50] sm:$0xff] %v1608_v61   ;;  %1740 = vst [vmem:[%s2612_s2 + $0xd0] sm:$0xff] %v1688_v31   ;;  %v1152_v31 = vadd.f32 %v1151_v9, %v2365_v16  ;;  %v1286_v15 = vadd.f32 %v1285_v27, %v1223_v6 }
 0x159   :  { %v648_v33 = vpop.f32.mrf.mxu0  ;;  %v2425_v34 = vpop.f32.mrf.mxu1 }
 0x15a   :  { %v1153_v37 = vadd.f32 %v1152_v31, %v2375_v43  ;;  %v1287_v26 = vadd.f32 %v1286_v15, %v1224_v50 }
 0x15b   :  { %v650_v45 = vpop.f32.mrf.mxu0  ;;  %v778_v41 = vpop.f32.mrf.mxu1 }
 0x15c   :  { %v1154_v16 = vadd.f32 %v1153_v37, %v2395_v60  ;;  %v1288_v43 = vadd.f32 %v1287_v26, %v1225_v3  ;;  %v1227_v45 = vmul.f32 %v648_v33, %v648_v33 }
 0x15d   :  { %v651_v54 = vpop.f32.mrf.mxu0  ;;  %v2433_v55 = vpop.f32.mrf.mxu1 }
 0x15e   :  { %v1613_v51 = vpack.c.bf16 %v651_v54, %v648_v33  ;;  %v1693_v19 = vpack.c.bf16 %v2433_v55, %v2425_v34  ;;  %v1155_v49 = vadd.f32 %v1154_v16, %v2405_v10  ;;  %v1289_v47 = vadd.f32 %v1288_v43, %v1226_v39 }
 0x15f   :  { %v653_v1 = vpop.f32.mrf.mxu0  ;;  %v781_v57 = vpop.f32.mrf.mxu1  ;;  %v1228_v56 = vmul.f32 %v651_v54, %v651_v54 }
 0x160   :  { %1725 = vst [vmem:[%s2612_s2 + $0x58] sm:$0xff] %v1613_v51   ;;  %1741 = vst [vmem:[%s2612_s2 + $0xd8] sm:$0xff] %v1693_v19   ;;  %v1156_v60 = vadd.f32 %v1155_v49, %v648_v33  ;;  %v1290_v59 = vadd.f32 %v1289_v47, %v1227_v45 }
 0x161   :  { %v656_v17 = vpop.f32.mrf.mxu0  ;;  %v2449_v21 = vpop.f32.mrf.mxu1 }
 0x162   :  { %v1229_v0 = vmul.f32 %v656_v17, %v656_v17  ;;  %v1157_v29 = vadd.f32 %v1156_v60, %v651_v54  ;;  %v1291_v9 = vadd.f32 %v1290_v59, %v1228_v56 }
 0x163   :  { %v658_v12 = vpop.f32.mrf.mxu0  ;;  %v786_v61 = vpop.f32.mrf.mxu1 }
 0x164   :  { %v1158_v10 = vadd.f32 %v1157_v29, %v656_v17  ;;  %v1292_v33 = vadd.f32 %v1291_v9, %v1229_v0 }
 0x165   :  { %v659_v24 = vpop.f32.mrf.mxu0  ;;  %v2457_v25 = vpop.f32.mrf.mxu1 }
 0x166   :  { %v1618_v7 = vpack.c.bf16 %v659_v24, %v656_v17  ;;  %v1698_v2 = vpack.c.bf16 %v2457_v25, %v2449_v21  ;;  %v1230_v27 = vmul.f32 %v659_v24, %v659_v24  ;;  %v1159_v15 = vadd.f32 %v1158_v10, %v659_v24 }
 0x167   :  { %v661_v40 = vpop.f32.mrf.mxu0  ;;  %v789_v13 = vpop.f32.mrf.mxu1 }
 0x168   :  { %1726 = vst [vmem:[%s2612_s2 + $0x60] sm:$0xff] %v1618_v7   ;;  %1742 = vst [vmem:[%s2612_s2 + $0xe0] sm:$0xff] %v1698_v2   ;;  %v1293_v3 = vadd.f32 %v1292_v33, %v1230_v27 }
 0x169   :  { %v664_v41 = vpop.f32.mrf.mxu0  ;;  %v2471_v46 = vpop.f32.mrf.mxu1 }
 0x16a   :  { %v1231_v61 = vmul.f32 %v664_v41, %v664_v41  ;;  %v1160_v26 = vadd.f32 %v1159_v15, %v664_v41 }
 0x16b   :  { %v666_v51 = vpop.f32.mrf.mxu0  ;;  %v794_v19 = vpop.f32.mrf.mxu1 }
 0x16c   :  { %v1294_v17 = vadd.f32 %v1293_v3, %v1231_v61  ;;  %v1237_v3 = vmul.f32 %v2186_v18, %v2186_v18 }
 0x16d   :  { %v667_v1 = vpop.f32.mrf.mxu0  ;;  %v2474_v57 = vpop.f32.mrf.mxu1 }
 0x16e   :  { %v1623_v35 = vpack.c.bf16 %v667_v1, %v664_v41  ;;  %v1703_v6 = vpack.c.bf16 %v2474_v57, %v2471_v46  ;;  %v1232_v37 = vmul.f32 %v667_v1, %v667_v1  ;;  %v1161_v16 = vadd.f32 %v1160_v26, %v667_v1 }
 0x16f   :  { %v669_v50 = vpop.f32.mrf.mxu0  ;;  %v797_v12 = vpop.f32.mrf.mxu1 }
 0x170   :  { %1727 = vst [vmem:[%s2612_s2 + $0x68] sm:$0xff] %v1623_v35   ;;  %1743 = vst [vmem:[%s2612_s2 + $0xe8] sm:$0xff] %v1703_v6   ;;  %v1295_v49 = vadd.f32 %v1294_v17, %v1232_v37 }
 0x171   :  { %v672_v54 = vpop.f32.mrf.mxu0  ;;  %v2484_v31 = vpop.f32.mrf.mxu1 }
 0x172   :  { %v1233_v39 = vmul.f32 %v672_v54, %v672_v54  ;;  %v1162_v24 = vadd.f32 %v1161_v16, %v672_v54 }
 0x173   :  { %v674_v7 = vpop.f32.mrf.mxu0  ;;  %v802_v2 = vpop.f32.mrf.mxu1 }
 0x174   :  { %v1296_v41 = vadd.f32 %v1295_v49, %v1233_v39  ;;  %v1238_v2 = vmul.f32 %v2190_v22, %v2190_v22  ;;  %v1239_v39 = vmul.f32 %v2204_v28, %v2204_v28  ;;  %v1241_v49 = vmul.f32 %v2222_v38, %v2222_v38 }
 0x175   :  { %v675_v40 = vpop.f32.mrf.mxu0  ;;  %v2486_v13 = vpop.f32.mrf.mxu1 }
 0x176   :  { %v1628_v43 = vpack.c.bf16 %v675_v40, %v672_v54  ;;  %v1708_v45 = vpack.c.bf16 %v2486_v13, %v2484_v31  ;;  %v1234_v47 = vmul.f32 %v675_v40, %v675_v40  ;;  %v1163_v59 = vadd.f32 %v1162_v24, %v675_v40 }
 0x177   :  { %v677_v56 = vpop.f32.mrf.mxu0  ;;  %v805_v51 = vpop.f32.mrf.mxu1 }
 0x178   :  { %1728 = vst [vmem:[%s2612_s2 + $0x70] sm:$0xff] %v1628_v43   ;;  %1744 = vst [vmem:[%s2612_s2 + $0xf0] sm:$0xff] %v1708_v45   ;;  %v1297_v1 = vadd.f32 %v1296_v41, %v1234_v47 }
 0x179   :  { %v680_v19 = vpop.f32.mrf.mxu0  ;;  %v2496_v60 = vpop.f32.mrf.mxu1 }
 0x17a   :  { %v1235_v0 = vmul.f32 %v680_v19, %v680_v19  ;;  %v1164_v6 = vadd.f32 %v1163_v59, %v680_v19 }
 0x17b   :  { %v682_v29 = vpop.f32.mrf.mxu0  ;;  %v810_v35 = vpop.f32.mrf.mxu1 }
 0x17c   :  { %v1298_v9 = vadd.f32 %v1297_v1, %v1235_v0 }
 0x17d   :  { %v683_v27 = vpop.f32.mrf.mxu0  ;;  %v2498_v50 = vpop.f32.mrf.mxu1 }
 0x17e   :  { %v1633_v12 = vpack.c.bf16 %v683_v27, %v680_v19  ;;  %v1165_v10 = vadd.f32 %v1164_v6, %v683_v27  ;;  %v1236_v33 = vmul.f32 %v683_v27, %v683_v27  ;;  %v1713_v61 = vpack.c.bf16 %v2498_v50, %v2496_v60 }
 0x17f   :  { %v685_v54 = vpop.f32.mrf.mxu0  ;;  %v813_v15 = vpop.f32.mrf.mxu1 }
 0x180   :  { %1729 = vst [vmem:[%s2612_s2 + $0x78] sm:$0xff] %v1633_v12   ;;  %v1166_v37 = vadd.f32 %v1165_v10, %v2186_v18  ;;  %v1299_v7 = vadd.f32 %v1298_v9, %v1236_v33  ;;  %1745 = vst [vmem:[%s2612_s2 + $0xf8] sm:$0xff] %v1713_v61   ;;  %v1240_v18 = vmul.f32 %v2208_v32, %v2208_v32 }
 0x182   :  { %v1167_v26 = vadd.f32 %v1166_v37, %v2190_v22  ;;  %v1300_v17 = vadd.f32 %v1299_v7, %v1237_v3  ;;  %v1242_v22 = vmul.f32 %v2226_v42, %v2226_v42 }
 0x184   :  { %v1168_v40 = vadd.f32 %v1167_v26, %v2204_v28  ;;  %v1301_v16 = vadd.f32 %v1300_v17, %v1238_v2  ;;  %v1243_v28 = vmul.f32 %v2240_v48, %v2240_v48 }
 0x186   :  { %v1169_v43 = vadd.f32 %v1168_v40, %v2208_v32  ;;  %v1302_v45 = vadd.f32 %v1301_v16, %v1239_v39  ;;  %v1244_v32 = vmul.f32 %v2244_v52, %v2244_v52  ;;  %v1254_v39 = vmul.f32 %v2347_v5, %v2347_v5 }
 0x188   :  { %v1170_v47 = vadd.f32 %v1169_v43, %v2222_v38  ;;  %v1303_v56 = vadd.f32 %v1302_v45, %v1240_v18  ;;  %v1245_v38 = vmul.f32 %v2258_v58, %v2258_v58  ;;  %v1255_v18 = vmul.f32 %v2367_v23, %v2367_v23 }
 0x189   :  { %v1256_v45 = vmul.f32 %v2377_v44, %v2377_v44 }
 0x18a   :  { %v1171_v51 = vadd.f32 %v1170_v47, %v2226_v42  ;;  %v1304_v24 = vadd.f32 %v1303_v56, %v1241_v49  ;;  %v1246_v42 = vmul.f32 %v2262_v62, %v2262_v62  ;;  %v1257_v47 = vmul.f32 %v2397_v63, %v2397_v63 }
 0x18c   :  { %v1172_v41 = vadd.f32 %v1171_v51, %v2240_v48  ;;  %v1305_v19 = vadd.f32 %v1304_v24, %v1242_v22  ;;  %v1247_v48 = vmul.f32 %v2276_v4, %v2276_v4  ;;  %v1258_v22 = vmul.f32 %v2407_v11, %v2407_v11 }
 0x18d   :  { %v1259_v24 = vmul.f32 %v2425_v34, %v2425_v34 }
 0x18e   :  { %v1173_v59 = vadd.f32 %v1172_v41, %v2244_v52  ;;  %v1306_v0 = vadd.f32 %v1305_v19, %v1243_v28  ;;  %v1248_v52 = vmul.f32 %v2280_v8, %v2280_v8  ;;  %v1260_v41 = vmul.f32 %v2433_v55, %v2433_v55 }
 0x190   :  { %v1307_v1 = vadd.f32 %v1306_v0, %v1244_v32  ;;  %v1174_v29 = vadd.f32 %v1173_v59, %v2258_v58  ;;  %v1249_v58 = vmul.f32 %v2294_v14, %v2294_v14  ;;  %v1261_v32 = vmul.f32 %v2449_v21, %v2449_v21 }
 0x191   :  { %v1262_v0 = vmul.f32 %v2457_v25, %v2457_v25 }
 0x192   :  { %v1175_v35 = vadd.f32 %v1174_v29, %v2262_v62  ;;  %v1308_v6 = vadd.f32 %v1307_v1, %v1245_v38  ;;  %v1250_v62 = vmul.f32 %v2298_v20, %v2298_v20  ;;  %v1263_v1 = vmul.f32 %v2471_v46, %v2471_v46 }
 0x194   :  { %v1176_v9 = vadd.f32 %v1175_v35, %v2276_v4  ;;  %v1309_v27 = vadd.f32 %v1308_v6, %v1246_v42  ;;  %v1251_v4 = vmul.f32 %v2312_v30, %v2312_v30  ;;  %v1264_v42 = vmul.f32 %v2474_v57, %v2474_v57 }
 0x195   :  { %v1265_v6 = vmul.f32 %v2484_v31, %v2484_v31 }
 0x196   :  { %v1177_v12 = vadd.f32 %v1176_v9, %v2280_v8  ;;  %v1310_v10 = vadd.f32 %v1309_v27, %v1247_v48  ;;  %v1252_v8 = vmul.f32 %v2316_v36, %v2316_v36  ;;  %v1266_v9 = vmul.f32 %v2486_v13, %v2486_v13 }
 0x198   :  { %v1178_v33 = vadd.f32 %v1177_v12, %v2294_v14  ;;  %v1311_v61 = vadd.f32 %v1310_v10, %v1248_v52  ;;  %v1253_v14 = vmul.f32 %v2336_v53, %v2336_v53  ;;  %v1267_v52 = vmul.f32 %v2496_v60, %v2496_v60 }
 0x199   :  { %v1268_v10 = vmul.f32 %v2498_v50, %v2498_v50 }
 0x19a   :  { %v1179_v54 = vadd.f32 %v1178_v33, %v2298_v20  ;;  %v1312_v15 = vadd.f32 %v1311_v61, %v1249_v58 }
 0x19c   :  { %v1180_v3 = vadd.f32 %v1179_v54, %v2312_v30  ;;  %v1313_v37 = vadd.f32 %v1312_v15, %v1250_v62 }
 0x19e   :  { %v1181_v7 = vadd.f32 %v1180_v3, %v2316_v36  ;;  %v1314_v2 = vadd.f32 %v1313_v37, %v1251_v4 }
 0x1a0   :  { %v1182_v26 = vadd.f32 %v1181_v7, %v2336_v53  ;;  %v1315_v17 = vadd.f32 %v1314_v2, %v1252_v8 }
 0x1a2   :  { %v1183_v20 = vadd.f32 %v1182_v26, %v2347_v5  ;;  %v1316_v40 = vadd.f32 %v1315_v17, %v1253_v14 }
 0x1a4   :  { %v1317_v30 = vadd.f32 %v1316_v40, %v1254_v39  ;;  %v1184_v16 = vadd.f32 %v1183_v20, %v2367_v23 }
 0x1a6   :  { %v1318_v36 = vadd.f32 %v1317_v30, %v1255_v18  ;;  %v1185_v43 = vadd.f32 %v1184_v16, %v2377_v44 }
 0x1a8   :  { %v1319_v53 = vadd.f32 %v1318_v36, %v1256_v45  ;;  %v1186_v49 = vadd.f32 %v1185_v43, %v2397_v63 }
 0x1aa   :  { %v1320_v5 = vadd.f32 %v1319_v53, %v1257_v47  ;;  %v1187_v56 = vadd.f32 %v1186_v49, %v2407_v11 }
 0x1ac   :  { %v1321_v51 = vadd.f32 %v1320_v5, %v1258_v22  ;;  %v1188_v23 = vadd.f32 %v1187_v56, %v2425_v34 }
 0x1ae   :  { %v1322_v28 = vadd.f32 %v1321_v51, %v1259_v24  ;;  %v1189_v44 = vadd.f32 %v1188_v23, %v2433_v55 }
 0x1b0   :  { %v1323_v19 = vadd.f32 %v1322_v28, %v1260_v41  ;;  %v1190_v63 = vadd.f32 %v1189_v44, %v2449_v21 }
 0x1b2   :  { %v1324_v59 = vadd.f32 %v1323_v19, %v1261_v32  ;;  %v1191_v11 = vadd.f32 %v1190_v63, %v2457_v25 }
 0x1b4   :  { %v1325_v38 = vadd.f32 %v1324_v59, %v1262_v0  ;;  %v1192_v34 = vadd.f32 %v1191_v11, %v2471_v46 }
 0x1b6   :  { %v1326_v29 = vadd.f32 %v1325_v38, %v1263_v1  ;;  %v1193_v55 = vadd.f32 %v1192_v34, %v2474_v57 }
 0x1b8   :  { %v1327_v35 = vadd.f32 %v1326_v29, %v1264_v42  ;;  %v1194_v21 = vadd.f32 %v1193_v55, %v2484_v31 }
 0x1ba   :  { %v1328_v48 = vadd.f32 %v1327_v35, %v1265_v6  ;;  %v1195_v25 = vadd.f32 %v1194_v21, %v2486_v13 }
 0x1bc   :  { %v1329_v27 = vadd.f32 %v1328_v48, %v1266_v9  ;;  %v1196_v46 = vadd.f32 %v1195_v25, %v2496_v60 }
 0x1be   :  { %v1330_v12 = vadd.f32 %v1329_v27, %v1267_v52  ;;  %v1197_v57 = vadd.f32 %v1196_v46, %v2498_v50 }
 0x1c0   :  { %v1198_v58 = vrot.slane %v1197_v57, 4  ;;  %v1331_v31 = vadd.f32 %v1330_v12, %v1268_v10 }
 0x1c2   :  { %v1199_v33 = vadd.f32 %v1198_v58, %v1197_v57  ;;  %v1332_v61 = vrot.slane %v1331_v31, 4 }
 0x1c4   :  { %v1200_v62 = vrot.slane %v1199_v33, 2  ;;  %v1333_v54 = vadd.f32 %v1332_v61, %v1331_v31 }
 0x1c6   :  { %v1201_v15 = vadd.f32 %v1200_v62, %v1199_v33  ;;  %v1334_v13 = vrot.slane %v1333_v54, 2 }
 0x1c8   :  { %v1202_v4 = vrot.slane %v1201_v15, 1  ;;  %v1335_v3 = vadd.f32 %v1334_v13, %v1333_v54 }
 0x1ca   :  { %v1203_v37 = vadd.f32 %v1202_v4, %v1201_v15  ;;  %v1336_v8 = vrot.slane %v1335_v3, 1 }
 0x1cc   :  { %1204 = vst [vmem:[%s2613_s3] sm:$0x1] %v1203_v37  ;;  %v1337_v60 = vadd.f32 %v1336_v8, %v1335_v3 }
 0x1ce   :  { %1338 = vst [vmem:[%s2613_s3 + $0x1] sm:$0x1] %v1337_v60 }

// kernel: _lambda_.19
= control target key start
LH: loop header
LB: loop body
LE: loop exit
PB: predicated region body
PF: predicated region fallthrough
CT: control target
= control target key end

     0   :  { %s884_s1 = inlined_call_operand.vmem [shape: bf16[256,128], index: 1, kind: input, shape index: {}]   ;;  %s885_s0 = inlined_call_operand.vmem [shape: bf16[128,256], index: 0, kind: input, shape index: {}]   ;;  %s886_s2 = inlined_call_operand.vmem [shape: bf16[128,128], index: 2, kind: output, shape index: {0}]   ;;  %s887_s3 = inlined_call_operand.vmem [shape: f32[8,128], index: 3, kind: output, shape index: {1}]  }
   0x1   :  { %v674_v0 = vld [vmem:[%s884_s1 + $0x78] sm:$0xff]   ;;  %v676_v2 = vld [vmem:[%s884_s1 + $0x70] sm:$0xff]   ;;  %v678_v4 = vld [vmem:[%s884_s1 + $0x68] sm:$0xff]  }
   0x2   :  { %v675_v1 = vld [vmem:[%s884_s1 + $0x38] sm:$0xff]   ;;  %594 = vmatprep.subr.bf16.mxu0 %v674_v0  ;;  %658 = vmatprep.subr.bf16.mxu1 %v674_v0  ;;  %v677_v3 = vld [vmem:[%s884_s1 + $0x30] sm:$0xff]   ;;  %v679_v5 = vld [vmem:[%s884_s1 + $0x28] sm:$0xff]  }
   0x3   :  { %595 = vmatpush3.bf16.msra.mxu0 %v675_v1  ;;  %666 = vmatpush3.bf16.msra.mxu1 %v675_v1  ;;  %v680_v6 = vld [vmem:[%s884_s1 + $0x60] sm:$0xff]   ;;  %v682_v8 = vld [vmem:[%s884_s1 + $0x58] sm:$0xff]   ;;  %v684_v10 = vld [vmem:[%s884_s1 + $0x50] sm:$0xff]  }
   0x4   :  { %596 = vmatprep.subr.bf16.mxu0 %v676_v2  ;;  %659 = vmatprep.subr.bf16.mxu1 %v676_v2  ;;  %v681_v7 = vld [vmem:[%s884_s1 + $0x20] sm:$0xff]   ;;  %v683_v9 = vld [vmem:[%s884_s1 + $0x18] sm:$0xff]   ;;  %v685_v12 = vld [vmem:[%s884_s1 + $0x10] sm:$0xff]  }
   0x5   :  { %v692_v11 = vld [vmem:[%s885_s0 + $0x4] ss:$8 sps:$4 sm:$0xff]   ;;  %v690_v18 = vld [vmem:[%s885_s0] ss:$8 sps:$4 sm:$0xff]   ;;  %v693_v20 = vld [vmem:[%s885_s0 + $0x14] ss:$8 sps:$4 sm:$0xff]  }
   0x6   :  { %v698_v13 = vld [vmem:[%s885_s0 + $0x44] ss:$8 sps:$4 sm:$0xff]   ;;  %270 = vmatprep.mubr.bf16.mxu0 %v692_v11  ;;  %v696_v19 = vld [vmem:[%s885_s0 + $0x40] ss:$8 sps:$4 sm:$0xff]   ;;  %v702_v21 = vld [vmem:[%s885_s0 + $0x54] ss:$8 sps:$4 sm:$0xff]  }
   0x7   :  { %597 = vmatpush3.bf16.msra.mxu0 %v677_v3  ;;  %667 = vmatpush3.bf16.msra.mxu1 %v677_v3  ;;  %v686_v14 = vld [vmem:[%s884_s1 + $0x48] sm:$0xff]   ;;  %v688_v16 = vld [vmem:[%s884_s1 + $0x40] sm:$0xff]   ;;  %v695_v22 = vld [vmem:[%s885_s0 + $0x10] ss:$8 sps:$4 sm:$0xff]  }
   0x8   :  { %598 = vmatprep.subr.bf16.mxu0 %v678_v4  ;;  %660 = vmatprep.subr.bf16.mxu1 %v678_v4  ;;  %v687_v15 = vld [vmem:[%s884_s1 + $0x8] sm:$0xff]   ;;  %v689_v17 = vld [vmem:[%s884_s1] sm:$0xff]   ;;  %v704_v23 = vld [vmem:[%s885_s0 + $0x50] ss:$8 sps:$4 sm:$0xff]  }
   0x9   :  { %302 = vmatprep.mubr.bf16.mxu1 %v698_v13  ;;  %v699_v24 = vld [vmem:[%s885_s0 + $0x24] ss:$8 sps:$4 sm:$0xff]   ;;  %v701_v26 = vld [vmem:[%s885_s0 + $0x20] ss:$8 sps:$4 sm:$0xff]   ;;  %v705_v28 = vld [vmem:[%s885_s0 + $0x34] ss:$8 sps:$4 sm:$0xff]  }
   0xa   :  { %v708_v25 = vld [vmem:[%s885_s0 + $0x64] ss:$8 sps:$4 sm:$0xff]   ;;  %v710_v27 = vld [vmem:[%s885_s0 + $0x60] ss:$8 sps:$4 sm:$0xff]   ;;  %v711_v29 = vld [vmem:[%s885_s0 + $0x74] ss:$8 sps:$4 sm:$0xff]  }
   0xb   :  { %599 = vmatpush3.bf16.msra.mxu0 %v679_v5  ;;  %668 = vmatpush3.bf16.msra.mxu1 %v679_v5  ;;  %v707_v30 = vld [vmem:[%s885_s0 + $0x30] ss:$8 sps:$4 sm:$0xff]  }
   0xc   :  { %600 = vmatprep.subr.bf16.mxu0 %v680_v6  ;;  %661 = vmatprep.subr.bf16.mxu1 %v680_v6  ;;  %v713_v31 = vld [vmem:[%s885_s0 + $0x70] ss:$8 sps:$4 sm:$0xff]  }
   0xf   :  { %601 = vmatpush3.bf16.msra.mxu0 %v681_v7  ;;  %669 = vmatpush3.bf16.msra.mxu1 %v681_v7 }
  0x10   :  { %602 = vmatprep.subr.bf16.mxu0 %v682_v8  ;;  %662 = vmatprep.subr.bf16.mxu1 %v682_v8 }
  0x13   :  { %603 = vmatpush3.bf16.msra.mxu0 %v683_v9  ;;  %670 = vmatpush3.bf16.msra.mxu1 %v683_v9 }
  0x14   :  { %604 = vmatprep.subr.bf16.mxu0 %v684_v10  ;;  %663 = vmatprep.subr.bf16.mxu1 %v684_v10 }
  0x17   :  { %605 = vmatpush3.bf16.msra.mxu0 %v685_v12  ;;  %671 = vmatpush3.bf16.msra.mxu1 %v685_v12 }
  0x18   :  { %606 = vmatprep.subr.bf16.mxu0 %v686_v14  ;;  %664 = vmatprep.subr.bf16.mxu1 %v686_v14 }
  0x1b   :  { %607 = vmatpush3.bf16.msra.mxu0 %v687_v15  ;;  %672 = vmatpush3.bf16.msra.mxu1 %v687_v15 }
  0x1c   :  { %608 = vmatprep.subr.bf16.mxu0 %v688_v16  ;;  %665 = vmatprep.subr.bf16.mxu1 %v688_v16 }
  0x1f   :  { %609 = vmatpush3.bf16.msra.mxu0 %v689_v17  ;;  %673 = vmatpush3.bf16.msra.mxu1 %v689_v17 }
  0x22   :  { %271 = vmatmul.mubr.bf16.vlgmr.msra.gmra.mxu0 %v690_v18  ;;  %303 = vmatmul.mubr.bf16.vlgmr.msra.gmra.mxu1 %v696_v19 }
  0x23   :  { %278 = vmatprep.mubr.bf16.mxu0 %v693_v20  ;;  %310 = vmatprep.mubr.bf16.mxu1 %v702_v21 }
  0x2a   :  { %279 = vmatmul.mubr.bf16.gmra.mxu0 %v695_v22  ;;  %311 = vmatmul.mubr.bf16.gmra.mxu1 %v704_v23 }
  0x2b   :  { %286 = vmatprep.mubr.bf16.mxu0 %v699_v24  ;;  %318 = vmatprep.mubr.bf16.mxu1 %v708_v25 }
  0x32   :  { %287 = vmatmul.mubr.bf16.gmra.mxu0 %v701_v26  ;;  %319 = vmatmul.mubr.bf16.gmra.mxu1 %v710_v27 }
  0x33   :  { %294 = vmatprep.mubr.bf16.mxu0 %v705_v28  ;;  %326 = vmatprep.mubr.bf16.mxu1 %v711_v29 }
  0x3a   :  { %295 = vmatmul.mubr.bf16.gmra.mxu0 %v707_v30  ;;  %327 = vmatmul.mubr.bf16.gmra.mxu1 %v713_v31 }
  0xe2   :  { %v610_v32 = vpop.f32.mrf.mxu0  ;;  %v634_v33 = vpop.f32.mrf.mxu1 }
  0xe4   :  { %v611_v34 = vpop.f32.mrf.mxu0  ;;  %v635_v35 = vpop.f32.mrf.mxu1 }
  0xe5   :  { %v830_v38 = vadd.f32 %v635_v35, %v634_v33  ;;  %v612_v41 = vadd.f32 %v611_v34, %v610_v32 }
  0xe6   :  { %v613_v36 = vpop.f32.mrf.mxu0  ;;  %v637_v37 = vpop.f32.mrf.mxu1 }
  0xe7   :  { %v437_v1 = vmul.f32 %v612_v41, %v612_v41 }
  0xe8   :  { %v614_v39 = vpop.f32.mrf.mxu0  ;;  %v638_v40 = vpop.f32.mrf.mxu1 }
  0xe9   :  { %v615_v42 = vadd.f32 %v614_v39, %v613_v36  ;;  %v832_v43 = vadd.f32 %v638_v40, %v637_v37 }
  0xea   :  { %v616_v44 = vpop.f32.mrf.mxu0  ;;  %v640_v45 = vpop.f32.mrf.mxu1 }
  0xeb   :  { %v550_v46 = vpack.c.bf16 %v615_v42, %v612_v41  ;;  %v570_v47 = vpack.c.bf16 %v832_v43, %v830_v38  ;;  %v438_v62 = vmul.f32 %v615_v42, %v615_v42  ;;  %v415_v6 = vadd.f32 %v615_v42, %v612_v41 }
  0xec   :  { %v617_v48 = vpop.f32.mrf.mxu0  ;;  %v641_v49 = vpop.f32.mrf.mxu1 }
  0xed   :  { %551 = vst [vmem:[%s886_s2] sm:$0xff] %v550_v46   ;;  %590 = vst [vmem:[%s886_s2 + $0x20] sm:$0xff] %v570_v47   ;;  %v842_v52 = vadd.f32 %v641_v49, %v640_v45  ;;  %v618_v55 = vadd.f32 %v617_v48, %v616_v44  ;;  %v453_v8 = vadd.f32 %v438_v62, %v437_v1 }
  0xee   :  { %v619_v50 = vpop.f32.mrf.mxu0  ;;  %v643_v51 = vpop.f32.mrf.mxu1  ;;  %v445_v47 = vmul.f32 %v830_v38, %v830_v38 }
  0xef   :  { %v439_v2 = vmul.f32 %v618_v55, %v618_v55  ;;  %v416_v12 = vadd.f32 %v618_v55, %v415_v6 }
  0xf0   :  { %v620_v53 = vpop.f32.mrf.mxu0  ;;  %v644_v54 = vpop.f32.mrf.mxu1 }
  0xf1   :  { %v621_v56 = vadd.f32 %v620_v53, %v619_v50  ;;  %v844_v57 = vadd.f32 %v644_v54, %v643_v51  ;;  %v454_v15 = vadd.f32 %v453_v8, %v439_v2  ;;  %v446_v50 = vmul.f32 %v832_v43, %v832_v43 }
  0xf2   :  { %v622_v58 = vpop.f32.mrf.mxu0  ;;  %v646_v59 = vpop.f32.mrf.mxu1  ;;  %v447_v54 = vmul.f32 %v842_v52, %v842_v52 }
  0xf3   :  { %v555_v60 = vpack.c.bf16 %v621_v56, %v618_v55  ;;  %v575_v61 = vpack.c.bf16 %v844_v57, %v842_v52  ;;  %v440_v9 = vmul.f32 %v621_v56, %v621_v56  ;;  %v417_v19 = vadd.f32 %v621_v56, %v416_v12 }
  0xf4   :  { %v623_v63 = vpop.f32.mrf.mxu0  ;;  %v647_v0 = vpop.f32.mrf.mxu1 }
  0xf5   :  { %587 = vst [vmem:[%s886_s2 + $0x8] sm:$0xff] %v555_v60   ;;  %591 = vst [vmem:[%s886_s2 + $0x28] sm:$0xff] %v575_v61   ;;  %v624_v3 = vadd.f32 %v623_v63, %v622_v58  ;;  %v648_v7 = vadd.f32 %v647_v0, %v646_v59  ;;  %v455_v22 = vadd.f32 %v454_v15, %v440_v9 }
  0xf6   :  { %v625_v4 = vpop.f32.mrf.mxu0  ;;  %v649_v5 = vpop.f32.mrf.mxu1 }
  0xf7   :  { %v441_v16 = vmul.f32 %v624_v3, %v624_v3  ;;  %v418_v26 = vadd.f32 %v624_v3, %v417_v19  ;;  %v449_v60 = vmul.f32 %v648_v7, %v648_v7 }
  0xf8   :  { %v626_v10 = vpop.f32.mrf.mxu0  ;;  %v650_v11 = vpop.f32.mrf.mxu1 }
  0xf9   :  { %v627_v13 = vadd.f32 %v626_v10, %v625_v4  ;;  %v651_v14 = vadd.f32 %v650_v11, %v649_v5  ;;  %v456_v28 = vadd.f32 %v455_v22, %v441_v16 }
  0xfa   :  { %v628_v17 = vpop.f32.mrf.mxu0  ;;  %v652_v18 = vpop.f32.mrf.mxu1 }
  0xfb   :  { %v560_v20 = vpack.c.bf16 %v627_v13, %v624_v3  ;;  %v580_v21 = vpack.c.bf16 %v651_v14, %v648_v7  ;;  %v442_v23 = vmul.f32 %v627_v13, %v627_v13  ;;  %v419_v31 = vadd.f32 %v627_v13, %v418_v26 }
  0xfc   :  { %v629_v24 = vpop.f32.mrf.mxu0  ;;  %v653_v25 = vpop.f32.mrf.mxu1  ;;  %v450_v0 = vmul.f32 %v651_v14, %v651_v14 }
  0xfd   :  { %588 = vst [vmem:[%s886_s2 + $0x10] sm:$0xff] %v560_v20   ;;  %v630_v27 = vadd.f32 %v629_v24, %v628_v17  ;;  %592 = vst [vmem:[%s886_s2 + $0x30] sm:$0xff] %v580_v21   ;;  %v654_v33 = vadd.f32 %v653_v25, %v652_v18  ;;  %v457_v34 = vadd.f32 %v456_v28, %v442_v23 }
  0xfe   :  { %v631_v29 = vpop.f32.mrf.mxu0  ;;  %v655_v30 = vpop.f32.mrf.mxu1 }
  0xff   :  { %v443_v32 = vmul.f32 %v630_v27, %v630_v27  ;;  %v420_v37 = vadd.f32 %v630_v27, %v419_v31  ;;  %v451_v3 = vmul.f32 %v654_v33, %v654_v33 }
 0x100   :  { %v632_v35 = vpop.f32.mrf.mxu0  ;;  %v656_v36 = vpop.f32.mrf.mxu1 }
 0x101   :  { %v633_v39 = vadd.f32 %v632_v35, %v631_v29  ;;  %v657_v40 = vadd.f32 %v656_v36, %v655_v30  ;;  %v458_v41 = vadd.f32 %v457_v34, %v443_v32 }
 0x103   :  { %v565_v42 = vpack.c.bf16 %v633_v39, %v630_v27  ;;  %v421_v44 = vadd.f32 %v633_v39, %v420_v37  ;;  %v444_v45 = vmul.f32 %v633_v39, %v633_v39  ;;  %v585_v46 = vpack.c.bf16 %v657_v40, %v654_v33 }
 0x104   :  { %v452_v6 = vmul.f32 %v657_v40, %v657_v40 }
 0x105   :  { %589 = vst [vmem:[%s886_s2 + $0x18] sm:$0xff] %v565_v42   ;;  %v422_v48 = vadd.f32 %v830_v38, %v421_v44  ;;  %v459_v49 = vadd.f32 %v458_v41, %v444_v45  ;;  %593 = vst [vmem:[%s886_s2 + $0x38] sm:$0xff] %v585_v46   ;;  %v448_v38 = vmul.f32 %v844_v57, %v844_v57 }
 0x107   :  { %v423_v51 = vadd.f32 %v832_v43, %v422_v48  ;;  %v460_v53 = vadd.f32 %v459_v49, %v445_v47 }
 0x109   :  { %v461_v55 = vadd.f32 %v460_v53, %v446_v50  ;;  %v424_v56 = vadd.f32 %v842_v52, %v423_v51 }
 0x10b   :  { %v425_v58 = vadd.f32 %v844_v57, %v424_v56  ;;  %v462_v59 = vadd.f32 %v461_v55, %v447_v54 }
 0x10d   :  { %v426_v61 = vadd.f32 %v648_v7, %v425_v58  ;;  %v463_v62 = vadd.f32 %v462_v59, %v448_v38 }
 0x10f   :  { %v427_v63 = vadd.f32 %v651_v14, %v426_v61  ;;  %v464_v1 = vadd.f32 %v463_v62, %v449_v60 }
 0x111   :  { %v465_v43 = vadd.f32 %v464_v1, %v450_v0  ;;  %v428_v2 = vadd.f32 %v654_v33, %v427_v63 }
 0x113   :  { %v466_v4 = vadd.f32 %v465_v43, %v451_v3  ;;  %v429_v5 = vadd.f32 %v657_v40, %v428_v2 }
 0x115   :  { %v430_v8 = vrot.slane %v429_v5, 4  ;;  %v467_v52 = vadd.f32 %v466_v4, %v452_v6 }
 0x117   :  { %v431_v9 = vadd.f32 %v430_v8, %v429_v5  ;;  %v468_v10 = vrot.slane %v467_v52, 4 }
 0x119   :  { %v432_v11 = vrot.slane %v431_v9, 2  ;;  %v469_v12 = vadd.f32 %v468_v10, %v467_v52 }
 0x11b   :  { %v433_v57 = vadd.f32 %v432_v11, %v431_v9  ;;  %v470_v13 = vrot.slane %v469_v12, 2 }
 0x11d   :  { %v434_v15 = vrot.slane %v433_v57, 1  ;;  %v471_v7 = vadd.f32 %v470_v13, %v469_v12 }
 0x11f   :  { %v435_v16 = vadd.f32 %v434_v15, %v433_v57  ;;  %v472_v17 = vrot.slane %v471_v7, 1 }
 0x121   :  { %436 = vst [vmem:[%s887_s3] sm:$0x1] %v435_v16  ;;  %v473_v14 = vadd.f32 %v472_v17, %v471_v7 }
 0x123   :  { %474 = vst [vmem:[%s887_s3 + $0x1] sm:$0x1] %v473_v14 }

// kernel: _lambda_.20
= control target key start
LH: loop header
LB: loop body
LE: loop exit
PB: predicated region body
PF: predicated region fallthrough
CT: control target
= control target key end

     0   :  { %s1332_s12 = smov 0   ;;  %s1334_s13 = smov 0   ;;  %s1483_s0 = inlined_call_operand.vmem [shape: bf16[128,512], index: 0, kind: input, shape index: {}]   ;;  %s1484_s1 = inlined_call_operand.vmem [shape: bf16[512,128], index: 1, kind: input, shape index: {}]   ;;  %s1485_s2 = inlined_call_operand.vmem [shape: bf16[128,128], index: 2, kind: output, shape index: {0}]   ;;  %s1486_s3 = inlined_call_operand.vmem [shape: f32[8,128], index: 3, kind: output, shape index: {1}]  }
   0x1   :  { %s1336_s14 = smov 0   ;;  %s1338_s15 = smov 0  }
   0x2   :  { %s1340_s16 = smov 0  }
   0x3 LB: > { %s23_s17 = sadd.s32 1, %s1305_s15  ;;  %p42_p1 = scmp.ne.s32.totalorder %s1297_s13, %s1293_s12  ;;  %s1309_s16 = sphi %s1340_s16, %s14_s16   ;;  %s1305_s15 = sphi %s1338_s15, %s1490_s15   ;;  %s1301_s14 = sphi %s1336_s14, %s1489_s14   ;;  %s1297_s13 = sphi %s1334_s13, %s1488_s13   ;;  %s1293_s12 = sphi %s1332_s12, %s1487_s12  }
   0x4   : > { %p24_p0 = scmp.ge.s32.totalorder %s23_s17, 2  ;;  %p43_p2 = scmp.eq.s32.totalorder %s1309_s16, 0 }
   0x5   : > { %s35_s19 = sadd.s32 1, %s1297_s13  ;;  %p983_p5 = scmp.ge.s32.totalorder %s1309_s16, 2 }
   0x6   : > { %s1492_s17 = smov (%p24_p0, %s23_s17), 0  ;;  %p44_p3 = por %p43_p2, %p42_p1 }
   0x7   : > { %s31_s18 = ssub.s32 %s1305_s15, %s1492_s17  ;;  %146 = sbr.rel (%p983_p5) target bundleno = 24 (0x18), region = 16 }
   0x8   : > { %p33_p4 = scmp.eq.s32.totalorder %s31_s18, 0 }
   0xa   : > { %s1367_s20 = scalar_select %p33_p4, %s1297_s13, %s35_s19  }
   0xc   : > { %149 = sbr.rel (!%p44_p3) target bundleno = 24 (0x18), region = 20  ;;  %s151_s21 = sand.u32 (%p44_p3), 1, %s1297_s13  }
   0xd   : > { %s1046_s22 = sshll.u32 (%p44_p3), %s1305_s15, 3  ;;  %s984_s23 = sshll.u32 (%p44_p3), %s151_s21, 7 }
   0xe   : > { %s1375_s26 = scalar_lea.vmem (%p44_p3), %s1483_s0, %s1046_s22  ;;  %s153_s27 = scalar_lea.vmem (%p44_p3), [#allocation3], %s984_s23 }
   0xf   : > { %v218_v0 = vld [vmem:[%s1375_s26] sm:$0xff] (%p44_p3)  ;;  %v220_v1 = vld [vmem:[%s1375_s26 + $0x10] sm:$0xff] (%p44_p3) }
  0x10   : > { %v222_v2 = vld [vmem:[%s1375_s26 + $0x20] sm:$0xff] (%p44_p3)  ;;  %219 = vst [vmem:[%s153_s27] sm:$0xff] (%p44_p3), %v218_v0  ;;  %221 = vst [vmem:[%s153_s27 + $0x8] sm:$0xff] (%p44_p3), %v220_v1  ;;  %v224_v3 = vld [vmem:[%s1375_s26 + $0x30] sm:$0xff] (%p44_p3) }
  0x11   : > { %223 = vst [vmem:[%s153_s27 + $0x10] sm:$0xff] %v222_v2  ;;  %v226_v4 = vld [vmem:[%s1375_s26 + $0x40] sm:$0xff]  ;;  %v228_v5 = vld [vmem:[%s1375_s26 + $0x50] sm:$0xff]  ;;  %225 = vst [vmem:[%s153_s27 + $0x18] sm:$0xff] %v224_v3 }
  0x12   : > { %227 = vst [vmem:[%s153_s27 + $0x20] sm:$0xff] %v226_v4  ;;  %229 = vst [vmem:[%s153_s27 + $0x28] sm:$0xff] %v228_v5  ;;  %v230_v6 = vld [vmem:[%s1375_s26 + $0x60] sm:$0xff]  ;;  %v232_v7 = vld [vmem:[%s1375_s26 + $0x70] sm:$0xff] }
  0x13   : > { %v234_v8 = vld [vmem:[%s1375_s26 + $0x80] sm:$0xff]  ;;  %231 = vst [vmem:[%s153_s27 + $0x30] sm:$0xff] %v230_v6  ;;  %233 = vst [vmem:[%s153_s27 + $0x38] sm:$0xff] %v232_v7  ;;  %v236_v9 = vld [vmem:[%s1375_s26 + $0x90] sm:$0xff] }
  0x14   : > { %235 = vst [vmem:[%s153_s27 + $0x40] sm:$0xff] %v234_v8  ;;  %v238_v10 = vld [vmem:[%s1375_s26 + $0xa0] sm:$0xff]  ;;  %v240_v11 = vld [vmem:[%s1375_s26 + $0xb0] sm:$0xff]  ;;  %237 = vst [vmem:[%s153_s27 + $0x48] sm:$0xff] %v236_v9 }
  0x15   : > { %239 = vst [vmem:[%s153_s27 + $0x50] sm:$0xff] %v238_v10  ;;  %241 = vst [vmem:[%s153_s27 + $0x58] sm:$0xff] %v240_v11  ;;  %v242_v12 = vld [vmem:[%s1375_s26 + $0xc0] sm:$0xff]  ;;  %v244_v13 = vld [vmem:[%s1375_s26 + $0xd0] sm:$0xff] }
  0x16   : > { %v246_v14 = vld [vmem:[%s1375_s26 + $0xe0] sm:$0xff]  ;;  %243 = vst [vmem:[%s153_s27 + $0x60] sm:$0xff] %v242_v12  ;;  %245 = vst [vmem:[%s153_s27 + $0x68] sm:$0xff] %v244_v13  ;;  %v248_v15 = vld [vmem:[%s1375_s26 + $0xf0] sm:$0xff] }
  0x17   : > { %247 = vst [vmem:[%s153_s27 + $0x70] sm:$0xff] %v246_v14  ;;  %249 = vst [vmem:[%s153_s27 + $0x78] sm:$0xff] %v248_v15 }
  0x18 PF: > { %p987_p6 = scmp.ge.s32.totalorder %s1309_s16, 1  ;;  %p263_p7 = scmp.lt.s32.totalorder %s1309_s16, 3 }
  0x1a   : > { %p264_p8 = pnand %p987_p6, %p263_p7 }
  0x1b   : > { %s270_s28 = sand.u32 (!%p264_p8), 1, %s1293_s12   ;;  %s989_s29 = sshll.u32 (!%p264_p8), %s1301_s14, 5 }
  0x1c   : > { %267 = sbr.rel (%p264_p8) target bundleno = 354 (0x162), region = 62  ;;  %s988_s30 = sshll.u32 (!%p264_p8), %s270_s28, 7 }
  0x1d   : > { %p305_p9 = scmp.lt.s32.totalorder (!%p264_p8), %s989_s29, 63  ;;  %s1402_s8 = scalar_lea.vmem (!%p264_p8), [#allocation3], %s988_s30 }
  0x1e   : > { %p991_p10 = scmp.ne.s32.totalorder (!%p264_p8), %s1301_s14, 0 }
  0x21   : > { %s1494_s29 = smov (!%p305_p9, %s989_s29), 63  ;;  %324 = sbr.rel (%p991_p10) target bundleno = 47 (0x2f), region = 70 }
  0x22   : > { %s990_s4 = sshll.u32 %s1494_s29, 2 }
  0x23   : > { %s1400_s7 = scalar_lea.vmem %s1484_s1, %s990_s4 }
  0x26   : > { %v1311_v16 = vmov 0.0  }
  0x27   : > { %325 = vst [vmem:[#allocation2 + $0x30] sm:$0xff] %v1311_v16  ;;  %326 = vst [vmem:[#allocation2] sm:$0xff] %v1311_v16 }
  0x28   : > { %327 = vst [vmem:[#allocation2 + $0x58] sm:$0xff] %v1311_v16  ;;  %328 = vst [vmem:[#allocation2 + $0x18] sm:$0xff] %v1311_v16 }
  0x29   : > { %329 = vst [vmem:[#allocation2 + $0x50] sm:$0xff] %v1311_v16  ;;  %330 = vst [vmem:[#allocation2 + $0x68] sm:$0xff] %v1311_v16 }
  0x2a   : > { %331 = vst [vmem:[#allocation2 + $0x8] sm:$0xff] %v1311_v16  ;;  %332 = vst [vmem:[#allocation2 + $0x48] sm:$0xff] %v1311_v16 }
  0x2b   : > { %333 = vst [vmem:[#allocation2 + $0x40] sm:$0xff] %v1311_v16  ;;  %334 = vst [vmem:[#allocation2 + $0x20] sm:$0xff] %v1311_v16 }
  0x2c   : > { %335 = vst [vmem:[#allocation2 + $0x10] sm:$0xff] %v1311_v16  ;;  %336 = vst [vmem:[#allocation2 + $0x38] sm:$0xff] %v1311_v16 }
  0x2d   : > { %337 = vst [vmem:[#allocation2 + $0x60] sm:$0xff] %v1311_v16  ;;  %338 = vst [vmem:[#allocation2 + $0x70] sm:$0xff] %v1311_v16 }
  0x2e   : > { %339 = vst [vmem:[#allocation2 + $0x78] sm:$0xff] %v1311_v16  ;;  %340 = vst [vmem:[#allocation2 + $0x28] sm:$0xff] %v1311_v16 }
  0x2f PF: > { %v1231_v17 = vld [vmem:[%s1400_s7 + $0x78] sm:$0xff]   ;;  %v1233_v19 = vld [vmem:[%s1400_s7 + $0x70] sm:$0xff]   ;;  %v1235_v21 = vld [vmem:[%s1400_s7 + $0x68] sm:$0xff]   ;;  %p1024_p11 = scmp.ne.s32.totalorder %s1301_s14, 1 }
  0x30   : > { %v1232_v18 = vld [vmem:[%s1400_s7 + $0x38] sm:$0xff]   ;;  %1110 = vmatprep.subr.bf16.mxu0 %v1231_v17  ;;  %1174 = vmatprep.subr.bf16.mxu1 %v1231_v17  ;;  %v1234_v20 = vld [vmem:[%s1400_s7 + $0x30] sm:$0xff]   ;;  %v1236_v22 = vld [vmem:[%s1400_s7 + $0x28] sm:$0xff]  }
  0x31   : > { %1111 = vmatpush3.bf16.msra.mxu0 %v1232_v18  ;;  %1182 = vmatpush3.bf16.msra.mxu1 %v1232_v18  ;;  %v1237_v23 = vld [vmem:[%s1400_s7 + $0x60] sm:$0xff]   ;;  %v1239_v25 = vld [vmem:[%s1400_s7 + $0x58] sm:$0xff]   ;;  %v1241_v27 = vld [vmem:[%s1400_s7 + $0x50] sm:$0xff]  }
  0x32   : > { %1112 = vmatprep.subr.bf16.mxu0 %v1233_v19  ;;  %1175 = vmatprep.subr.bf16.mxu1 %v1233_v19  ;;  %v1238_v24 = vld [vmem:[%s1400_s7 + $0x20] sm:$0xff]   ;;  %v1240_v26 = vld [vmem:[%s1400_s7 + $0x18] sm:$0xff]   ;;  %v1242_v30 = vld [vmem:[%s1400_s7 + $0x10] sm:$0xff]  }
  0x33   : > { %v1249_v28 = vld [vmem:[%s1402_s8 + $0x4] ss:$8 sps:$4 sm:$0xff]   ;;  %v1247_v35 = vld [vmem:[%s1402_s8] ss:$8 sps:$4 sm:$0xff]   ;;  %v1253_v37 = vld [vmem:[%s1402_s8 + $0x14] ss:$8 sps:$4 sm:$0xff]  }
  0x34   : > { %v1252_v29 = vld [vmem:[%s1402_s8 + $0x44] ss:$8 sps:$4 sm:$0xff]   ;;  %613 = vmatprep.mubr.bf16.mxu0 %v1249_v28  ;;  %v1250_v36 = vld [vmem:[%s1402_s8 + $0x40] ss:$8 sps:$4 sm:$0xff]   ;;  %v1255_v38 = vld [vmem:[%s1402_s8 + $0x54] ss:$8 sps:$4 sm:$0xff]  }
  0x35   : > { %1113 = vmatpush3.bf16.msra.mxu0 %v1234_v20  ;;  %1183 = vmatpush3.bf16.msra.mxu1 %v1234_v20  ;;  %v1243_v31 = vld [vmem:[%s1400_s7 + $0x48] sm:$0xff]   ;;  %v1245_v33 = vld [vmem:[%s1400_s7 + $0x40] sm:$0xff]   ;;  %v1257_v39 = vld [vmem:[%s1402_s8 + $0x10] ss:$8 sps:$4 sm:$0xff]  }
  0x36   : > { %1114 = vmatprep.subr.bf16.mxu0 %v1235_v21  ;;  %1176 = vmatprep.subr.bf16.mxu1 %v1235_v21  ;;  %v1244_v32 = vld [vmem:[%s1400_s7 + $0x8] sm:$0xff]   ;;  %v1246_v34 = vld [vmem:[%s1400_s7] sm:$0xff]   ;;  %v1258_v40 = vld [vmem:[%s1402_s8 + $0x50] ss:$8 sps:$4 sm:$0xff]  }
  0x37   : > { %645 = vmatprep.mubr.bf16.mxu1 %v1252_v29  ;;  %v1259_v41 = vld [vmem:[%s1402_s8 + $0x24] ss:$8 sps:$4 sm:$0xff]   ;;  %v1263_v43 = vld [vmem:[%s1402_s8 + $0x20] ss:$8 sps:$4 sm:$0xff]   ;;  %v1265_v45 = vld [vmem:[%s1402_s8 + $0x34] ss:$8 sps:$4 sm:$0xff]  }
  0x38   : > { %v1261_v42 = vld [vmem:[%s1402_s8 + $0x64] ss:$8 sps:$4 sm:$0xff]   ;;  %v1264_v44 = vld [vmem:[%s1402_s8 + $0x60] ss:$8 sps:$4 sm:$0xff]   ;;  %v1267_v46 = vld [vmem:[%s1402_s8 + $0x74] ss:$8 sps:$4 sm:$0xff]  }
  0x39   : > { %1115 = vmatpush3.bf16.msra.mxu0 %v1236_v22  ;;  %1184 = vmatpush3.bf16.msra.mxu1 %v1236_v22  ;;  %v1269_v47 = vld [vmem:[%s1402_s8 + $0x30] ss:$8 sps:$4 sm:$0xff]   ;;  %v349_v53 = vld [vmem:[#allocation2 + $0x40] sm:$0xff] }
  0x3a   : > { %1116 = vmatprep.subr.bf16.mxu0 %v1237_v23  ;;  %1177 = vmatprep.subr.bf16.mxu1 %v1237_v23  ;;  %v1270_v48 = vld [vmem:[%s1402_s8 + $0x70] ss:$8 sps:$4 sm:$0xff]   ;;  %v342_v61 = vld [vmem:[#allocation2] sm:$0xff] }
  0x3b   : > { %v341_v51 = vld [vmem:[#allocation2 + $0x30] sm:$0xff]  ;;  %v350_v63 = vld [vmem:[#allocation2 + $0x20] sm:$0xff]  ;;  %v343_v7 = vld [vmem:[#allocation2 + $0x58] sm:$0xff] }
  0x3c   : > { %v351_v9 = vld [vmem:[#allocation2 + $0x10] sm:$0xff]  ;;  %v344_v17 = vld [vmem:[#allocation2 + $0x18] sm:$0xff]  ;;  %v353_v29 = vld [vmem:[#allocation2 + $0x60] sm:$0xff] }
  0x3d   : > { %1117 = vmatpush3.bf16.msra.mxu0 %v1238_v24  ;;  %1185 = vmatpush3.bf16.msra.mxu1 %v1238_v24  ;;  %v352_v19 = vld [vmem:[#allocation2 + $0x38] sm:$0xff] }
  0x3e   : > { %1118 = vmatprep.subr.bf16.mxu0 %v1239_v25  ;;  %1178 = vmatprep.subr.bf16.mxu1 %v1239_v25 }
  0x41   : > { %1119 = vmatpush3.bf16.msra.mxu0 %v1240_v26  ;;  %1186 = vmatpush3.bf16.msra.mxu1 %v1240_v26 }
  0x42   : > { %1120 = vmatprep.subr.bf16.mxu0 %v1241_v27  ;;  %1179 = vmatprep.subr.bf16.mxu1 %v1241_v27  ;;  %v345_v27 = vld [vmem:[#allocation2 + $0x50] sm:$0xff] }
  0x45   : > { %1121 = vmatpush3.bf16.msra.mxu0 %v1242_v30  ;;  %1187 = vmatpush3.bf16.msra.mxu1 %v1242_v30 }
  0x46   : > { %1122 = vmatprep.subr.bf16.mxu0 %v1243_v31  ;;  %1180 = vmatprep.subr.bf16.mxu1 %v1243_v31 }
  0x49   : > { %1123 = vmatpush3.bf16.msra.mxu0 %v1244_v32  ;;  %1188 = vmatpush3.bf16.msra.mxu1 %v1244_v32 }
  0x4a   : > { %1124 = vmatprep.subr.bf16.mxu0 %v1245_v33  ;;  %1181 = vmatprep.subr.bf16.mxu1 %v1245_v33 }
  0x4d   : > { %1125 = vmatpush3.bf16.msra.mxu0 %v1246_v34  ;;  %1189 = vmatpush3.bf16.msra.mxu1 %v1246_v34 }
  0x50   : > { %614 = vmatmul.mubr.bf16.vlgmr.msra.gmra.mxu0 %v1247_v35  ;;  %646 = vmatmul.mubr.bf16.vlgmr.msra.gmra.mxu1 %v1250_v36 }
  0x51   : > { %621 = vmatprep.mubr.bf16.mxu0 %v1253_v37  ;;  %653 = vmatprep.mubr.bf16.mxu1 %v1255_v38  ;;  %v346_v37 = vld [vmem:[#allocation2 + $0x68] sm:$0xff] }
  0x58   : > { %622 = vmatmul.mubr.bf16.gmra.mxu0 %v1257_v39  ;;  %654 = vmatmul.mubr.bf16.gmra.mxu1 %v1258_v40  ;;  %v354_v39 = vld [vmem:[#allocation2 + $0x70] sm:$0xff] }
  0x59   : > { %629 = vmatprep.mubr.bf16.mxu0 %v1259_v41  ;;  %661 = vmatprep.mubr.bf16.mxu1 %v1261_v42 }
  0x60   : > { %630 = vmatmul.mubr.bf16.gmra.mxu0 %v1263_v43  ;;  %662 = vmatmul.mubr.bf16.gmra.mxu1 %v1264_v44 }
  0x61   : > { %637 = vmatprep.mubr.bf16.mxu0 %v1265_v45  ;;  %669 = vmatprep.mubr.bf16.mxu1 %v1267_v46 }
  0x68   : > { %638 = vmatmul.mubr.bf16.gmra.mxu0 %v1269_v47  ;;  %670 = vmatmul.mubr.bf16.gmra.mxu1 %v1270_v48  ;;  %v347_v47 = vld [vmem:[#allocation2 + $0x8] sm:$0xff] }
 0x110   : > { %v1126_v49 = vpop.f32.mrf.mxu0  ;;  %v1150_v50 = vpop.f32.mrf.mxu1 }
 0x112   : > { %v1127_v52 = vpop.f32.mrf.mxu0  ;;  %v1151_v54 = vpop.f32.mrf.mxu1 }
 0x113   : > { %v1128_v55 = vadd.f32 %v1127_v52, %v1126_v49  ;;  %v1152_v56 = vadd.f32 %v1151_v54, %v1150_v50  ;;  %v355_v49 = vld [vmem:[#allocation2 + $0x78] sm:$0xff] }
 0x114   : > { %v1129_v57 = vpop.f32.mrf.mxu0  ;;  %v1153_v58 = vpop.f32.mrf.mxu1 }
 0x115   : > { %v678_v59 = vadd.f32 %v1128_v55, %v341_v51  ;;  %v686_v60 = vadd.f32 %v1152_v56, %v349_v53 }
 0x116   : > { %v1130_v62 = vpop.f32.mrf.mxu0  ;;  %v1154_v0 = vpop.f32.mrf.mxu1 }
 0x117   : > { %694 = vst [vmem:[#allocation2 + $0x30] sm:$0xff] %v678_v59  ;;  %702 = vst [vmem:[#allocation2 + $0x40] sm:$0xff] %v686_v60  ;;  %v1131_v1 = vadd.f32 %v1130_v62, %v1129_v57  ;;  %v1155_v2 = vadd.f32 %v1154_v0, %v1153_v58  ;;  %v348_v57 = vld [vmem:[#allocation2 + $0x48] sm:$0xff] }
 0x118   : > { %v1132_v3 = vpop.f32.mrf.mxu0  ;;  %v1156_v4 = vpop.f32.mrf.mxu1  ;;  %v356_v59 = vld [vmem:[#allocation2 + $0x28] sm:$0xff] }
 0x119   : > { %v679_v5 = vadd.f32 %v1131_v1, %v342_v61  ;;  %v687_v6 = vadd.f32 %v1155_v2, %v350_v63 }
 0x11a   : > { %v1133_v8 = vpop.f32.mrf.mxu0  ;;  %v1157_v10 = vpop.f32.mrf.mxu1 }
 0x11b   : > { %695 = vst [vmem:[#allocation2] sm:$0xff] %v679_v5  ;;  %703 = vst [vmem:[#allocation2 + $0x20] sm:$0xff] %v687_v6  ;;  %v1134_v11 = vadd.f32 %v1133_v8, %v1132_v3  ;;  %v1158_v12 = vadd.f32 %v1157_v10, %v1156_v4 }
 0x11c   : > { %v1135_v13 = vpop.f32.mrf.mxu0  ;;  %v1159_v14 = vpop.f32.mrf.mxu1 }
 0x11d   : > { %v680_v15 = vadd.f32 %v1134_v11, %v343_v7  ;;  %v688_v16 = vadd.f32 %v1158_v12, %v351_v9 }
 0x11e   : > { %v1136_v18 = vpop.f32.mrf.mxu0  ;;  %v1160_v20 = vpop.f32.mrf.mxu1 }
 0x11f   : > { %696 = vst [vmem:[#allocation2 + $0x58] sm:$0xff] %v680_v15  ;;  %704 = vst [vmem:[#allocation2 + $0x10] sm:$0xff] %v688_v16  ;;  %v1137_v21 = vadd.f32 %v1136_v18, %v1135_v13  ;;  %v1161_v22 = vadd.f32 %v1160_v20, %v1159_v14 }
 0x120   : > { %v1138_v23 = vpop.f32.mrf.mxu0  ;;  %v1162_v24 = vpop.f32.mrf.mxu1 }
 0x121   : > { %v681_v25 = vadd.f32 %v1137_v21, %v344_v17  ;;  %v689_v26 = vadd.f32 %v1161_v22, %v352_v19 }
 0x122   : > { %v1139_v28 = vpop.f32.mrf.mxu0  ;;  %v1163_v30 = vpop.f32.mrf.mxu1 }
 0x123   : > { %697 = vst [vmem:[#allocation2 + $0x18] sm:$0xff] %v681_v25  ;;  %705 = vst [vmem:[#allocation2 + $0x38] sm:$0xff] %v689_v26  ;;  %v1140_v31 = vadd.f32 %v1139_v28, %v1138_v23  ;;  %v1164_v32 = vadd.f32 %v1163_v30, %v1162_v24 }
 0x124   : > { %v1141_v33 = vpop.f32.mrf.mxu0  ;;  %v1165_v34 = vpop.f32.mrf.mxu1 }
 0x125   : > { %v682_v35 = vadd.f32 %v1140_v31, %v345_v27  ;;  %v690_v36 = vadd.f32 %v1164_v32, %v353_v29 }
 0x126   : > { %v1142_v38 = vpop.f32.mrf.mxu0  ;;  %v1166_v40 = vpop.f32.mrf.mxu1 }
 0x127   : > { %698 = vst [vmem:[#allocation2 + $0x50] sm:$0xff] %v682_v35  ;;  %706 = vst [vmem:[#allocation2 + $0x60] sm:$0xff] %v690_v36  ;;  %v1143_v41 = vadd.f32 %v1142_v38, %v1141_v33  ;;  %v1167_v42 = vadd.f32 %v1166_v40, %v1165_v34 }
 0x128   : > { %v1144_v43 = vpop.f32.mrf.mxu0  ;;  %v1168_v44 = vpop.f32.mrf.mxu1 }
 0x129   : > { %v683_v45 = vadd.f32 %v1143_v41, %v346_v37  ;;  %v691_v46 = vadd.f32 %v1167_v42, %v354_v39 }
 0x12a   : > { %v1145_v48 = vpop.f32.mrf.mxu0  ;;  %v1169_v50 = vpop.f32.mrf.mxu1 }
 0x12b   : > { %699 = vst [vmem:[#allocation2 + $0x68] sm:$0xff] %v683_v45  ;;  %707 = vst [vmem:[#allocation2 + $0x70] sm:$0xff] %v691_v46  ;;  %v1146_v51 = vadd.f32 %v1145_v48, %v1144_v43  ;;  %v1170_v52 = vadd.f32 %v1169_v50, %v1168_v44 }
 0x12c   : > { %v1147_v53 = vpop.f32.mrf.mxu0  ;;  %v1171_v54 = vpop.f32.mrf.mxu1 }
 0x12d   : > { %v684_v55 = vadd.f32 %v1146_v51, %v347_v47  ;;  %v692_v56 = vadd.f32 %v1170_v52, %v355_v49 }
 0x12e   : > { %v1148_v58 = vpop.f32.mrf.mxu0  ;;  %v1172_v60 = vpop.f32.mrf.mxu1 }
 0x12f   : > { %700 = vst [vmem:[#allocation2 + $0x8] sm:$0xff] %v684_v55  ;;  %708 = vst [vmem:[#allocation2 + $0x78] sm:$0xff] %v692_v56  ;;  %v1149_v61 = vadd.f32 %v1148_v58, %v1147_v53  ;;  %v1173_v62 = vadd.f32 %v1172_v60, %v1171_v54  ;;  %713 = sbr.rel (%p1024_p11) target bundleno = 354 (0x162), region = 74 }
 0x131   : > { %v685_v63 = vadd.f32 %v1149_v61, %v348_v57  ;;  %v693_v0 = vadd.f32 %v1173_v62, %v356_v59 }
 0x133   : > { %701 = vst [vmem:[#allocation2 + $0x48] sm:$0xff] %v685_v63  ;;  %709 = vst [vmem:[#allocation2 + $0x28] sm:$0xff] %v693_v0 }
 0x134   : > { %v714_v1 = vld [vmem:[#allocation2 + $0x30] sm:$0xff]  ;;  %v715_v2 = vld [vmem:[#allocation2] sm:$0xff]  ;;  %v716_v3 = vld [vmem:[#allocation2 + $0x58] sm:$0xff] }
 0x135   : > { %v1066_v4 = vpack.c.bf16 %v715_v2, %v714_v1  ;;  %v810_v5 = vadd.f32 %v715_v2, %v714_v1  ;;  %v832_v6 = vmul.f32 %v714_v1, %v714_v1  ;;  %v833_v7 = vmul.f32 %v715_v2, %v715_v2  ;;  %v717_v8 = vld [vmem:[#allocation2 + $0x18] sm:$0xff]  ;;  %v718_v9 = vld [vmem:[#allocation2 + $0x50] sm:$0xff]  ;;  %v719_v10 = vld [vmem:[#allocation2 + $0x68] sm:$0xff] }
 0x136   : > { %v1071_v11 = vpack.c.bf16 %v717_v8, %v716_v3  ;;  %v834_v12 = vmul.f32 %v716_v3, %v716_v3  ;;  %v1076_v13 = vpack.c.bf16 %v719_v10, %v718_v9  ;;  %v720_v14 = vld [vmem:[#allocation2 + $0x8] sm:$0xff]  ;;  %v835_v17 = vmul.f32 %v717_v8, %v717_v8  ;;  %v722_v19 = vld [vmem:[#allocation2 + $0x40] sm:$0xff]  ;;  %v724_v23 = vld [vmem:[#allocation2 + $0x10] sm:$0xff] }
 0x137   : > { %1067 = vst [vmem:[%s1485_s2] sm:$0xff] %v1066_v4   ;;  %v848_v15 = vadd.f32 %v833_v7, %v832_v6  ;;  %v811_v16 = vadd.f32 %v810_v5, %v716_v3  ;;  %v723_v20 = vld [vmem:[#allocation2 + $0x20] sm:$0xff]  ;;  %v836_v26 = vmul.f32 %v718_v9, %v718_v9  ;;  %v725_v27 = vld [vmem:[#allocation2 + $0x38] sm:$0xff]  ;;  %v727_v29 = vld [vmem:[#allocation2 + $0x70] sm:$0xff]  ;;  %v837_v34 = vmul.f32 %v719_v10, %v719_v10 }
 0x138   : > { %1103 = vst [vmem:[%s1485_s2 + $0x8] sm:$0xff] %v1071_v11   ;;  %1104 = vst [vmem:[%s1485_s2 + $0x10] sm:$0xff] %v1076_v13   ;;  %v1086_v22 = vpack.c.bf16 %v723_v20, %v722_v19  ;;  %v726_v28 = vld [vmem:[#allocation2 + $0x60] sm:$0xff]  ;;  %v1091_v30 = vpack.c.bf16 %v725_v27, %v724_v23  ;;  %v728_v35 = vld [vmem:[#allocation2 + $0x78] sm:$0xff]  ;;  %v838_v40 = vmul.f32 %v720_v14, %v720_v14 }
 0x139   : > { %v812_v24 = vadd.f32 %v811_v16, %v717_v8  ;;  %v849_v25 = vadd.f32 %v848_v15, %v834_v12  ;;  %v1096_v31 = vpack.c.bf16 %v727_v29, %v726_v28  ;;  %v840_v46 = vmul.f32 %v722_v19, %v722_v19 }
 0x13a   : > { %v721_v18 = vld [vmem:[#allocation2 + $0x48] sm:$0xff]  ;;  %1106 = vst [vmem:[%s1485_s2 + $0x20] sm:$0xff] %v1086_v22   ;;  %1107 = vst [vmem:[%s1485_s2 + $0x28] sm:$0xff] %v1091_v30   ;;  %v841_v49 = vmul.f32 %v723_v20, %v723_v20  ;;  %v842_v52 = vmul.f32 %v724_v23, %v724_v23  ;;  %v843_v55 = vmul.f32 %v725_v27, %v725_v27 }
 0x13b   : > { %v1081_v21 = vpack.c.bf16 %v721_v18, %v720_v14  ;;  %v850_v32 = vadd.f32 %v849_v25, %v835_v17  ;;  %v813_v33 = vadd.f32 %v812_v24, %v718_v9  ;;  %v729_v36 = vld [vmem:[#allocation2 + $0x28] sm:$0xff]  ;;  %1108 = vst [vmem:[%s1485_s2 + $0x30] sm:$0xff] %v1096_v31   ;;  %v839_v43 = vmul.f32 %v721_v18, %v721_v18 }
 0x13c   : > { %v1101_v37 = vpack.c.bf16 %v729_v36, %v728_v35  ;;  %v844_v58 = vmul.f32 %v726_v28, %v726_v28  ;;  %v845_v61 = vmul.f32 %v727_v29, %v727_v29  ;;  %v846_v0 = vmul.f32 %v728_v35, %v728_v35 }
 0x13d   : > { %1105 = vst [vmem:[%s1485_s2 + $0x18] sm:$0xff] %v1081_v21   ;;  %v814_v38 = vadd.f32 %v813_v33, %v719_v10  ;;  %v851_v39 = vadd.f32 %v850_v32, %v836_v26  ;;  %v847_v3 = vmul.f32 %v729_v36, %v729_v36 }
 0x13e   : > { %1109 = vst [vmem:[%s1485_s2 + $0x38] sm:$0xff] %v1101_v37  }
 0x13f   : > { %v852_v41 = vadd.f32 %v851_v39, %v837_v34  ;;  %v815_v42 = vadd.f32 %v814_v38, %v720_v14 }
 0x141   : > { %v816_v44 = vadd.f32 %v815_v42, %v721_v18  ;;  %v853_v45 = vadd.f32 %v852_v41, %v838_v40 }
 0x143   : > { %v854_v47 = vadd.f32 %v853_v45, %v839_v43  ;;  %v817_v48 = vadd.f32 %v816_v44, %v722_v19 }
 0x145   : > { %v818_v50 = vadd.f32 %v817_v48, %v723_v20  ;;  %v855_v51 = vadd.f32 %v854_v47, %v840_v46 }
 0x147   : > { %v856_v53 = vadd.f32 %v855_v51, %v841_v49  ;;  %v819_v54 = vadd.f32 %v818_v50, %v724_v23 }
 0x149   : > { %v820_v56 = vadd.f32 %v819_v54, %v725_v27  ;;  %v857_v57 = vadd.f32 %v856_v53, %v842_v52 }
 0x14b   : > { %v858_v59 = vadd.f32 %v857_v57, %v843_v55  ;;  %v821_v60 = vadd.f32 %v820_v56, %v726_v28 }
 0x14d   : > { %v822_v62 = vadd.f32 %v821_v60, %v727_v29  ;;  %v859_v63 = vadd.f32 %v858_v59, %v844_v58 }
 0x14f   : > { %v860_v1 = vadd.f32 %v859_v63, %v845_v61  ;;  %v823_v2 = vadd.f32 %v822_v62, %v728_v35 }
 0x151   : > { %v824_v4 = vadd.f32 %v823_v2, %v729_v36  ;;  %v861_v5 = vadd.f32 %v860_v1, %v846_v0 }
 0x153   : > { %v825_v6 = vrot.slane %v824_v4, 4  ;;  %v862_v7 = vadd.f32 %v861_v5, %v847_v3 }
 0x155   : > { %v826_v8 = vadd.f32 %v825_v6, %v824_v4  ;;  %v863_v9 = vrot.slane %v862_v7, 4 }
 0x157   : > { %v827_v10 = vrot.slane %v826_v8, 2  ;;  %v864_v11 = vadd.f32 %v863_v9, %v862_v7 }
 0x159   : > { %v828_v12 = vadd.f32 %v827_v10, %v826_v8  ;;  %v865_v13 = vrot.slane %v864_v11, 2 }
 0x15b   : > { %v829_v14 = vrot.slane %v828_v12, 1  ;;  %v866_v15 = vadd.f32 %v865_v13, %v864_v11 }
 0x15d   : > { %v830_v16 = vadd.f32 %v829_v14, %v828_v12  ;;  %v867_v17 = vrot.slane %v866_v15, 1 }
 0x15f   : > { %831 = vst [vmem:[%s1486_s3] sm:$0x1] %v830_v16  ;;  %v868_v18 = vadd.f32 %v867_v17, %v866_v15 }
 0x161   : > { %869 = vst [vmem:[%s1486_s3 + $0x1] sm:$0x1] %v868_v18 }
 0x162 PF: > { %s14_s16 = sadd.s32 1, %s1309_s16   ;;  %s1487_s12 = smov %s1297_s13 }
 0x163   : > { %p11_p12 = scmp.ge.s32.totalorder %s14_s16, 4   ;;  %s1488_s13 = smov %s1367_s20 }
 0x164   : > { %s1489_s14 = smov %s1305_s15  ;;  %s1490_s15 = smov %s1492_s17 }
 0x165   :  { %13 = sbr.rel (!%p11_p12) target bundleno = 3 (0x3), region = 124 }

// kernel: _lambda_.21
= control target key start
LH: loop header
LB: loop body
LE: loop exit
PB: predicated region body
PF: predicated region fallthrough
CT: control target
= control target key end

     0   :  { %s882_s12 = smov 0   ;;  %s884_s13 = smov 0   ;;  %s985_s0 = inlined_call_operand.vmem [shape: bf16[32,512], index: 0, kind: input, shape index: {}]   ;;  %s986_s1 = inlined_call_operand.vmem [shape: bf16[512,128], index: 1, kind: input, shape index: {}]   ;;  %s987_s2 = inlined_call_operand.vmem [shape: bf16[32,128], index: 2, kind: output, shape index: {0}]   ;;  %s988_s3 = inlined_call_operand.vmem [shape: f32[8,128], index: 3, kind: output, shape index: {1}]  }
   0x1   :  { %s886_s14 = smov 0   ;;  %s888_s15 = smov 0  }
   0x2   :  { %s890_s16 = smov 0  }
   0x3 LB: > { %s23_s17 = sadd.s32 1, %s855_s15  ;;  %p42_p1 = scmp.ne.s32.totalorder %s847_s13, %s843_s12  ;;  %s859_s16 = sphi %s890_s16, %s14_s16   ;;  %s855_s15 = sphi %s888_s15, %s992_s15   ;;  %s851_s14 = sphi %s886_s14, %s991_s14   ;;  %s847_s13 = sphi %s884_s13, %s990_s13   ;;  %s843_s12 = sphi %s882_s12, %s989_s12  }
   0x4   : > { %p24_p0 = scmp.ge.s32.totalorder %s23_s17, 2  ;;  %p43_p2 = scmp.eq.s32.totalorder %s859_s16, 0 }
   0x5   : > { %s35_s19 = sadd.s32 1, %s847_s13  ;;  %p659_p5 = scmp.ge.s32.totalorder %s859_s16, 2 }
   0x6   : > { %s994_s17 = smov (%p24_p0, %s23_s17), 0  ;;  %p44_p3 = por %p43_p2, %p42_p1 }
   0x7   : > { %s31_s18 = ssub.s32 %s855_s15, %s994_s17  ;;  %146 = sbr.rel (%p659_p5) target bundleno = 18 (0x12), region = 16 }
   0x8   : > { %p33_p4 = scmp.eq.s32.totalorder %s31_s18, 0 }
   0xa   : > { %s917_s20 = scalar_select %p33_p4, %s847_s13, %s35_s19  }
   0xc   : > { %149 = sbr.rel (!%p44_p3) target bundleno = 18 (0x12), region = 20  ;;  %s151_s21 = sand.u32 (%p44_p3), 1, %s847_s13  }
   0xd   : > { %s698_s22 = sshll.u32 (%p44_p3), %s855_s15, 3  ;;  %s660_s23 = sshll.u32 (%p44_p3), %s151_s21, 5 }
   0xe   : > { %s159_s26 = scalar_lea.vmem (%p44_p3), %s985_s0, %s698_s22  ;;  %s153_s27 = scalar_lea.vmem (%p44_p3), [#allocation3], %s660_s23 }
   0xf   : > { %v194_v0 = vld [vmem:[%s159_s26] sm:$0xff] (%p44_p3)  ;;  %v196_v1 = vld [vmem:[%s159_s26 + $0x10] sm:$0xff] (%p44_p3) }
  0x10   : > { %v198_v2 = vld [vmem:[%s159_s26 + $0x20] sm:$0xff] (%p44_p3)  ;;  %195 = vst [vmem:[%s153_s27] sm:$0xff] (%p44_p3), %v194_v0  ;;  %197 = vst [vmem:[%s153_s27 + $0x8] sm:$0xff] (%p44_p3), %v196_v1  ;;  %v200_v3 = vld [vmem:[%s159_s26 + $0x30] sm:$0xff] (%p44_p3) }
  0x11   : > { %199 = vst [vmem:[%s153_s27 + $0x10] sm:$0xff] %v198_v2  ;;  %201 = vst [vmem:[%s153_s27 + $0x18] sm:$0xff] %v200_v3 }
  0x12 PF: > { %p663_p6 = scmp.ge.s32.totalorder %s859_s16, 1  ;;  %p215_p7 = scmp.lt.s32.totalorder %s859_s16, 3 }
  0x14   : > { %p216_p8 = pnand %p663_p6, %p215_p7 }
  0x15   : > { %s222_s28 = sand.u32 (!%p216_p8), 1, %s843_s12   ;;  %s665_s29 = sshll.u32 (!%p216_p8), %s851_s14, 5 }
  0x16   : > { %219 = sbr.rel (%p216_p8) target bundleno = 300 (0x12c), region = 62  ;;  %s664_s30 = sshll.u32 (!%p216_p8), %s222_s28, 5 }
  0x17   : > { %p257_p9 = scmp.lt.s32.totalorder (!%p216_p8), %s665_s29, 63  ;;  %s934_s8 = scalar_lea.vmem (!%p216_p8), [#allocation3], %s664_s30 }
  0x18   : > { %p667_p10 = scmp.ne.s32.totalorder (!%p216_p8), %s851_s14, 0 }
  0x1b   : > { %s996_s29 = smov (!%p257_p9, %s665_s29), 63  ;;  %276 = sbr.rel (%p667_p10) target bundleno = 35 (0x23), region = 70 }
  0x1c   : > { %s666_s4 = sshll.u32 %s996_s29, 2 }
  0x1d   : > { %s932_s7 = scalar_lea.vmem %s986_s1, %s666_s4 }
  0x20   : > { %v861_v4 = vmov 0.0  }
  0x21   : > { %277 = vst [vmem:[#allocation2 + $0x10] sm:$0xff] %v861_v4  ;;  %278 = vst [vmem:[#allocation2] sm:$0xff] %v861_v4 }
  0x22   : > { %279 = vst [vmem:[#allocation2 + $0x18] sm:$0xff] %v861_v4  ;;  %280 = vst [vmem:[#allocation2 + $0x8] sm:$0xff] %v861_v4 }
  0x23 PF: > { %v799_v5 = vld [vmem:[%s932_s7 + $0x78] sm:$0xff]   ;;  %v801_v7 = vld [vmem:[%s932_s7 + $0x70] sm:$0xff]   ;;  %v803_v9 = vld [vmem:[%s932_s7 + $0x68] sm:$0xff]   ;;  %p688_p11 = scmp.ne.s32.totalorder %s851_s14, 1 }
  0x24   : > { %v800_v6 = vld [vmem:[%s932_s7 + $0x38] sm:$0xff]   ;;  %714 = vmatprep.subr.bf16.mxu0 %v799_v5  ;;  %742 = vmatprep.subr.bf16.mxu1 %v799_v5  ;;  %v802_v8 = vld [vmem:[%s932_s7 + $0x30] sm:$0xff]   ;;  %v804_v10 = vld [vmem:[%s932_s7 + $0x28] sm:$0xff]  }
  0x25   : > { %715 = vmatpush3.bf16.msra.mxu0 %v800_v6  ;;  %750 = vmatpush3.bf16.msra.mxu1 %v800_v6  ;;  %v805_v11 = vld [vmem:[%s932_s7 + $0x60] sm:$0xff]   ;;  %v807_v13 = vld [vmem:[%s932_s7 + $0x58] sm:$0xff]   ;;  %v809_v15 = vld [vmem:[%s932_s7 + $0x50] sm:$0xff]  }
  0x26   : > { %716 = vmatprep.subr.bf16.mxu0 %v801_v7  ;;  %743 = vmatprep.subr.bf16.mxu1 %v801_v7  ;;  %v806_v12 = vld [vmem:[%s932_s7 + $0x20] sm:$0xff]   ;;  %v808_v14 = vld [vmem:[%s932_s7 + $0x18] sm:$0xff]   ;;  %v810_v18 = vld [vmem:[%s932_s7 + $0x10] sm:$0xff]  }
  0x27   : > { %v817_v16 = vld [vmem:[%s934_s8 + $0x4] ss:$8 sps:$4 sm:$0xff]   ;;  %v820_v17 = vld [vmem:[%s934_s8 + $0x14] ss:$8 sps:$4 sm:$0xff]   ;;  %v815_v23 = vld [vmem:[%s934_s8] ss:$8 sps:$4 sm:$0xff]  }
  0x28   : > { %v811_v19 = vld [vmem:[%s932_s7 + $0x48] sm:$0xff]   ;;  %469 = vmatprep.mubr.bf16.mxu0 %v817_v16  ;;  %477 = vmatprep.mubr.bf16.mxu1 %v820_v17  ;;  %v813_v21 = vld [vmem:[%s932_s7 + $0x40] sm:$0xff]   ;;  %v818_v24 = vld [vmem:[%s934_s8 + $0x10] ss:$8 sps:$4 sm:$0xff]  }
  0x29   : > { %717 = vmatpush3.bf16.msra.mxu0 %v802_v8  ;;  %751 = vmatpush3.bf16.msra.mxu1 %v802_v8  ;;  %v812_v20 = vld [vmem:[%s932_s7 + $0x8] sm:$0xff]   ;;  %v814_v22 = vld [vmem:[%s932_s7] sm:$0xff]   ;;  %v281_v27 = vld [vmem:[#allocation2 + $0x10] sm:$0xff] }
  0x2a   : > { %718 = vmatprep.subr.bf16.mxu0 %v803_v9  ;;  %744 = vmatprep.subr.bf16.mxu1 %v803_v9  ;;  %v283_v29 = vld [vmem:[#allocation2 + $0x18] sm:$0xff]  ;;  %v282_v37 = vld [vmem:[#allocation2] sm:$0xff]  ;;  %v284_v39 = vld [vmem:[#allocation2 + $0x8] sm:$0xff] }
  0x2d   : > { %719 = vmatpush3.bf16.msra.mxu0 %v804_v10  ;;  %752 = vmatpush3.bf16.msra.mxu1 %v804_v10 }
  0x2e   : > { %720 = vmatprep.subr.bf16.mxu0 %v805_v11  ;;  %745 = vmatprep.subr.bf16.mxu1 %v805_v11 }
  0x31   : > { %721 = vmatpush3.bf16.msra.mxu0 %v806_v12  ;;  %753 = vmatpush3.bf16.msra.mxu1 %v806_v12 }
  0x32   : > { %722 = vmatprep.subr.bf16.mxu0 %v807_v13  ;;  %746 = vmatprep.subr.bf16.mxu1 %v807_v13 }
  0x35   : > { %723 = vmatpush3.bf16.msra.mxu0 %v808_v14  ;;  %754 = vmatpush3.bf16.msra.mxu1 %v808_v14 }
  0x36   : > { %724 = vmatprep.subr.bf16.mxu0 %v809_v15  ;;  %747 = vmatprep.subr.bf16.mxu1 %v809_v15 }
  0x39   : > { %725 = vmatpush3.bf16.msra.mxu0 %v810_v18  ;;  %755 = vmatpush3.bf16.msra.mxu1 %v810_v18 }
  0x3a   : > { %726 = vmatprep.subr.bf16.mxu0 %v811_v19  ;;  %748 = vmatprep.subr.bf16.mxu1 %v811_v19 }
  0x3d   : > { %727 = vmatpush3.bf16.msra.mxu0 %v812_v20  ;;  %756 = vmatpush3.bf16.msra.mxu1 %v812_v20 }
  0x3e   : > { %728 = vmatprep.subr.bf16.mxu0 %v813_v21  ;;  %749 = vmatprep.subr.bf16.mxu1 %v813_v21 }
  0x41   : > { %729 = vmatpush3.bf16.msra.mxu0 %v814_v22  ;;  %757 = vmatpush3.bf16.msra.mxu1 %v814_v22 }
  0x44   : > { %470 = vmatmul.mubr.bf16.vlgmr.msra.gmra.mxu0 %v815_v23  ;;  %478 = vmatmul.mubr.bf16.vlgmr.msra.gmra.mxu1 %v818_v24 }
 0x104   : > { %v730_v25 = vpop.f32.mrf.mxu0  ;;  %v736_v26 = vpop.f32.mrf.mxu1 }
 0x106   : > { %v731_v28 = vpop.f32.mrf.mxu0  ;;  %v737_v30 = vpop.f32.mrf.mxu1 }
 0x107   : > { %v732_v31 = vadd.f32 %v731_v28, %v730_v25  ;;  %v738_v32 = vadd.f32 %v737_v30, %v736_v26 }
 0x108   : > { %v733_v33 = vpop.f32.mrf.mxu0  ;;  %v739_v34 = vpop.f32.mrf.mxu1 }
 0x109   : > { %v486_v35 = vadd.f32 %v732_v31, %v281_v27  ;;  %v488_v36 = vadd.f32 %v738_v32, %v283_v29 }
 0x10a   : > { %v734_v38 = vpop.f32.mrf.mxu0  ;;  %v740_v40 = vpop.f32.mrf.mxu1 }
 0x10b   : > { %490 = vst [vmem:[#allocation2 + $0x10] sm:$0xff] %v486_v35  ;;  %492 = vst [vmem:[#allocation2 + $0x18] sm:$0xff] %v488_v36  ;;  %v735_v41 = vadd.f32 %v734_v38, %v733_v33  ;;  %v741_v42 = vadd.f32 %v740_v40, %v739_v34  ;;  %497 = sbr.rel (%p688_p11) target bundleno = 300 (0x12c), region = 74 }
 0x10d   : > { %v487_v43 = vadd.f32 %v735_v41, %v282_v37  ;;  %v489_v44 = vadd.f32 %v741_v42, %v284_v39 }
 0x10f   : > { %491 = vst [vmem:[#allocation2] sm:$0xff] %v487_v43  ;;  %493 = vst [vmem:[#allocation2 + $0x8] sm:$0xff] %v489_v44 }
 0x112   : > { %v498_v45 = vld [vmem:[#allocation2 + $0x10] sm:$0xff]  ;;  %v500_v47 = vld [vmem:[#allocation2 + $0x18] sm:$0xff] }
 0x113   : > { %v532_v50 = vmul.f32 %v498_v45, %v498_v45  ;;  %v534_v54 = vmul.f32 %v500_v47, %v500_v47 }
 0x116   : > { %v499_v46 = vld [vmem:[#allocation2] sm:$0xff]  ;;  %v501_v52 = vld [vmem:[#allocation2 + $0x8] sm:$0xff] }
 0x117   : > { %v706_v48 = vpack.c.bf16 %v499_v46, %v498_v45  ;;  %v522_v49 = vadd.f32 %v499_v46, %v498_v45  ;;  %v533_v51 = vmul.f32 %v499_v46, %v499_v46  ;;  %v711_v53 = vpack.c.bf16 %v501_v52, %v500_v47 }
 0x118   : > { %v535_v57 = vmul.f32 %v501_v52, %v501_v52 }
 0x119   : > { %707 = vst [vmem:[%s987_s2] sm:$0xff] %v706_v48   ;;  %v536_v55 = vadd.f32 %v533_v51, %v532_v50  ;;  %v523_v56 = vadd.f32 %v522_v49, %v500_v47  ;;  %713 = vst [vmem:[%s987_s2 + $0x8] sm:$0xff] %v711_v53  }
 0x11b   : > { %v524_v58 = vadd.f32 %v523_v56, %v501_v52  ;;  %v537_v59 = vadd.f32 %v536_v55, %v534_v54 }
 0x11d   : > { %v525_v60 = vrot.slane %v524_v58, 4  ;;  %v538_v61 = vadd.f32 %v537_v59, %v535_v57 }
 0x11f   : > { %v526_v62 = vadd.f32 %v525_v60, %v524_v58  ;;  %v539_v63 = vrot.slane %v538_v61, 4 }
 0x121   : > { %v527_v0 = vrot.slane %v526_v62, 2  ;;  %v540_v1 = vadd.f32 %v539_v63, %v538_v61 }
 0x123   : > { %v528_v2 = vadd.f32 %v527_v0, %v526_v62  ;;  %v541_v3 = vrot.slane %v540_v1, 2 }
 0x125   : > { %v529_v4 = vrot.slane %v528_v2, 1  ;;  %v542_v5 = vadd.f32 %v541_v3, %v540_v1 }
 0x127   : > { %v530_v6 = vadd.f32 %v529_v4, %v528_v2  ;;  %v543_v7 = vrot.slane %v542_v5, 1 }
 0x129   : > { %531 = vst [vmem:[%s988_s3] sm:$0x1] %v530_v6  ;;  %v544_v8 = vadd.f32 %v543_v7, %v542_v5 }
 0x12b   : > { %545 = vst [vmem:[%s988_s3 + $0x1] sm:$0x1] %v544_v8 }
 0x12c PF: > { %s14_s16 = sadd.s32 1, %s859_s16   ;;  %s989_s12 = smov %s847_s13 }
 0x12d   : > { %p11_p12 = scmp.ge.s32.totalorder %s14_s16, 4   ;;  %s990_s13 = smov %s917_s20 }
 0x12e   : > { %s991_s14 = smov %s855_s15  ;;  %s992_s15 = smov %s994_s17 }
 0x12f   :  { %13 = sbr.rel (!%p11_p12) target bundleno = 3 (0x3), region = 124 }

// kernel: _lambda_.22
= control target key start
LH: loop header
LB: loop body
LE: loop exit
PB: predicated region body
PF: predicated region fallthrough
CT: control target
= control target key end

     0   :  { %s882_s12 = smov 0   ;;  %s884_s13 = smov 0   ;;  %s985_s0 = inlined_call_operand.vmem [shape: bf16[32,768], index: 0, kind: input, shape index: {}]   ;;  %s986_s1 = inlined_call_operand.vmem [shape: bf16[768,128], index: 1, kind: input, shape index: {}]   ;;  %s987_s2 = inlined_call_operand.vmem [shape: bf16[32,128], index: 2, kind: output, shape index: {0}]   ;;  %s988_s3 = inlined_call_operand.vmem [shape: f32[8,128], index: 3, kind: output, shape index: {1}]  }
   0x1   :  { %s886_s14 = smov 0   ;;  %s888_s15 = smov 0  }
   0x2   :  { %s890_s16 = smov 0  }
   0x3 LB: > { %s23_s17 = sadd.s32 1, %s855_s15  ;;  %p42_p1 = scmp.ne.s32.totalorder %s847_s13, %s843_s12  ;;  %s859_s16 = sphi %s890_s16, %s14_s16   ;;  %s855_s15 = sphi %s888_s15, %s992_s15   ;;  %s851_s14 = sphi %s886_s14, %s991_s14   ;;  %s847_s13 = sphi %s884_s13, %s990_s13   ;;  %s843_s12 = sphi %s882_s12, %s989_s12  }
   0x4   : > { %p24_p0 = scmp.ge.s32.totalorder %s23_s17, 3  ;;  %p43_p2 = scmp.eq.s32.totalorder %s859_s16, 0 }
   0x5   : > { %s35_s19 = sadd.s32 1, %s847_s13  ;;  %p659_p5 = scmp.ge.s32.totalorder %s859_s16, 3 }
   0x6   : > { %s994_s17 = smov (%p24_p0, %s23_s17), 0  ;;  %p44_p3 = por %p43_p2, %p42_p1 }
   0x7   : > { %s31_s18 = ssub.s32 %s855_s15, %s994_s17  ;;  %146 = sbr.rel (%p659_p5) target bundleno = 18 (0x12), region = 16 }
   0x8   : > { %p33_p4 = scmp.eq.s32.totalorder %s31_s18, 0 }
   0xa   : > { %s917_s20 = scalar_select %p33_p4, %s847_s13, %s35_s19  }
   0xc   : > { %149 = sbr.rel (!%p44_p3) target bundleno = 18 (0x12), region = 20  ;;  %s151_s21 = sand.u32 (%p44_p3), 1, %s847_s13  }
   0xd   : > { %s698_s22 = sshll.u32 (%p44_p3), %s855_s15, 3  ;;  %s660_s23 = sshll.u32 (%p44_p3), %s151_s21, 5 }
   0xe   : > { %s159_s26 = scalar_lea.vmem (%p44_p3), %s985_s0, %s698_s22  ;;  %s153_s27 = scalar_lea.vmem (%p44_p3), [#allocation3], %s660_s23 }
   0xf   : > { %v194_v0 = vld [vmem:[%s159_s26] sm:$0xff] (%p44_p3)  ;;  %v196_v1 = vld [vmem:[%s159_s26 + $0x18] sm:$0xff] (%p44_p3)  ;;  %v198_v2 = vld [vmem:[%s159_s26 + $0x30] sm:$0xff] (%p44_p3) }
  0x10   : > { %195 = vst [vmem:[%s153_s27] sm:$0xff] (%p44_p3), %v194_v0  ;;  %197 = vst [vmem:[%s153_s27 + $0x8] sm:$0xff] (%p44_p3), %v196_v1  ;;  %v200_v3 = vld [vmem:[%s159_s26 + $0x48] sm:$0xff] (%p44_p3) }
  0x11   : > { %199 = vst [vmem:[%s153_s27 + $0x10] sm:$0xff] %v198_v2  ;;  %201 = vst [vmem:[%s153_s27 + $0x18] sm:$0xff] %v200_v3 }
  0x12 PF: > { %p663_p6 = scmp.ge.s32.totalorder %s859_s16, 1  ;;  %p215_p7 = scmp.lt.s32.totalorder %s859_s16, 4 }
  0x14   : > { %p216_p8 = pnand %p663_p6, %p215_p7 }
  0x15   : > { %s222_s28 = sand.u32 (!%p216_p8), 1, %s843_s12   ;;  %s665_s29 = sshll.u32 (!%p216_p8), %s851_s14, 5 }
  0x16   : > { %219 = sbr.rel (%p216_p8) target bundleno = 300 (0x12c), region = 62  ;;  %s664_s30 = sshll.u32 (!%p216_p8), %s222_s28, 5 }
  0x17   : > { %p257_p9 = scmp.lt.s32.totalorder (!%p216_p8), %s665_s29, 95  ;;  %s934_s8 = scalar_lea.vmem (!%p216_p8), [#allocation3], %s664_s30 }
  0x18   : > { %p667_p10 = scmp.ne.s32.totalorder (!%p216_p8), %s851_s14, 0 }
  0x1b   : > { %s996_s29 = smov (!%p257_p9, %s665_s29), 95  ;;  %276 = sbr.rel (%p667_p10) target bundleno = 35 (0x23), region = 70 }
  0x1c   : > { %s666_s4 = sshll.u32 %s996_s29, 2 }
  0x1d   : > { %s932_s7 = scalar_lea.vmem %s986_s1, %s666_s4 }
  0x20   : > { %v861_v4 = vmov 0.0  }
  0x21   : > { %277 = vst [vmem:[#allocation2 + $0x10] sm:$0xff] %v861_v4  ;;  %278 = vst [vmem:[#allocation2] sm:$0xff] %v861_v4 }
  0x22   : > { %279 = vst [vmem:[#allocation2 + $0x18] sm:$0xff] %v861_v4  ;;  %280 = vst [vmem:[#allocation2 + $0x8] sm:$0xff] %v861_v4 }
  0x23 PF: > { %v799_v5 = vld [vmem:[%s932_s7 + $0x78] sm:$0xff]   ;;  %v801_v7 = vld [vmem:[%s932_s7 + $0x70] sm:$0xff]   ;;  %v803_v9 = vld [vmem:[%s932_s7 + $0x68] sm:$0xff]   ;;  %p688_p11 = scmp.ne.s32.totalorder %s851_s14, 2 }
  0x24   : > { %v800_v6 = vld [vmem:[%s932_s7 + $0x38] sm:$0xff]   ;;  %714 = vmatprep.subr.bf16.mxu0 %v799_v5  ;;  %742 = vmatprep.subr.bf16.mxu1 %v799_v5  ;;  %v802_v8 = vld [vmem:[%s932_s7 + $0x30] sm:$0xff]   ;;  %v804_v10 = vld [vmem:[%s932_s7 + $0x28] sm:$0xff]  }
  0x25   : > { %715 = vmatpush3.bf16.msra.mxu0 %v800_v6  ;;  %750 = vmatpush3.bf16.msra.mxu1 %v800_v6  ;;  %v805_v11 = vld [vmem:[%s932_s7 + $0x60] sm:$0xff]   ;;  %v807_v13 = vld [vmem:[%s932_s7 + $0x58] sm:$0xff]   ;;  %v809_v15 = vld [vmem:[%s932_s7 + $0x50] sm:$0xff]  }
  0x26   : > { %716 = vmatprep.subr.bf16.mxu0 %v801_v7  ;;  %743 = vmatprep.subr.bf16.mxu1 %v801_v7  ;;  %v806_v12 = vld [vmem:[%s932_s7 + $0x20] sm:$0xff]   ;;  %v808_v14 = vld [vmem:[%s932_s7 + $0x18] sm:$0xff]   ;;  %v810_v18 = vld [vmem:[%s932_s7 + $0x10] sm:$0xff]  }
  0x27   : > { %v817_v16 = vld [vmem:[%s934_s8 + $0x4] ss:$8 sps:$4 sm:$0xff]   ;;  %v820_v17 = vld [vmem:[%s934_s8 + $0x14] ss:$8 sps:$4 sm:$0xff]   ;;  %v815_v23 = vld [vmem:[%s934_s8] ss:$8 sps:$4 sm:$0xff]  }
  0x28   : > { %v811_v19 = vld [vmem:[%s932_s7 + $0x48] sm:$0xff]   ;;  %469 = vmatprep.mubr.bf16.mxu0 %v817_v16  ;;  %477 = vmatprep.mubr.bf16.mxu1 %v820_v17  ;;  %v813_v21 = vld [vmem:[%s932_s7 + $0x40] sm:$0xff]   ;;  %v818_v24 = vld [vmem:[%s934_s8 + $0x10] ss:$8 sps:$4 sm:$0xff]  }
  0x29   : > { %717 = vmatpush3.bf16.msra.mxu0 %v802_v8  ;;  %751 = vmatpush3.bf16.msra.mxu1 %v802_v8  ;;  %v812_v20 = vld [vmem:[%s932_s7 + $0x8] sm:$0xff]   ;;  %v814_v22 = vld [vmem:[%s932_s7] sm:$0xff]   ;;  %v281_v27 = vld [vmem:[#allocation2 + $0x10] sm:$0xff] }
  0x2a   : > { %718 = vmatprep.subr.bf16.mxu0 %v803_v9  ;;  %744 = vmatprep.subr.bf16.mxu1 %v803_v9  ;;  %v283_v29 = vld [vmem:[#allocation2 + $0x18] sm:$0xff]  ;;  %v282_v37 = vld [vmem:[#allocation2] sm:$0xff]  ;;  %v284_v39 = vld [vmem:[#allocation2 + $0x8] sm:$0xff] }
  0x2d   : > { %719 = vmatpush3.bf16.msra.mxu0 %v804_v10  ;;  %752 = vmatpush3.bf16.msra.mxu1 %v804_v10 }
  0x2e   : > { %720 = vmatprep.subr.bf16.mxu0 %v805_v11  ;;  %745 = vmatprep.subr.bf16.mxu1 %v805_v11 }
  0x31   : > { %721 = vmatpush3.bf16.msra.mxu0 %v806_v12  ;;  %753 = vmatpush3.bf16.msra.mxu1 %v806_v12 }
  0x32   : > { %722 = vmatprep.subr.bf16.mxu0 %v807_v13  ;;  %746 = vmatprep.subr.bf16.mxu1 %v807_v13 }
  0x35   : > { %723 = vmatpush3.bf16.msra.mxu0 %v808_v14  ;;  %754 = vmatpush3.bf16.msra.mxu1 %v808_v14 }
  0x36   : > { %724 = vmatprep.subr.bf16.mxu0 %v809_v15  ;;  %747 = vmatprep.subr.bf16.mxu1 %v809_v15 }
  0x39   : > { %725 = vmatpush3.bf16.msra.mxu0 %v810_v18  ;;  %755 = vmatpush3.bf16.msra.mxu1 %v810_v18 }
  0x3a   : > { %726 = vmatprep.subr.bf16.mxu0 %v811_v19  ;;  %748 = vmatprep.subr.bf16.mxu1 %v811_v19 }
  0x3d   : > { %727 = vmatpush3.bf16.msra.mxu0 %v812_v20  ;;  %756 = vmatpush3.bf16.msra.mxu1 %v812_v20 }
  0x3e   : > { %728 = vmatprep.subr.bf16.mxu0 %v813_v21  ;;  %749 = vmatprep.subr.bf16.mxu1 %v813_v21 }
  0x41   : > { %729 = vmatpush3.bf16.msra.mxu0 %v814_v22  ;;  %757 = vmatpush3.bf16.msra.mxu1 %v814_v22 }
  0x44   : > { %470 = vmatmul.mubr.bf16.vlgmr.msra.gmra.mxu0 %v815_v23  ;;  %478 = vmatmul.mubr.bf16.vlgmr.msra.gmra.mxu1 %v818_v24 }
 0x104   : > { %v730_v25 = vpop.f32.mrf.mxu0  ;;  %v736_v26 = vpop.f32.mrf.mxu1 }
 0x106   : > { %v731_v28 = vpop.f32.mrf.mxu0  ;;  %v737_v30 = vpop.f32.mrf.mxu1 }
 0x107   : > { %v732_v31 = vadd.f32 %v731_v28, %v730_v25  ;;  %v738_v32 = vadd.f32 %v737_v30, %v736_v26 }
 0x108   : > { %v733_v33 = vpop.f32.mrf.mxu0  ;;  %v739_v34 = vpop.f32.mrf.mxu1 }
 0x109   : > { %v486_v35 = vadd.f32 %v732_v31, %v281_v27  ;;  %v488_v36 = vadd.f32 %v738_v32, %v283_v29 }
 0x10a   : > { %v734_v38 = vpop.f32.mrf.mxu0  ;;  %v740_v40 = vpop.f32.mrf.mxu1 }
 0x10b   : > { %490 = vst [vmem:[#allocation2 + $0x10] sm:$0xff] %v486_v35  ;;  %492 = vst [vmem:[#allocation2 + $0x18] sm:$0xff] %v488_v36  ;;  %v735_v41 = vadd.f32 %v734_v38, %v733_v33  ;;  %v741_v42 = vadd.f32 %v740_v40, %v739_v34  ;;  %497 = sbr.rel (%p688_p11) target bundleno = 300 (0x12c), region = 74 }
 0x10d   : > { %v487_v43 = vadd.f32 %v735_v41, %v282_v37  ;;  %v489_v44 = vadd.f32 %v741_v42, %v284_v39 }
 0x10f   : > { %491 = vst [vmem:[#allocation2] sm:$0xff] %v487_v43  ;;  %493 = vst [vmem:[#allocation2 + $0x8] sm:$0xff] %v489_v44 }
 0x112   : > { %v498_v45 = vld [vmem:[#allocation2 + $0x10] sm:$0xff]  ;;  %v500_v47 = vld [vmem:[#allocation2 + $0x18] sm:$0xff] }
 0x113   : > { %v532_v50 = vmul.f32 %v498_v45, %v498_v45  ;;  %v534_v54 = vmul.f32 %v500_v47, %v500_v47 }
 0x116   : > { %v499_v46 = vld [vmem:[#allocation2] sm:$0xff]  ;;  %v501_v52 = vld [vmem:[#allocation2 + $0x8] sm:$0xff] }
 0x117   : > { %v706_v48 = vpack.c.bf16 %v499_v46, %v498_v45  ;;  %v522_v49 = vadd.f32 %v499_v46, %v498_v45  ;;  %v533_v51 = vmul.f32 %v499_v46, %v499_v46  ;;  %v711_v53 = vpack.c.bf16 %v501_v52, %v500_v47 }
 0x118   : > { %v535_v57 = vmul.f32 %v501_v52, %v501_v52 }
 0x119   : > { %707 = vst [vmem:[%s987_s2] sm:$0xff] %v706_v48   ;;  %v536_v55 = vadd.f32 %v533_v51, %v532_v50  ;;  %v523_v56 = vadd.f32 %v522_v49, %v500_v47  ;;  %713 = vst [vmem:[%s987_s2 + $0x8] sm:$0xff] %v711_v53  }
 0x11b   : > { %v524_v58 = vadd.f32 %v523_v56, %v501_v52  ;;  %v537_v59 = vadd.f32 %v536_v55, %v534_v54 }
 0x11d   : > { %v525_v60 = vrot.slane %v524_v58, 4  ;;  %v538_v61 = vadd.f32 %v537_v59, %v535_v57 }
 0x11f   : > { %v526_v62 = vadd.f32 %v525_v60, %v524_v58  ;;  %v539_v63 = vrot.slane %v538_v61, 4 }
 0x121   : > { %v527_v0 = vrot.slane %v526_v62, 2  ;;  %v540_v1 = vadd.f32 %v539_v63, %v538_v61 }
 0x123   : > { %v528_v2 = vadd.f32 %v527_v0, %v526_v62  ;;  %v541_v3 = vrot.slane %v540_v1, 2 }
 0x125   : > { %v529_v4 = vrot.slane %v528_v2, 1  ;;  %v542_v5 = vadd.f32 %v541_v3, %v540_v1 }
 0x127   : > { %v530_v6 = vadd.f32 %v529_v4, %v528_v2  ;;  %v543_v7 = vrot.slane %v542_v5, 1 }
 0x129   : > { %531 = vst [vmem:[%s988_s3] sm:$0x1] %v530_v6  ;;  %v544_v8 = vadd.f32 %v543_v7, %v542_v5 }
 0x12b   : > { %545 = vst [vmem:[%s988_s3 + $0x1] sm:$0x1] %v544_v8 }
 0x12c PF: > { %s14_s16 = sadd.s32 1, %s859_s16   ;;  %s989_s12 = smov %s847_s13 }
 0x12d   : > { %p11_p12 = scmp.ge.s32.totalorder %s14_s16, 5   ;;  %s990_s13 = smov %s917_s20 }
 0x12e   : > { %s991_s14 = smov %s855_s15  ;;  %s992_s15 = smov %s994_s17 }
 0x12f   :  { %13 = sbr.rel (!%p11_p12) target bundleno = 3 (0x3), region = 124 }

// kernel: _lambda_.23
= control target key start
LH: loop header
LB: loop body
LE: loop exit
PB: predicated region body
PF: predicated region fallthrough
CT: control target
= control target key end

     0   :  { %s1332_s12 = smov 0   ;;  %s1334_s13 = smov 0   ;;  %s1483_s0 = inlined_call_operand.vmem [shape: bf16[128,1024], index: 0, kind: input, shape index: {}]   ;;  %s1484_s1 = inlined_call_operand.vmem [shape: bf16[1024,128], index: 1, kind: input, shape index: {}]   ;;  %s1485_s2 = inlined_call_operand.vmem [shape: bf16[128,128], index: 2, kind: output, shape index: {0}]   ;;  %s1486_s3 = inlined_call_operand.vmem [shape: f32[8,128], index: 3, kind: output, shape index: {1}]  }
   0x1   :  { %s1336_s14 = smov 0   ;;  %s1338_s15 = smov 0  }
   0x2   :  { %s1340_s16 = smov 0  }
   0x3 LB: > { %s23_s17 = sadd.s32 1, %s1305_s15  ;;  %p42_p1 = scmp.ne.s32.totalorder %s1297_s13, %s1293_s12  ;;  %s1309_s16 = sphi %s1340_s16, %s14_s16   ;;  %s1305_s15 = sphi %s1338_s15, %s1490_s15   ;;  %s1301_s14 = sphi %s1336_s14, %s1489_s14   ;;  %s1297_s13 = sphi %s1334_s13, %s1488_s13   ;;  %s1293_s12 = sphi %s1332_s12, %s1487_s12  }
   0x4   : > { %p24_p0 = scmp.ge.s32.totalorder %s23_s17, 4  ;;  %p43_p2 = scmp.eq.s32.totalorder %s1309_s16, 0 }
   0x5   : > { %s35_s19 = sadd.s32 1, %s1297_s13  ;;  %p983_p5 = scmp.ge.s32.totalorder %s1309_s16, 4 }
   0x6   : > { %s1492_s17 = smov (%p24_p0, %s23_s17), 0  ;;  %p44_p3 = por %p43_p2, %p42_p1 }
   0x7   : > { %s31_s18 = ssub.s32 %s1305_s15, %s1492_s17  ;;  %146 = sbr.rel (%p983_p5) target bundleno = 32 (0x20), region = 16 }
   0x8   : > { %p33_p4 = scmp.eq.s32.totalorder %s31_s18, 0 }
   0xa   : > { %s1367_s20 = scalar_select %p33_p4, %s1297_s13, %s35_s19  }
   0xc   : > { %149 = sbr.rel (!%p44_p3) target bundleno = 32 (0x20), region = 20  ;;  %s151_s21 = sand.u32 (%p44_p3), 1, %s1297_s13  }
   0xd   : > { %s1046_s22 = sshll.u32 (%p44_p3), %s1305_s15, 3  ;;  %s984_s23 = sshll.u32 (%p44_p3), %s151_s21, 7 }
   0xe   : > { %s1375_s26 = scalar_lea.vmem (%p44_p3), %s1483_s0, %s1046_s22  ;;  %s153_s27 = scalar_lea.vmem (%p44_p3), [#allocation3], %s984_s23 }
   0xf   : > { %v218_v0 = vld [vmem:[%s1375_s26] sm:$0xff] (%p44_p3) }
  0x10   : > { %v220_v1 = vld [vmem:[%s1375_s26 + $0x20] sm:$0xff] (%p44_p3)  ;;  %219 = vst [vmem:[%s153_s27] sm:$0xff] (%p44_p3), %v218_v0 }
  0x11   : > { %v222_v2 = vld [vmem:[%s1375_s26 + $0x40] sm:$0xff]  ;;  %221 = vst [vmem:[%s153_s27 + $0x8] sm:$0xff] %v220_v1 }
  0x12   : > { %223 = vst [vmem:[%s153_s27 + $0x10] sm:$0xff] %v222_v2  ;;  %v224_v3 = vld [vmem:[%s1375_s26 + $0x60] sm:$0xff] }
  0x13   : > { %v226_v4 = vld [vmem:[%s1375_s26 + $0x80] sm:$0xff]  ;;  %225 = vst [vmem:[%s153_s27 + $0x18] sm:$0xff] %v224_v3 }
  0x14   : > { %v228_v5 = vld [vmem:[%s1375_s26 + $0xa0] sm:$0xff]  ;;  %227 = vst [vmem:[%s153_s27 + $0x20] sm:$0xff] %v226_v4 }
  0x15   : > { %229 = vst [vmem:[%s153_s27 + $0x28] sm:$0xff] %v228_v5  ;;  %v230_v6 = vld [vmem:[%s1375_s26 + $0xc0] sm:$0xff] }
  0x16   : > { %v232_v7 = vld [vmem:[%s1375_s26 + $0xe0] sm:$0xff]  ;;  %231 = vst [vmem:[%s153_s27 + $0x30] sm:$0xff] %v230_v6 }
  0x17   : > { %v234_v8 = vld [vmem:[%s1375_s26 + $0x100] sm:$0xff]  ;;  %233 = vst [vmem:[%s153_s27 + $0x38] sm:$0xff] %v232_v7 }
  0x18   : > { %235 = vst [vmem:[%s153_s27 + $0x40] sm:$0xff] %v234_v8  ;;  %v236_v9 = vld [vmem:[%s1375_s26 + $0x120] sm:$0xff] }
  0x19   : > { %v238_v10 = vld [vmem:[%s1375_s26 + $0x140] sm:$0xff]  ;;  %237 = vst [vmem:[%s153_s27 + $0x48] sm:$0xff] %v236_v9 }
  0x1a   : > { %v240_v11 = vld [vmem:[%s1375_s26 + $0x160] sm:$0xff]  ;;  %239 = vst [vmem:[%s153_s27 + $0x50] sm:$0xff] %v238_v10 }
  0x1b   : > { %241 = vst [vmem:[%s153_s27 + $0x58] sm:$0xff] %v240_v11  ;;  %v242_v12 = vld [vmem:[%s1375_s26 + $0x180] sm:$0xff] }
  0x1c   : > { %v244_v13 = vld [vmem:[%s1375_s26 + $0x1a0] sm:$0xff]  ;;  %243 = vst [vmem:[%s153_s27 + $0x60] sm:$0xff] %v242_v12 }
  0x1d   : > { %v246_v14 = vld [vmem:[%s1375_s26 + $0x1c0] sm:$0xff]  ;;  %245 = vst [vmem:[%s153_s27 + $0x68] sm:$0xff] %v244_v13 }
  0x1e   : > { %247 = vst [vmem:[%s153_s27 + $0x70] sm:$0xff] %v246_v14  ;;  %v248_v15 = vld [vmem:[%s1375_s26 + $0x1e0] sm:$0xff] }
  0x1f   : > { %249 = vst [vmem:[%s153_s27 + $0x78] sm:$0xff] %v248_v15 }
  0x20 PF: > { %p987_p6 = scmp.ge.s32.totalorder %s1309_s16, 1  ;;  %p263_p7 = scmp.lt.s32.totalorder %s1309_s16, 5 }
  0x22   : > { %p264_p8 = pnand %p987_p6, %p263_p7 }
  0x23   : > { %s270_s28 = sand.u32 (!%p264_p8), 1, %s1293_s12   ;;  %s989_s29 = sshll.u32 (!%p264_p8), %s1301_s14, 5 }
  0x24   : > { %267 = sbr.rel (%p264_p8) target bundleno = 362 (0x16a), region = 62  ;;  %s988_s30 = sshll.u32 (!%p264_p8), %s270_s28, 7 }
  0x25   : > { %p305_p9 = scmp.lt.s32.totalorder (!%p264_p8), %s989_s29, 127  ;;  %s1402_s8 = scalar_lea.vmem (!%p264_p8), [#allocation3], %s988_s30 }
  0x26   : > { %p991_p10 = scmp.ne.s32.totalorder (!%p264_p8), %s1301_s14, 0 }
  0x29   : > { %s1494_s29 = smov (!%p305_p9, %s989_s29), 127  ;;  %324 = sbr.rel (%p991_p10) target bundleno = 55 (0x37), region = 70 }
  0x2a   : > { %s990_s4 = sshll.u32 %s1494_s29, 2 }
  0x2b   : > { %s1400_s7 = scalar_lea.vmem %s1484_s1, %s990_s4 }
  0x2e   : > { %v1311_v16 = vmov 0.0  }
  0x2f   : > { %325 = vst [vmem:[#allocation2 + $0x30] sm:$0xff] %v1311_v16  ;;  %326 = vst [vmem:[#allocation2] sm:$0xff] %v1311_v16 }
  0x30   : > { %327 = vst [vmem:[#allocation2 + $0x58] sm:$0xff] %v1311_v16  ;;  %328 = vst [vmem:[#allocation2 + $0x18] sm:$0xff] %v1311_v16 }
  0x31   : > { %329 = vst [vmem:[#allocation2 + $0x50] sm:$0xff] %v1311_v16  ;;  %330 = vst [vmem:[#allocation2 + $0x68] sm:$0xff] %v1311_v16 }
  0x32   : > { %331 = vst [vmem:[#allocation2 + $0x8] sm:$0xff] %v1311_v16  ;;  %332 = vst [vmem:[#allocation2 + $0x48] sm:$0xff] %v1311_v16 }
  0x33   : > { %333 = vst [vmem:[#allocation2 + $0x40] sm:$0xff] %v1311_v16  ;;  %334 = vst [vmem:[#allocation2 + $0x20] sm:$0xff] %v1311_v16 }
  0x34   : > { %335 = vst [vmem:[#allocation2 + $0x10] sm:$0xff] %v1311_v16  ;;  %336 = vst [vmem:[#allocation2 + $0x38] sm:$0xff] %v1311_v16 }
  0x35   : > { %337 = vst [vmem:[#allocation2 + $0x60] sm:$0xff] %v1311_v16  ;;  %338 = vst [vmem:[#allocation2 + $0x70] sm:$0xff] %v1311_v16 }
  0x36   : > { %339 = vst [vmem:[#allocation2 + $0x78] sm:$0xff] %v1311_v16  ;;  %340 = vst [vmem:[#allocation2 + $0x28] sm:$0xff] %v1311_v16 }
  0x37 PF: > { %v1231_v17 = vld [vmem:[%s1400_s7 + $0x78] sm:$0xff]   ;;  %v1233_v19 = vld [vmem:[%s1400_s7 + $0x70] sm:$0xff]   ;;  %v1235_v21 = vld [vmem:[%s1400_s7 + $0x68] sm:$0xff]   ;;  %p1024_p11 = scmp.ne.s32.totalorder %s1301_s14, 3 }
  0x38   : > { %v1232_v18 = vld [vmem:[%s1400_s7 + $0x38] sm:$0xff]   ;;  %1110 = vmatprep.subr.bf16.mxu0 %v1231_v17  ;;  %1174 = vmatprep.subr.bf16.mxu1 %v1231_v17  ;;  %v1234_v20 = vld [vmem:[%s1400_s7 + $0x30] sm:$0xff]   ;;  %v1236_v22 = vld [vmem:[%s1400_s7 + $0x28] sm:$0xff]  }
  0x39   : > { %1111 = vmatpush3.bf16.msra.mxu0 %v1232_v18  ;;  %1182 = vmatpush3.bf16.msra.mxu1 %v1232_v18  ;;  %v1237_v23 = vld [vmem:[%s1400_s7 + $0x60] sm:$0xff]   ;;  %v1239_v25 = vld [vmem:[%s1400_s7 + $0x58] sm:$0xff]   ;;  %v1241_v27 = vld [vmem:[%s1400_s7 + $0x50] sm:$0xff]  }
  0x3a   : > { %1112 = vmatprep.subr.bf16.mxu0 %v1233_v19  ;;  %1175 = vmatprep.subr.bf16.mxu1 %v1233_v19  ;;  %v1238_v24 = vld [vmem:[%s1400_s7 + $0x20] sm:$0xff]   ;;  %v1240_v26 = vld [vmem:[%s1400_s7 + $0x18] sm:$0xff]   ;;  %v1242_v30 = vld [vmem:[%s1400_s7 + $0x10] sm:$0xff]  }
  0x3b   : > { %v1249_v28 = vld [vmem:[%s1402_s8 + $0x4] ss:$8 sps:$4 sm:$0xff]   ;;  %v1247_v35 = vld [vmem:[%s1402_s8] ss:$8 sps:$4 sm:$0xff]   ;;  %v1253_v37 = vld [vmem:[%s1402_s8 + $0x14] ss:$8 sps:$4 sm:$0xff]  }
  0x3c   : > { %v1252_v29 = vld [vmem:[%s1402_s8 + $0x44] ss:$8 sps:$4 sm:$0xff]   ;;  %613 = vmatprep.mubr.bf16.mxu0 %v1249_v28  ;;  %v1250_v36 = vld [vmem:[%s1402_s8 + $0x40] ss:$8 sps:$4 sm:$0xff]   ;;  %v1255_v38 = vld [vmem:[%s1402_s8 + $0x54] ss:$8 sps:$4 sm:$0xff]  }
  0x3d   : > { %1113 = vmatpush3.bf16.msra.mxu0 %v1234_v20  ;;  %1183 = vmatpush3.bf16.msra.mxu1 %v1234_v20  ;;  %v1243_v31 = vld [vmem:[%s1400_s7 + $0x48] sm:$0xff]   ;;  %v1245_v33 = vld [vmem:[%s1400_s7 + $0x40] sm:$0xff]   ;;  %v1257_v39 = vld [vmem:[%s1402_s8 + $0x10] ss:$8 sps:$4 sm:$0xff]  }
  0x3e   : > { %1114 = vmatprep.subr.bf16.mxu0 %v1235_v21  ;;  %1176 = vmatprep.subr.bf16.mxu1 %v1235_v21  ;;  %v1244_v32 = vld [vmem:[%s1400_s7 + $0x8] sm:$0xff]   ;;  %v1246_v34 = vld [vmem:[%s1400_s7] sm:$0xff]   ;;  %v1258_v40 = vld [vmem:[%s1402_s8 + $0x50] ss:$8 sps:$4 sm:$0xff]  }
  0x3f   : > { %645 = vmatprep.mubr.bf16.mxu1 %v1252_v29  ;;  %v1259_v41 = vld [vmem:[%s1402_s8 + $0x24] ss:$8 sps:$4 sm:$0xff]   ;;  %v1263_v43 = vld [vmem:[%s1402_s8 + $0x20] ss:$8 sps:$4 sm:$0xff]   ;;  %v1265_v45 = vld [vmem:[%s1402_s8 + $0x34] ss:$8 sps:$4 sm:$0xff]  }
  0x40   : > { %v1261_v42 = vld [vmem:[%s1402_s8 + $0x64] ss:$8 sps:$4 sm:$0xff]   ;;  %v1264_v44 = vld [vmem:[%s1402_s8 + $0x60] ss:$8 sps:$4 sm:$0xff]   ;;  %v1267_v46 = vld [vmem:[%s1402_s8 + $0x74] ss:$8 sps:$4 sm:$0xff]  }
  0x41   : > { %1115 = vmatpush3.bf16.msra.mxu0 %v1236_v22  ;;  %1184 = vmatpush3.bf16.msra.mxu1 %v1236_v22  ;;  %v1269_v47 = vld [vmem:[%s1402_s8 + $0x30] ss:$8 sps:$4 sm:$0xff]   ;;  %v349_v53 = vld [vmem:[#allocation2 + $0x40] sm:$0xff] }
  0x42   : > { %1116 = vmatprep.subr.bf16.mxu0 %v1237_v23  ;;  %1177 = vmatprep.subr.bf16.mxu1 %v1237_v23  ;;  %v1270_v48 = vld [vmem:[%s1402_s8 + $0x70] ss:$8 sps:$4 sm:$0xff]   ;;  %v342_v61 = vld [vmem:[#allocation2] sm:$0xff] }
  0x43   : > { %v341_v51 = vld [vmem:[#allocation2 + $0x30] sm:$0xff]  ;;  %v350_v63 = vld [vmem:[#allocation2 + $0x20] sm:$0xff]  ;;  %v343_v7 = vld [vmem:[#allocation2 + $0x58] sm:$0xff] }
  0x44   : > { %v351_v9 = vld [vmem:[#allocation2 + $0x10] sm:$0xff]  ;;  %v344_v17 = vld [vmem:[#allocation2 + $0x18] sm:$0xff]  ;;  %v353_v29 = vld [vmem:[#allocation2 + $0x60] sm:$0xff] }
  0x45   : > { %1117 = vmatpush3.bf16.msra.mxu0 %v1238_v24  ;;  %1185 = vmatpush3.bf16.msra.mxu1 %v1238_v24  ;;  %v352_v19 = vld [vmem:[#allocation2 + $0x38] sm:$0xff] }
  0x46   : > { %1118 = vmatprep.subr.bf16.mxu0 %v1239_v25  ;;  %1178 = vmatprep.subr.bf16.mxu1 %v1239_v25 }
  0x49   : > { %1119 = vmatpush3.bf16.msra.mxu0 %v1240_v26  ;;  %1186 = vmatpush3.bf16.msra.mxu1 %v1240_v26 }
  0x4a   : > { %1120 = vmatprep.subr.bf16.mxu0 %v1241_v27  ;;  %1179 = vmatprep.subr.bf16.mxu1 %v1241_v27  ;;  %v345_v27 = vld [vmem:[#allocation2 + $0x50] sm:$0xff] }
  0x4d   : > { %1121 = vmatpush3.bf16.msra.mxu0 %v1242_v30  ;;  %1187 = vmatpush3.bf16.msra.mxu1 %v1242_v30 }
  0x4e   : > { %1122 = vmatprep.subr.bf16.mxu0 %v1243_v31  ;;  %1180 = vmatprep.subr.bf16.mxu1 %v1243_v31 }
  0x51   : > { %1123 = vmatpush3.bf16.msra.mxu0 %v1244_v32  ;;  %1188 = vmatpush3.bf16.msra.mxu1 %v1244_v32 }
  0x52   : > { %1124 = vmatprep.subr.bf16.mxu0 %v1245_v33  ;;  %1181 = vmatprep.subr.bf16.mxu1 %v1245_v33 }
  0x55   : > { %1125 = vmatpush3.bf16.msra.mxu0 %v1246_v34  ;;  %1189 = vmatpush3.bf16.msra.mxu1 %v1246_v34 }
  0x58   : > { %614 = vmatmul.mubr.bf16.vlgmr.msra.gmra.mxu0 %v1247_v35  ;;  %646 = vmatmul.mubr.bf16.vlgmr.msra.gmra.mxu1 %v1250_v36 }
  0x59   : > { %621 = vmatprep.mubr.bf16.mxu0 %v1253_v37  ;;  %653 = vmatprep.mubr.bf16.mxu1 %v1255_v38  ;;  %v346_v37 = vld [vmem:[#allocation2 + $0x68] sm:$0xff] }
  0x60   : > { %622 = vmatmul.mubr.bf16.gmra.mxu0 %v1257_v39  ;;  %654 = vmatmul.mubr.bf16.gmra.mxu1 %v1258_v40  ;;  %v354_v39 = vld [vmem:[#allocation2 + $0x70] sm:$0xff] }
  0x61   : > { %629 = vmatprep.mubr.bf16.mxu0 %v1259_v41  ;;  %661 = vmatprep.mubr.bf16.mxu1 %v1261_v42 }
  0x68   : > { %630 = vmatmul.mubr.bf16.gmra.mxu0 %v1263_v43  ;;  %662 = vmatmul.mubr.bf16.gmra.mxu1 %v1264_v44 }
  0x69   : > { %637 = vmatprep.mubr.bf16.mxu0 %v1265_v45  ;;  %669 = vmatprep.mubr.bf16.mxu1 %v1267_v46 }
  0x70   : > { %638 = vmatmul.mubr.bf16.gmra.mxu0 %v1269_v47  ;;  %670 = vmatmul.mubr.bf16.gmra.mxu1 %v1270_v48  ;;  %v347_v47 = vld [vmem:[#allocation2 + $0x8] sm:$0xff] }
 0x118   : > { %v1126_v49 = vpop.f32.mrf.mxu0  ;;  %v1150_v50 = vpop.f32.mrf.mxu1 }
 0x11a   : > { %v1127_v52 = vpop.f32.mrf.mxu0  ;;  %v1151_v54 = vpop.f32.mrf.mxu1 }
 0x11b   : > { %v1128_v55 = vadd.f32 %v1127_v52, %v1126_v49  ;;  %v1152_v56 = vadd.f32 %v1151_v54, %v1150_v50  ;;  %v355_v49 = vld [vmem:[#allocation2 + $0x78] sm:$0xff] }
 0x11c   : > { %v1129_v57 = vpop.f32.mrf.mxu0  ;;  %v1153_v58 = vpop.f32.mrf.mxu1 }
 0x11d   : > { %v678_v59 = vadd.f32 %v1128_v55, %v341_v51  ;;  %v686_v60 = vadd.f32 %v1152_v56, %v349_v53 }
 0x11e   : > { %v1130_v62 = vpop.f32.mrf.mxu0  ;;  %v1154_v0 = vpop.f32.mrf.mxu1 }
 0x11f   : > { %694 = vst [vmem:[#allocation2 + $0x30] sm:$0xff] %v678_v59  ;;  %702 = vst [vmem:[#allocation2 + $0x40] sm:$0xff] %v686_v60  ;;  %v1131_v1 = vadd.f32 %v1130_v62, %v1129_v57  ;;  %v1155_v2 = vadd.f32 %v1154_v0, %v1153_v58  ;;  %v348_v57 = vld [vmem:[#allocation2 + $0x48] sm:$0xff] }
 0x120   : > { %v1132_v3 = vpop.f32.mrf.mxu0  ;;  %v1156_v4 = vpop.f32.mrf.mxu1  ;;  %v356_v59 = vld [vmem:[#allocation2 + $0x28] sm:$0xff] }
 0x121   : > { %v679_v5 = vadd.f32 %v1131_v1, %v342_v61  ;;  %v687_v6 = vadd.f32 %v1155_v2, %v350_v63 }
 0x122   : > { %v1133_v8 = vpop.f32.mrf.mxu0  ;;  %v1157_v10 = vpop.f32.mrf.mxu1 }
 0x123   : > { %695 = vst [vmem:[#allocation2] sm:$0xff] %v679_v5  ;;  %703 = vst [vmem:[#allocation2 + $0x20] sm:$0xff] %v687_v6  ;;  %v1134_v11 = vadd.f32 %v1133_v8, %v1132_v3  ;;  %v1158_v12 = vadd.f32 %v1157_v10, %v1156_v4 }
 0x124   : > { %v1135_v13 = vpop.f32.mrf.mxu0  ;;  %v1159_v14 = vpop.f32.mrf.mxu1 }
 0x125   : > { %v680_v15 = vadd.f32 %v1134_v11, %v343_v7  ;;  %v688_v16 = vadd.f32 %v1158_v12, %v351_v9 }
 0x126   : > { %v1136_v18 = vpop.f32.mrf.mxu0  ;;  %v1160_v20 = vpop.f32.mrf.mxu1 }
 0x127   : > { %696 = vst [vmem:[#allocation2 + $0x58] sm:$0xff] %v680_v15  ;;  %704 = vst [vmem:[#allocation2 + $0x10] sm:$0xff] %v688_v16  ;;  %v1137_v21 = vadd.f32 %v1136_v18, %v1135_v13  ;;  %v1161_v22 = vadd.f32 %v1160_v20, %v1159_v14 }
 0x128   : > { %v1138_v23 = vpop.f32.mrf.mxu0  ;;  %v1162_v24 = vpop.f32.mrf.mxu1 }
 0x129   : > { %v681_v25 = vadd.f32 %v1137_v21, %v344_v17  ;;  %v689_v26 = vadd.f32 %v1161_v22, %v352_v19 }
 0x12a   : > { %v1139_v28 = vpop.f32.mrf.mxu0  ;;  %v1163_v30 = vpop.f32.mrf.mxu1 }
 0x12b   : > { %697 = vst [vmem:[#allocation2 + $0x18] sm:$0xff] %v681_v25  ;;  %705 = vst [vmem:[#allocation2 + $0x38] sm:$0xff] %v689_v26  ;;  %v1140_v31 = vadd.f32 %v1139_v28, %v1138_v23  ;;  %v1164_v32 = vadd.f32 %v1163_v30, %v1162_v24 }
 0x12c   : > { %v1141_v33 = vpop.f32.mrf.mxu0  ;;  %v1165_v34 = vpop.f32.mrf.mxu1 }
 0x12d   : > { %v682_v35 = vadd.f32 %v1140_v31, %v345_v27  ;;  %v690_v36 = vadd.f32 %v1164_v32, %v353_v29 }
 0x12e   : > { %v1142_v38 = vpop.f32.mrf.mxu0  ;;  %v1166_v40 = vpop.f32.mrf.mxu1 }
 0x12f   : > { %698 = vst [vmem:[#allocation2 + $0x50] sm:$0xff] %v682_v35  ;;  %706 = vst [vmem:[#allocation2 + $0x60] sm:$0xff] %v690_v36  ;;  %v1143_v41 = vadd.f32 %v1142_v38, %v1141_v33  ;;  %v1167_v42 = vadd.f32 %v1166_v40, %v1165_v34 }
 0x130   : > { %v1144_v43 = vpop.f32.mrf.mxu0  ;;  %v1168_v44 = vpop.f32.mrf.mxu1 }
 0x131   : > { %v683_v45 = vadd.f32 %v1143_v41, %v346_v37  ;;  %v691_v46 = vadd.f32 %v1167_v42, %v354_v39 }
 0x132   : > { %v1145_v48 = vpop.f32.mrf.mxu0  ;;  %v1169_v50 = vpop.f32.mrf.mxu1 }
 0x133   : > { %699 = vst [vmem:[#allocation2 + $0x68] sm:$0xff] %v683_v45  ;;  %707 = vst [vmem:[#allocation2 + $0x70] sm:$0xff] %v691_v46  ;;  %v1146_v51 = vadd.f32 %v1145_v48, %v1144_v43  ;;  %v1170_v52 = vadd.f32 %v1169_v50, %v1168_v44 }
 0x134   : > { %v1147_v53 = vpop.f32.mrf.mxu0  ;;  %v1171_v54 = vpop.f32.mrf.mxu1 }
 0x135   : > { %v684_v55 = vadd.f32 %v1146_v51, %v347_v47  ;;  %v692_v56 = vadd.f32 %v1170_v52, %v355_v49 }
 0x136   : > { %v1148_v58 = vpop.f32.mrf.mxu0  ;;  %v1172_v60 = vpop.f32.mrf.mxu1 }
 0x137   : > { %700 = vst [vmem:[#allocation2 + $0x8] sm:$0xff] %v684_v55  ;;  %708 = vst [vmem:[#allocation2 + $0x78] sm:$0xff] %v692_v56  ;;  %v1149_v61 = vadd.f32 %v1148_v58, %v1147_v53  ;;  %v1173_v62 = vadd.f32 %v1172_v60, %v1171_v54  ;;  %713 = sbr.rel (%p1024_p11) target bundleno = 362 (0x16a), region = 74 }
 0x139   : > { %v685_v63 = vadd.f32 %v1149_v61, %v348_v57  ;;  %v693_v0 = vadd.f32 %v1173_v62, %v356_v59 }
 0x13b   : > { %701 = vst [vmem:[#allocation2 + $0x48] sm:$0xff] %v685_v63  ;;  %709 = vst [vmem:[#allocation2 + $0x28] sm:$0xff] %v693_v0 }
 0x13c   : > { %v714_v1 = vld [vmem:[#allocation2 + $0x30] sm:$0xff]  ;;  %v715_v2 = vld [vmem:[#allocation2] sm:$0xff]  ;;  %v716_v3 = vld [vmem:[#allocation2 + $0x58] sm:$0xff] }
 0x13d   : > { %v1066_v4 = vpack.c.bf16 %v715_v2, %v714_v1  ;;  %v810_v5 = vadd.f32 %v715_v2, %v714_v1  ;;  %v832_v6 = vmul.f32 %v714_v1, %v714_v1  ;;  %v833_v7 = vmul.f32 %v715_v2, %v715_v2  ;;  %v717_v8 = vld [vmem:[#allocation2 + $0x18] sm:$0xff]  ;;  %v718_v9 = vld [vmem:[#allocation2 + $0x50] sm:$0xff]  ;;  %v719_v10 = vld [vmem:[#allocation2 + $0x68] sm:$0xff] }
 0x13e   : > { %v1071_v11 = vpack.c.bf16 %v717_v8, %v716_v3  ;;  %v834_v12 = vmul.f32 %v716_v3, %v716_v3  ;;  %v1076_v13 = vpack.c.bf16 %v719_v10, %v718_v9  ;;  %v720_v14 = vld [vmem:[#allocation2 + $0x8] sm:$0xff]  ;;  %v835_v17 = vmul.f32 %v717_v8, %v717_v8  ;;  %v722_v19 = vld [vmem:[#allocation2 + $0x40] sm:$0xff]  ;;  %v724_v23 = vld [vmem:[#allocation2 + $0x10] sm:$0xff] }
 0x13f   : > { %1067 = vst [vmem:[%s1485_s2] sm:$0xff] %v1066_v4   ;;  %v848_v15 = vadd.f32 %v833_v7, %v832_v6  ;;  %v811_v16 = vadd.f32 %v810_v5, %v716_v3  ;;  %v723_v20 = vld [vmem:[#allocation2 + $0x20] sm:$0xff]  ;;  %v836_v26 = vmul.f32 %v718_v9, %v718_v9  ;;  %v725_v27 = vld [vmem:[#allocation2 + $0x38] sm:$0xff]  ;;  %v727_v29 = vld [vmem:[#allocation2 + $0x70] sm:$0xff]  ;;  %v837_v34 = vmul.f32 %v719_v10, %v719_v10 }
 0x140   : > { %1103 = vst [vmem:[%s1485_s2 + $0x8] sm:$0xff] %v1071_v11   ;;  %1104 = vst [vmem:[%s1485_s2 + $0x10] sm:$0xff] %v1076_v13   ;;  %v1086_v22 = vpack.c.bf16 %v723_v20, %v722_v19  ;;  %v726_v28 = vld [vmem:[#allocation2 + $0x60] sm:$0xff]  ;;  %v1091_v30 = vpack.c.bf16 %v725_v27, %v724_v23  ;;  %v728_v35 = vld [vmem:[#allocation2 + $0x78] sm:$0xff]  ;;  %v838_v40 = vmul.f32 %v720_v14, %v720_v14 }
 0x141   : > { %v812_v24 = vadd.f32 %v811_v16, %v717_v8  ;;  %v849_v25 = vadd.f32 %v848_v15, %v834_v12  ;;  %v1096_v31 = vpack.c.bf16 %v727_v29, %v726_v28  ;;  %v840_v46 = vmul.f32 %v722_v19, %v722_v19 }
 0x142   : > { %v721_v18 = vld [vmem:[#allocation2 + $0x48] sm:$0xff]  ;;  %1106 = vst [vmem:[%s1485_s2 + $0x20] sm:$0xff] %v1086_v22   ;;  %1107 = vst [vmem:[%s1485_s2 + $0x28] sm:$0xff] %v1091_v30   ;;  %v841_v49 = vmul.f32 %v723_v20, %v723_v20  ;;  %v842_v52 = vmul.f32 %v724_v23, %v724_v23  ;;  %v843_v55 = vmul.f32 %v725_v27, %v725_v27 }
 0x143   : > { %v1081_v21 = vpack.c.bf16 %v721_v18, %v720_v14  ;;  %v850_v32 = vadd.f32 %v849_v25, %v835_v17  ;;  %v813_v33 = vadd.f32 %v812_v24, %v718_v9  ;;  %v729_v36 = vld [vmem:[#allocation2 + $0x28] sm:$0xff]  ;;  %1108 = vst [vmem:[%s1485_s2 + $0x30] sm:$0xff] %v1096_v31   ;;  %v839_v43 = vmul.f32 %v721_v18, %v721_v18 }
 0x144   : > { %v1101_v37 = vpack.c.bf16 %v729_v36, %v728_v35  ;;  %v844_v58 = vmul.f32 %v726_v28, %v726_v28  ;;  %v845_v61 = vmul.f32 %v727_v29, %v727_v29  ;;  %v846_v0 = vmul.f32 %v728_v35, %v728_v35 }
 0x145   : > { %1105 = vst [vmem:[%s1485_s2 + $0x18] sm:$0xff] %v1081_v21   ;;  %v814_v38 = vadd.f32 %v813_v33, %v719_v10  ;;  %v851_v39 = vadd.f32 %v850_v32, %v836_v26  ;;  %v847_v3 = vmul.f32 %v729_v36, %v729_v36 }
 0x146   : > { %1109 = vst [vmem:[%s1485_s2 + $0x38] sm:$0xff] %v1101_v37  }
 0x147   : > { %v852_v41 = vadd.f32 %v851_v39, %v837_v34  ;;  %v815_v42 = vadd.f32 %v814_v38, %v720_v14 }
 0x149   : > { %v816_v44 = vadd.f32 %v815_v42, %v721_v18  ;;  %v853_v45 = vadd.f32 %v852_v41, %v838_v40 }
 0x14b   : > { %v854_v47 = vadd.f32 %v853_v45, %v839_v43  ;;  %v817_v48 = vadd.f32 %v816_v44, %v722_v19 }
 0x14d   : > { %v818_v50 = vadd.f32 %v817_v48, %v723_v20  ;;  %v855_v51 = vadd.f32 %v854_v47, %v840_v46 }
 0x14f   : > { %v856_v53 = vadd.f32 %v855_v51, %v841_v49  ;;  %v819_v54 = vadd.f32 %v818_v50, %v724_v23 }
 0x151   : > { %v820_v56 = vadd.f32 %v819_v54, %v725_v27  ;;  %v857_v57 = vadd.f32 %v856_v53, %v842_v52 }
 0x153   : > { %v858_v59 = vadd.f32 %v857_v57, %v843_v55  ;;  %v821_v60 = vadd.f32 %v820_v56, %v726_v28 }
 0x155   : > { %v822_v62 = vadd.f32 %v821_v60, %v727_v29  ;;  %v859_v63 = vadd.f32 %v858_v59, %v844_v58 }
 0x157   : > { %v860_v1 = vadd.f32 %v859_v63, %v845_v61  ;;  %v823_v2 = vadd.f32 %v822_v62, %v728_v35 }
 0x159   : > { %v824_v4 = vadd.f32 %v823_v2, %v729_v36  ;;  %v861_v5 = vadd.f32 %v860_v1, %v846_v0 }
 0x15b   : > { %v825_v6 = vrot.slane %v824_v4, 4  ;;  %v862_v7 = vadd.f32 %v861_v5, %v847_v3 }
 0x15d   : > { %v826_v8 = vadd.f32 %v825_v6, %v824_v4  ;;  %v863_v9 = vrot.slane %v862_v7, 4 }
 0x15f   : > { %v827_v10 = vrot.slane %v826_v8, 2  ;;  %v864_v11 = vadd.f32 %v863_v9, %v862_v7 }
 0x161   : > { %v828_v12 = vadd.f32 %v827_v10, %v826_v8  ;;  %v865_v13 = vrot.slane %v864_v11, 2 }
 0x163   : > { %v829_v14 = vrot.slane %v828_v12, 1  ;;  %v866_v15 = vadd.f32 %v865_v13, %v864_v11 }
 0x165   : > { %v830_v16 = vadd.f32 %v829_v14, %v828_v12  ;;  %v867_v17 = vrot.slane %v866_v15, 1 }
 0x167   : > { %831 = vst [vmem:[%s1486_s3] sm:$0x1] %v830_v16  ;;  %v868_v18 = vadd.f32 %v867_v17, %v866_v15 }
 0x169   : > { %869 = vst [vmem:[%s1486_s3 + $0x1] sm:$0x1] %v868_v18 }
 0x16a PF: > { %s14_s16 = sadd.s32 1, %s1309_s16   ;;  %s1487_s12 = smov %s1297_s13 }
 0x16b   : > { %p11_p12 = scmp.ge.s32.totalorder %s14_s16, 6   ;;  %s1488_s13 = smov %s1367_s20 }
 0x16c   : > { %s1489_s14 = smov %s1305_s15  ;;  %s1490_s15 = smov %s1492_s17 }
 0x16d   :  { %13 = sbr.rel (!%p11_p12) target bundleno = 3 (0x3), region = 124 }

// kernel: _lambda_.25
= control target key start
LH: loop header
LB: loop body
LE: loop exit
PB: predicated region body
PF: predicated region fallthrough
CT: control target
= control target key end

     0   :  { %s2942_s12 = smov 0   ;;  %s2944_s13 = smov 0   ;;  %s3759_s0 = inlined_call_operand.vmem [shape: bf16[512,512], index: 0, kind: input, shape index: {}]   ;;  %s3760_s1 = inlined_call_operand.vmem [shape: bf16[512,128], index: 1, kind: input, shape index: {}]   ;;  %s3761_s2 = inlined_call_operand.vmem [shape: bf16[512,128], index: 2, kind: output, shape index: {0}]   ;;  %s3762_s3 = inlined_call_operand.vmem [shape: f32[8,128], index: 3, kind: output, shape index: {1}]  }
   0x1   :  { %s2946_s14 = smov 0   ;;  %s2948_s15 = smov 0  }
   0x2   :  { %s2950_s16 = smov 0  }
   0x3 LB: > { %s23_s17 = sadd.s32 1, %s2914_s15  ;;  %p42_p1 = scmp.ne.s32.totalorder %s2906_s13, %s2902_s12  ;;  %s2918_s16 = sphi %s2950_s16, %s14_s16   ;;  %s2914_s15 = sphi %s2948_s15, %s3766_s15   ;;  %s2910_s14 = sphi %s2946_s14, %s3765_s14   ;;  %s2906_s13 = sphi %s2944_s13, %s3764_s13   ;;  %s2902_s12 = sphi %s2942_s12, %s3763_s12  }
   0x4   : > { %p24_p0 = scmp.ge.s32.totalorder %s23_s17, 2  ;;  %p43_p2 = scmp.eq.s32.totalorder %s2918_s16, 0 }
   0x5   : > { %s35_s19 = sadd.s32 1, %s2906_s13  ;;  %p2279_p5 = scmp.ge.s32.totalorder %s2918_s16, 2 }
   0x6   : > { %s3768_s17 = smov (%p24_p0, %s23_s17), 0  ;;  %p44_p3 = por %p43_p2, %p42_p1 }
   0x7   : > { %s31_s18 = ssub.s32 %s2914_s15, %s3768_s17  ;;  %146 = sbr.rel (%p2279_p5) target bundleno = 48 (0x30), region = 16 }
   0x8   : > { %p33_p4 = scmp.eq.s32.totalorder %s31_s18, 0 }
   0xa   : > { %s2977_s20 = scalar_select %p33_p4, %s2906_s13, %s35_s19  }
   0xc   : > { %149 = sbr.rel (!%p44_p3) target bundleno = 48 (0x30), region = 20  ;;  %s151_s21 = sand.u32 (%p44_p3), 1, %s2906_s13  }
   0xd   : > { %s2438_s22 = sshll.u32 (%p44_p3), %s2914_s15, 3  ;;  %s2280_s23 = sshll.u32 (%p44_p3), %s151_s21, 9 }
   0xe   : > { %s2985_s26 = scalar_lea.vmem (%p44_p3), %s3759_s0, %s2438_s22  ;;  %s2990_s27 = scalar_lea.vmem (%p44_p3), [#allocation3], %s2280_s23 }
   0xf   : > { %v314_v0 = vld [vmem:[%s2985_s26] sm:$0xff] (%p44_p3)  ;;  %v316_v1 = vld [vmem:[%s2985_s26 + $0x10] sm:$0xff] (%p44_p3) }
  0x10   : > { %v318_v2 = vld [vmem:[%s2985_s26 + $0x20] sm:$0xff] (%p44_p3)  ;;  %315 = vst [vmem:[%s2990_s27] sm:$0xff] (%p44_p3), %v314_v0  ;;  %317 = vst [vmem:[%s2990_s27 + $0x8] sm:$0xff] (%p44_p3), %v316_v1  ;;  %v320_v3 = vld [vmem:[%s2985_s26 + $0x30] sm:$0xff] (%p44_p3) }
  0x11   : > { %319 = vst [vmem:[%s2990_s27 + $0x10] sm:$0xff] %v318_v2  ;;  %v322_v4 = vld [vmem:[%s2985_s26 + $0x40] sm:$0xff]  ;;  %v324_v5 = vld [vmem:[%s2985_s26 + $0x50] sm:$0xff]  ;;  %321 = vst [vmem:[%s2990_s27 + $0x18] sm:$0xff] %v320_v3 }
  0x12   : > { %323 = vst [vmem:[%s2990_s27 + $0x20] sm:$0xff] %v322_v4  ;;  %325 = vst [vmem:[%s2990_s27 + $0x28] sm:$0xff] %v324_v5  ;;  %v326_v6 = vld [vmem:[%s2985_s26 + $0x60] sm:$0xff]  ;;  %v328_v7 = vld [vmem:[%s2985_s26 + $0x70] sm:$0xff] }
  0x13   : > { %v330_v8 = vld [vmem:[%s2985_s26 + $0x80] sm:$0xff]  ;;  %327 = vst [vmem:[%s2990_s27 + $0x30] sm:$0xff] %v326_v6  ;;  %329 = vst [vmem:[%s2990_s27 + $0x38] sm:$0xff] %v328_v7  ;;  %v332_v9 = vld [vmem:[%s2985_s26 + $0x90] sm:$0xff] }
  0x14   : > { %331 = vst [vmem:[%s2990_s27 + $0x40] sm:$0xff] %v330_v8  ;;  %v334_v10 = vld [vmem:[%s2985_s26 + $0xa0] sm:$0xff]  ;;  %v336_v11 = vld [vmem:[%s2985_s26 + $0xb0] sm:$0xff]  ;;  %333 = vst [vmem:[%s2990_s27 + $0x48] sm:$0xff] %v332_v9 }
  0x15   : > { %335 = vst [vmem:[%s2990_s27 + $0x50] sm:$0xff] %v334_v10  ;;  %337 = vst [vmem:[%s2990_s27 + $0x58] sm:$0xff] %v336_v11  ;;  %v338_v12 = vld [vmem:[%s2985_s26 + $0xc0] sm:$0xff]  ;;  %v340_v13 = vld [vmem:[%s2985_s26 + $0xd0] sm:$0xff] }
  0x16   : > { %v342_v14 = vld [vmem:[%s2985_s26 + $0xe0] sm:$0xff]  ;;  %339 = vst [vmem:[%s2990_s27 + $0x60] sm:$0xff] %v338_v12  ;;  %341 = vst [vmem:[%s2990_s27 + $0x68] sm:$0xff] %v340_v13  ;;  %v344_v15 = vld [vmem:[%s2985_s26 + $0xf0] sm:$0xff] }
  0x17   : > { %343 = vst [vmem:[%s2990_s27 + $0x70] sm:$0xff] %v342_v14  ;;  %v346_v16 = vld [vmem:[%s2985_s26 + $0x100] sm:$0xff]  ;;  %v348_v17 = vld [vmem:[%s2985_s26 + $0x110] sm:$0xff]  ;;  %345 = vst [vmem:[%s2990_s27 + $0x78] sm:$0xff] %v344_v15 }
  0x18   : > { %347 = vst [vmem:[%s2990_s27 + $0x80] sm:$0xff] %v346_v16  ;;  %349 = vst [vmem:[%s2990_s27 + $0x88] sm:$0xff] %v348_v17  ;;  %v350_v18 = vld [vmem:[%s2985_s26 + $0x120] sm:$0xff]  ;;  %v352_v19 = vld [vmem:[%s2985_s26 + $0x130] sm:$0xff] }
  0x19   : > { %v354_v20 = vld [vmem:[%s2985_s26 + $0x140] sm:$0xff]  ;;  %351 = vst [vmem:[%s2990_s27 + $0x90] sm:$0xff] %v350_v18  ;;  %353 = vst [vmem:[%s2990_s27 + $0x98] sm:$0xff] %v352_v19  ;;  %v356_v21 = vld [vmem:[%s2985_s26 + $0x150] sm:$0xff] }
  0x1a   : > { %355 = vst [vmem:[%s2990_s27 + $0xa0] sm:$0xff] %v354_v20  ;;  %v358_v22 = vld [vmem:[%s2985_s26 + $0x160] sm:$0xff]  ;;  %v360_v23 = vld [vmem:[%s2985_s26 + $0x170] sm:$0xff]  ;;  %357 = vst [vmem:[%s2990_s27 + $0xa8] sm:$0xff] %v356_v21 }
  0x1b   : > { %359 = vst [vmem:[%s2990_s27 + $0xb0] sm:$0xff] %v358_v22  ;;  %361 = vst [vmem:[%s2990_s27 + $0xb8] sm:$0xff] %v360_v23  ;;  %v362_v24 = vld [vmem:[%s2985_s26 + $0x180] sm:$0xff]  ;;  %v364_v25 = vld [vmem:[%s2985_s26 + $0x190] sm:$0xff] }
  0x1c   : > { %v366_v26 = vld [vmem:[%s2985_s26 + $0x1a0] sm:$0xff]  ;;  %363 = vst [vmem:[%s2990_s27 + $0xc0] sm:$0xff] %v362_v24  ;;  %365 = vst [vmem:[%s2990_s27 + $0xc8] sm:$0xff] %v364_v25  ;;  %v368_v27 = vld [vmem:[%s2985_s26 + $0x1b0] sm:$0xff] }
  0x1d   : > { %367 = vst [vmem:[%s2990_s27 + $0xd0] sm:$0xff] %v366_v26  ;;  %v370_v28 = vld [vmem:[%s2985_s26 + $0x1c0] sm:$0xff]  ;;  %v372_v29 = vld [vmem:[%s2985_s26 + $0x1d0] sm:$0xff]  ;;  %369 = vst [vmem:[%s2990_s27 + $0xd8] sm:$0xff] %v368_v27 }
  0x1e   : > { %371 = vst [vmem:[%s2990_s27 + $0xe0] sm:$0xff] %v370_v28  ;;  %373 = vst [vmem:[%s2990_s27 + $0xe8] sm:$0xff] %v372_v29  ;;  %v374_v30 = vld [vmem:[%s2985_s26 + $0x1e0] sm:$0xff]  ;;  %v376_v31 = vld [vmem:[%s2985_s26 + $0x1f0] sm:$0xff] }
  0x1f   : > { %v378_v32 = vld [vmem:[%s2985_s26 + $0x200] sm:$0xff]  ;;  %375 = vst [vmem:[%s2990_s27 + $0xf0] sm:$0xff] %v374_v30  ;;  %377 = vst [vmem:[%s2990_s27 + $0xf8] sm:$0xff] %v376_v31  ;;  %v380_v33 = vld [vmem:[%s2985_s26 + $0x210] sm:$0xff] }
  0x20   : > { %379 = vst [vmem:[%s2990_s27 + $0x100] sm:$0xff] %v378_v32  ;;  %v382_v34 = vld [vmem:[%s2985_s26 + $0x220] sm:$0xff]  ;;  %v384_v35 = vld [vmem:[%s2985_s26 + $0x230] sm:$0xff]  ;;  %381 = vst [vmem:[%s2990_s27 + $0x108] sm:$0xff] %v380_v33 }
  0x21   : > { %383 = vst [vmem:[%s2990_s27 + $0x110] sm:$0xff] %v382_v34  ;;  %385 = vst [vmem:[%s2990_s27 + $0x118] sm:$0xff] %v384_v35  ;;  %v386_v36 = vld [vmem:[%s2985_s26 + $0x240] sm:$0xff]  ;;  %v388_v37 = vld [vmem:[%s2985_s26 + $0x250] sm:$0xff] }
  0x22   : > { %v390_v38 = vld [vmem:[%s2985_s26 + $0x260] sm:$0xff]  ;;  %387 = vst [vmem:[%s2990_s27 + $0x120] sm:$0xff] %v386_v36  ;;  %389 = vst [vmem:[%s2990_s27 + $0x128] sm:$0xff] %v388_v37  ;;  %v392_v39 = vld [vmem:[%s2985_s26 + $0x270] sm:$0xff] }
  0x23   : > { %391 = vst [vmem:[%s2990_s27 + $0x130] sm:$0xff] %v390_v38  ;;  %v394_v40 = vld [vmem:[%s2985_s26 + $0x280] sm:$0xff]  ;;  %v396_v41 = vld [vmem:[%s2985_s26 + $0x290] sm:$0xff]  ;;  %393 = vst [vmem:[%s2990_s27 + $0x138] sm:$0xff] %v392_v39 }
  0x24   : > { %395 = vst [vmem:[%s2990_s27 + $0x140] sm:$0xff] %v394_v40  ;;  %397 = vst [vmem:[%s2990_s27 + $0x148] sm:$0xff] %v396_v41  ;;  %v398_v42 = vld [vmem:[%s2985_s26 + $0x2a0] sm:$0xff]  ;;  %v400_v43 = vld [vmem:[%s2985_s26 + $0x2b0] sm:$0xff] }
  0x25   : > { %v402_v44 = vld [vmem:[%s2985_s26 + $0x2c0] sm:$0xff]  ;;  %399 = vst [vmem:[%s2990_s27 + $0x150] sm:$0xff] %v398_v42  ;;  %401 = vst [vmem:[%s2990_s27 + $0x158] sm:$0xff] %v400_v43  ;;  %v404_v45 = vld [vmem:[%s2985_s26 + $0x2d0] sm:$0xff] }
  0x26   : > { %403 = vst [vmem:[%s2990_s27 + $0x160] sm:$0xff] %v402_v44  ;;  %v406_v46 = vld [vmem:[%s2985_s26 + $0x2e0] sm:$0xff]  ;;  %v408_v47 = vld [vmem:[%s2985_s26 + $0x2f0] sm:$0xff]  ;;  %405 = vst [vmem:[%s2990_s27 + $0x168] sm:$0xff] %v404_v45 }
  0x27   : > { %407 = vst [vmem:[%s2990_s27 + $0x170] sm:$0xff] %v406_v46  ;;  %409 = vst [vmem:[%s2990_s27 + $0x178] sm:$0xff] %v408_v47  ;;  %v410_v48 = vld [vmem:[%s2985_s26 + $0x300] sm:$0xff]  ;;  %v412_v49 = vld [vmem:[%s2985_s26 + $0x310] sm:$0xff] }
  0x28   : > { %v414_v50 = vld [vmem:[%s2985_s26 + $0x320] sm:$0xff]  ;;  %411 = vst [vmem:[%s2990_s27 + $0x180] sm:$0xff] %v410_v48  ;;  %413 = vst [vmem:[%s2990_s27 + $0x188] sm:$0xff] %v412_v49  ;;  %v416_v51 = vld [vmem:[%s2985_s26 + $0x330] sm:$0xff] }
  0x29   : > { %415 = vst [vmem:[%s2990_s27 + $0x190] sm:$0xff] %v414_v50  ;;  %v418_v52 = vld [vmem:[%s2985_s26 + $0x340] sm:$0xff]  ;;  %v420_v53 = vld [vmem:[%s2985_s26 + $0x350] sm:$0xff]  ;;  %417 = vst [vmem:[%s2990_s27 + $0x198] sm:$0xff] %v416_v51 }
  0x2a   : > { %419 = vst [vmem:[%s2990_s27 + $0x1a0] sm:$0xff] %v418_v52  ;;  %421 = vst [vmem:[%s2990_s27 + $0x1a8] sm:$0xff] %v420_v53  ;;  %v422_v54 = vld [vmem:[%s2985_s26 + $0x360] sm:$0xff]  ;;  %v424_v55 = vld [vmem:[%s2985_s26 + $0x370] sm:$0xff] }
  0x2b   : > { %v426_v56 = vld [vmem:[%s2985_s26 + $0x380] sm:$0xff]  ;;  %423 = vst [vmem:[%s2990_s27 + $0x1b0] sm:$0xff] %v422_v54  ;;  %425 = vst [vmem:[%s2990_s27 + $0x1b8] sm:$0xff] %v424_v55  ;;  %v428_v57 = vld [vmem:[%s2985_s26 + $0x390] sm:$0xff] }
  0x2c   : > { %427 = vst [vmem:[%s2990_s27 + $0x1c0] sm:$0xff] %v426_v56  ;;  %v430_v58 = vld [vmem:[%s2985_s26 + $0x3a0] sm:$0xff]  ;;  %v432_v59 = vld [vmem:[%s2985_s26 + $0x3b0] sm:$0xff]  ;;  %429 = vst [vmem:[%s2990_s27 + $0x1c8] sm:$0xff] %v428_v57 }
  0x2d   : > { %431 = vst [vmem:[%s2990_s27 + $0x1d0] sm:$0xff] %v430_v58  ;;  %433 = vst [vmem:[%s2990_s27 + $0x1d8] sm:$0xff] %v432_v59  ;;  %v434_v60 = vld [vmem:[%s2985_s26 + $0x3c0] sm:$0xff]  ;;  %v436_v61 = vld [vmem:[%s2985_s26 + $0x3d0] sm:$0xff] }
  0x2e   : > { %v438_v62 = vld [vmem:[%s2985_s26 + $0x3e0] sm:$0xff]  ;;  %435 = vst [vmem:[%s2990_s27 + $0x1e0] sm:$0xff] %v434_v60  ;;  %437 = vst [vmem:[%s2990_s27 + $0x1e8] sm:$0xff] %v436_v61  ;;  %v440_v63 = vld [vmem:[%s2985_s26 + $0x3f0] sm:$0xff] }
  0x2f   : > { %439 = vst [vmem:[%s2990_s27 + $0x1f0] sm:$0xff] %v438_v62  ;;  %441 = vst [vmem:[%s2990_s27 + $0x1f8] sm:$0xff] %v440_v63 }
  0x30 PF: > { %p2283_p6 = scmp.ge.s32.totalorder %s2918_s16, 1  ;;  %p455_p7 = scmp.lt.s32.totalorder %s2918_s16, 3 }
  0x32   : > { %p456_p8 = pnand %p2283_p6, %p455_p7 }
  0x33   : > { %s462_s28 = sand.u32 (!%p456_p8), 1, %s2902_s12   ;;  %s2285_s29 = sshll.u32 (!%p456_p8), %s2910_s14, 5 }
  0x34   : > { %459 = sbr.rel (%p456_p8) target bundleno = 623 (0x26f), region = 62  ;;  %s2284_s30 = sshll.u32 (!%p456_p8), %s462_s28, 9 }
  0x35   : > { %p497_p9 = scmp.lt.s32.totalorder (!%p456_p8), %s2285_s29, 63  ;;  %s3126_s8 = scalar_lea.vmem (!%p456_p8), [#allocation3], %s2284_s30 }
  0x36   : > { %p2287_p10 = scmp.ne.s32.totalorder (!%p456_p8), %s2910_s14, 0 }
  0x39   : > { %s3770_s29 = smov (!%p497_p9, %s2285_s29), 63  ;;  %516 = sbr.rel (%p2287_p10) target bundleno = 95 (0x5f), region = 70 }
  0x3a   : > { %s2286_s4 = sshll.u32 %s3770_s29, 2 }
  0x3b   : > { %s3124_s7 = scalar_lea.vmem %s3760_s1, %s2286_s4 }
  0x3e   : > { %v2920_v0 = vmov 0.0  }
  0x3f   : > { %517 = vst [vmem:[#allocation2 + $0xb0] sm:$0xff] %v2920_v0  ;;  %518 = vst [vmem:[#allocation2 + $0x1b0] sm:$0xff] %v2920_v0 }
  0x40   : > { %519 = vst [vmem:[#allocation2 + $0xd8] sm:$0xff] %v2920_v0  ;;  %520 = vst [vmem:[#allocation2 + $0x18] sm:$0xff] %v2920_v0 }
  0x41   : > { %521 = vst [vmem:[#allocation2 + $0x50] sm:$0xff] %v2920_v0  ;;  %522 = vst [vmem:[#allocation2 + $0x168] sm:$0xff] %v2920_v0 }
  0x42   : > { %523 = vst [vmem:[#allocation2 + $0x130] sm:$0xff] %v2920_v0  ;;  %524 = vst [vmem:[#allocation2 + $0x48] sm:$0xff] %v2920_v0 }
  0x43   : > { %525 = vst [vmem:[#allocation2 + $0x180] sm:$0xff] %v2920_v0  ;;  %526 = vst [vmem:[#allocation2 + $0x110] sm:$0xff] %v2920_v0 }
  0x44   : > { %527 = vst [vmem:[#allocation2 + $0x118] sm:$0xff] %v2920_v0  ;;  %528 = vst [vmem:[#allocation2 + $0x98] sm:$0xff] %v2920_v0 }
  0x45   : > { %529 = vst [vmem:[#allocation2 + $0x120] sm:$0xff] %v2920_v0  ;;  %530 = vst [vmem:[#allocation2 + $0x150] sm:$0xff] %v2920_v0 }
  0x46   : > { %531 = vst [vmem:[#allocation2 + $0x108] sm:$0xff] %v2920_v0  ;;  %532 = vst [vmem:[#allocation2 + $0x60] sm:$0xff] %v2920_v0 }
  0x47   : > { %533 = vst [vmem:[#allocation2 + $0xe0] sm:$0xff] %v2920_v0  ;;  %534 = vst [vmem:[#allocation2 + $0x188] sm:$0xff] %v2920_v0 }
  0x48   : > { %535 = vst [vmem:[#allocation2 + $0x138] sm:$0xff] %v2920_v0  ;;  %536 = vst [vmem:[#allocation2 + $0x140] sm:$0xff] %v2920_v0 }
  0x49   : > { %537 = vst [vmem:[#allocation2 + $0x80] sm:$0xff] %v2920_v0  ;;  %538 = vst [vmem:[#allocation2 + $0x1a8] sm:$0xff] %v2920_v0 }
  0x4a   : > { %539 = vst [vmem:[#allocation2 + $0x1b8] sm:$0xff] %v2920_v0  ;;  %540 = vst [vmem:[#allocation2 + $0x28] sm:$0xff] %v2920_v0 }
  0x4b   : > { %541 = vst [vmem:[#allocation2 + $0x1e8] sm:$0xff] %v2920_v0  ;;  %542 = vst [vmem:[#allocation2 + $0xf8] sm:$0xff] %v2920_v0 }
  0x4c   : > { %543 = vst [vmem:[#allocation2 + $0x160] sm:$0xff] %v2920_v0  ;;  %544 = vst [vmem:[#allocation2 + $0x30] sm:$0xff] %v2920_v0 }
  0x4d   : > { %545 = vst [vmem:[#allocation2 + $0x1e0] sm:$0xff] %v2920_v0  ;;  %546 = vst [vmem:[#allocation2] sm:$0xff] %v2920_v0 }
  0x4e   : > { %547 = vst [vmem:[#allocation2 + $0xf0] sm:$0xff] %v2920_v0  ;;  %548 = vst [vmem:[#allocation2 + $0x8] sm:$0xff] %v2920_v0 }
  0x4f   : > { %549 = vst [vmem:[#allocation2 + $0x148] sm:$0xff] %v2920_v0  ;;  %550 = vst [vmem:[#allocation2 + $0x1d0] sm:$0xff] %v2920_v0 }
  0x50   : > { %551 = vst [vmem:[#allocation2 + $0x100] sm:$0xff] %v2920_v0  ;;  %552 = vst [vmem:[#allocation2 + $0xc8] sm:$0xff] %v2920_v0 }
  0x51   : > { %553 = vst [vmem:[#allocation2 + $0x40] sm:$0xff] %v2920_v0  ;;  %554 = vst [vmem:[#allocation2 + $0x1f8] sm:$0xff] %v2920_v0 }
  0x52   : > { %555 = vst [vmem:[#allocation2 + $0x20] sm:$0xff] %v2920_v0  ;;  %556 = vst [vmem:[#allocation2 + $0x128] sm:$0xff] %v2920_v0 }
  0x53   : > { %557 = vst [vmem:[#allocation2 + $0x1a0] sm:$0xff] %v2920_v0  ;;  %558 = vst [vmem:[#allocation2 + $0x1f0] sm:$0xff] %v2920_v0 }
  0x54   : > { %559 = vst [vmem:[#allocation2 + $0xe8] sm:$0xff] %v2920_v0  ;;  %560 = vst [vmem:[#allocation2 + $0x78] sm:$0xff] %v2920_v0 }
  0x55   : > { %561 = vst [vmem:[#allocation2 + $0x70] sm:$0xff] %v2920_v0  ;;  %562 = vst [vmem:[#allocation2 + $0x90] sm:$0xff] %v2920_v0 }
  0x56   : > { %563 = vst [vmem:[#allocation2 + $0x1d8] sm:$0xff] %v2920_v0  ;;  %564 = vst [vmem:[#allocation2 + $0xd0] sm:$0xff] %v2920_v0 }
  0x57   : > { %565 = vst [vmem:[#allocation2 + $0xb8] sm:$0xff] %v2920_v0  ;;  %566 = vst [vmem:[#allocation2 + $0x88] sm:$0xff] %v2920_v0 }
  0x58   : > { %567 = vst [vmem:[#allocation2 + $0xa8] sm:$0xff] %v2920_v0  ;;  %568 = vst [vmem:[#allocation2 + $0x1c8] sm:$0xff] %v2920_v0 }
  0x59   : > { %569 = vst [vmem:[#allocation2 + $0x170] sm:$0xff] %v2920_v0  ;;  %570 = vst [vmem:[#allocation2 + $0x178] sm:$0xff] %v2920_v0 }
  0x5a   : > { %571 = vst [vmem:[#allocation2 + $0x68] sm:$0xff] %v2920_v0  ;;  %572 = vst [vmem:[#allocation2 + $0x190] sm:$0xff] %v2920_v0 }
  0x5b   : > { %573 = vst [vmem:[#allocation2 + $0x198] sm:$0xff] %v2920_v0  ;;  %574 = vst [vmem:[#allocation2 + $0x38] sm:$0xff] %v2920_v0 }
  0x5c   : > { %575 = vst [vmem:[#allocation2 + $0xc0] sm:$0xff] %v2920_v0  ;;  %576 = vst [vmem:[#allocation2 + $0x1c0] sm:$0xff] %v2920_v0 }
  0x5d   : > { %577 = vst [vmem:[#allocation2 + $0x158] sm:$0xff] %v2920_v0  ;;  %578 = vst [vmem:[#allocation2 + $0x10] sm:$0xff] %v2920_v0 }
  0x5e   : > { %579 = vst [vmem:[#allocation2 + $0x58] sm:$0xff] %v2920_v0  ;;  %580 = vst [vmem:[#allocation2 + $0xa0] sm:$0xff] %v2920_v0 }
  0x5f PF: > { %v2768_v1 = vld [vmem:[%s3124_s7 + $0x38] sm:$0xff]   ;;  %v2921_v2 = vmov 0   ;;  %v2769_v3 = vld [vmem:[%s3124_s7 + $0x30] sm:$0xff]   ;;  %v2770_v4 = vld [vmem:[%s3124_s7 + $0x28] sm:$0xff]   ;;  %p2368_p11 = scmp.ne.s32.totalorder %s2910_s14, 1 }
  0x60   : > { %1157 = vmatprep.subr.bf16.mxu0 %v2921_v2  ;;  %2694 = vmatprep.subr.bf16.mxu1 %v2921_v2  ;;  %v2771_v5 = vld [vmem:[%s3124_s7 + $0x20] sm:$0xff]   ;;  %v2772_v6 = vld [vmem:[%s3124_s7 + $0x18] sm:$0xff]   ;;  %v2773_v8 = vld [vmem:[%s3124_s7 + $0x10] sm:$0xff]  }
  0x61   : > { %1158 = vmatpush1.bf16.msra.mxu0 %v2768_v1  ;;  %2710 = vmatpush1.bf16.msra.mxu1 %v2768_v1  ;;  %v2786_v7 = vld [vmem:[%s3126_s8 + $0x4] ss:$8 sps:$4 sm:$0xff]   ;;  %v2776_v12 = vld [vmem:[%s3124_s7 + $0x78] sm:$0xff]   ;;  %v2777_v13 = vld [vmem:[%s3124_s7 + $0x70] sm:$0xff]  }
  0x62   : > { %1159 = vmatprep.subr.bf16.mxu0 %v2921_v2  ;;  %2695 = vmatprep.subr.bf16.mxu1 %v2921_v2  ;;  %v2789_v9 = vld [vmem:[%s3126_s8 + $0x104] ss:$8 sps:$4 sm:$0xff]   ;;  %v2780_v16 = vld [vmem:[%s3124_s7 + $0x58] sm:$0xff]   ;;  %v2781_v17 = vld [vmem:[%s3124_s7 + $0x50] sm:$0xff]  }
  0x63   : > { %1189 = vmatprep.mubr.bf16.mxu0 %v2786_v7  ;;  %1317 = vmatprep.mubr.bf16.mxu1 %v2789_v9  ;;  %v2774_v10 = vld [vmem:[%s3124_s7 + $0x8] sm:$0xff]   ;;  %v2775_v11 = vld [vmem:[%s3124_s7] sm:$0xff]   ;;  %v2790_v22 = vld [vmem:[%s3126_s8 + $0x14] ss:$8 sps:$4 sm:$0xff]  }
  0x64   : > { %v2778_v14 = vld [vmem:[%s3124_s7 + $0x68] sm:$0xff]   ;;  %v2779_v15 = vld [vmem:[%s3124_s7 + $0x60] sm:$0xff]   ;;  %v2792_v23 = vld [vmem:[%s3126_s8 + $0x114] ss:$8 sps:$4 sm:$0xff]  }
  0x65   : > { %1160 = vmatpush1.bf16.msra.mxu0 %v2769_v3  ;;  %2711 = vmatpush1.bf16.msra.mxu1 %v2769_v3  ;;  %v2782_v18 = vld [vmem:[%s3124_s7 + $0x48] sm:$0xff]   ;;  %v2783_v19 = vld [vmem:[%s3124_s7 + $0x40] sm:$0xff]   ;;  %v2794_v24 = vld [vmem:[%s3126_s8 + $0x10] ss:$8 sps:$4 sm:$0xff]  }
  0x66   : > { %1161 = vmatprep.subr.bf16.mxu0 %v2921_v2  ;;  %2696 = vmatprep.subr.bf16.mxu1 %v2921_v2  ;;  %v2784_v20 = vld [vmem:[%s3126_s8] ss:$8 sps:$4 sm:$0xff]   ;;  %v2795_v25 = vld [vmem:[%s3126_s8 + $0x110] ss:$8 sps:$4 sm:$0xff]   ;;  %v2796_v26 = vld [vmem:[%s3126_s8 + $0x24] ss:$8 sps:$4 sm:$0xff]  }
  0x67   : > { %v2787_v21 = vld [vmem:[%s3126_s8 + $0x100] ss:$8 sps:$4 sm:$0xff]   ;;  %v2798_v27 = vld [vmem:[%s3126_s8 + $0x124] ss:$8 sps:$4 sm:$0xff]   ;;  %v2802_v30 = vld [vmem:[%s3126_s8 + $0x34] ss:$8 sps:$4 sm:$0xff]  }
  0x68   : > { %v2800_v28 = vld [vmem:[%s3126_s8 + $0x20] ss:$8 sps:$4 sm:$0xff]   ;;  %v2804_v31 = vld [vmem:[%s3126_s8 + $0x134] ss:$8 sps:$4 sm:$0xff]   ;;  %v2806_v32 = vld [vmem:[%s3126_s8 + $0x30] ss:$8 sps:$4 sm:$0xff]  }
  0x69   : > { %1162 = vmatpush1.bf16.msra.mxu0 %v2770_v4  ;;  %2712 = vmatpush1.bf16.msra.mxu1 %v2770_v4  ;;  %v2801_v29 = vld [vmem:[%s3126_s8 + $0x120] ss:$8 sps:$4 sm:$0xff]   ;;  %v2807_v33 = vld [vmem:[%s3126_s8 + $0x130] ss:$8 sps:$4 sm:$0xff]   ;;  %v2808_v34 = vld [vmem:[%s3126_s8 + $0x44] ss:$8 sps:$4 sm:$0xff]  }
  0x6a   : > { %1163 = vmatprep.subr.bf16.mxu0 %v2921_v2  ;;  %2697 = vmatprep.subr.bf16.mxu1 %v2921_v2  ;;  %v2810_v35 = vld [vmem:[%s3126_s8 + $0x144] ss:$8 sps:$4 sm:$0xff]   ;;  %v2812_v36 = vld [vmem:[%s3126_s8 + $0x40] ss:$8 sps:$4 sm:$0xff]   ;;  %v2814_v38 = vld [vmem:[%s3126_s8 + $0x54] ss:$8 sps:$4 sm:$0xff]  }
  0x6b   : > { %v2813_v37 = vld [vmem:[%s3126_s8 + $0x140] ss:$8 sps:$4 sm:$0xff]   ;;  %v2816_v39 = vld [vmem:[%s3126_s8 + $0x154] ss:$8 sps:$4 sm:$0xff]   ;;  %v2818_v40 = vld [vmem:[%s3126_s8 + $0x50] ss:$8 sps:$4 sm:$0xff]  }
  0x6c   : > { %v2819_v41 = vld [vmem:[%s3126_s8 + $0x150] ss:$8 sps:$4 sm:$0xff]   ;;  %v2820_v42 = vld [vmem:[%s3126_s8 + $0x64] ss:$8 sps:$4 sm:$0xff]   ;;  %v2824_v44 = vld [vmem:[%s3126_s8 + $0x60] ss:$8 sps:$4 sm:$0xff]  }
  0x6d   : > { %1164 = vmatpush1.bf16.msra.mxu0 %v2771_v5  ;;  %2713 = vmatpush1.bf16.msra.mxu1 %v2771_v5  ;;  %v2822_v43 = vld [vmem:[%s3126_s8 + $0x164] ss:$8 sps:$4 sm:$0xff]   ;;  %v2825_v45 = vld [vmem:[%s3126_s8 + $0x160] ss:$8 sps:$4 sm:$0xff]   ;;  %v2826_v46 = vld [vmem:[%s3126_s8 + $0x74] ss:$8 sps:$4 sm:$0xff]  }
  0x6e   : > { %1165 = vmatprep.subr.bf16.mxu0 %v2921_v2  ;;  %2698 = vmatprep.subr.bf16.mxu1 %v2921_v2  ;;  %v2828_v47 = vld [vmem:[%s3126_s8 + $0x174] ss:$8 sps:$4 sm:$0xff]   ;;  %v2830_v48 = vld [vmem:[%s3126_s8 + $0x70] ss:$8 sps:$4 sm:$0xff]   ;;  %v2832_v50 = vld [vmem:[%s3126_s8 + $0x84] ss:$8 sps:$4 sm:$0xff]  }
  0x6f   : > { %v2831_v49 = vld [vmem:[%s3126_s8 + $0x170] ss:$8 sps:$4 sm:$0xff]   ;;  %v2834_v51 = vld [vmem:[%s3126_s8 + $0x184] ss:$8 sps:$4 sm:$0xff]   ;;  %v2836_v52 = vld [vmem:[%s3126_s8 + $0x80] ss:$8 sps:$4 sm:$0xff]  }
  0x70   : > { %v2837_v53 = vld [vmem:[%s3126_s8 + $0x180] ss:$8 sps:$4 sm:$0xff]   ;;  %v2838_v54 = vld [vmem:[%s3126_s8 + $0x94] ss:$8 sps:$4 sm:$0xff]   ;;  %v2842_v56 = vld [vmem:[%s3126_s8 + $0x90] ss:$8 sps:$4 sm:$0xff]  }
  0x71   : > { %1166 = vmatpush1.bf16.msra.mxu0 %v2772_v6  ;;  %2714 = vmatpush1.bf16.msra.mxu1 %v2772_v6  ;;  %v2840_v55 = vld [vmem:[%s3126_s8 + $0x194] ss:$8 sps:$4 sm:$0xff]   ;;  %v2843_v57 = vld [vmem:[%s3126_s8 + $0x190] ss:$8 sps:$4 sm:$0xff]   ;;  %v2844_v58 = vld [vmem:[%s3126_s8 + $0xa4] ss:$8 sps:$4 sm:$0xff]  }
  0x72   : > { %1167 = vmatprep.subr.bf16.mxu0 %v2921_v2  ;;  %2699 = vmatprep.subr.bf16.mxu1 %v2921_v2  ;;  %v2846_v59 = vld [vmem:[%s3126_s8 + $0x1a4] ss:$8 sps:$4 sm:$0xff]   ;;  %v2848_v60 = vld [vmem:[%s3126_s8 + $0xa0] ss:$8 sps:$4 sm:$0xff]   ;;  %v2850_v62 = vld [vmem:[%s3126_s8 + $0xb4] ss:$8 sps:$4 sm:$0xff]  }
  0x73   : > { %v2849_v61 = vld [vmem:[%s3126_s8 + $0x1a0] ss:$8 sps:$4 sm:$0xff]   ;;  %v2852_v63 = vld [vmem:[%s3126_s8 + $0x1b4] ss:$8 sps:$4 sm:$0xff]   ;;  %v2854_v0 = vld [vmem:[%s3126_s8 + $0xb0] ss:$8 sps:$4 sm:$0xff]  }
  0x74   : > { %v2855_v1 = vld [vmem:[%s3126_s8 + $0x1b0] ss:$8 sps:$4 sm:$0xff]   ;;  %v2858_v3 = vld [vmem:[%s3126_s8 + $0x1c4] ss:$8 sps:$4 sm:$0xff]   ;;  %v2860_v4 = vld [vmem:[%s3126_s8 + $0xc0] ss:$8 sps:$4 sm:$0xff]  }
  0x75   : > { %1168 = vmatpush1.bf16.msra.mxu0 %v2773_v8  ;;  %2715 = vmatpush1.bf16.msra.mxu1 %v2773_v8  ;;  %v2861_v5 = vld [vmem:[%s3126_s8 + $0x1c0] ss:$8 sps:$4 sm:$0xff]   ;;  %v2862_v6 = vld [vmem:[%s3126_s8 + $0xd4] ss:$8 sps:$4 sm:$0xff]   ;;  %v2866_v8 = vld [vmem:[%s3126_s8 + $0xd0] ss:$8 sps:$4 sm:$0xff]  }
  0x76   : > { %1169 = vmatprep.subr.bf16.mxu0 %v2921_v2  ;;  %2700 = vmatprep.subr.bf16.mxu1 %v2921_v2  ;;  %v2864_v7 = vld [vmem:[%s3126_s8 + $0x1d4] ss:$8 sps:$4 sm:$0xff]   ;;  %v2867_v9 = vld [vmem:[%s3126_s8 + $0x1d0] ss:$8 sps:$4 sm:$0xff]  }
  0x79   : > { %1170 = vmatpush1.bf16.msra.mxu0 %v2774_v10  ;;  %2716 = vmatpush1.bf16.msra.mxu1 %v2774_v10  ;;  %v2868_v10 = vld [vmem:[%s3126_s8 + $0xe4] ss:$8 sps:$4 sm:$0xff]  }
  0x7a   : > { %1171 = vmatprep.subr.bf16.mxu0 %v2921_v2  ;;  %2701 = vmatprep.subr.bf16.mxu1 %v2921_v2 }
  0x7d   : > { %1172 = vmatpush1.bf16.msra.mxu0 %v2775_v11  ;;  %2717 = vmatpush1.bf16.msra.mxu1 %v2775_v11  ;;  %v2870_v11 = vld [vmem:[%s3126_s8 + $0x1e4] ss:$8 sps:$4 sm:$0xff]  }
  0x7e   : > { %1173 = vmatprep.subr.bf16.mxu0 %v2921_v2  ;;  %2702 = vmatprep.subr.bf16.mxu1 %v2921_v2 }
  0x81   : > { %1174 = vmatpush2.bf16.msra.mxu0 %v2776_v12  ;;  %2718 = vmatpush2.bf16.msra.mxu1 %v2776_v12  ;;  %v2872_v12 = vld [vmem:[%s3126_s8 + $0xe0] ss:$8 sps:$4 sm:$0xff]  }
  0x82   : > { %1175 = vmatprep.subr.bf16.mxu0 %v2921_v2  ;;  %2703 = vmatprep.subr.bf16.mxu1 %v2921_v2 }
  0x85   : > { %1176 = vmatpush2.bf16.msra.mxu0 %v2777_v13  ;;  %2719 = vmatpush2.bf16.msra.mxu1 %v2777_v13  ;;  %v2873_v13 = vld [vmem:[%s3126_s8 + $0x1e0] ss:$8 sps:$4 sm:$0xff]  }
  0x86   : > { %1177 = vmatprep.subr.bf16.mxu0 %v2921_v2  ;;  %2704 = vmatprep.subr.bf16.mxu1 %v2921_v2 }
  0x89   : > { %1178 = vmatpush2.bf16.msra.mxu0 %v2778_v14  ;;  %2720 = vmatpush2.bf16.msra.mxu1 %v2778_v14  ;;  %v2874_v14 = vld [vmem:[%s3126_s8 + $0xf4] ss:$8 sps:$4 sm:$0xff]  }
  0x8a   : > { %1179 = vmatprep.subr.bf16.mxu0 %v2921_v2  ;;  %2705 = vmatprep.subr.bf16.mxu1 %v2921_v2 }
  0x8d   : > { %1180 = vmatpush2.bf16.msra.mxu0 %v2779_v15  ;;  %2721 = vmatpush2.bf16.msra.mxu1 %v2779_v15  ;;  %v2876_v15 = vld [vmem:[%s3126_s8 + $0x1f4] ss:$8 sps:$4 sm:$0xff]  }
  0x8e   : > { %1181 = vmatprep.subr.bf16.mxu0 %v2921_v2  ;;  %2706 = vmatprep.subr.bf16.mxu1 %v2921_v2 }
  0x91   : > { %1182 = vmatpush2.bf16.msra.mxu0 %v2780_v16  ;;  %2722 = vmatpush2.bf16.msra.mxu1 %v2780_v16  ;;  %v2878_v16 = vld [vmem:[%s3126_s8 + $0xf0] ss:$8 sps:$4 sm:$0xff]  }
  0x92   : > { %1183 = vmatprep.subr.bf16.mxu0 %v2921_v2  ;;  %2707 = vmatprep.subr.bf16.mxu1 %v2921_v2 }
  0x95   : > { %1184 = vmatpush2.bf16.msra.mxu0 %v2781_v17  ;;  %2723 = vmatpush2.bf16.msra.mxu1 %v2781_v17  ;;  %v2879_v17 = vld [vmem:[%s3126_s8 + $0x1f0] ss:$8 sps:$4 sm:$0xff]  }
  0x96   : > { %1185 = vmatprep.subr.bf16.mxu0 %v2921_v2  ;;  %2708 = vmatprep.subr.bf16.mxu1 %v2921_v2 }
  0x99   : > { %1186 = vmatpush2.bf16.msra.mxu0 %v2782_v18  ;;  %2724 = vmatpush2.bf16.msra.mxu1 %v2782_v18  ;;  %v581_v18 = vld [vmem:[#allocation2 + $0xb0] sm:$0xff] }
  0x9a   : > { %1187 = vmatprep.subr.bf16.mxu0 %v2921_v2  ;;  %2709 = vmatprep.subr.bf16.mxu1 %v2921_v2  ;;  %v2856_v2 = vld [vmem:[%s3126_s8 + $0xc4] ss:$8 sps:$4 sm:$0xff]  }
  0x9d   : > { %1188 = vmatpush2.bf16.msra.mxu0 %v2783_v19  ;;  %2725 = vmatpush2.bf16.msra.mxu1 %v2783_v19  ;;  %v613_v19 = vld [vmem:[#allocation2 + $0x148] sm:$0xff] }
  0xa0   : > { %1190 = vmatmul.mubr.bf16.vlgmr.msra.gmra.mxu0 %v2784_v20  ;;  %1318 = vmatmul.mubr.bf16.vlgmr.msra.gmra.mxu1 %v2787_v21 }
  0xa1   : > { %1197 = vmatprep.mubr.bf16.mxu0 %v2790_v22  ;;  %1325 = vmatprep.mubr.bf16.mxu1 %v2792_v23 }
  0xa8   : > { %1198 = vmatmul.mubr.bf16.gmra.mxu0 %v2794_v24  ;;  %1326 = vmatmul.mubr.bf16.gmra.mxu1 %v2795_v25 }
  0xa9   : > { %1205 = vmatprep.mubr.bf16.mxu0 %v2796_v26  ;;  %1333 = vmatprep.mubr.bf16.mxu1 %v2798_v27  ;;  %v582_v26 = vld [vmem:[#allocation2 + $0x1b0] sm:$0xff] }
  0xaa   : > { %v614_v27 = vld [vmem:[#allocation2 + $0x1d0] sm:$0xff] }
  0xb0   : > { %1206 = vmatmul.mubr.bf16.gmra.mxu0 %v2800_v28  ;;  %1334 = vmatmul.mubr.bf16.gmra.mxu1 %v2801_v29 }
  0xb1   : > { %1213 = vmatprep.mubr.bf16.mxu0 %v2802_v30  ;;  %1341 = vmatprep.mubr.bf16.mxu1 %v2804_v31 }
  0xb8   : > { %1214 = vmatmul.mubr.bf16.gmra.mxu0 %v2806_v32  ;;  %1342 = vmatmul.mubr.bf16.gmra.mxu1 %v2807_v33 }
  0xb9   : > { %1221 = vmatprep.mubr.bf16.mxu0 %v2808_v34  ;;  %1349 = vmatprep.mubr.bf16.mxu1 %v2810_v35  ;;  %v583_v34 = vld [vmem:[#allocation2 + $0xd8] sm:$0xff]  ;;  %v615_v35 = vld [vmem:[#allocation2 + $0x100] sm:$0xff] }
  0xc0   : > { %1222 = vmatmul.mubr.bf16.gmra.mxu0 %v2812_v36  ;;  %1350 = vmatmul.mubr.bf16.gmra.mxu1 %v2813_v37 }
  0xc1   : > { %1229 = vmatprep.mubr.bf16.mxu0 %v2814_v38  ;;  %1357 = vmatprep.mubr.bf16.mxu1 %v2816_v39 }
  0xc8   : > { %1230 = vmatmul.mubr.bf16.gmra.mxu0 %v2818_v40  ;;  %1358 = vmatmul.mubr.bf16.gmra.mxu1 %v2819_v41 }
  0xc9   : > { %1237 = vmatprep.mubr.bf16.mxu0 %v2820_v42  ;;  %1365 = vmatprep.mubr.bf16.mxu1 %v2822_v43  ;;  %v584_v42 = vld [vmem:[#allocation2 + $0x18] sm:$0xff]  ;;  %v616_v43 = vld [vmem:[#allocation2 + $0xc8] sm:$0xff] }
  0xd0   : > { %1238 = vmatmul.mubr.bf16.gmra.mxu0 %v2824_v44  ;;  %1366 = vmatmul.mubr.bf16.gmra.mxu1 %v2825_v45 }
  0xd1   : > { %1245 = vmatprep.mubr.bf16.mxu0 %v2826_v46  ;;  %1373 = vmatprep.mubr.bf16.mxu1 %v2828_v47 }
  0xd8   : > { %1246 = vmatmul.mubr.bf16.gmra.mxu0 %v2830_v48  ;;  %1374 = vmatmul.mubr.bf16.gmra.mxu1 %v2831_v49 }
  0xd9   : > { %1253 = vmatprep.mubr.bf16.mxu0 %v2832_v50  ;;  %1381 = vmatprep.mubr.bf16.mxu1 %v2834_v51  ;;  %v585_v50 = vld [vmem:[#allocation2 + $0x50] sm:$0xff]  ;;  %v617_v51 = vld [vmem:[#allocation2 + $0x40] sm:$0xff] }
  0xe0   : > { %1254 = vmatmul.mubr.bf16.gmra.mxu0 %v2836_v52  ;;  %1382 = vmatmul.mubr.bf16.gmra.mxu1 %v2837_v53 }
  0xe1   : > { %1261 = vmatprep.mubr.bf16.mxu0 %v2838_v54  ;;  %1389 = vmatprep.mubr.bf16.mxu1 %v2840_v55 }
  0xe8   : > { %1262 = vmatmul.mubr.bf16.gmra.mxu0 %v2842_v56  ;;  %1390 = vmatmul.mubr.bf16.gmra.mxu1 %v2843_v57 }
  0xe9   : > { %1269 = vmatprep.mubr.bf16.mxu0 %v2844_v58  ;;  %1397 = vmatprep.mubr.bf16.mxu1 %v2846_v59  ;;  %v586_v58 = vld [vmem:[#allocation2 + $0x168] sm:$0xff]  ;;  %v618_v59 = vld [vmem:[#allocation2 + $0x1f8] sm:$0xff] }
  0xf0   : > { %1270 = vmatmul.mubr.bf16.gmra.mxu0 %v2848_v60  ;;  %1398 = vmatmul.mubr.bf16.gmra.mxu1 %v2849_v61 }
  0xf1   : > { %1277 = vmatprep.mubr.bf16.mxu0 %v2850_v62  ;;  %1405 = vmatprep.mubr.bf16.mxu1 %v2852_v63 }
  0xf8   : > { %1278 = vmatmul.mubr.bf16.gmra.mxu0 %v2854_v0  ;;  %1406 = vmatmul.mubr.bf16.gmra.mxu1 %v2855_v1 }
  0xf9   : > { %1285 = vmatprep.mubr.bf16.mxu0 %v2856_v2  ;;  %1413 = vmatprep.mubr.bf16.mxu1 %v2858_v3  ;;  %v587_v2 = vld [vmem:[#allocation2 + $0x130] sm:$0xff]  ;;  %v619_v3 = vld [vmem:[#allocation2 + $0x20] sm:$0xff] }
 0x100   : > { %1286 = vmatmul.mubr.bf16.gmra.mxu0 %v2860_v4  ;;  %1414 = vmatmul.mubr.bf16.gmra.mxu1 %v2861_v5 }
 0x101   : > { %1293 = vmatprep.mubr.bf16.mxu0 %v2862_v6  ;;  %1421 = vmatprep.mubr.bf16.mxu1 %v2864_v7 }
 0x108   : > { %1294 = vmatmul.mubr.bf16.gmra.mxu0 %v2866_v8  ;;  %1422 = vmatmul.mubr.bf16.gmra.mxu1 %v2867_v9 }
 0x109   : > { %1301 = vmatprep.mubr.bf16.mxu0 %v2868_v10  ;;  %1429 = vmatprep.mubr.bf16.mxu1 %v2870_v11  ;;  %v588_v10 = vld [vmem:[#allocation2 + $0x48] sm:$0xff] }
 0x10a   : > { %v620_v11 = vld [vmem:[#allocation2 + $0x128] sm:$0xff] }
 0x110   : > { %1302 = vmatmul.mubr.bf16.gmra.mxu0 %v2872_v12  ;;  %1430 = vmatmul.mubr.bf16.gmra.mxu1 %v2873_v13 }
 0x111   : > { %1309 = vmatprep.mubr.bf16.mxu0 %v2874_v14  ;;  %1437 = vmatprep.mubr.bf16.mxu1 %v2876_v15 }
 0x118   : > { %1310 = vmatmul.mubr.bf16.gmra.mxu0 %v2878_v16  ;;  %1438 = vmatmul.mubr.bf16.gmra.mxu1 %v2879_v17 }
 0x160   : > { %v1191_v20 = vpop.f32.mrf.mxu0  ;;  %v1319_v21 = vpop.f32.mrf.mxu1 }
 0x161   : > { %v1446_v22 = vadd.f32 %v1191_v20, %v581_v18  ;;  %v1478_v23 = vadd.f32 %v1319_v21, %v613_v19  ;;  %v589_v18 = vld [vmem:[#allocation2 + $0x180] sm:$0xff] }
 0x162   : > { %v1193_v24 = vpop.f32.mrf.mxu0  ;;  %v1321_v25 = vpop.f32.mrf.mxu1  ;;  %v621_v19 = vld [vmem:[#allocation2 + $0x1a0] sm:$0xff] }
 0x163   : > { %1510 = vst [vmem:[#allocation2 + $0xb0] sm:$0xff] %v1446_v22  ;;  %1542 = vst [vmem:[#allocation2 + $0x148] sm:$0xff] %v1478_v23 }
 0x164   : > { %v1194_v28 = vpop.f32.mrf.mxu0  ;;  %v1322_v29 = vpop.f32.mrf.mxu1 }
 0x165   : > { %v1447_v30 = vadd.f32 %v1194_v28, %v582_v26  ;;  %v1479_v31 = vadd.f32 %v1322_v29, %v614_v27  ;;  %v590_v26 = vld [vmem:[#allocation2 + $0x110] sm:$0xff] }
 0x166   : > { %v1196_v32 = vpop.f32.mrf.mxu0  ;;  %v1324_v33 = vpop.f32.mrf.mxu1  ;;  %v622_v27 = vld [vmem:[#allocation2 + $0x1f0] sm:$0xff] }
 0x167   : > { %1511 = vst [vmem:[#allocation2 + $0x1b0] sm:$0xff] %v1447_v30  ;;  %1543 = vst [vmem:[#allocation2 + $0x1d0] sm:$0xff] %v1479_v31 }
 0x168   : > { %v1199_v36 = vpop.f32.mrf.mxu0  ;;  %v1327_v37 = vpop.f32.mrf.mxu1 }
 0x169   : > { %v1448_v38 = vadd.f32 %v1199_v36, %v583_v34  ;;  %v1480_v39 = vadd.f32 %v1327_v37, %v615_v35  ;;  %v591_v34 = vld [vmem:[#allocation2 + $0x118] sm:$0xff]  ;;  %v623_v35 = vld [vmem:[#allocation2 + $0xe8] sm:$0xff] }
 0x16a   : > { %v1201_v40 = vpop.f32.mrf.mxu0  ;;  %v1329_v41 = vpop.f32.mrf.mxu1 }
 0x16b   : > { %1512 = vst [vmem:[#allocation2 + $0xd8] sm:$0xff] %v1448_v38  ;;  %1544 = vst [vmem:[#allocation2 + $0x100] sm:$0xff] %v1480_v39 }
 0x16c   : > { %v1202_v44 = vpop.f32.mrf.mxu0  ;;  %v1330_v45 = vpop.f32.mrf.mxu1 }
 0x16d   : > { %v1449_v46 = vadd.f32 %v1202_v44, %v584_v42  ;;  %v1481_v47 = vadd.f32 %v1330_v45, %v616_v43  ;;  %v592_v42 = vld [vmem:[#allocation2 + $0x98] sm:$0xff] }
 0x16e   : > { %v1204_v48 = vpop.f32.mrf.mxu0  ;;  %v1332_v49 = vpop.f32.mrf.mxu1  ;;  %v624_v43 = vld [vmem:[#allocation2 + $0x78] sm:$0xff] }
 0x16f   : > { %1513 = vst [vmem:[#allocation2 + $0x18] sm:$0xff] %v1449_v46  ;;  %1545 = vst [vmem:[#allocation2 + $0xc8] sm:$0xff] %v1481_v47 }
 0x170   : > { %v1207_v52 = vpop.f32.mrf.mxu0  ;;  %v1335_v53 = vpop.f32.mrf.mxu1 }
 0x171   : > { %v1450_v54 = vadd.f32 %v1207_v52, %v585_v50  ;;  %v1482_v55 = vadd.f32 %v1335_v53, %v617_v51  ;;  %v593_v50 = vld [vmem:[#allocation2 + $0x120] sm:$0xff]  ;;  %v625_v51 = vld [vmem:[#allocation2 + $0x70] sm:$0xff] }
 0x172   : > { %v1209_v56 = vpop.f32.mrf.mxu0  ;;  %v1337_v57 = vpop.f32.mrf.mxu1 }
 0x173   : > { %1514 = vst [vmem:[#allocation2 + $0x50] sm:$0xff] %v1450_v54  ;;  %1546 = vst [vmem:[#allocation2 + $0x40] sm:$0xff] %v1482_v55 }
 0x174   : > { %v1210_v60 = vpop.f32.mrf.mxu0  ;;  %v1338_v61 = vpop.f32.mrf.mxu1 }
 0x175   : > { %v1451_v62 = vadd.f32 %v1210_v60, %v586_v58  ;;  %v1483_v63 = vadd.f32 %v1338_v61, %v618_v59  ;;  %v594_v58 = vld [vmem:[#allocation2 + $0x150] sm:$0xff] }
 0x176   : > { %v1212_v0 = vpop.f32.mrf.mxu0  ;;  %v1340_v1 = vpop.f32.mrf.mxu1  ;;  %v626_v59 = vld [vmem:[#allocation2 + $0x90] sm:$0xff] }
 0x177   : > { %1515 = vst [vmem:[#allocation2 + $0x168] sm:$0xff] %v1451_v62  ;;  %1547 = vst [vmem:[#allocation2 + $0x1f8] sm:$0xff] %v1483_v63 }
 0x178   : > { %v1215_v4 = vpop.f32.mrf.mxu0  ;;  %v1343_v5 = vpop.f32.mrf.mxu1 }
 0x179   : > { %v1452_v6 = vadd.f32 %v1215_v4, %v587_v2  ;;  %v1484_v7 = vadd.f32 %v1343_v5, %v619_v3  ;;  %v595_v2 = vld [vmem:[#allocation2 + $0x108] sm:$0xff]  ;;  %v627_v3 = vld [vmem:[#allocation2 + $0x1d8] sm:$0xff] }
 0x17a   : > { %v1217_v8 = vpop.f32.mrf.mxu0  ;;  %v1345_v9 = vpop.f32.mrf.mxu1 }
 0x17b   : > { %1516 = vst [vmem:[#allocation2 + $0x130] sm:$0xff] %v1452_v6  ;;  %1548 = vst [vmem:[#allocation2 + $0x20] sm:$0xff] %v1484_v7 }
 0x17c   : > { %v1218_v12 = vpop.f32.mrf.mxu0  ;;  %v1346_v13 = vpop.f32.mrf.mxu1 }
 0x17d   : > { %v1453_v14 = vadd.f32 %v1218_v12, %v588_v10  ;;  %v1485_v15 = vadd.f32 %v1346_v13, %v620_v11  ;;  %v596_v10 = vld [vmem:[#allocation2 + $0x60] sm:$0xff]  ;;  %v628_v11 = vld [vmem:[#allocation2 + $0xd0] sm:$0xff] }
 0x17e   : > { %v1220_v16 = vpop.f32.mrf.mxu0  ;;  %v1348_v17 = vpop.f32.mrf.mxu1 }
 0x17f   : > { %1517 = vst [vmem:[#allocation2 + $0x48] sm:$0xff] %v1453_v14  ;;  %1549 = vst [vmem:[#allocation2 + $0x128] sm:$0xff] %v1485_v15 }
 0x180   : > { %v1223_v20 = vpop.f32.mrf.mxu0  ;;  %v1351_v21 = vpop.f32.mrf.mxu1 }
 0x181   : > { %v1454_v22 = vadd.f32 %v1223_v20, %v589_v18  ;;  %v1486_v23 = vadd.f32 %v1351_v21, %v621_v19  ;;  %v597_v18 = vld [vmem:[#allocation2 + $0xe0] sm:$0xff]  ;;  %v629_v19 = vld [vmem:[#allocation2 + $0xb8] sm:$0xff] }
 0x182   : > { %v1225_v24 = vpop.f32.mrf.mxu0  ;;  %v1353_v25 = vpop.f32.mrf.mxu1 }
 0x183   : > { %1518 = vst [vmem:[#allocation2 + $0x180] sm:$0xff] %v1454_v22  ;;  %1550 = vst [vmem:[#allocation2 + $0x1a0] sm:$0xff] %v1486_v23 }
 0x184   : > { %v1226_v28 = vpop.f32.mrf.mxu0  ;;  %v1354_v29 = vpop.f32.mrf.mxu1 }
 0x185   : > { %v1455_v30 = vadd.f32 %v1226_v28, %v590_v26  ;;  %v1487_v31 = vadd.f32 %v1354_v29, %v622_v27  ;;  %v598_v26 = vld [vmem:[#allocation2 + $0x188] sm:$0xff] }
 0x186   : > { %v1228_v32 = vpop.f32.mrf.mxu0  ;;  %v1356_v33 = vpop.f32.mrf.mxu1  ;;  %v630_v27 = vld [vmem:[#allocation2 + $0x88] sm:$0xff] }
 0x187   : > { %1519 = vst [vmem:[#allocation2 + $0x110] sm:$0xff] %v1455_v30  ;;  %1551 = vst [vmem:[#allocation2 + $0x1f0] sm:$0xff] %v1487_v31 }
 0x188   : > { %v1231_v36 = vpop.f32.mrf.mxu0  ;;  %v1359_v37 = vpop.f32.mrf.mxu1 }
 0x189   : > { %v1456_v38 = vadd.f32 %v1231_v36, %v591_v34  ;;  %v1488_v39 = vadd.f32 %v1359_v37, %v623_v35  ;;  %v599_v34 = vld [vmem:[#allocation2 + $0x138] sm:$0xff]  ;;  %v631_v35 = vld [vmem:[#allocation2 + $0xa8] sm:$0xff] }
 0x18a   : > { %v1233_v40 = vpop.f32.mrf.mxu0  ;;  %v1361_v41 = vpop.f32.mrf.mxu1 }
 0x18b   : > { %1520 = vst [vmem:[#allocation2 + $0x118] sm:$0xff] %v1456_v38  ;;  %1552 = vst [vmem:[#allocation2 + $0xe8] sm:$0xff] %v1488_v39 }
 0x18c   : > { %v1234_v44 = vpop.f32.mrf.mxu0  ;;  %v1362_v45 = vpop.f32.mrf.mxu1 }
 0x18d   : > { %v1457_v46 = vadd.f32 %v1234_v44, %v592_v42  ;;  %v1489_v47 = vadd.f32 %v1362_v45, %v624_v43  ;;  %v600_v42 = vld [vmem:[#allocation2 + $0x140] sm:$0xff]  ;;  %v632_v43 = vld [vmem:[#allocation2 + $0x1c8] sm:$0xff] }
 0x18e   : > { %v1236_v48 = vpop.f32.mrf.mxu0  ;;  %v1364_v49 = vpop.f32.mrf.mxu1 }
 0x18f   : > { %1521 = vst [vmem:[#allocation2 + $0x98] sm:$0xff] %v1457_v46  ;;  %1553 = vst [vmem:[#allocation2 + $0x78] sm:$0xff] %v1489_v47 }
 0x190   : > { %v1239_v52 = vpop.f32.mrf.mxu0  ;;  %v1367_v53 = vpop.f32.mrf.mxu1 }
 0x191   : > { %v1458_v54 = vadd.f32 %v1239_v52, %v593_v50  ;;  %v1490_v55 = vadd.f32 %v1367_v53, %v625_v51  ;;  %v601_v50 = vld [vmem:[#allocation2 + $0x80] sm:$0xff]  ;;  %v633_v51 = vld [vmem:[#allocation2 + $0x170] sm:$0xff] }
 0x192   : > { %v1241_v56 = vpop.f32.mrf.mxu0  ;;  %v1369_v57 = vpop.f32.mrf.mxu1 }
 0x193   : > { %1522 = vst [vmem:[#allocation2 + $0x120] sm:$0xff] %v1458_v54  ;;  %1554 = vst [vmem:[#allocation2 + $0x70] sm:$0xff] %v1490_v55 }
 0x194   : > { %v1242_v60 = vpop.f32.mrf.mxu0  ;;  %v1370_v61 = vpop.f32.mrf.mxu1 }
 0x195   : > { %v1459_v62 = vadd.f32 %v1242_v60, %v594_v58  ;;  %v1491_v63 = vadd.f32 %v1370_v61, %v626_v59  ;;  %v602_v58 = vld [vmem:[#allocation2 + $0x1a8] sm:$0xff]  ;;  %v634_v59 = vld [vmem:[#allocation2 + $0x178] sm:$0xff] }
 0x196   : > { %v1244_v0 = vpop.f32.mrf.mxu0  ;;  %v1372_v1 = vpop.f32.mrf.mxu1 }
 0x197   : > { %1523 = vst [vmem:[#allocation2 + $0x150] sm:$0xff] %v1459_v62  ;;  %1555 = vst [vmem:[#allocation2 + $0x90] sm:$0xff] %v1491_v63 }
 0x198   : > { %v1247_v4 = vpop.f32.mrf.mxu0  ;;  %v1375_v5 = vpop.f32.mrf.mxu1 }
 0x199   : > { %v1460_v6 = vadd.f32 %v1247_v4, %v595_v2  ;;  %v1492_v7 = vadd.f32 %v1375_v5, %v627_v3  ;;  %v603_v2 = vld [vmem:[#allocation2 + $0x1b8] sm:$0xff]  ;;  %v635_v3 = vld [vmem:[#allocation2 + $0x68] sm:$0xff] }
 0x19a   : > { %v1249_v8 = vpop.f32.mrf.mxu0  ;;  %v1377_v9 = vpop.f32.mrf.mxu1 }
 0x19b   : > { %1524 = vst [vmem:[#allocation2 + $0x108] sm:$0xff] %v1460_v6  ;;  %1556 = vst [vmem:[#allocation2 + $0x1d8] sm:$0xff] %v1492_v7 }
 0x19c   : > { %v1250_v12 = vpop.f32.mrf.mxu0  ;;  %v1378_v13 = vpop.f32.mrf.mxu1 }
 0x19d   : > { %v1461_v14 = vadd.f32 %v1250_v12, %v596_v10  ;;  %v1493_v15 = vadd.f32 %v1378_v13, %v628_v11  ;;  %v604_v10 = vld [vmem:[#allocation2 + $0x28] sm:$0xff]  ;;  %v636_v11 = vld [vmem:[#allocation2 + $0x190] sm:$0xff] }
 0x19e   : > { %v1252_v16 = vpop.f32.mrf.mxu0  ;;  %v1380_v17 = vpop.f32.mrf.mxu1 }
 0x19f   : > { %1525 = vst [vmem:[#allocation2 + $0x60] sm:$0xff] %v1461_v14  ;;  %1557 = vst [vmem:[#allocation2 + $0xd0] sm:$0xff] %v1493_v15 }
 0x1a0   : > { %v1255_v20 = vpop.f32.mrf.mxu0  ;;  %v1383_v21 = vpop.f32.mrf.mxu1 }
 0x1a1   : > { %v1462_v22 = vadd.f32 %v1255_v20, %v597_v18  ;;  %v1494_v23 = vadd.f32 %v1383_v21, %v629_v19  ;;  %v605_v18 = vld [vmem:[#allocation2 + $0x1e8] sm:$0xff]  ;;  %v637_v19 = vld [vmem:[#allocation2 + $0x198] sm:$0xff] }
 0x1a2   : > { %v1257_v24 = vpop.f32.mrf.mxu0  ;;  %v1385_v25 = vpop.f32.mrf.mxu1 }
 0x1a3   : > { %1526 = vst [vmem:[#allocation2 + $0xe0] sm:$0xff] %v1462_v22  ;;  %1558 = vst [vmem:[#allocation2 + $0xb8] sm:$0xff] %v1494_v23 }
 0x1a4   : > { %v1258_v28 = vpop.f32.mrf.mxu0  ;;  %v1386_v29 = vpop.f32.mrf.mxu1 }
 0x1a5   : > { %v1463_v30 = vadd.f32 %v1258_v28, %v598_v26  ;;  %v1495_v31 = vadd.f32 %v1386_v29, %v630_v27  ;;  %v606_v26 = vld [vmem:[#allocation2 + $0xf8] sm:$0xff] }
 0x1a6   : > { %v1260_v32 = vpop.f32.mrf.mxu0  ;;  %v1388_v33 = vpop.f32.mrf.mxu1  ;;  %v638_v27 = vld [vmem:[#allocation2 + $0x38] sm:$0xff] }
 0x1a7   : > { %1527 = vst [vmem:[#allocation2 + $0x188] sm:$0xff] %v1463_v30  ;;  %1559 = vst [vmem:[#allocation2 + $0x88] sm:$0xff] %v1495_v31 }
 0x1a8   : > { %v1263_v36 = vpop.f32.mrf.mxu0  ;;  %v1391_v37 = vpop.f32.mrf.mxu1 }
 0x1a9   : > { %v1464_v38 = vadd.f32 %v1263_v36, %v599_v34  ;;  %v1496_v39 = vadd.f32 %v1391_v37, %v631_v35  ;;  %v607_v34 = vld [vmem:[#allocation2 + $0x160] sm:$0xff] }
 0x1aa   : > { %v1265_v40 = vpop.f32.mrf.mxu0  ;;  %v1393_v41 = vpop.f32.mrf.mxu1  ;;  %v639_v35 = vld [vmem:[#allocation2 + $0xc0] sm:$0xff] }
 0x1ab   : > { %1528 = vst [vmem:[#allocation2 + $0x138] sm:$0xff] %v1464_v38  ;;  %1560 = vst [vmem:[#allocation2 + $0xa8] sm:$0xff] %v1496_v39 }
 0x1ac   : > { %v1266_v44 = vpop.f32.mrf.mxu0  ;;  %v1394_v45 = vpop.f32.mrf.mxu1 }
 0x1ad   : > { %v1465_v46 = vadd.f32 %v1266_v44, %v600_v42  ;;  %v1497_v47 = vadd.f32 %v1394_v45, %v632_v43  ;;  %v608_v42 = vld [vmem:[#allocation2 + $0x30] sm:$0xff]  ;;  %v640_v43 = vld [vmem:[#allocation2 + $0x1c0] sm:$0xff] }
 0x1ae   : > { %v1268_v48 = vpop.f32.mrf.mxu0  ;;  %v1396_v49 = vpop.f32.mrf.mxu1 }
 0x1af   : > { %1529 = vst [vmem:[#allocation2 + $0x140] sm:$0xff] %v1465_v46  ;;  %1561 = vst [vmem:[#allocation2 + $0x1c8] sm:$0xff] %v1497_v47 }
 0x1b0   : > { %v1271_v52 = vpop.f32.mrf.mxu0  ;;  %v1399_v53 = vpop.f32.mrf.mxu1 }
 0x1b1   : > { %v1466_v54 = vadd.f32 %v1271_v52, %v601_v50  ;;  %v1498_v55 = vadd.f32 %v1399_v53, %v633_v51  ;;  %v609_v50 = vld [vmem:[#allocation2 + $0x1e0] sm:$0xff]  ;;  %v641_v51 = vld [vmem:[#allocation2 + $0x158] sm:$0xff] }
 0x1b2   : > { %v1273_v56 = vpop.f32.mrf.mxu0  ;;  %v1401_v57 = vpop.f32.mrf.mxu1 }
 0x1b3   : > { %1530 = vst [vmem:[#allocation2 + $0x80] sm:$0xff] %v1466_v54  ;;  %1562 = vst [vmem:[#allocation2 + $0x170] sm:$0xff] %v1498_v55 }
 0x1b4   : > { %v1274_v60 = vpop.f32.mrf.mxu0  ;;  %v1402_v61 = vpop.f32.mrf.mxu1 }
 0x1b5   : > { %v1467_v62 = vadd.f32 %v1274_v60, %v602_v58  ;;  %v1499_v63 = vadd.f32 %v1402_v61, %v634_v59  ;;  %v610_v58 = vld [vmem:[#allocation2] sm:$0xff]  ;;  %v642_v59 = vld [vmem:[#allocation2 + $0x10] sm:$0xff] }
 0x1b6   : > { %v1276_v0 = vpop.f32.mrf.mxu0  ;;  %v1404_v1 = vpop.f32.mrf.mxu1 }
 0x1b7   : > { %1531 = vst [vmem:[#allocation2 + $0x1a8] sm:$0xff] %v1467_v62  ;;  %1563 = vst [vmem:[#allocation2 + $0x178] sm:$0xff] %v1499_v63 }
 0x1b8   : > { %v1279_v4 = vpop.f32.mrf.mxu0  ;;  %v1407_v5 = vpop.f32.mrf.mxu1 }
 0x1b9   : > { %v1468_v6 = vadd.f32 %v1279_v4, %v603_v2  ;;  %v1500_v7 = vadd.f32 %v1407_v5, %v635_v3  ;;  %v611_v2 = vld [vmem:[#allocation2 + $0xf0] sm:$0xff]  ;;  %v643_v3 = vld [vmem:[#allocation2 + $0x58] sm:$0xff] }
 0x1ba   : > { %v1281_v8 = vpop.f32.mrf.mxu0  ;;  %v1409_v9 = vpop.f32.mrf.mxu1 }
 0x1bb   : > { %1532 = vst [vmem:[#allocation2 + $0x1b8] sm:$0xff] %v1468_v6  ;;  %1564 = vst [vmem:[#allocation2 + $0x68] sm:$0xff] %v1500_v7 }
 0x1bc   : > { %v1282_v12 = vpop.f32.mrf.mxu0  ;;  %v1410_v13 = vpop.f32.mrf.mxu1 }
 0x1bd   : > { %v1469_v14 = vadd.f32 %v1282_v12, %v604_v10  ;;  %v1501_v15 = vadd.f32 %v1410_v13, %v636_v11  ;;  %v612_v10 = vld [vmem:[#allocation2 + $0x8] sm:$0xff]  ;;  %v644_v11 = vld [vmem:[#allocation2 + $0xa0] sm:$0xff] }
 0x1be   : > { %v1284_v16 = vpop.f32.mrf.mxu0  ;;  %v1412_v17 = vpop.f32.mrf.mxu1 }
 0x1bf   : > { %1533 = vst [vmem:[#allocation2 + $0x28] sm:$0xff] %v1469_v14  ;;  %1565 = vst [vmem:[#allocation2 + $0x190] sm:$0xff] %v1501_v15 }
 0x1c0   : > { %v1287_v20 = vpop.f32.mrf.mxu0  ;;  %v1415_v21 = vpop.f32.mrf.mxu1 }
 0x1c1   : > { %v1470_v22 = vadd.f32 %v1287_v20, %v605_v18  ;;  %v1502_v23 = vadd.f32 %v1415_v21, %v637_v19 }
 0x1c2   : > { %v1289_v24 = vpop.f32.mrf.mxu0  ;;  %v1417_v25 = vpop.f32.mrf.mxu1 }
 0x1c3   : > { %1534 = vst [vmem:[#allocation2 + $0x1e8] sm:$0xff] %v1470_v22  ;;  %1566 = vst [vmem:[#allocation2 + $0x198] sm:$0xff] %v1502_v23 }
 0x1c4   : > { %v1290_v28 = vpop.f32.mrf.mxu0  ;;  %v1418_v29 = vpop.f32.mrf.mxu1 }
 0x1c5   : > { %v1471_v30 = vadd.f32 %v1290_v28, %v606_v26  ;;  %v1503_v31 = vadd.f32 %v1418_v29, %v638_v27 }
 0x1c6   : > { %v1292_v32 = vpop.f32.mrf.mxu0  ;;  %v1420_v33 = vpop.f32.mrf.mxu1 }
 0x1c7   : > { %1535 = vst [vmem:[#allocation2 + $0xf8] sm:$0xff] %v1471_v30  ;;  %1567 = vst [vmem:[#allocation2 + $0x38] sm:$0xff] %v1503_v31 }
 0x1c8   : > { %v1295_v36 = vpop.f32.mrf.mxu0  ;;  %v1423_v37 = vpop.f32.mrf.mxu1 }
 0x1c9   : > { %v1472_v38 = vadd.f32 %v1295_v36, %v607_v34  ;;  %v1504_v39 = vadd.f32 %v1423_v37, %v639_v35 }
 0x1ca   : > { %v1297_v40 = vpop.f32.mrf.mxu0  ;;  %v1425_v41 = vpop.f32.mrf.mxu1 }
 0x1cb   : > { %1536 = vst [vmem:[#allocation2 + $0x160] sm:$0xff] %v1472_v38  ;;  %1568 = vst [vmem:[#allocation2 + $0xc0] sm:$0xff] %v1504_v39 }
 0x1cc   : > { %v1298_v44 = vpop.f32.mrf.mxu0  ;;  %v1426_v45 = vpop.f32.mrf.mxu1 }
 0x1cd   : > { %v1473_v46 = vadd.f32 %v1298_v44, %v608_v42  ;;  %v1505_v47 = vadd.f32 %v1426_v45, %v640_v43 }
 0x1ce   : > { %v1300_v48 = vpop.f32.mrf.mxu0  ;;  %v1428_v49 = vpop.f32.mrf.mxu1 }
 0x1cf   : > { %1537 = vst [vmem:[#allocation2 + $0x30] sm:$0xff] %v1473_v46  ;;  %1569 = vst [vmem:[#allocation2 + $0x1c0] sm:$0xff] %v1505_v47 }
 0x1d0   : > { %v1303_v52 = vpop.f32.mrf.mxu0  ;;  %v1431_v53 = vpop.f32.mrf.mxu1 }
 0x1d1   : > { %v1474_v54 = vadd.f32 %v1303_v52, %v609_v50  ;;  %v1506_v55 = vadd.f32 %v1431_v53, %v641_v51 }
 0x1d2   : > { %v1305_v56 = vpop.f32.mrf.mxu0  ;;  %v1433_v57 = vpop.f32.mrf.mxu1 }
 0x1d3   : > { %1538 = vst [vmem:[#allocation2 + $0x1e0] sm:$0xff] %v1474_v54  ;;  %1570 = vst [vmem:[#allocation2 + $0x158] sm:$0xff] %v1506_v55 }
 0x1d4   : > { %v1306_v60 = vpop.f32.mrf.mxu0  ;;  %v1434_v61 = vpop.f32.mrf.mxu1 }
 0x1d5   : > { %v1475_v62 = vadd.f32 %v1306_v60, %v610_v58  ;;  %v1507_v63 = vadd.f32 %v1434_v61, %v642_v59 }
 0x1d6   : > { %v1308_v0 = vpop.f32.mrf.mxu0  ;;  %v1436_v1 = vpop.f32.mrf.mxu1 }
 0x1d7   : > { %1539 = vst [vmem:[#allocation2] sm:$0xff] %v1475_v62  ;;  %1571 = vst [vmem:[#allocation2 + $0x10] sm:$0xff] %v1507_v63 }
 0x1d8   : > { %v1311_v4 = vpop.f32.mrf.mxu0  ;;  %v1439_v5 = vpop.f32.mrf.mxu1 }
 0x1d9   : > { %v1476_v6 = vadd.f32 %v1311_v4, %v611_v2  ;;  %v1508_v7 = vadd.f32 %v1439_v5, %v643_v3 }
 0x1da   : > { %v1313_v8 = vpop.f32.mrf.mxu0  ;;  %v1441_v9 = vpop.f32.mrf.mxu1 }
 0x1db   : > { %1540 = vst [vmem:[#allocation2 + $0xf0] sm:$0xff] %v1476_v6  ;;  %1572 = vst [vmem:[#allocation2 + $0x58] sm:$0xff] %v1508_v7  ;;  %1577 = sbr.rel (%p2368_p11) target bundleno = 623 (0x26f), region = 74 }
 0x1dc   : > { %v1314_v12 = vpop.f32.mrf.mxu0  ;;  %v1442_v13 = vpop.f32.mrf.mxu1 }
 0x1dd   : > { %v1477_v14 = vadd.f32 %v1314_v12, %v612_v10  ;;  %v1509_v15 = vadd.f32 %v1442_v13, %v644_v11 }
 0x1de   : > { %v1316_v16 = vpop.f32.mrf.mxu0  ;;  %v1444_v17 = vpop.f32.mrf.mxu1 }
 0x1df   : > { %1541 = vst [vmem:[#allocation2 + $0x8] sm:$0xff] %v1477_v14  ;;  %1573 = vst [vmem:[#allocation2 + $0xa0] sm:$0xff] %v1509_v15 }
 0x1e0   : > { %v1578_v18 = vld [vmem:[#allocation2 + $0xb0] sm:$0xff]  ;;  %v1580_v20 = vld [vmem:[#allocation2 + $0xd8] sm:$0xff]  ;;  %v1583_v27 = vld [vmem:[#allocation2 + $0x168] sm:$0xff] }
 0x1e1   : > { %v1579_v19 = vld [vmem:[#allocation2 + $0x1b0] sm:$0xff]  ;;  %v2032_v23 = vmul.f32 %v1578_v18, %v1578_v18  ;;  %v1581_v25 = vld [vmem:[#allocation2 + $0x18] sm:$0xff]  ;;  %v2034_v29 = vmul.f32 %v1580_v20, %v1580_v20  ;;  %v1585_v35 = vld [vmem:[#allocation2 + $0x48] sm:$0xff]  ;;  %v2037_v52 = vmul.f32 %v1583_v27, %v1583_v27 }
 0x1e2   : > { %v2506_v21 = vpack.c.bf16 %v1579_v19, %v1578_v18  ;;  %v1962_v22 = vadd.f32 %v1579_v19, %v1578_v18  ;;  %v2033_v24 = vmul.f32 %v1579_v19, %v1579_v19  ;;  %v1582_v26 = vld [vmem:[#allocation2 + $0x50] sm:$0xff]  ;;  %v2511_v28 = vpack.c.bf16 %v1581_v25, %v1580_v20  ;;  %v3309_v36 = vld [vmem:[#allocation2 + $0x180] sm:$0xff]  ;;  %v3321_v40 = vld [vmem:[#allocation2 + $0x118] sm:$0xff] }
 0x1e3   : > { %v2516_v30 = vpack.c.bf16 %v1583_v27, %v1582_v26  ;;  %v1584_v31 = vld [vmem:[#allocation2 + $0x130] sm:$0xff]  ;;  %v2035_v34 = vmul.f32 %v1581_v25, %v1581_v25  ;;  %v2036_v43 = vmul.f32 %v1582_v26, %v1582_v26  ;;  %v3323_v44 = vld [vmem:[#allocation2 + $0x98] sm:$0xff]  ;;  %v3325_v45 = vld [vmem:[#allocation2 + $0x120] sm:$0xff]  ;;  %v2039_v6 = vmul.f32 %v1585_v35, %v1585_v35 }
 0x1e4   : > { %2507 = vst [vmem:[%s3761_s2] sm:$0xff] %v2506_v21   ;;  %v2096_v32 = vadd.f32 %v2033_v24, %v2032_v23  ;;  %v1963_v33 = vadd.f32 %v1962_v22, %v1580_v20  ;;  %v3311_v37 = vld [vmem:[#allocation2 + $0x110] sm:$0xff]  ;;  %2663 = vst [vmem:[%s3761_s2 + $0x8] sm:$0xff] %v2511_v28   ;;  %v2521_v38 = vpack.c.bf16 %v1585_v35, %v1584_v31  ;;  %v3339_v49 = vld [vmem:[#allocation2 + $0x108] sm:$0xff] }
 0x1e5   : > { %2664 = vst [vmem:[%s3761_s2 + $0x10] sm:$0xff] %v2516_v30   ;;  %v2526_v39 = vpack.c.bf16 %v3311_v37, %v3309_v36  ;;  %v3327_v46 = vld [vmem:[#allocation2 + $0x150] sm:$0xff]  ;;  %v2531_v47 = vpack.c.bf16 %v3323_v44, %v3321_v40  ;;  %v3341_v53 = vld [vmem:[#allocation2 + $0x60] sm:$0xff]  ;;  %v3345_v55 = vld [vmem:[#allocation2 + $0x188] sm:$0xff]  ;;  %v2038_v61 = vmul.f32 %v1584_v31, %v1584_v31  ;;  %v2040_v15 = vmul.f32 %v3309_v36, %v3309_v36 }
 0x1e6   : > { %v1964_v41 = vadd.f32 %v1963_v33, %v1581_v25  ;;  %v2097_v42 = vadd.f32 %v2096_v32, %v2034_v29  ;;  %2665 = vst [vmem:[%s3761_s2 + $0x18] sm:$0xff] %v2521_v38   ;;  %v2536_v48 = vpack.c.bf16 %v3327_v46, %v3325_v45  ;;  %v3343_v54 = vld [vmem:[#allocation2 + $0xe0] sm:$0xff]  ;;  %v2541_v56 = vpack.c.bf16 %v3341_v53, %v3339_v49  ;;  %v3357_v58 = vld [vmem:[#allocation2 + $0x138] sm:$0xff]  ;;  %v3363_v0 = vld [vmem:[#allocation2 + $0x1a8] sm:$0xff] }
 0x1e7   : > { %2666 = vst [vmem:[%s3761_s2 + $0x20] sm:$0xff] %v2526_v39   ;;  %2667 = vst [vmem:[%s3761_s2 + $0x28] sm:$0xff] %v2531_v47   ;;  %v2546_v57 = vpack.c.bf16 %v3345_v55, %v3343_v54  ;;  %v3359_v62 = vld [vmem:[#allocation2 + $0x140] sm:$0xff]  ;;  %v3375_v3 = vld [vmem:[#allocation2 + $0x1b8] sm:$0xff]  ;;  %v2041_v24 = vmul.f32 %v3311_v37, %v3311_v37  ;;  %v2042_v33 = vmul.f32 %v3321_v40, %v3321_v40 }
 0x1e8   : > { %v2098_v50 = vadd.f32 %v2097_v42, %v2035_v34  ;;  %v1965_v51 = vadd.f32 %v1964_v41, %v1582_v26  ;;  %2668 = vst [vmem:[%s3761_s2 + $0x30] sm:$0xff] %v2536_v48   ;;  %v3361_v63 = vld [vmem:[#allocation2 + $0x80] sm:$0xff]  ;;  %2669 = vst [vmem:[%s3761_s2 + $0x38] sm:$0xff] %v2541_v56   ;;  %v2551_v1 = vpack.c.bf16 %v3359_v62, %v3357_v58  ;;  %v3377_v7 = vld [vmem:[#allocation2 + $0x28] sm:$0xff] }
 0x1e9   : > { %2670 = vst [vmem:[%s3761_s2 + $0x40] sm:$0xff] %v2546_v57   ;;  %v2556_v2 = vpack.c.bf16 %v3363_v0, %v3361_v63  ;;  %v3379_v8 = vld [vmem:[#allocation2 + $0x1e8] sm:$0xff]  ;;  %v3381_v9 = vld [vmem:[#allocation2 + $0xf8] sm:$0xff]  ;;  %v2561_v10 = vpack.c.bf16 %v3377_v7, %v3375_v3  ;;  %v3393_v12 = vld [vmem:[#allocation2 + $0x160] sm:$0xff] }
 0x1ea   : > { %v1966_v59 = vadd.f32 %v1965_v51, %v1583_v27  ;;  %v2099_v60 = vadd.f32 %v2098_v50, %v2036_v43  ;;  %2671 = vst [vmem:[%s3761_s2 + $0x48] sm:$0xff] %v2551_v1   ;;  %v2566_v11 = vpack.c.bf16 %v3381_v9, %v3379_v8  ;;  %v3397_v16 = vld [vmem:[#allocation2 + $0x30] sm:$0xff]  ;;  %v3399_v17 = vld [vmem:[#allocation2 + $0x1e0] sm:$0xff]  ;;  %v3418_v25 = vld [vmem:[#allocation2 + $0x8] sm:$0xff]  ;;  %v2043_v43 = vmul.f32 %v3323_v44, %v3323_v44 }
 0x1eb   : > { %2672 = vst [vmem:[%s3761_s2 + $0x50] sm:$0xff] %v2556_v2   ;;  %v3401_v18 = vld [vmem:[#allocation2] sm:$0xff]  ;;  %2673 = vst [vmem:[%s3761_s2 + $0x58] sm:$0xff] %v2561_v10   ;;  %v2571_v19 = vpack.c.bf16 %v3397_v16, %v3393_v12  ;;  %v3413_v21 = vld [vmem:[#allocation2 + $0xf0] sm:$0xff]  ;;  %v2045_v10 = vmul.f32 %v3327_v46, %v3327_v46 }
 0x1ec   : > { %v2100_v4 = vadd.f32 %v2099_v60, %v2037_v52  ;;  %v1967_v5 = vadd.f32 %v1966_v59, %v1584_v31  ;;  %2674 = vst [vmem:[%s3761_s2 + $0x60] sm:$0xff] %v2566_v11   ;;  %v2576_v20 = vpack.c.bf16 %v3401_v18, %v3399_v17  ;;  %v3420_v26 = vld [vmem:[#allocation2 + $0x148] sm:$0xff]  ;;  %v3422_v27 = vld [vmem:[#allocation2 + $0x1d0] sm:$0xff]  ;;  %v2581_v28 = vpack.c.bf16 %v3418_v25, %v3413_v21  ;;  %v3434_v30 = vld [vmem:[#allocation2 + $0x100] sm:$0xff] }
 0x1ed   : > { %2675 = vst [vmem:[%s3761_s2 + $0x68] sm:$0xff] %v2571_v19   ;;  %v2586_v29 = vpack.c.bf16 %v3422_v27, %v3420_v26  ;;  %v3439_v34 = vld [vmem:[#allocation2 + $0xc8] sm:$0xff]  ;;  %v3455_v39 = vld [vmem:[#allocation2 + $0x20] sm:$0xff]  ;;  %v3464_v50 = vld [vmem:[#allocation2 + $0x1f0] sm:$0xff]  ;;  %v2044_v59 = vmul.f32 %v3325_v45, %v3325_v45 }
 0x1ee   : > { %v1968_v13 = vadd.f32 %v1967_v5, %v1585_v35  ;;  %v2101_v14 = vadd.f32 %v2100_v4, %v2038_v61  ;;  %2676 = vst [vmem:[%s3761_s2 + $0x70] sm:$0xff] %v2576_v20   ;;  %v3441_v35 = vld [vmem:[#allocation2 + $0x40] sm:$0xff]  ;;  %2677 = vst [vmem:[%s3761_s2 + $0x78] sm:$0xff] %v2581_v28   ;;  %v3460_v47 = vld [vmem:[#allocation2 + $0x128] sm:$0xff] }
 0x1ef   : > { %2678 = vst [vmem:[%s3761_s2 + $0x80] sm:$0xff] %v2586_v29   ;;  %v3462_v48 = vld [vmem:[#allocation2 + $0x1a0] sm:$0xff]  ;;  %v3476_v52 = vld [vmem:[#allocation2 + $0xe8] sm:$0xff]  ;;  %v3481_v60 = vld [vmem:[#allocation2 + $0x78] sm:$0xff] }
 0x1f0   : > { %v2102_v22 = vadd.f32 %v2101_v14, %v2039_v6  ;;  %v1969_v23 = vadd.f32 %v1968_v13, %v3309_v36  ;;  %v3443_v36 = vld [vmem:[#allocation2 + $0x1f8] sm:$0xff]  ;;  %v2606_v51 = vpack.c.bf16 %v3464_v50, %v3462_v48  ;;  %v3483_v61 = vld [vmem:[#allocation2 + $0x70] sm:$0xff]  ;;  %v3506_v14 = vld [vmem:[#allocation2 + $0x88] sm:$0xff] }
 0x1f1   : > { %v2596_v38 = vpack.c.bf16 %v3443_v36, %v3441_v35  ;;  %v3485_v1 = vld [vmem:[#allocation2 + $0x90] sm:$0xff]  ;;  %v3497_v4 = vld [vmem:[#allocation2 + $0x1d8] sm:$0xff]  ;;  %v3518_v19 = vld [vmem:[#allocation2 + $0xa8] sm:$0xff] }
 0x1f2   : > { %v1970_v31 = vadd.f32 %v1969_v23, %v3311_v37  ;;  %v2103_v32 = vadd.f32 %v2102_v22, %v2040_v15  ;;  %v2591_v37 = vpack.c.bf16 %v3439_v34, %v3434_v30  ;;  %2682 = vst [vmem:[%s3761_s2 + $0xa0] sm:$0xff] %v2606_v51   ;;  %v2616_v2 = vpack.c.bf16 %v3485_v1, %v3483_v61  ;;  %v3502_v11 = vld [vmem:[#allocation2 + $0xd0] sm:$0xff]  ;;  %v3504_v13 = vld [vmem:[#allocation2 + $0xb8] sm:$0xff]  ;;  %v3560_v51 = vld [vmem:[#allocation2 + $0xc0] sm:$0xff] }
 0x1f3   : > { %2680 = vst [vmem:[%s3761_s2 + $0x90] sm:$0xff] %v2596_v38   ;;  %v2626_v15 = vpack.c.bf16 %v3506_v14, %v3504_v13  ;;  %v2046_v23 = vmul.f32 %v3339_v49, %v3339_v49  ;;  %v3525_v28 = vld [vmem:[#allocation2 + $0x170] sm:$0xff]  ;;  %v3527_v29 = vld [vmem:[#allocation2 + $0x178] sm:$0xff]  ;;  %v2047_v38 = vmul.f32 %v3341_v53, %v3341_v53 }
 0x1f4   : > { %v2104_v41 = vadd.f32 %v2103_v32, %v2041_v24  ;;  %v1971_v42 = vadd.f32 %v1970_v31, %v3321_v40  ;;  %2679 = vst [vmem:[%s3761_s2 + $0x88] sm:$0xff] %v2591_v37   ;;  %v2601_v40 = vpack.c.bf16 %v3460_v47, %v3455_v39  ;;  %2684 = vst [vmem:[%s3761_s2 + $0xb0] sm:$0xff] %v2616_v2   ;;  %v3523_v24 = vld [vmem:[#allocation2 + $0x1c8] sm:$0xff]  ;;  %v3567_v2 = vld [vmem:[#allocation2 + $0x158] sm:$0xff] }
 0x1f5   : > { %2686 = vst [vmem:[%s3761_s2 + $0xc0] sm:$0xff] %v2626_v15   ;;  %v2636_v31 = vpack.c.bf16 %v3527_v29, %v3525_v28  ;;  %v3539_v32 = vld [vmem:[#allocation2 + $0x68] sm:$0xff]  ;;  %v2049_v15 = vmul.f32 %v3345_v55, %v3345_v55 }
 0x1f6   : > { %v1972_v56 = vadd.f32 %v1971_v42, %v3323_v44  ;;  %v2105_v57 = vadd.f32 %v2104_v41, %v2042_v33  ;;  %2681 = vst [vmem:[%s3761_s2 + $0x98] sm:$0xff] %v2601_v40   ;;  %v2611_v44 = vpack.c.bf16 %v3481_v60, %v3476_v52  ;;  %v3544_v41 = vld [vmem:[#allocation2 + $0x190] sm:$0xff]  ;;  %v3546_v42 = vld [vmem:[#allocation2 + $0x198] sm:$0xff] }
 0x1f7   : > { %2688 = vst [vmem:[%s3761_s2 + $0xd0] sm:$0xff] %v2636_v31   ;;  %v2050_v31 = vmul.f32 %v3357_v58, %v3357_v58 }
 0x1f8   : > { %v2106_v5 = vadd.f32 %v2105_v57, %v2043_v43  ;;  %v1973_v6 = vadd.f32 %v1972_v56, %v3325_v45  ;;  %2683 = vst [vmem:[%s3761_s2 + $0xa8] sm:$0xff] %v2611_v44   ;;  %v2621_v45 = vpack.c.bf16 %v3502_v11, %v3497_v4  ;;  %v3548_v43 = vld [vmem:[#allocation2 + $0x38] sm:$0xff]  ;;  %v3565_v44 = vld [vmem:[#allocation2 + $0x1c0] sm:$0xff] }
 0x1f9   : > { %v2646_v40 = vpack.c.bf16 %v3548_v43, %v3546_v42 }
 0x1fa   : > { %v1974_v20 = vadd.f32 %v1973_v6, %v3327_v46  ;;  %v2107_v22 = vadd.f32 %v2106_v5, %v2044_v59  ;;  %2685 = vst [vmem:[%s3761_s2 + $0xb8] sm:$0xff] %v2621_v45   ;;  %v2631_v46 = vpack.c.bf16 %v3523_v24, %v3518_v19  ;;  %v2048_v59 = vmul.f32 %v3343_v54, %v3343_v54  ;;  %v3569_v5 = vld [vmem:[#allocation2 + $0x10] sm:$0xff] }
 0x1fb   : > { %2690 = vst [vmem:[%s3761_s2 + $0xe0] sm:$0xff] %v2646_v40   ;;  %v2656_v6 = vpack.c.bf16 %v3569_v5, %v3567_v2 }
 0x1fc   : > { %v2108_v33 = vadd.f32 %v2107_v22, %v2045_v10  ;;  %v1975_v37 = vadd.f32 %v1974_v20, %v3339_v49  ;;  %2687 = vst [vmem:[%s3761_s2 + $0xc8] sm:$0xff] %v2631_v46   ;;  %v2641_v49 = vpack.c.bf16 %v3544_v41, %v3539_v32  ;;  %v3584_v20 = vld [vmem:[#allocation2 + $0x58] sm:$0xff]  ;;  %v3586_v22 = vld [vmem:[#allocation2 + $0xa0] sm:$0xff] }
 0x1fd   : > { %2692 = vst [vmem:[%s3761_s2 + $0xf0] sm:$0xff] %v2656_v6  }
 0x1fe   : > { %v1976_v56 = vadd.f32 %v1975_v37, %v3341_v53  ;;  %v2109_v57 = vadd.f32 %v2108_v33, %v2046_v23  ;;  %2689 = vst [vmem:[%s3761_s2 + $0xd8] sm:$0xff] %v2641_v49   ;;  %v2651_v53 = vpack.c.bf16 %v3565_v44, %v3560_v51  ;;  %v2661_v23 = vpack.c.bf16 %v3586_v22, %v3584_v20 }
 0x200   : > { %v2110_v10 = vadd.f32 %v2109_v57, %v2047_v38  ;;  %v1977_v45 = vadd.f32 %v1976_v56, %v3343_v54  ;;  %2691 = vst [vmem:[%s3761_s2 + $0xe8] sm:$0xff] %v2651_v53   ;;  %2693 = vst [vmem:[%s3761_s2 + $0xf8] sm:$0xff] %v2661_v23   ;;  %v2051_v38 = vmul.f32 %v3359_v62, %v3359_v62 }
 0x202   : > { %v1978_v54 = vadd.f32 %v1977_v45, %v3345_v55  ;;  %v2111_v46 = vadd.f32 %v2110_v10, %v2048_v59  ;;  %v2052_v55 = vmul.f32 %v3361_v63, %v3361_v63  ;;  %v2053_v59 = vmul.f32 %v3363_v0, %v3363_v0 }
 0x204   : > { %v2112_v33 = vadd.f32 %v2111_v46, %v2049_v15  ;;  %v1979_v37 = vadd.f32 %v1978_v54, %v3357_v58  ;;  %v2054_v58 = vmul.f32 %v3375_v3, %v3375_v3 }
 0x206   : > { %v1980_v49 = vadd.f32 %v1979_v37, %v3359_v62  ;;  %v2113_v40 = vadd.f32 %v2112_v33, %v2050_v31  ;;  %v2055_v62 = vmul.f32 %v3377_v7, %v3377_v7 }
 0x208   : > { %v2114_v56 = vadd.f32 %v2113_v40, %v2051_v38  ;;  %v1981_v57 = vadd.f32 %v1980_v49, %v3361_v63  ;;  %v2056_v63 = vmul.f32 %v3379_v8, %v3379_v8 }
 0x20a   : > { %v1982_v53 = vadd.f32 %v1981_v57, %v3363_v0  ;;  %v2115_v6 = vadd.f32 %v2114_v56, %v2052_v55  ;;  %v2057_v0 = vmul.f32 %v3381_v9, %v3381_v9 }
 0x20c   : > { %v2116_v10 = vadd.f32 %v2115_v6, %v2053_v59  ;;  %v1983_v45 = vadd.f32 %v1982_v53, %v3375_v3  ;;  %v2058_v3 = vmul.f32 %v3393_v12, %v3393_v12 }
 0x20e   : > { %v1984_v15 = vadd.f32 %v1983_v45, %v3377_v7  ;;  %v2117_v23 = vadd.f32 %v2116_v10, %v2054_v58  ;;  %v2059_v7 = vmul.f32 %v3397_v16, %v3397_v16 }
 0x210   : > { %v2118_v54 = vadd.f32 %v2117_v23, %v2055_v62  ;;  %v1985_v46 = vadd.f32 %v1984_v15, %v3379_v8  ;;  %v2060_v8 = vmul.f32 %v3399_v17, %v3399_v17 }
 0x212   : > { %v1986_v31 = vadd.f32 %v1985_v46, %v3381_v9  ;;  %v2119_v33 = vadd.f32 %v2118_v54, %v2056_v63  ;;  %v2061_v9 = vmul.f32 %v3401_v18, %v3401_v18 }
 0x214   : > { %v2120_v37 = vadd.f32 %v2119_v33, %v2057_v0  ;;  %v1987_v38 = vadd.f32 %v1986_v31, %v3393_v12  ;;  %v2062_v12 = vmul.f32 %v3413_v21, %v3413_v21 }
 0x216   : > { %v1988_v49 = vadd.f32 %v1987_v38, %v3397_v16  ;;  %v2121_v40 = vadd.f32 %v2120_v37, %v2058_v3  ;;  %v2063_v16 = vmul.f32 %v3418_v25, %v3418_v25 }
 0x218   : > { %v2122_v55 = vadd.f32 %v2121_v40, %v2059_v7  ;;  %v1989_v56 = vadd.f32 %v1988_v49, %v3399_v17  ;;  %v2064_v17 = vmul.f32 %v3420_v26, %v3420_v26 }
 0x21a   : > { %v1990_v57 = vadd.f32 %v1989_v56, %v3401_v18  ;;  %v2123_v59 = vadd.f32 %v2122_v55, %v2060_v8  ;;  %v2065_v18 = vmul.f32 %v3422_v27, %v3422_v27 }
 0x21c   : > { %v2124_v53 = vadd.f32 %v2123_v59, %v2061_v9  ;;  %v1991_v6 = vadd.f32 %v1990_v57, %v3413_v21  ;;  %v2066_v21 = vmul.f32 %v3434_v30, %v3434_v30 }
 0x21e   : > { %v1992_v58 = vadd.f32 %v1991_v6, %v3418_v25  ;;  %v2125_v10 = vadd.f32 %v2124_v53, %v2062_v12  ;;  %v2067_v25 = vmul.f32 %v3439_v34, %v3439_v34 }
 0x220   : > { %v2126_v45 = vadd.f32 %v2125_v10, %v2063_v16  ;;  %v1993_v62 = vadd.f32 %v1992_v58, %v3420_v26  ;;  %v2068_v26 = vmul.f32 %v3441_v35, %v3441_v35 }
 0x222   : > { %v1994_v15 = vadd.f32 %v1993_v62, %v3422_v27  ;;  %v2127_v23 = vadd.f32 %v2126_v45, %v2064_v17  ;;  %v2069_v27 = vmul.f32 %v3443_v36, %v3443_v36 }
 0x224   : > { %v2128_v63 = vadd.f32 %v2127_v23, %v2065_v18  ;;  %v1995_v54 = vadd.f32 %v1994_v15, %v3434_v30  ;;  %v2070_v30 = vmul.f32 %v3455_v39, %v3455_v39 }
 0x226   : > { %v1996_v46 = vadd.f32 %v1995_v54, %v3439_v34  ;;  %v2129_v0 = vadd.f32 %v2128_v63, %v2066_v21  ;;  %v2071_v34 = vmul.f32 %v3460_v47, %v3460_v47 }
 0x228   : > { %v2130_v31 = vadd.f32 %v2129_v0, %v2067_v25  ;;  %v1997_v33 = vadd.f32 %v1996_v46, %v3441_v35  ;;  %v2072_v35 = vmul.f32 %v3462_v48, %v3462_v48 }
 0x22a   : > { %v1998_v3 = vadd.f32 %v1997_v33, %v3443_v36  ;;  %v2131_v37 = vadd.f32 %v2130_v31, %v2068_v26  ;;  %v2073_v36 = vmul.f32 %v3464_v50, %v3464_v50 }
 0x22c   : > { %v2132_v38 = vadd.f32 %v2131_v37, %v2069_v27  ;;  %v1999_v7 = vadd.f32 %v1998_v3, %v3455_v39  ;;  %v2074_v39 = vmul.f32 %v3476_v52, %v3476_v52 }
 0x22e   : > { %v2000_v49 = vadd.f32 %v1999_v7, %v3460_v47  ;;  %v2133_v40 = vadd.f32 %v2132_v38, %v2070_v30  ;;  %v2075_v47 = vmul.f32 %v3481_v60, %v3481_v60 }
 0x230   : > { %v2134_v8 = vadd.f32 %v2133_v40, %v2071_v34  ;;  %v2001_v55 = vadd.f32 %v2000_v49, %v3462_v48  ;;  %v2076_v48 = vmul.f32 %v3483_v61, %v3483_v61 }
 0x232   : > { %v2002_v56 = vadd.f32 %v2001_v55, %v3464_v50  ;;  %v2135_v9 = vadd.f32 %v2134_v8, %v2072_v35  ;;  %v2077_v50 = vmul.f32 %v3485_v1, %v3485_v1 }
 0x234   : > { %v2136_v57 = vadd.f32 %v2135_v9, %v2073_v36  ;;  %v2003_v59 = vadd.f32 %v2002_v56, %v3476_v52  ;;  %v2078_v52 = vmul.f32 %v3497_v4, %v3497_v4 }
 0x236   : > { %v2004_v12 = vadd.f32 %v2003_v59, %v3481_v60  ;;  %v2137_v53 = vadd.f32 %v2136_v57, %v2074_v39  ;;  %v2079_v60 = vmul.f32 %v3502_v11, %v3502_v11 }
 0x238   : > { %v2138_v6 = vadd.f32 %v2137_v53, %v2075_v47  ;;  %v2005_v16 = vadd.f32 %v2004_v12, %v3483_v61  ;;  %v2080_v61 = vmul.f32 %v3504_v13, %v3504_v13 }
 0x23a   : > { %v2006_v58 = vadd.f32 %v2005_v16, %v3485_v1  ;;  %v2139_v10 = vadd.f32 %v2138_v6, %v2076_v48  ;;  %v2081_v1 = vmul.f32 %v3506_v14, %v3506_v14 }
 0x23c   : > { %v2140_v17 = vadd.f32 %v2139_v10, %v2077_v50  ;;  %v2007_v45 = vadd.f32 %v2006_v58, %v3497_v4  ;;  %v2082_v4 = vmul.f32 %v3518_v19, %v3518_v19 }
 0x23e   : > { %v2008_v62 = vadd.f32 %v2007_v45, %v3502_v11  ;;  %v2141_v18 = vadd.f32 %v2140_v17, %v2078_v52  ;;  %v2083_v11 = vmul.f32 %v3523_v24, %v3523_v24 }
 0x240   : > { %v2142_v15 = vadd.f32 %v2141_v18, %v2079_v60  ;;  %v2009_v23 = vadd.f32 %v2008_v62, %v3504_v13  ;;  %v2084_v13 = vmul.f32 %v3525_v28, %v3525_v28 }
 0x242   : > { %v2010_v21 = vadd.f32 %v2009_v23, %v3506_v14  ;;  %v2143_v63 = vadd.f32 %v2142_v15, %v2080_v61  ;;  %v2085_v14 = vmul.f32 %v3527_v29, %v3527_v29 }
 0x244   : > { %v2144_v54 = vadd.f32 %v2143_v63, %v2081_v1  ;;  %v2011_v25 = vadd.f32 %v2010_v21, %v3518_v19  ;;  %v2086_v19 = vmul.f32 %v3539_v32, %v3539_v32 }
 0x246   : > { %v2012_v46 = vadd.f32 %v2011_v25, %v3523_v24  ;;  %v2145_v0 = vadd.f32 %v2144_v54, %v2082_v4  ;;  %v2087_v24 = vmul.f32 %v3544_v41, %v3544_v41 }
 0x248   : > { %v2146_v26 = vadd.f32 %v2145_v0, %v2083_v11  ;;  %v2013_v31 = vadd.f32 %v2012_v46, %v3525_v28  ;;  %v2088_v28 = vmul.f32 %v3546_v42, %v3546_v42 }
 0x24a   : > { %v2014_v33 = vadd.f32 %v2013_v31, %v3527_v29  ;;  %v2147_v27 = vadd.f32 %v2146_v26, %v2084_v13  ;;  %v2089_v29 = vmul.f32 %v3548_v43, %v3548_v43 }
 0x24c   : > { %v2148_v3 = vadd.f32 %v2147_v27, %v2085_v14  ;;  %v2015_v37 = vadd.f32 %v2014_v33, %v3539_v32  ;;  %v2090_v32 = vmul.f32 %v3560_v51, %v3560_v51 }
 0x24e   : > { %v2016_v30 = vadd.f32 %v2015_v37, %v3544_v41  ;;  %v2149_v38 = vadd.f32 %v2148_v3, %v2086_v19  ;;  %v2091_v41 = vmul.f32 %v3565_v44, %v3565_v44 }
 0x250   : > { %v2150_v7 = vadd.f32 %v2149_v38, %v2087_v24  ;;  %v2017_v34 = vadd.f32 %v2016_v30, %v3546_v42  ;;  %v2092_v42 = vmul.f32 %v3567_v2, %v3567_v2 }
 0x252   : > { %v2018_v49 = vadd.f32 %v2017_v34, %v3548_v43  ;;  %v2151_v40 = vadd.f32 %v2150_v7, %v2088_v28  ;;  %v2093_v43 = vmul.f32 %v3569_v5, %v3569_v5 }
 0x254   : > { %v2152_v35 = vadd.f32 %v2151_v40, %v2089_v29  ;;  %v2019_v8 = vadd.f32 %v2018_v49, %v3560_v51  ;;  %v2094_v51 = vmul.f32 %v3584_v20, %v3584_v20 }
 0x256   : > { %v2020_v55 = vadd.f32 %v2019_v8, %v3565_v44  ;;  %v2153_v36 = vadd.f32 %v2152_v35, %v2090_v32  ;;  %v2095_v44 = vmul.f32 %v3586_v22, %v3586_v22 }
 0x258   : > { %v2154_v56 = vadd.f32 %v2153_v36, %v2091_v41  ;;  %v2021_v9 = vadd.f32 %v2020_v55, %v3567_v2 }
 0x25a   : > { %v2022_v39 = vadd.f32 %v2021_v9, %v3569_v5  ;;  %v2155_v57 = vadd.f32 %v2154_v56, %v2092_v42 }
 0x25c   : > { %v2156_v59 = vadd.f32 %v2155_v57, %v2093_v43  ;;  %v2023_v47 = vadd.f32 %v2022_v39, %v3584_v20 }
 0x25e   : > { %v2024_v12 = vadd.f32 %v2023_v47, %v3586_v22  ;;  %v2157_v53 = vadd.f32 %v2156_v59, %v2094_v51 }
 0x260   : > { %v2025_v48 = vrot.slane %v2024_v12, 4  ;;  %v2158_v2 = vadd.f32 %v2157_v53, %v2095_v44 }
 0x262   : > { %v2026_v6 = vadd.f32 %v2025_v48, %v2024_v12  ;;  %v2159_v16 = vrot.slane %v2158_v2, 4 }
 0x264   : > { %v2027_v50 = vrot.slane %v2026_v6, 2  ;;  %v2160_v58 = vadd.f32 %v2159_v16, %v2158_v2 }
 0x266   : > { %v2028_v5 = vadd.f32 %v2027_v50, %v2026_v6  ;;  %v2161_v10 = vrot.slane %v2160_v58, 2 }
 0x268   : > { %v2029_v52 = vrot.slane %v2028_v5, 1  ;;  %v2162_v17 = vadd.f32 %v2161_v10, %v2160_v58 }
 0x26a   : > { %v2030_v45 = vadd.f32 %v2029_v52, %v2028_v5  ;;  %v2163_v60 = vrot.slane %v2162_v17, 1 }
 0x26c   : > { %2031 = vst [vmem:[%s3762_s3] sm:$0x1] %v2030_v45  ;;  %v2164_v20 = vadd.f32 %v2163_v60, %v2162_v17 }
 0x26e   : > { %2165 = vst [vmem:[%s3762_s3 + $0x1] sm:$0x1] %v2164_v20 }
 0x26f PF: > { %s14_s16 = sadd.s32 1, %s2918_s16   ;;  %s3763_s12 = smov %s2906_s13 }
 0x270   : > { %p11_p12 = scmp.ge.s32.totalorder %s14_s16, 4   ;;  %s3764_s13 = smov %s2977_s20 }
 0x271   : > { %s3765_s14 = smov %s2914_s15  ;;  %s3766_s15 = smov %s3768_s17 }
 0x272   :  { %13 = sbr.rel (!%p11_p12) target bundleno = 3 (0x3), region = 124 }

// kernel: _lambda_.27
= control target key start
LH: loop header
LB: loop body
LE: loop exit
PB: predicated region body
PF: predicated region fallthrough
CT: control target
= control target key end

     0   :  { %s2309_s12 = smov 0   ;;  %s2311_s13 = smov 0   ;;  %s2858_s0 = inlined_call_operand.vmem [shape: bf16[2048,256], index: 0, kind: input, shape index: {}]   ;;  %s2859_s1 = inlined_call_operand.vmem [shape: bf16[256,128], index: 1, kind: input, shape index: {}]   ;;  %s2860_s2 = inlined_call_operand.vmem [shape: bf16[2048,128], index: 2, kind: output, shape index: {0}]   ;;  %s2861_s3 = inlined_call_operand.vmem [shape: f32[32,128], index: 3, kind: output, shape index: {1}]  }
   0x1   :  { %s2313_s14 = smov 0  }
   0x2 LB: > { %s26_s15 = sadd.s32 1, %s2282_s13  ;;  %p1686_p0 = scmp.ge.s32.totalorder %s2286_s14, 1  ;;  %s2286_s14 = sphi %s2313_s14, %s14_s14   ;;  %s2282_s13 = sphi %s2311_s13, %s2863_s13   ;;  %s2278_s12 = sphi %s2309_s12, %s2862_s12  }
   0x3   : > { %p28_p1 = scmp.ge.s32.totalorder %s26_s15, 4  ;;  %p172_p2 = scmp.lt.s32.totalorder %s2286_s14, 5 }
   0x5   : > { %s2865_s15 = smov (%p28_p1, %s26_s15), 0  ;;  %p173_p3 = pnand %p1686_p0, %p172_p2 }
   0x6   : > { %s1687_s18 = sshll.u32 (!%p173_p3), %s2278_s12, 6  ;;  %p234_p5 = scmp.lt.s32.totalorder (!%p173_p3), %s2278_s12, 3 }
   0x7   : > { %176 = sbr.rel (%p173_p3) target bundleno = 475 (0x1db), region = 28  ;;  %p212_p4 = scmp.lt.s32.totalorder (!%p173_p3), %s1687_s18, 255 }
   0xc   : > { %v2152_v0 = vld [vmem:[%s2859_s1 + $0x38] sm:$0xff]   ;;  %v2288_v1 = vmov 0   ;;  %v2153_v2 = vld [vmem:[%s2859_s1 + $0x30] sm:$0xff]   ;;  %v2154_v3 = vld [vmem:[%s2859_s1 + $0x28] sm:$0xff]   ;;  %s2867_s18 = smov (!%p212_p4, %s1687_s18), 255  ;;  %s2869_s12 = smov (!%p234_p5, %s2278_s12), 3 }
   0xd   : > { %751 = vmatprep.subr.bf16.mxu0 %v2288_v1  ;;  %2095 = vmatprep.subr.bf16.mxu1 %v2288_v1  ;;  %v2155_v4 = vld [vmem:[%s2859_s1 + $0x20] sm:$0xff]   ;;  %s1839_s25 = sshll.u32 %s2867_s18, 3  ;;  %v2156_v5 = vld [vmem:[%s2859_s1 + $0x18] sm:$0xff]   ;;  %v2157_v7 = vld [vmem:[%s2859_s1 + $0x10] sm:$0xff]   ;;  %s1691_s5 = sshll.u32 %s2867_s18, 2 }
   0xe   : > { %752 = vmatpush1.bf16.msra.mxu0 %v2152_v0  ;;  %2111 = vmatpush1.bf16.msra.mxu1 %v2152_v0  ;;  %s2359_s30 = scalar_lea.vmem %s2858_s0, %s1839_s25  ;;  %v2158_v8 = vld [vmem:[%s2859_s1 + $0x8] sm:$0xff]   ;;  %v2159_v9 = vld [vmem:[%s2859_s1] sm:$0xff]   ;;  %v2160_v11 = vld [vmem:[%s2859_s1 + $0x78] sm:$0xff]   ;;  %s2490_s8 = scalar_lea.vmem %s2860_s2, %s1691_s5 }
   0xf   : > { %753 = vmatprep.subr.bf16.mxu0 %v2288_v1  ;;  %2096 = vmatprep.subr.bf16.mxu1 %v2288_v1  ;;  %v2170_v6 = vld [vmem:[%s2359_s30 + $0x4] ss:$8 sps:$4 sm:$0xff]   ;;  %v2161_v12 = vld [vmem:[%s2859_s1 + $0x70] sm:$0xff]   ;;  %v2164_v15 = vld [vmem:[%s2859_s1 + $0x58] sm:$0xff]   ;;  %s1692_s18 = sshll.u32 %s2869_s12, 3 }
  0x10   : > { %783 = vmatprep.mubr.bf16.mxu0 %v2170_v6  ;;  %v2194_v10 = vld [vmem:[%s2359_s30 + $0x104] ss:$8 sps:$4 sm:$0xff]   ;;  %v2165_v16 = vld [vmem:[%s2859_s1 + $0x50] sm:$0xff]   ;;  %v2168_v19 = vld [vmem:[%s2359_s30] ss:$8 sps:$4 sm:$0xff]   ;;  %s237_s10 = scalar_lea.vmem %s2861_s3, %s1692_s18 }
  0x11   : > { %911 = vmatprep.mubr.bf16.mxu1 %v2194_v10  ;;  %v2162_v13 = vld [vmem:[%s2859_s1 + $0x68] sm:$0xff]   ;;  %v2163_v14 = vld [vmem:[%s2859_s1 + $0x60] sm:$0xff]   ;;  %v2171_v21 = vld [vmem:[%s2359_s30 + $0x14] ss:$8 sps:$4 sm:$0xff]  }
  0x12   : > { %754 = vmatpush1.bf16.msra.mxu0 %v2153_v2  ;;  %2112 = vmatpush1.bf16.msra.mxu1 %v2153_v2  ;;  %v2166_v17 = vld [vmem:[%s2859_s1 + $0x48] sm:$0xff]   ;;  %v2167_v18 = vld [vmem:[%s2859_s1 + $0x40] sm:$0xff]   ;;  %v2198_v22 = vld [vmem:[%s2359_s30 + $0x114] ss:$8 sps:$4 sm:$0xff]  }
  0x13   : > { %755 = vmatprep.subr.bf16.mxu0 %v2288_v1  ;;  %2097 = vmatprep.subr.bf16.mxu1 %v2288_v1  ;;  %v2192_v20 = vld [vmem:[%s2359_s30 + $0x100] ss:$8 sps:$4 sm:$0xff]   ;;  %v2173_v23 = vld [vmem:[%s2359_s30 + $0x10] ss:$8 sps:$4 sm:$0xff]   ;;  %v2174_v25 = vld [vmem:[%s2359_s30 + $0x24] ss:$8 sps:$4 sm:$0xff]  }
  0x14   : > { %v2200_v24 = vld [vmem:[%s2359_s30 + $0x110] ss:$8 sps:$4 sm:$0xff]   ;;  %v2204_v26 = vld [vmem:[%s2359_s30 + $0x124] ss:$8 sps:$4 sm:$0xff]   ;;  %v2176_v27 = vld [vmem:[%s2359_s30 + $0x20] ss:$8 sps:$4 sm:$0xff]  }
  0x15   : > { %v2206_v28 = vld [vmem:[%s2359_s30 + $0x120] ss:$8 sps:$4 sm:$0xff]   ;;  %v2177_v29 = vld [vmem:[%s2359_s30 + $0x34] ss:$8 sps:$4 sm:$0xff]   ;;  %v2179_v31 = vld [vmem:[%s2359_s30 + $0x30] ss:$8 sps:$4 sm:$0xff]  }
  0x16   : > { %756 = vmatpush1.bf16.msra.mxu0 %v2154_v3  ;;  %2113 = vmatpush1.bf16.msra.mxu1 %v2154_v3  ;;  %v2210_v30 = vld [vmem:[%s2359_s30 + $0x134] ss:$8 sps:$4 sm:$0xff]   ;;  %v2212_v32 = vld [vmem:[%s2359_s30 + $0x130] ss:$8 sps:$4 sm:$0xff]   ;;  %v2180_v33 = vld [vmem:[%s2359_s30 + $0x44] ss:$8 sps:$4 sm:$0xff]  }
  0x17   : > { %757 = vmatprep.subr.bf16.mxu0 %v2288_v1  ;;  %2098 = vmatprep.subr.bf16.mxu1 %v2288_v1  ;;  %v2216_v34 = vld [vmem:[%s2359_s30 + $0x144] ss:$8 sps:$4 sm:$0xff]   ;;  %v2182_v35 = vld [vmem:[%s2359_s30 + $0x40] ss:$8 sps:$4 sm:$0xff]   ;;  %v2183_v37 = vld [vmem:[%s2359_s30 + $0x54] ss:$8 sps:$4 sm:$0xff]  }
  0x18   : > { %v2218_v36 = vld [vmem:[%s2359_s30 + $0x140] ss:$8 sps:$4 sm:$0xff]   ;;  %v2222_v38 = vld [vmem:[%s2359_s30 + $0x154] ss:$8 sps:$4 sm:$0xff]   ;;  %v2185_v39 = vld [vmem:[%s2359_s30 + $0x50] ss:$8 sps:$4 sm:$0xff]  }
  0x19   : > { %v2224_v40 = vld [vmem:[%s2359_s30 + $0x150] ss:$8 sps:$4 sm:$0xff]   ;;  %v2186_v41 = vld [vmem:[%s2359_s30 + $0x64] ss:$8 sps:$4 sm:$0xff]   ;;  %v2188_v43 = vld [vmem:[%s2359_s30 + $0x60] ss:$8 sps:$4 sm:$0xff]  }
  0x1a   : > { %758 = vmatpush1.bf16.msra.mxu0 %v2155_v4  ;;  %2114 = vmatpush1.bf16.msra.mxu1 %v2155_v4  ;;  %v2228_v42 = vld [vmem:[%s2359_s30 + $0x164] ss:$8 sps:$4 sm:$0xff]   ;;  %v2230_v44 = vld [vmem:[%s2359_s30 + $0x160] ss:$8 sps:$4 sm:$0xff]   ;;  %v2189_v45 = vld [vmem:[%s2359_s30 + $0x74] ss:$8 sps:$4 sm:$0xff]  }
  0x1b   : > { %759 = vmatprep.subr.bf16.mxu0 %v2288_v1  ;;  %2099 = vmatprep.subr.bf16.mxu1 %v2288_v1  ;;  %v2234_v46 = vld [vmem:[%s2359_s30 + $0x174] ss:$8 sps:$4 sm:$0xff]   ;;  %v2191_v47 = vld [vmem:[%s2359_s30 + $0x70] ss:$8 sps:$4 sm:$0xff]   ;;  %v2195_v49 = vld [vmem:[%s2359_s30 + $0x84] ss:$8 sps:$4 sm:$0xff]  }
  0x1c   : > { %v2236_v48 = vld [vmem:[%s2359_s30 + $0x170] ss:$8 sps:$4 sm:$0xff]   ;;  %v2240_v50 = vld [vmem:[%s2359_s30 + $0x184] ss:$8 sps:$4 sm:$0xff]   ;;  %v2197_v51 = vld [vmem:[%s2359_s30 + $0x80] ss:$8 sps:$4 sm:$0xff]  }
  0x1d   : > { %v2242_v52 = vld [vmem:[%s2359_s30 + $0x180] ss:$8 sps:$4 sm:$0xff]   ;;  %v2201_v53 = vld [vmem:[%s2359_s30 + $0x94] ss:$8 sps:$4 sm:$0xff]   ;;  %v2203_v55 = vld [vmem:[%s2359_s30 + $0x90] ss:$8 sps:$4 sm:$0xff]  }
  0x1e   : > { %760 = vmatpush1.bf16.msra.mxu0 %v2156_v5  ;;  %2115 = vmatpush1.bf16.msra.mxu1 %v2156_v5  ;;  %v2243_v54 = vld [vmem:[%s2359_s30 + $0x194] ss:$8 sps:$4 sm:$0xff]   ;;  %v2245_v56 = vld [vmem:[%s2359_s30 + $0x190] ss:$8 sps:$4 sm:$0xff]   ;;  %v2207_v57 = vld [vmem:[%s2359_s30 + $0xa4] ss:$8 sps:$4 sm:$0xff]  }
  0x1f   : > { %761 = vmatprep.subr.bf16.mxu0 %v2288_v1  ;;  %2100 = vmatprep.subr.bf16.mxu1 %v2288_v1  ;;  %v2246_v58 = vld [vmem:[%s2359_s30 + $0x1a4] ss:$8 sps:$4 sm:$0xff]   ;;  %v2209_v59 = vld [vmem:[%s2359_s30 + $0xa0] ss:$8 sps:$4 sm:$0xff]   ;;  %v2213_v61 = vld [vmem:[%s2359_s30 + $0xb4] ss:$8 sps:$4 sm:$0xff]  }
  0x20   : > { %v2248_v60 = vld [vmem:[%s2359_s30 + $0x1a0] ss:$8 sps:$4 sm:$0xff]   ;;  %v2249_v62 = vld [vmem:[%s2359_s30 + $0x1b4] ss:$8 sps:$4 sm:$0xff]   ;;  %v2215_v63 = vld [vmem:[%s2359_s30 + $0xb0] ss:$8 sps:$4 sm:$0xff]  }
  0x21   : > { %v2251_v0 = vld [vmem:[%s2359_s30 + $0x1b0] ss:$8 sps:$4 sm:$0xff]   ;;  %v2252_v2 = vld [vmem:[%s2359_s30 + $0x1c4] ss:$8 sps:$4 sm:$0xff]   ;;  %v2221_v3 = vld [vmem:[%s2359_s30 + $0xc0] ss:$8 sps:$4 sm:$0xff]  }
  0x22   : > { %762 = vmatpush1.bf16.msra.mxu0 %v2157_v7  ;;  %2116 = vmatpush1.bf16.msra.mxu1 %v2157_v7  ;;  %v2254_v4 = vld [vmem:[%s2359_s30 + $0x1c0] ss:$8 sps:$4 sm:$0xff]   ;;  %v2225_v5 = vld [vmem:[%s2359_s30 + $0xd4] ss:$8 sps:$4 sm:$0xff]   ;;  %v2227_v7 = vld [vmem:[%s2359_s30 + $0xd0] ss:$8 sps:$4 sm:$0xff]  }
  0x23   : > { %763 = vmatprep.subr.bf16.mxu0 %v2288_v1  ;;  %2101 = vmatprep.subr.bf16.mxu1 %v2288_v1  ;;  %v2255_v6 = vld [vmem:[%s2359_s30 + $0x1d4] ss:$8 sps:$4 sm:$0xff]   ;;  %v2258_v10 = vld [vmem:[%s2359_s30 + $0x1e4] ss:$8 sps:$4 sm:$0xff]  }
  0x26   : > { %764 = vmatpush1.bf16.msra.mxu0 %v2158_v8  ;;  %2117 = vmatpush1.bf16.msra.mxu1 %v2158_v8  ;;  %v2257_v8 = vld [vmem:[%s2359_s30 + $0x1d0] ss:$8 sps:$4 sm:$0xff]  }
  0x27   : > { %765 = vmatprep.subr.bf16.mxu0 %v2288_v1  ;;  %2102 = vmatprep.subr.bf16.mxu1 %v2288_v1 }
  0x2a   : > { %766 = vmatpush1.bf16.msra.mxu0 %v2159_v9  ;;  %2118 = vmatpush1.bf16.msra.mxu1 %v2159_v9  ;;  %v2231_v9 = vld [vmem:[%s2359_s30 + $0xe4] ss:$8 sps:$4 sm:$0xff]  }
  0x2b   : > { %767 = vmatprep.subr.bf16.mxu0 %v2288_v1  ;;  %2103 = vmatprep.subr.bf16.mxu1 %v2288_v1 }
  0x2e   : > { %768 = vmatpush2.bf16.msra.mxu0 %v2160_v11  ;;  %2119 = vmatpush2.bf16.msra.mxu1 %v2160_v11  ;;  %v2233_v11 = vld [vmem:[%s2359_s30 + $0xe0] ss:$8 sps:$4 sm:$0xff]  }
  0x2f   : > { %769 = vmatprep.subr.bf16.mxu0 %v2288_v1  ;;  %2104 = vmatprep.subr.bf16.mxu1 %v2288_v1 }
  0x32   : > { %770 = vmatpush2.bf16.msra.mxu0 %v2161_v12  ;;  %2120 = vmatpush2.bf16.msra.mxu1 %v2161_v12  ;;  %v2260_v12 = vld [vmem:[%s2359_s30 + $0x1e0] ss:$8 sps:$4 sm:$0xff]  }
  0x33   : > { %771 = vmatprep.subr.bf16.mxu0 %v2288_v1  ;;  %2105 = vmatprep.subr.bf16.mxu1 %v2288_v1 }
  0x36   : > { %772 = vmatpush2.bf16.msra.mxu0 %v2162_v13  ;;  %2121 = vmatpush2.bf16.msra.mxu1 %v2162_v13  ;;  %v2237_v13 = vld [vmem:[%s2359_s30 + $0xf4] ss:$8 sps:$4 sm:$0xff]  }
  0x37   : > { %773 = vmatprep.subr.bf16.mxu0 %v2288_v1  ;;  %2106 = vmatprep.subr.bf16.mxu1 %v2288_v1 }
  0x3a   : > { %774 = vmatpush2.bf16.msra.mxu0 %v2163_v14  ;;  %2122 = vmatpush2.bf16.msra.mxu1 %v2163_v14  ;;  %v2261_v14 = vld [vmem:[%s2359_s30 + $0x1f4] ss:$8 sps:$4 sm:$0xff]  }
  0x3b   : > { %775 = vmatprep.subr.bf16.mxu0 %v2288_v1  ;;  %2107 = vmatprep.subr.bf16.mxu1 %v2288_v1 }
  0x3e   : > { %776 = vmatpush2.bf16.msra.mxu0 %v2164_v15  ;;  %2123 = vmatpush2.bf16.msra.mxu1 %v2164_v15  ;;  %v2239_v15 = vld [vmem:[%s2359_s30 + $0xf0] ss:$8 sps:$4 sm:$0xff]  }
  0x3f   : > { %777 = vmatprep.subr.bf16.mxu0 %v2288_v1  ;;  %2108 = vmatprep.subr.bf16.mxu1 %v2288_v1 }
  0x42   : > { %778 = vmatpush2.bf16.msra.mxu0 %v2165_v16  ;;  %2124 = vmatpush2.bf16.msra.mxu1 %v2165_v16  ;;  %v2263_v16 = vld [vmem:[%s2359_s30 + $0x1f0] ss:$8 sps:$4 sm:$0xff]  }
  0x43   : > { %779 = vmatprep.subr.bf16.mxu0 %v2288_v1  ;;  %2109 = vmatprep.subr.bf16.mxu1 %v2288_v1 }
  0x46   : > { %780 = vmatpush2.bf16.msra.mxu0 %v2166_v17  ;;  %2125 = vmatpush2.bf16.msra.mxu1 %v2166_v17 }
  0x47   : > { %781 = vmatprep.subr.bf16.mxu0 %v2288_v1  ;;  %2110 = vmatprep.subr.bf16.mxu1 %v2288_v1  ;;  %v2219_v1 = vld [vmem:[%s2359_s30 + $0xc4] ss:$8 sps:$4 sm:$0xff]  }
  0x4a   : > { %782 = vmatpush2.bf16.msra.mxu0 %v2167_v18  ;;  %2126 = vmatpush2.bf16.msra.mxu1 %v2167_v18 }
  0x4d   : > { %784 = vmatmul.mubr.bf16.vlgmr.msra.gmra.mxu0 %v2168_v19  ;;  %912 = vmatmul.mubr.bf16.vlgmr.msra.gmra.mxu1 %v2192_v20 }
  0x4e   : > { %791 = vmatprep.mubr.bf16.mxu0 %v2171_v21  ;;  %919 = vmatprep.mubr.bf16.mxu1 %v2198_v22 }
  0x55   : > { %792 = vmatmul.mubr.bf16.gmra.mxu0 %v2173_v23  ;;  %920 = vmatmul.mubr.bf16.gmra.mxu1 %v2200_v24 }
  0x56   : > { %799 = vmatprep.mubr.bf16.mxu0 %v2174_v25  ;;  %927 = vmatprep.mubr.bf16.mxu1 %v2204_v26 }
  0x5d   : > { %800 = vmatmul.mubr.bf16.gmra.mxu0 %v2176_v27  ;;  %928 = vmatmul.mubr.bf16.gmra.mxu1 %v2206_v28 }
  0x5e   : > { %807 = vmatprep.mubr.bf16.mxu0 %v2177_v29  ;;  %935 = vmatprep.mubr.bf16.mxu1 %v2210_v30 }
  0x65   : > { %808 = vmatmul.mubr.bf16.gmra.mxu0 %v2179_v31  ;;  %936 = vmatmul.mubr.bf16.gmra.mxu1 %v2212_v32 }
  0x66   : > { %815 = vmatprep.mubr.bf16.mxu0 %v2180_v33  ;;  %943 = vmatprep.mubr.bf16.mxu1 %v2216_v34 }
  0x6d   : > { %816 = vmatmul.mubr.bf16.gmra.mxu0 %v2182_v35  ;;  %944 = vmatmul.mubr.bf16.gmra.mxu1 %v2218_v36 }
  0x6e   : > { %823 = vmatprep.mubr.bf16.mxu0 %v2183_v37  ;;  %951 = vmatprep.mubr.bf16.mxu1 %v2222_v38 }
  0x75   : > { %824 = vmatmul.mubr.bf16.gmra.mxu0 %v2185_v39  ;;  %952 = vmatmul.mubr.bf16.gmra.mxu1 %v2224_v40 }
  0x76   : > { %831 = vmatprep.mubr.bf16.mxu0 %v2186_v41  ;;  %959 = vmatprep.mubr.bf16.mxu1 %v2228_v42 }
  0x7d   : > { %832 = vmatmul.mubr.bf16.gmra.mxu0 %v2188_v43  ;;  %960 = vmatmul.mubr.bf16.gmra.mxu1 %v2230_v44 }
  0x7e   : > { %839 = vmatprep.mubr.bf16.mxu0 %v2189_v45  ;;  %967 = vmatprep.mubr.bf16.mxu1 %v2234_v46 }
  0x85   : > { %840 = vmatmul.mubr.bf16.gmra.mxu0 %v2191_v47  ;;  %968 = vmatmul.mubr.bf16.gmra.mxu1 %v2236_v48 }
  0x86   : > { %847 = vmatprep.mubr.bf16.mxu0 %v2195_v49  ;;  %975 = vmatprep.mubr.bf16.mxu1 %v2240_v50 }
  0x8d   : > { %848 = vmatmul.mubr.bf16.gmra.mxu0 %v2197_v51  ;;  %976 = vmatmul.mubr.bf16.gmra.mxu1 %v2242_v52 }
  0x8e   : > { %855 = vmatprep.mubr.bf16.mxu0 %v2201_v53  ;;  %983 = vmatprep.mubr.bf16.mxu1 %v2243_v54 }
  0x95   : > { %856 = vmatmul.mubr.bf16.gmra.mxu0 %v2203_v55  ;;  %984 = vmatmul.mubr.bf16.gmra.mxu1 %v2245_v56 }
  0x96   : > { %863 = vmatprep.mubr.bf16.mxu0 %v2207_v57  ;;  %991 = vmatprep.mubr.bf16.mxu1 %v2246_v58 }
  0x9d   : > { %864 = vmatmul.mubr.bf16.gmra.mxu0 %v2209_v59  ;;  %992 = vmatmul.mubr.bf16.gmra.mxu1 %v2248_v60 }
  0x9e   : > { %871 = vmatprep.mubr.bf16.mxu0 %v2213_v61  ;;  %999 = vmatprep.mubr.bf16.mxu1 %v2249_v62 }
  0xa5   : > { %872 = vmatmul.mubr.bf16.gmra.mxu0 %v2215_v63  ;;  %1000 = vmatmul.mubr.bf16.gmra.mxu1 %v2251_v0 }
  0xa6   : > { %879 = vmatprep.mubr.bf16.mxu0 %v2219_v1  ;;  %1007 = vmatprep.mubr.bf16.mxu1 %v2252_v2 }
  0xad   : > { %880 = vmatmul.mubr.bf16.gmra.mxu0 %v2221_v3  ;;  %1008 = vmatmul.mubr.bf16.gmra.mxu1 %v2254_v4 }
  0xae   : > { %887 = vmatprep.mubr.bf16.mxu0 %v2225_v5  ;;  %1015 = vmatprep.mubr.bf16.mxu1 %v2255_v6 }
  0xb5   : > { %888 = vmatmul.mubr.bf16.gmra.mxu0 %v2227_v7  ;;  %1016 = vmatmul.mubr.bf16.gmra.mxu1 %v2257_v8 }
  0xb6   : > { %895 = vmatprep.mubr.bf16.mxu0 %v2231_v9  ;;  %1023 = vmatprep.mubr.bf16.mxu1 %v2258_v10 }
  0xbd   : > { %896 = vmatmul.mubr.bf16.gmra.mxu0 %v2233_v11  ;;  %1024 = vmatmul.mubr.bf16.gmra.mxu1 %v2260_v12 }
  0xbe   : > { %903 = vmatprep.mubr.bf16.mxu0 %v2237_v13  ;;  %1031 = vmatprep.mubr.bf16.mxu1 %v2261_v14 }
  0xc5   : > { %904 = vmatmul.mubr.bf16.gmra.mxu0 %v2239_v15  ;;  %1032 = vmatmul.mubr.bf16.gmra.mxu1 %v2263_v16 }
 0x10d   : > { %v2482_v17 = vpop.f32.mrf.mxu0  ;;  %v2484_v18 = vpop.f32.mrf.mxu1 }
 0x10f   : > { %v787_v19 = vpop.f32.mrf.mxu0  ;;  %v915_v20 = vpop.f32.mrf.mxu1 }
 0x111   : > { %v2492_v21 = vpop.f32.mrf.mxu0  ;;  %v2494_v22 = vpop.f32.mrf.mxu1 }
 0x112   : > { %v1907_v23 = vpack.c.bf16 %v2492_v21, %v2482_v17  ;;  %v1987_v24 = vpack.c.bf16 %v2494_v22, %v2484_v18 }
 0x113   : > { %v790_v25 = vpop.f32.mrf.mxu0  ;;  %v918_v26 = vpop.f32.mrf.mxu1 }
 0x114   : > { %1908 = vst [vmem:[%s2490_s8] sm:$0xff] %v1907_v23   ;;  %2079 = vst [vmem:[%s2490_s8 + $0x80] sm:$0xff] %v1987_v24  }
 0x115   : > { %v2502_v27 = vpop.f32.mrf.mxu0  ;;  %v2504_v28 = vpop.f32.mrf.mxu1 }
 0x117   : > { %v795_v29 = vpop.f32.mrf.mxu0  ;;  %v923_v30 = vpop.f32.mrf.mxu1 }
 0x119   : > { %v2506_v31 = vpop.f32.mrf.mxu0  ;;  %v2508_v32 = vpop.f32.mrf.mxu1 }
 0x11a   : > { %v1912_v33 = vpack.c.bf16 %v2506_v31, %v2502_v27  ;;  %v1992_v34 = vpack.c.bf16 %v2508_v32, %v2504_v28 }
 0x11b   : > { %v798_v35 = vpop.f32.mrf.mxu0  ;;  %v926_v36 = vpop.f32.mrf.mxu1 }
 0x11c   : > { %2064 = vst [vmem:[%s2490_s8 + $0x8] sm:$0xff] %v1912_v33   ;;  %2080 = vst [vmem:[%s2490_s8 + $0x88] sm:$0xff] %v1992_v34  }
 0x11d   : > { %v2516_v37 = vpop.f32.mrf.mxu0  ;;  %v2518_v38 = vpop.f32.mrf.mxu1 }
 0x11f   : > { %v803_v39 = vpop.f32.mrf.mxu0  ;;  %v931_v40 = vpop.f32.mrf.mxu1 }
 0x121   : > { %v2520_v41 = vpop.f32.mrf.mxu0  ;;  %v2522_v42 = vpop.f32.mrf.mxu1 }
 0x122   : > { %v1917_v43 = vpack.c.bf16 %v2520_v41, %v2516_v37  ;;  %v1997_v44 = vpack.c.bf16 %v2522_v42, %v2518_v38 }
 0x123   : > { %v806_v45 = vpop.f32.mrf.mxu0  ;;  %v934_v46 = vpop.f32.mrf.mxu1 }
 0x124   : > { %2065 = vst [vmem:[%s2490_s8 + $0x10] sm:$0xff] %v1917_v43   ;;  %2081 = vst [vmem:[%s2490_s8 + $0x90] sm:$0xff] %v1997_v44   ;;  %v1431_v43 = vmul.f32 %v2492_v21, %v2492_v21  ;;  %v1430_v46 = vmul.f32 %v2482_v17, %v2482_v17 }
 0x125   : > { %v2530_v47 = vpop.f32.mrf.mxu0  ;;  %v2532_v48 = vpop.f32.mrf.mxu1 }
 0x127   : > { %v811_v49 = vpop.f32.mrf.mxu0  ;;  %v939_v50 = vpop.f32.mrf.mxu1 }
 0x128   : > { %v1432_v49 = vmul.f32 %v2502_v27, %v2502_v27 }
 0x129   : > { %v2534_v51 = vpop.f32.mrf.mxu0  ;;  %v2536_v52 = vpop.f32.mrf.mxu1 }
 0x12a   : > { %v1922_v53 = vpack.c.bf16 %v2534_v51, %v2530_v47  ;;  %v2002_v54 = vpack.c.bf16 %v2536_v52, %v2532_v48 }
 0x12b   : > { %v814_v55 = vpop.f32.mrf.mxu0  ;;  %v942_v56 = vpop.f32.mrf.mxu1 }
 0x12c   : > { %2066 = vst [vmem:[%s2490_s8 + $0x18] sm:$0xff] %v1922_v53   ;;  %2082 = vst [vmem:[%s2490_s8 + $0x98] sm:$0xff] %v2002_v54   ;;  %v1360_v54 = vadd.f32 %v2492_v21, %v2482_v17  ;;  %v1494_v55 = vadd.f32 %v1431_v43, %v1430_v46  ;;  %v1433_v56 = vmul.f32 %v2506_v31, %v2506_v31 }
 0x12d   : > { %v2544_v57 = vpop.f32.mrf.mxu0  ;;  %v2546_v58 = vpop.f32.mrf.mxu1 }
 0x12f   : > { %v819_v59 = vpop.f32.mrf.mxu0  ;;  %v947_v60 = vpop.f32.mrf.mxu1 }
 0x131   : > { %v2548_v61 = vpop.f32.mrf.mxu0  ;;  %v2550_v62 = vpop.f32.mrf.mxu1 }
 0x132   : > { %v1927_v63 = vpack.c.bf16 %v2548_v61, %v2544_v57  ;;  %v2007_v0 = vpack.c.bf16 %v2550_v62, %v2546_v58 }
 0x133   : > { %v822_v1 = vpop.f32.mrf.mxu0  ;;  %v950_v2 = vpop.f32.mrf.mxu1 }
 0x134   : > { %2067 = vst [vmem:[%s2490_s8 + $0x20] sm:$0xff] %v1927_v63   ;;  %2083 = vst [vmem:[%s2490_s8 + $0xa0] sm:$0xff] %v2007_v0   ;;  %v1361_v63 = vadd.f32 %v1360_v54, %v2502_v27  ;;  %v1495_v0 = vadd.f32 %v1494_v55, %v1432_v49  ;;  %v1434_v1 = vmul.f32 %v2516_v37, %v2516_v37 }
 0x135   : > { %v2558_v3 = vpop.f32.mrf.mxu0  ;;  %v2560_v4 = vpop.f32.mrf.mxu1  ;;  %v1435_v27 = vmul.f32 %v2520_v41, %v2520_v41 }
 0x136   : > { %v1362_v17 = vadd.f32 %v1361_v63, %v2506_v31  ;;  %v1436_v31 = vmul.f32 %v2530_v47, %v2530_v47 }
 0x137   : > { %v827_v5 = vpop.f32.mrf.mxu0  ;;  %v955_v6 = vpop.f32.mrf.mxu1 }
 0x139   : > { %v2562_v7 = vpop.f32.mrf.mxu0  ;;  %v2564_v8 = vpop.f32.mrf.mxu1 }
 0x13a   : > { %v1932_v9 = vpack.c.bf16 %v2562_v7, %v2558_v3  ;;  %v2012_v10 = vpack.c.bf16 %v2564_v8, %v2560_v4 }
 0x13b   : > { %v830_v11 = vpop.f32.mrf.mxu0  ;;  %v958_v12 = vpop.f32.mrf.mxu1 }
 0x13c   : > { %2068 = vst [vmem:[%s2490_s8 + $0x28] sm:$0xff] %v1932_v9   ;;  %2084 = vst [vmem:[%s2490_s8 + $0xa8] sm:$0xff] %v2012_v10   ;;  %v1496_v9 = vadd.f32 %v1495_v0, %v1433_v56  ;;  %v1363_v12 = vadd.f32 %v1362_v17, %v2516_v37  ;;  %v1441_v17 = vmul.f32 %v2562_v7, %v2562_v7 }
 0x13d   : > { %v2572_v13 = vpop.f32.mrf.mxu0  ;;  %v2574_v14 = vpop.f32.mrf.mxu1 }
 0x13f   : > { %v835_v15 = vpop.f32.mrf.mxu0  ;;  %v963_v16 = vpop.f32.mrf.mxu1 }
 0x140   : > { %v1497_v15 = vadd.f32 %v1496_v9, %v1434_v1 }
 0x141   : > { %v2576_v19 = vpop.f32.mrf.mxu0  ;;  %v2578_v20 = vpop.f32.mrf.mxu1 }
 0x142   : > { %v1937_v23 = vpack.c.bf16 %v2576_v19, %v2572_v13  ;;  %v2017_v24 = vpack.c.bf16 %v2578_v20, %v2574_v14 }
 0x143   : > { %v838_v25 = vpop.f32.mrf.mxu0  ;;  %v966_v26 = vpop.f32.mrf.mxu1 }
 0x144   : > { %2069 = vst [vmem:[%s2490_s8 + $0x30] sm:$0xff] %v1937_v23   ;;  %2085 = vst [vmem:[%s2490_s8 + $0xb0] sm:$0xff] %v2017_v24   ;;  %v1364_v24 = vadd.f32 %v1363_v12, %v2520_v41  ;;  %v1498_v25 = vadd.f32 %v1497_v15, %v1435_v27  ;;  %v1437_v26 = vmul.f32 %v2534_v51, %v2534_v51 }
 0x145   : > { %v2586_v29 = vpop.f32.mrf.mxu0  ;;  %v2588_v30 = vpop.f32.mrf.mxu1  ;;  %v1442_v27 = vmul.f32 %v2572_v13, %v2572_v13 }
 0x147   : > { %v843_v33 = vpop.f32.mrf.mxu0  ;;  %v971_v34 = vpop.f32.mrf.mxu1 }
 0x148   : > { %v1365_v34 = vadd.f32 %v1364_v24, %v2530_v47  ;;  %v1439_v47 = vmul.f32 %v2548_v61, %v2548_v61 }
 0x149   : > { %v2590_v35 = vpop.f32.mrf.mxu0  ;;  %v2592_v36 = vpop.f32.mrf.mxu1 }
 0x14a   : > { %v1942_v39 = vpack.c.bf16 %v2590_v35, %v2586_v29  ;;  %v2022_v40 = vpack.c.bf16 %v2592_v36, %v2588_v30  ;;  %v1366_v41 = vadd.f32 %v1365_v34, %v2534_v51  ;;  %v1440_v51 = vmul.f32 %v2558_v3, %v2558_v3 }
 0x14b   : > { %v846_v44 = vpop.f32.mrf.mxu0  ;;  %v974_v45 = vpop.f32.mrf.mxu1 }
 0x14c   : > { %2070 = vst [vmem:[%s2490_s8 + $0x38] sm:$0xff] %v1942_v39   ;;  %2086 = vst [vmem:[%s2490_s8 + $0xb8] sm:$0xff] %v2022_v40   ;;  %v1499_v39 = vadd.f32 %v1498_v25, %v1436_v31  ;;  %v1438_v40 = vmul.f32 %v2544_v57, %v2544_v57  ;;  %v1367_v56 = vadd.f32 %v1366_v41, %v2544_v57 }
 0x14d   : > { %v2606_v50 = vpop.f32.mrf.mxu0  ;;  %v2608_v53 = vpop.f32.mrf.mxu1  ;;  %v1445_v41 = vmul.f32 %v2590_v35, %v2590_v35 }
 0x14e   : > { %v1500_v49 = vadd.f32 %v1499_v39, %v1437_v26  ;;  %v1368_v0 = vadd.f32 %v1367_v56, %v2548_v61 }
 0x14f   : > { %v851_v59 = vpop.f32.mrf.mxu0  ;;  %v979_v60 = vpop.f32.mrf.mxu1 }
 0x150   : > { %v1501_v59 = vadd.f32 %v1500_v49, %v1438_v40 }
 0x151   : > { %v2617_v2 = vpop.f32.mrf.mxu0  ;;  %v2619_v5 = vpop.f32.mrf.mxu1 }
 0x152   : > { %v1947_v21 = vpack.c.bf16 %v2617_v2, %v2606_v50  ;;  %v2027_v6 = vpack.c.bf16 %v2619_v5, %v2608_v53  ;;  %v1502_v1 = vadd.f32 %v1501_v59, %v1439_v47  ;;  %v1446_v47 = vmul.f32 %v2606_v50, %v2606_v50 }
 0x153   : > { %v854_v10 = vpop.f32.mrf.mxu0  ;;  %v982_v11 = vpop.f32.mrf.mxu1 }
 0x154   : > { %2071 = vst [vmem:[%s2490_s8 + $0x40] sm:$0xff] %v1947_v21   ;;  %2087 = vst [vmem:[%s2490_s8 + $0xc0] sm:$0xff] %v2027_v6   ;;  %v1369_v6 = vadd.f32 %v1368_v0, %v2558_v3  ;;  %v1503_v9 = vadd.f32 %v1502_v1, %v1440_v51  ;;  %v1443_v3 = vmul.f32 %v2576_v19, %v2576_v19 }
 0x155   : > { %v2633_v16 = vpop.f32.mrf.mxu0  ;;  %v2635_v23 = vpop.f32.mrf.mxu1  ;;  %v1447_v0 = vmul.f32 %v2617_v2, %v2617_v2 }
 0x156   : > { %v1370_v61 = vadd.f32 %v1369_v6, %v2562_v7  ;;  %v1504_v31 = vadd.f32 %v1503_v9, %v1441_v17  ;;  %v1444_v7 = vmul.f32 %v2586_v29, %v2586_v29 }
 0x157   : > { %v859_v33 = vpop.f32.mrf.mxu0  ;;  %v987_v37 = vpop.f32.mrf.mxu1 }
 0x158   : > { %v1371_v26 = vadd.f32 %v1370_v61, %v2572_v13  ;;  %v1505_v33 = vadd.f32 %v1504_v31, %v1442_v27 }
 0x159   : > { %v2643_v43 = vpop.f32.mrf.mxu0  ;;  %v2645_v44 = vpop.f32.mrf.mxu1 }
 0x15a   : > { %v1952_v45 = vpack.c.bf16 %v2643_v43, %v2633_v16  ;;  %v2032_v46 = vpack.c.bf16 %v2645_v44, %v2635_v23  ;;  %v1372_v39 = vadd.f32 %v1371_v26, %v2576_v19  ;;  %v1506_v40 = vadd.f32 %v1505_v33, %v1443_v3 }
 0x15b   : > { %v862_v54 = vpop.f32.mrf.mxu0  ;;  %v990_v55 = vpop.f32.mrf.mxu1  ;;  %v1449_v61 = vmul.f32 %v2643_v43, %v2643_v43 }
 0x15c   : > { %2072 = vst [vmem:[%s2490_s8 + $0x48] sm:$0xff] %v1952_v45   ;;  %2088 = vst [vmem:[%s2490_s8 + $0xc8] sm:$0xff] %v2032_v46   ;;  %v1373_v13 = vadd.f32 %v1372_v39, %v2586_v29  ;;  %v1507_v49 = vadd.f32 %v1506_v40, %v1444_v7 }
 0x15d   : > { %v2659_v60 = vpop.f32.mrf.mxu0  ;;  %v2661_v63 = vpop.f32.mrf.mxu1 }
 0x15e   : > { %v1374_v56 = vadd.f32 %v1373_v13, %v2590_v35  ;;  %v1508_v51 = vadd.f32 %v1507_v49, %v1445_v41  ;;  %v1450_v3 = vmul.f32 %v2659_v60, %v2659_v60 }
 0x15f   : > { %v867_v21 = vpop.f32.mrf.mxu0  ;;  %v995_v57 = vpop.f32.mrf.mxu1 }
 0x160   : > { %v1375_v29 = vadd.f32 %v1374_v56, %v2606_v50  ;;  %v1509_v21 = vadd.f32 %v1508_v51, %v1446_v47  ;;  %v1448_v57 = vmul.f32 %v2633_v16, %v2633_v16 }
 0x161   : > { %v2669_v10 = vpop.f32.mrf.mxu0  ;;  %v2671_v11 = vpop.f32.mrf.mxu1 }
 0x162   : > { %v1957_v12 = vpack.c.bf16 %v2669_v10, %v2659_v60  ;;  %v2037_v15 = vpack.c.bf16 %v2671_v11, %v2661_v63  ;;  %v1376_v9 = vadd.f32 %v1375_v29, %v2617_v2  ;;  %v1510_v27 = vadd.f32 %v1509_v21, %v1447_v0 }
 0x163   : > { %v870_v24 = vpop.f32.mrf.mxu0  ;;  %v998_v25 = vpop.f32.mrf.mxu1  ;;  %v1451_v39 = vmul.f32 %v2669_v10, %v2669_v10 }
 0x164   : > { %2073 = vst [vmem:[%s2490_s8 + $0x50] sm:$0xff] %v1957_v12   ;;  %2089 = vst [vmem:[%s2490_s8 + $0xd0] sm:$0xff] %v2037_v15   ;;  %v1377_v50 = vadd.f32 %v1376_v9, %v2633_v16  ;;  %v1511_v31 = vadd.f32 %v1510_v27, %v1448_v57 }
 0x165   : > { %v873_v37 = vpop.f32.mrf.mxu0  ;;  %v2685_v34 = vpop.f32.mrf.mxu1 }
 0x166   : > { %v1378_v26 = vadd.f32 %v1377_v50, %v2643_v43  ;;  %v1512_v7 = vadd.f32 %v1511_v31, %v1449_v61 }
 0x167   : > { %v875_v45 = vpop.f32.mrf.mxu0  ;;  %v1003_v46 = vpop.f32.mrf.mxu1 }
 0x168   : > { %v1379_v16 = vadd.f32 %v1378_v26, %v2659_v60  ;;  %v1513_v45 = vadd.f32 %v1512_v7, %v1450_v3  ;;  %v1452_v46 = vmul.f32 %v873_v37, %v873_v37 }
 0x169   : > { %v876_v54 = vpop.f32.mrf.mxu0  ;;  %v2693_v55 = vpop.f32.mrf.mxu1 }
 0x16a   : > { %v1962_v19 = vpack.c.bf16 %v876_v54, %v873_v37  ;;  %v2042_v59 = vpack.c.bf16 %v2693_v55, %v2685_v34  ;;  %v1380_v43 = vadd.f32 %v1379_v16, %v2669_v10  ;;  %v1514_v47 = vadd.f32 %v1513_v45, %v1451_v39 }
 0x16b   : > { %v878_v1 = vpop.f32.mrf.mxu0  ;;  %v1006_v17 = vpop.f32.mrf.mxu1  ;;  %v1453_v56 = vmul.f32 %v876_v54, %v876_v54 }
 0x16c   : > { %2074 = vst [vmem:[%s2490_s8 + $0x58] sm:$0xff] %v1962_v19   ;;  %2090 = vst [vmem:[%s2490_s8 + $0xd8] sm:$0xff] %v2042_v59   ;;  %v1381_v51 = vadd.f32 %v1380_v43, %v873_v37  ;;  %v1515_v0 = vadd.f32 %v1514_v47, %v1452_v46 }
 0x16d   : > { %v881_v6 = vpop.f32.mrf.mxu0  ;;  %v2705_v35 = vpop.f32.mrf.mxu1 }
 0x16e   : > { %v1454_v1 = vmul.f32 %v881_v6, %v881_v6  ;;  %v1382_v29 = vadd.f32 %v1381_v51, %v876_v54  ;;  %v1516_v9 = vadd.f32 %v1515_v0, %v1453_v56 }
 0x16f   : > { %v883_v12 = vpop.f32.mrf.mxu0  ;;  %v1011_v15 = vpop.f32.mrf.mxu1 }
 0x170   : > { %v1383_v12 = vadd.f32 %v1382_v29, %v881_v6  ;;  %v1517_v15 = vadd.f32 %v1516_v9, %v1454_v1 }
 0x171   : > { %v884_v24 = vpop.f32.mrf.mxu0  ;;  %v2713_v25 = vpop.f32.mrf.mxu1 }
 0x172   : > { %v1967_v2 = vpack.c.bf16 %v884_v24, %v881_v6  ;;  %v2047_v33 = vpack.c.bf16 %v2713_v25, %v2705_v35  ;;  %v1455_v27 = vmul.f32 %v884_v24, %v884_v24  ;;  %v1384_v3 = vadd.f32 %v1383_v12, %v884_v24 }
 0x173   : > { %v886_v40 = vpop.f32.mrf.mxu0  ;;  %v1014_v41 = vpop.f32.mrf.mxu1 }
 0x174   : > { %2075 = vst [vmem:[%s2490_s8 + $0x60] sm:$0xff] %v1967_v2   ;;  %2091 = vst [vmem:[%s2490_s8 + $0xe0] sm:$0xff] %v2047_v33   ;;  %v1518_v26 = vadd.f32 %v1517_v15, %v1455_v27 }
 0x175   : > { %v889_v13 = vpop.f32.mrf.mxu0  ;;  %v2723_v49 = vpop.f32.mrf.mxu1 }
 0x176   : > { %v1456_v50 = vmul.f32 %v889_v13, %v889_v13  ;;  %v1385_v7 = vadd.f32 %v1384_v3, %v889_v13 }
 0x177   : > { %v891_v19 = vpop.f32.mrf.mxu0  ;;  %v1019_v59 = vpop.f32.mrf.mxu1 }
 0x178   : > { %v1519_v39 = vadd.f32 %v1518_v26, %v1456_v50  ;;  %v1462_v26 = vmul.f32 %v2484_v18, %v2484_v18 }
 0x179   : > { %v892_v17 = vpop.f32.mrf.mxu0  ;;  %v2726_v60 = vpop.f32.mrf.mxu1 }
 0x17a   : > { %v1972_v21 = vpack.c.bf16 %v892_v17, %v889_v13  ;;  %v2052_v57 = vpack.c.bf16 %v2726_v60, %v2723_v49  ;;  %v1457_v2 = vmul.f32 %v892_v17, %v892_v17  ;;  %v1386_v6 = vadd.f32 %v1385_v7, %v892_v17 }
 0x17b   : > { %v894_v10 = vpop.f32.mrf.mxu0  ;;  %v1022_v61 = vpop.f32.mrf.mxu1 }
 0x17c   : > { %2076 = vst [vmem:[%s2490_s8 + $0x68] sm:$0xff] %v1972_v21   ;;  %2092 = vst [vmem:[%s2490_s8 + $0xe8] sm:$0xff] %v2052_v57   ;;  %v1520_v43 = vadd.f32 %v1519_v39, %v1457_v2 }
 0x17d   : > { %v897_v37 = vpop.f32.mrf.mxu0  ;;  %v2732_v31 = vpop.f32.mrf.mxu1 }
 0x17e   : > { %v1458_v40 = vmul.f32 %v897_v37, %v897_v37  ;;  %v1387_v19 = vadd.f32 %v1386_v6, %v897_v37 }
 0x17f   : > { %v899_v54 = vpop.f32.mrf.mxu0  ;;  %v1027_v33 = vpop.f32.mrf.mxu1 }
 0x180   : > { %v1521_v59 = vadd.f32 %v1520_v43, %v1458_v40  ;;  %v1463_v33 = vmul.f32 %v2494_v22, %v2494_v22  ;;  %v1464_v40 = vmul.f32 %v2504_v28, %v2504_v28  ;;  %v1466_v43 = vmul.f32 %v2518_v38, %v2518_v38 }
 0x181   : > { %v900_v41 = vpop.f32.mrf.mxu0  ;;  %v2734_v16 = vpop.f32.mrf.mxu1 }
 0x182   : > { %v1977_v45 = vpack.c.bf16 %v900_v41, %v897_v37  ;;  %v2057_v46 = vpack.c.bf16 %v2734_v16, %v2732_v31  ;;  %v1459_v47 = vmul.f32 %v900_v41, %v900_v41  ;;  %v1388_v0 = vadd.f32 %v1387_v19, %v900_v41 }
 0x183   : > { %v902_v24 = vpop.f32.mrf.mxu0  ;;  %v1030_v56 = vpop.f32.mrf.mxu1 }
 0x184   : > { %2077 = vst [vmem:[%s2490_s8 + $0x70] sm:$0xff] %v1977_v45   ;;  %2093 = vst [vmem:[%s2490_s8 + $0xf0] sm:$0xff] %v2057_v46   ;;  %v1522_v29 = vadd.f32 %v1521_v59, %v1459_v47  ;;  %v1465_v45 = vmul.f32 %v2508_v32, %v2508_v32 }
 0x185   : > { %v905_v51 = vpop.f32.mrf.mxu0  ;;  %v2740_v13 = vpop.f32.mrf.mxu1 }
 0x186   : > { %v1460_v1 = vmul.f32 %v905_v51, %v905_v51  ;;  %v1389_v57 = vadd.f32 %v1388_v0, %v905_v51 }
 0x187   : > { %v907_v17 = vpop.f32.mrf.mxu0  ;;  %v1035_v21 = vpop.f32.mrf.mxu1 }
 0x188   : > { %v1523_v9 = vadd.f32 %v1522_v29, %v1460_v1 }
 0x189   : > { %v908_v27 = vpop.f32.mrf.mxu0  ;;  %v2742_v10 = vpop.f32.mrf.mxu1 }
 0x18a   : > { %v1982_v61 = vpack.c.bf16 %v908_v27, %v905_v51  ;;  %v1390_v12 = vadd.f32 %v1389_v57, %v908_v27  ;;  %v1461_v15 = vmul.f32 %v908_v27, %v908_v27  ;;  %v2062_v50 = vpack.c.bf16 %v2742_v10, %v2740_v13 }
 0x18b   : > { %v910_v37 = vpop.f32.mrf.mxu0  ;;  %v1038_v3 = vpop.f32.mrf.mxu1 }
 0x18c   : > { %2078 = vst [vmem:[%s2490_s8 + $0x78] sm:$0xff] %v1982_v61   ;;  %v1391_v2 = vadd.f32 %v1390_v12, %v2484_v18  ;;  %v1524_v54 = vadd.f32 %v1523_v9, %v1461_v15  ;;  %2094 = vst [vmem:[%s2490_s8 + $0xf8] sm:$0xff] %v2062_v50  }
 0x18e   : > { %v1392_v7 = vadd.f32 %v1391_v2, %v2494_v22  ;;  %v1525_v39 = vadd.f32 %v1524_v54, %v1462_v26  ;;  %v1467_v22 = vmul.f32 %v2522_v42, %v2522_v42 }
 0x190   : > { %v1393_v41 = vadd.f32 %v1392_v7, %v2504_v28  ;;  %v1526_v6 = vadd.f32 %v1525_v39, %v1463_v33  ;;  %v1468_v28 = vmul.f32 %v2532_v48, %v2532_v48 }
 0x192   : > { %v1394_v46 = vadd.f32 %v1393_v41, %v2508_v32  ;;  %v1527_v18 = vadd.f32 %v1526_v6, %v1464_v40  ;;  %v1469_v32 = vmul.f32 %v2536_v52, %v2536_v52  ;;  %v1479_v40 = vmul.f32 %v2619_v5, %v2619_v5 }
 0x194   : > { %v1395_v47 = vadd.f32 %v1394_v46, %v2518_v38  ;;  %v1528_v24 = vadd.f32 %v1527_v18, %v1465_v45  ;;  %v1470_v38 = vmul.f32 %v2546_v58, %v2546_v58  ;;  %v1480_v45 = vmul.f32 %v2635_v23, %v2635_v23 }
 0x195   : > { %v1481_v18 = vmul.f32 %v2645_v44, %v2645_v44 }
 0x196   : > { %v1396_v56 = vadd.f32 %v1395_v47, %v2522_v42  ;;  %v1529_v19 = vadd.f32 %v1528_v24, %v1466_v43  ;;  %v1471_v42 = vmul.f32 %v2550_v62, %v2550_v62  ;;  %v1482_v47 = vmul.f32 %v2661_v63, %v2661_v63 }
 0x198   : > { %v1397_v59 = vadd.f32 %v1396_v56, %v2532_v48  ;;  %v1530_v51 = vadd.f32 %v1529_v19, %v1467_v22  ;;  %v1472_v48 = vmul.f32 %v2560_v4, %v2560_v4  ;;  %v1483_v22 = vmul.f32 %v2671_v11, %v2671_v11 }
 0x199   : > { %v1484_v19 = vmul.f32 %v2685_v34, %v2685_v34 }
 0x19a   : > { %v1398_v0 = vadd.f32 %v1397_v59, %v2536_v52  ;;  %v1531_v1 = vadd.f32 %v1530_v51, %v1468_v28  ;;  %v1473_v52 = vmul.f32 %v2564_v8, %v2564_v8  ;;  %v1485_v59 = vmul.f32 %v2693_v55, %v2693_v55 }
 0x19c   : > { %v1532_v29 = vadd.f32 %v1531_v1, %v1469_v32  ;;  %v1399_v17 = vadd.f32 %v1398_v0, %v2546_v58  ;;  %v1474_v58 = vmul.f32 %v2574_v14, %v2574_v14  ;;  %v1486_v32 = vmul.f32 %v2705_v35, %v2705_v35 }
 0x19d   : > { %v1487_v1 = vmul.f32 %v2713_v25, %v2713_v25 }
 0x19e   : > { %v1400_v21 = vadd.f32 %v1399_v17, %v2550_v62  ;;  %v1533_v57 = vadd.f32 %v1532_v29, %v1470_v38  ;;  %v1475_v62 = vmul.f32 %v2578_v20, %v2578_v20  ;;  %v1488_v29 = vmul.f32 %v2723_v49, %v2723_v49 }
 0x1a0   : > { %v1401_v9 = vadd.f32 %v1400_v21, %v2560_v4  ;;  %v1534_v27 = vadd.f32 %v1533_v57, %v1471_v42  ;;  %v1476_v4 = vmul.f32 %v2588_v30, %v2588_v30  ;;  %v1489_v42 = vmul.f32 %v2726_v60, %v2726_v60 }
 0x1a2   : > { %v1402_v61 = vadd.f32 %v1401_v9, %v2564_v8  ;;  %v1535_v12 = vadd.f32 %v1534_v27, %v1472_v48  ;;  %v1477_v8 = vmul.f32 %v2592_v36, %v2592_v36  ;;  %v1491_v9 = vmul.f32 %v2734_v16, %v2734_v16 }
 0x1a4   : > { %v1403_v15 = vadd.f32 %v1402_v61, %v2574_v14  ;;  %v1536_v50 = vadd.f32 %v1535_v12, %v1473_v52  ;;  %v1478_v14 = vmul.f32 %v2608_v53, %v2608_v53  ;;  %v1492_v52 = vmul.f32 %v2740_v13, %v2740_v13 }
 0x1a5   : > { %v1493_v12 = vmul.f32 %v2742_v10, %v2742_v10 }
 0x1a6   : > { %v1404_v37 = vadd.f32 %v1403_v15, %v2578_v20  ;;  %v1537_v3 = vadd.f32 %v1536_v50, %v1474_v58 }
 0x1a8   : > { %v1405_v26 = vadd.f32 %v1404_v37, %v2588_v30  ;;  %v1538_v2 = vadd.f32 %v1537_v3, %v1475_v62 }
 0x1aa   : > { %v1406_v54 = vadd.f32 %v1405_v26, %v2592_v36  ;;  %v1539_v33 = vadd.f32 %v1538_v2, %v1476_v4 }
 0x1ac   : > { %v1407_v7 = vadd.f32 %v1406_v54, %v2608_v53  ;;  %v1540_v39 = vadd.f32 %v1539_v33, %v1477_v8 }
 0x1ae   : > { %v1408_v20 = vadd.f32 %v1407_v7, %v2619_v5  ;;  %v1541_v41 = vadd.f32 %v1540_v39, %v1478_v14 }
 0x1b0   : > { %v1542_v30 = vadd.f32 %v1541_v41, %v1479_v40  ;;  %v1409_v6 = vadd.f32 %v1408_v20, %v2635_v23 }
 0x1b2   : > { %v1543_v36 = vadd.f32 %v1542_v30, %v1480_v45  ;;  %v1410_v46 = vadd.f32 %v1409_v6, %v2645_v44 }
 0x1b4   : > { %v1544_v53 = vadd.f32 %v1543_v36, %v1481_v18  ;;  %v1411_v43 = vadd.f32 %v1410_v46, %v2661_v63 }
 0x1b6   : > { %v1545_v5 = vadd.f32 %v1544_v53, %v1482_v47  ;;  %v1412_v24 = vadd.f32 %v1411_v43, %v2671_v11 }
 0x1b8   : > { %v1546_v56 = vadd.f32 %v1545_v5, %v1483_v22  ;;  %v1413_v23 = vadd.f32 %v1412_v24, %v2685_v34 }
 0x1ba   : > { %v1547_v28 = vadd.f32 %v1546_v56, %v1484_v19  ;;  %v1414_v44 = vadd.f32 %v1413_v23, %v2693_v55 }
 0x1bc   : > { %v1548_v51 = vadd.f32 %v1547_v28, %v1485_v59  ;;  %v1415_v63 = vadd.f32 %v1414_v44, %v2705_v35 }
 0x1be   : > { %v1549_v0 = vadd.f32 %v1548_v51, %v1486_v32  ;;  %v1416_v11 = vadd.f32 %v1415_v63, %v2713_v25  ;;  %v1490_v25 = vmul.f32 %v2732_v31, %v2732_v31 }
 0x1c0   : > { %v1550_v38 = vadd.f32 %v1549_v0, %v1487_v1  ;;  %v1417_v34 = vadd.f32 %v1416_v11, %v2723_v49 }
 0x1c2   : > { %v1551_v55 = vadd.f32 %v1550_v38, %v1488_v29  ;;  %v1418_v17 = vadd.f32 %v1417_v34, %v2726_v60 }
 0x1c4   : > { %v1552_v35 = vadd.f32 %v1551_v55, %v1489_v42  ;;  %v1419_v21 = vadd.f32 %v1418_v17, %v2732_v31 }
 0x1c6   : > { %v1553_v57 = vadd.f32 %v1552_v35, %v1490_v25  ;;  %v1420_v48 = vadd.f32 %v1419_v21, %v2734_v16 }
 0x1c8   : > { %v1554_v49 = vadd.f32 %v1553_v57, %v1491_v9  ;;  %v1421_v27 = vadd.f32 %v1420_v48, %v2740_v13 }
 0x1ca   : > { %v1555_v60 = vadd.f32 %v1554_v49, %v1492_v52  ;;  %v1422_v61 = vadd.f32 %v1421_v27, %v2742_v10 }
 0x1cc   : > { %v1423_v31 = vrot.slane %v1422_v61, 4  ;;  %v1556_v58 = vadd.f32 %v1555_v60, %v1493_v12 }
 0x1ce   : > { %v1424_v15 = vadd.f32 %v1423_v31, %v1422_v61  ;;  %v1557_v50 = vrot.slane %v1556_v58, 4 }
 0x1d0   : > { %v1425_v62 = vrot.slane %v1424_v15, 2  ;;  %v1558_v16 = vadd.f32 %v1557_v50, %v1556_v58 }
 0x1d2   : > { %v1426_v37 = vadd.f32 %v1425_v62, %v1424_v15  ;;  %v1559_v3 = vrot.slane %v1558_v16, 2 }
 0x1d4   : > { %v1427_v4 = vrot.slane %v1426_v37, 1  ;;  %v1560_v26 = vadd.f32 %v1559_v3, %v1558_v16 }
 0x1d6   : > { %v1428_v13 = vadd.f32 %v1427_v4, %v1426_v37  ;;  %v1561_v2 = vrot.slane %v1560_v26, 1 }
 0x1d8   : > { %1429 = vst [vmem:[%s237_s10] sm:$0x1] %v1428_v13  ;;  %v1562_v10 = vadd.f32 %v1561_v2, %v1560_v26 }
 0x1da   : > { %1563 = vst [vmem:[%s237_s10 + $0x1] sm:$0x1] %v1562_v10 }
 0x1db PF: > { %s14_s14 = sadd.s32 1, %s2286_s14   ;;  %s2862_s12 = smov %s2282_s13 }
 0x1dc   : > { %p11_p6 = scmp.ge.s32.totalorder %s14_s14, 6   ;;  %s2863_s13 = smov %s2865_s15 }
 0x1de   :  { %13 = sbr.rel (!%p11_p6) target bundleno = 2 (0x2), region = 73 }

// kernel: _lambda_.29
= control target key start
LH: loop header
LB: loop body
LE: loop exit
PB: predicated region body
PF: predicated region fallthrough
CT: control target
= control target key end

     0   :  { %s1344_s12 = smov 0   ;;  %s1346_s13 = smov 0   ;;  %s1574_s0 = inlined_call_operand.vmem [shape: bf16[2048,128], index: 0, kind: input, shape index: {}]   ;;  %s1575_s1 = inlined_call_operand.vmem [shape: bf16[128,128], index: 1, kind: input, shape index: {}]   ;;  %s1576_s2 = inlined_call_operand.vmem [shape: f32[1,128], index: 2, kind: input, shape index: {}]   ;;  %s1577_s3 = inlined_call_operand.vmem [shape: f32[2048,128], index: 3, kind: output, shape index: {}]  }
   0x1   :  { %s1348_s14 = smov 0  }
   0x2 LB: > { %s25_s15 = sadd.s32 1, %s1318_s13  ;;  %p1052_p0 = scmp.ge.s32.totalorder %s1322_s14, 1  ;;  %s1322_s14 = sphi %s1348_s14, %s13_s14   ;;  %s1318_s13 = sphi %s1346_s13, %s1579_s13   ;;  %s1314_s12 = sphi %s1344_s12, %s1578_s12  }
   0x3   : > { %p27_p1 = scmp.ge.s32.totalorder %s25_s15, 4  ;;  %p166_p2 = scmp.lt.s32.totalorder %s1322_s14, 5 }
   0x5   : > { %s1581_s15 = smov (%p27_p1, %s25_s15), 0  ;;  %p167_p3 = pnand %p1052_p0, %p166_p2 }
   0x6   : > { %s1053_s18 = sshll.u32 (!%p167_p3), %s1314_s12, 6 }
   0x7   : > { %170 = sbr.rel (%p167_p3) target bundleno = 305 (0x131), region = 32  ;;  %p199_p4 = scmp.lt.s32.totalorder (!%p167_p3), %s1053_s18, 255 }
   0xc   : > { %v1260_v0 = vld [vmem:[%s1575_s1 + $0x38] sm:$0xff]   ;;  %v1261_v1 = vld [vmem:[%s1575_s1 + $0x30] sm:$0xff]   ;;  %s1583_s18 = smov (!%p199_p4, %s1053_s18), 255  ;;  %v1262_v2 = vld [vmem:[%s1575_s1 + $0x28] sm:$0xff]  }
   0xd   : > { %1140 = vmatprep.subr.bf16.mxu0 %v1260_v0  ;;  %1220 = vmatprep.subr.bf16.mxu1 %v1260_v0  ;;  %s1054_s23 = sshll.u32 %s1583_s18, 2  ;;  %v1263_v3 = vld [vmem:[%s1575_s1 + $0x20] sm:$0xff]   ;;  %v1264_v6 = vld [vmem:[%s1575_s1 + $0x18] sm:$0xff]   ;;  %v1265_v7 = vld [vmem:[%s1575_s1 + $0x10] sm:$0xff]   ;;  %s1056_s12 = sshll.u32 %s1583_s18, 3 }
   0xe   : > { %1141 = vmatpush3.bf16.msra.mxu0 %v1260_v0  ;;  %1228 = vmatpush3.bf16.msra.mxu1 %v1260_v0  ;;  %s1377_s26 = scalar_lea.vmem %s1574_s0, %s1054_s23  ;;  %v1266_v8 = vld [vmem:[%s1575_s1 + $0x8] sm:$0xff]   ;;  %v1267_v9 = vld [vmem:[%s1575_s1] sm:$0xff]   ;;  %s1437_s19 = scalar_lea.vmem %s1577_s3, %s1056_s12 }
   0xf   : > { %1142 = vmatprep.subr.bf16.mxu0 %v1261_v1  ;;  %1221 = vmatprep.subr.bf16.mxu1 %v1261_v1  ;;  %v1268_v4 = vld [vmem:[%s1377_s26] sm:$0xff]   ;;  %v1270_v10 = vld [vmem:[%s1377_s26 + $0x8] sm:$0xff]   ;;  %v1272_v12 = vld [vmem:[%s1377_s26 + $0x10] sm:$0xff]  }
  0x10   : > { %v1269_v5 = vld [vmem:[%s1377_s26 + $0x80] sm:$0xff]   ;;  %1156 = vmatprep.mubr.bf16.mxu0 %v1268_v4  ;;  %v1271_v11 = vld [vmem:[%s1377_s26 + $0x88] sm:$0xff]   ;;  %v1273_v13 = vld [vmem:[%s1377_s26 + $0x90] sm:$0xff]  }
  0x11   : > { %1188 = vmatprep.mubr.bf16.mxu1 %v1269_v5  ;;  %v1274_v14 = vld [vmem:[%s1377_s26 + $0x18] sm:$0xff]   ;;  %v1276_v16 = vld [vmem:[%s1377_s26 + $0x20] sm:$0xff]   ;;  %v1278_v18 = vld [vmem:[%s1377_s26 + $0x28] sm:$0xff]  }
  0x12   : > { %1143 = vmatpush3.bf16.msra.mxu0 %v1261_v1  ;;  %1229 = vmatpush3.bf16.msra.mxu1 %v1261_v1  ;;  %v1275_v15 = vld [vmem:[%s1377_s26 + $0x98] sm:$0xff]   ;;  %v1277_v17 = vld [vmem:[%s1377_s26 + $0xa0] sm:$0xff]   ;;  %v1279_v19 = vld [vmem:[%s1377_s26 + $0xa8] sm:$0xff]  }
  0x13   : > { %1144 = vmatprep.subr.bf16.mxu0 %v1262_v2  ;;  %1222 = vmatprep.subr.bf16.mxu1 %v1262_v2  ;;  %v1280_v20 = vld [vmem:[%s1377_s26 + $0x30] sm:$0xff]   ;;  %v1282_v22 = vld [vmem:[%s1377_s26 + $0x38] sm:$0xff]   ;;  %v1284_v24 = vld [vmem:[%s1377_s26 + $0x40] sm:$0xff]  }
  0x14   : > { %v1281_v21 = vld [vmem:[%s1377_s26 + $0xb0] sm:$0xff]   ;;  %v1283_v23 = vld [vmem:[%s1377_s26 + $0xb8] sm:$0xff]   ;;  %v1285_v25 = vld [vmem:[%s1377_s26 + $0xc0] sm:$0xff]  }
  0x15   : > { %v1286_v26 = vld [vmem:[%s1377_s26 + $0x48] sm:$0xff]   ;;  %v1288_v28 = vld [vmem:[%s1377_s26 + $0x50] sm:$0xff]   ;;  %v1290_v30 = vld [vmem:[%s1377_s26 + $0x58] sm:$0xff]  }
  0x16   : > { %1145 = vmatpush3.bf16.msra.mxu0 %v1262_v2  ;;  %1230 = vmatpush3.bf16.msra.mxu1 %v1262_v2  ;;  %v1287_v27 = vld [vmem:[%s1377_s26 + $0xc8] sm:$0xff]   ;;  %v1289_v29 = vld [vmem:[%s1377_s26 + $0xd0] sm:$0xff]   ;;  %v1291_v31 = vld [vmem:[%s1377_s26 + $0xd8] sm:$0xff]  }
  0x17   : > { %1146 = vmatprep.subr.bf16.mxu0 %v1263_v3  ;;  %1223 = vmatprep.subr.bf16.mxu1 %v1263_v3  ;;  %v1292_v32 = vld [vmem:[%s1377_s26 + $0x60] sm:$0xff]   ;;  %v1294_v34 = vld [vmem:[%s1377_s26 + $0x68] sm:$0xff]   ;;  %v1296_v36 = vld [vmem:[%s1377_s26 + $0x70] sm:$0xff]  }
  0x18   : > { %v1293_v33 = vld [vmem:[%s1377_s26 + $0xe0] sm:$0xff]   ;;  %v1295_v35 = vld [vmem:[%s1377_s26 + $0xe8] sm:$0xff]   ;;  %v1297_v37 = vld [vmem:[%s1377_s26 + $0xf0] sm:$0xff]  }
  0x19   : > { %v1298_v38 = vld [vmem:[%s1377_s26 + $0x78] sm:$0xff]   ;;  %v1429_v40 = vld [vmem:[%s1576_s2] ss:$0 sm:$0xff] }
  0x1a   : > { %1147 = vmatpush3.bf16.msra.mxu0 %v1263_v3  ;;  %1231 = vmatpush3.bf16.msra.mxu1 %v1263_v3  ;;  %v1299_v39 = vld [vmem:[%s1377_s26 + $0xf8] sm:$0xff]  }
  0x1b   : > { %1148 = vmatprep.subr.bf16.mxu0 %v1264_v6  ;;  %1224 = vmatprep.subr.bf16.mxu1 %v1264_v6 }
  0x1e   : > { %1149 = vmatpush3.bf16.msra.mxu0 %v1264_v6  ;;  %1232 = vmatpush3.bf16.msra.mxu1 %v1264_v6 }
  0x1f   : > { %1150 = vmatprep.subr.bf16.mxu0 %v1265_v7  ;;  %1225 = vmatprep.subr.bf16.mxu1 %v1265_v7 }
  0x22   : > { %1151 = vmatpush3.bf16.msra.mxu0 %v1265_v7  ;;  %1233 = vmatpush3.bf16.msra.mxu1 %v1265_v7 }
  0x23   : > { %1152 = vmatprep.subr.bf16.mxu0 %v1266_v8  ;;  %1226 = vmatprep.subr.bf16.mxu1 %v1266_v8 }
  0x26   : > { %1153 = vmatpush3.bf16.msra.mxu0 %v1266_v8  ;;  %1234 = vmatpush3.bf16.msra.mxu1 %v1266_v8 }
  0x27   : > { %1154 = vmatprep.subr.bf16.mxu0 %v1267_v9  ;;  %1227 = vmatprep.subr.bf16.mxu1 %v1267_v9 }
  0x2a   : > { %1155 = vmatpush3.bf16.msra.mxu0 %v1267_v9  ;;  %1235 = vmatpush3.bf16.msra.mxu1 %v1267_v9 }
  0x2d   : > { %1157 = vmatmul.mubr.bf16.vlgmr.msra.gmra.mxu0 %v1270_v10  ;;  %1189 = vmatmul.mubr.bf16.vlgmr.msra.gmra.mxu1 %v1271_v11 }
  0x2e   : > { %1160 = vmatprep.mubr.bf16.mxu0 %v1272_v12  ;;  %1192 = vmatprep.mubr.bf16.mxu1 %v1273_v13 }
  0x35   : > { %1161 = vmatmul.mubr.bf16.gmra.mxu0 %v1274_v14  ;;  %1193 = vmatmul.mubr.bf16.gmra.mxu1 %v1275_v15 }
  0x36   : > { %1164 = vmatprep.mubr.bf16.mxu0 %v1276_v16  ;;  %1196 = vmatprep.mubr.bf16.mxu1 %v1277_v17 }
  0x3d   : > { %1165 = vmatmul.mubr.bf16.gmra.mxu0 %v1278_v18  ;;  %1197 = vmatmul.mubr.bf16.gmra.mxu1 %v1279_v19 }
  0x3e   : > { %1168 = vmatprep.mubr.bf16.mxu0 %v1280_v20  ;;  %1200 = vmatprep.mubr.bf16.mxu1 %v1281_v21 }
  0x45   : > { %1169 = vmatmul.mubr.bf16.gmra.mxu0 %v1282_v22  ;;  %1201 = vmatmul.mubr.bf16.gmra.mxu1 %v1283_v23 }
  0x46   : > { %1172 = vmatprep.mubr.bf16.mxu0 %v1284_v24  ;;  %1204 = vmatprep.mubr.bf16.mxu1 %v1285_v25 }
  0x4d   : > { %1173 = vmatmul.mubr.bf16.gmra.mxu0 %v1286_v26  ;;  %1205 = vmatmul.mubr.bf16.gmra.mxu1 %v1287_v27 }
  0x4e   : > { %1176 = vmatprep.mubr.bf16.mxu0 %v1288_v28  ;;  %1208 = vmatprep.mubr.bf16.mxu1 %v1289_v29 }
  0x55   : > { %1177 = vmatmul.mubr.bf16.gmra.mxu0 %v1290_v30  ;;  %1209 = vmatmul.mubr.bf16.gmra.mxu1 %v1291_v31 }
  0x56   : > { %1180 = vmatprep.mubr.bf16.mxu0 %v1292_v32  ;;  %1212 = vmatprep.mubr.bf16.mxu1 %v1293_v33 }
  0x5d   : > { %1181 = vmatmul.mubr.bf16.gmra.mxu0 %v1294_v34  ;;  %1213 = vmatmul.mubr.bf16.gmra.mxu1 %v1295_v35 }
  0x5e   : > { %1184 = vmatprep.mubr.bf16.mxu0 %v1296_v36  ;;  %1216 = vmatprep.mubr.bf16.mxu1 %v1297_v37 }
  0x65   : > { %1185 = vmatmul.mubr.bf16.gmra.mxu0 %v1298_v38  ;;  %1217 = vmatmul.mubr.bf16.gmra.mxu1 %v1299_v39 }
  0xed   : > { %v1158_v41 = vpop.f32.mrf.mxu0  ;;  %v1190_v42 = vpop.f32.mrf.mxu1 }
  0xee   : > { %v590_v43 = vadd.f32 %v1158_v41, %v1429_v40  ;;  %v718_v44 = vadd.f32 %v1190_v42, %v1429_v40 }
  0xef   : > { %v581_v45 = vpop.f32.mrf.mxu0  ;;  %v709_v46 = vpop.f32.mrf.mxu1 }
  0xf0   : > { %v838_v47 = vmax.f32 %v590_v43, 0.0  ;;  %v870_v48 = vmax.f32 %v718_v44, 0.0  ;;  %v582_v49 = vadd.f32 %v1429_v40, %v581_v45  ;;  %v710_v50 = vadd.f32 %v1429_v40, %v709_v46 }
  0xf1   : > { %v1159_v51 = vpop.f32.mrf.mxu0  ;;  %v1191_v52 = vpop.f32.mrf.mxu1 }
  0xf2   : > { %902 = vst [vmem:[%s1437_s19 + $0x10] sm:$0xff] %v838_v47  ;;  %934 = vst [vmem:[%s1437_s19 + $0x110] sm:$0xff] %v870_v48  ;;  %v836_v53 = vmax.f32 %v582_v49, 0.0  ;;  %v868_v54 = vmax.f32 %v710_v50, 0.0  ;;  %v593_v55 = vadd.f32 %v1159_v51, %v1429_v40  ;;  %v721_v56 = vadd.f32 %v1191_v52, %v1429_v40 }
  0xf3   : > { %v584_v57 = vpop.f32.mrf.mxu0  ;;  %v712_v58 = vpop.f32.mrf.mxu1 }
  0xf4   : > { %900 = vst [vmem:[%s1437_s19] sm:$0xff] %v836_v53  ;;  %932 = vst [vmem:[%s1437_s19 + $0x100] sm:$0xff] %v868_v54  ;;  %v839_v59 = vmax.f32 %v593_v55, 0.0  ;;  %v871_v60 = vmax.f32 %v721_v56, 0.0  ;;  %v585_v61 = vadd.f32 %v1429_v40, %v584_v57  ;;  %v713_v62 = vadd.f32 %v1429_v40, %v712_v58 }
  0xf5   : > { %v1162_v63 = vpop.f32.mrf.mxu0  ;;  %v1194_v0 = vpop.f32.mrf.mxu1 }
  0xf6   : > { %903 = vst [vmem:[%s1437_s19 + $0x18] sm:$0xff] %v839_v59  ;;  %935 = vst [vmem:[%s1437_s19 + $0x118] sm:$0xff] %v871_v60  ;;  %v837_v1 = vmax.f32 %v585_v61, 0.0  ;;  %v869_v2 = vmax.f32 %v713_v62, 0.0  ;;  %v606_v3 = vadd.f32 %v1162_v63, %v1429_v40  ;;  %v734_v4 = vadd.f32 %v1194_v0, %v1429_v40 }
  0xf7   : > { %v597_v5 = vpop.f32.mrf.mxu0  ;;  %v725_v6 = vpop.f32.mrf.mxu1 }
  0xf8   : > { %901 = vst [vmem:[%s1437_s19 + $0x8] sm:$0xff] %v837_v1  ;;  %933 = vst [vmem:[%s1437_s19 + $0x108] sm:$0xff] %v869_v2  ;;  %v842_v7 = vmax.f32 %v606_v3, 0.0  ;;  %v874_v8 = vmax.f32 %v734_v4, 0.0  ;;  %v598_v9 = vadd.f32 %v1429_v40, %v597_v5  ;;  %v726_v10 = vadd.f32 %v1429_v40, %v725_v6 }
  0xf9   : > { %v1163_v11 = vpop.f32.mrf.mxu0  ;;  %v1195_v12 = vpop.f32.mrf.mxu1 }
  0xfa   : > { %906 = vst [vmem:[%s1437_s19 + $0x30] sm:$0xff] %v842_v7  ;;  %938 = vst [vmem:[%s1437_s19 + $0x130] sm:$0xff] %v874_v8  ;;  %v840_v13 = vmax.f32 %v598_v9, 0.0  ;;  %v872_v14 = vmax.f32 %v726_v10, 0.0  ;;  %v609_v15 = vadd.f32 %v1163_v11, %v1429_v40  ;;  %v737_v16 = vadd.f32 %v1195_v12, %v1429_v40 }
  0xfb   : > { %v600_v17 = vpop.f32.mrf.mxu0  ;;  %v728_v18 = vpop.f32.mrf.mxu1 }
  0xfc   : > { %904 = vst [vmem:[%s1437_s19 + $0x20] sm:$0xff] %v840_v13  ;;  %936 = vst [vmem:[%s1437_s19 + $0x120] sm:$0xff] %v872_v14  ;;  %v843_v19 = vmax.f32 %v609_v15, 0.0  ;;  %v875_v20 = vmax.f32 %v737_v16, 0.0  ;;  %v601_v21 = vadd.f32 %v1429_v40, %v600_v17  ;;  %v729_v22 = vadd.f32 %v1429_v40, %v728_v18 }
  0xfd   : > { %v1166_v23 = vpop.f32.mrf.mxu0  ;;  %v1198_v24 = vpop.f32.mrf.mxu1 }
  0xfe   : > { %907 = vst [vmem:[%s1437_s19 + $0x38] sm:$0xff] %v843_v19  ;;  %939 = vst [vmem:[%s1437_s19 + $0x138] sm:$0xff] %v875_v20  ;;  %v841_v25 = vmax.f32 %v601_v21, 0.0  ;;  %v873_v26 = vmax.f32 %v729_v22, 0.0  ;;  %v622_v27 = vadd.f32 %v1166_v23, %v1429_v40  ;;  %v750_v28 = vadd.f32 %v1198_v24, %v1429_v40 }
  0xff   : > { %v613_v29 = vpop.f32.mrf.mxu0  ;;  %v741_v30 = vpop.f32.mrf.mxu1 }
 0x100   : > { %905 = vst [vmem:[%s1437_s19 + $0x28] sm:$0xff] %v841_v25  ;;  %937 = vst [vmem:[%s1437_s19 + $0x128] sm:$0xff] %v873_v26  ;;  %v846_v31 = vmax.f32 %v622_v27, 0.0  ;;  %v878_v32 = vmax.f32 %v750_v28, 0.0  ;;  %v614_v33 = vadd.f32 %v1429_v40, %v613_v29  ;;  %v742_v34 = vadd.f32 %v1429_v40, %v741_v30 }
 0x101   : > { %v1167_v35 = vpop.f32.mrf.mxu0  ;;  %v1199_v36 = vpop.f32.mrf.mxu1 }
 0x102   : > { %910 = vst [vmem:[%s1437_s19 + $0x50] sm:$0xff] %v846_v31  ;;  %942 = vst [vmem:[%s1437_s19 + $0x150] sm:$0xff] %v878_v32  ;;  %v844_v37 = vmax.f32 %v614_v33, 0.0  ;;  %v876_v38 = vmax.f32 %v742_v34, 0.0  ;;  %v625_v39 = vadd.f32 %v1167_v35, %v1429_v40  ;;  %v753_v41 = vadd.f32 %v1199_v36, %v1429_v40 }
 0x103   : > { %v616_v42 = vpop.f32.mrf.mxu0  ;;  %v744_v43 = vpop.f32.mrf.mxu1 }
 0x104   : > { %908 = vst [vmem:[%s1437_s19 + $0x40] sm:$0xff] %v844_v37  ;;  %940 = vst [vmem:[%s1437_s19 + $0x140] sm:$0xff] %v876_v38  ;;  %v847_v44 = vmax.f32 %v625_v39, 0.0  ;;  %v879_v45 = vmax.f32 %v753_v41, 0.0  ;;  %v617_v46 = vadd.f32 %v1429_v40, %v616_v42  ;;  %v745_v47 = vadd.f32 %v1429_v40, %v744_v43 }
 0x105   : > { %v1170_v48 = vpop.f32.mrf.mxu0  ;;  %v1202_v49 = vpop.f32.mrf.mxu1 }
 0x106   : > { %911 = vst [vmem:[%s1437_s19 + $0x58] sm:$0xff] %v847_v44  ;;  %943 = vst [vmem:[%s1437_s19 + $0x158] sm:$0xff] %v879_v45  ;;  %v845_v50 = vmax.f32 %v617_v46, 0.0  ;;  %v877_v51 = vmax.f32 %v745_v47, 0.0  ;;  %v638_v52 = vadd.f32 %v1170_v48, %v1429_v40  ;;  %v766_v53 = vadd.f32 %v1202_v49, %v1429_v40 }
 0x107   : > { %v629_v54 = vpop.f32.mrf.mxu0  ;;  %v757_v55 = vpop.f32.mrf.mxu1 }
 0x108   : > { %909 = vst [vmem:[%s1437_s19 + $0x48] sm:$0xff] %v845_v50  ;;  %941 = vst [vmem:[%s1437_s19 + $0x148] sm:$0xff] %v877_v51  ;;  %v850_v56 = vmax.f32 %v638_v52, 0.0  ;;  %v882_v57 = vmax.f32 %v766_v53, 0.0  ;;  %v630_v58 = vadd.f32 %v1429_v40, %v629_v54  ;;  %v758_v59 = vadd.f32 %v1429_v40, %v757_v55 }
 0x109   : > { %v1171_v60 = vpop.f32.mrf.mxu0  ;;  %v1203_v61 = vpop.f32.mrf.mxu1 }
 0x10a   : > { %914 = vst [vmem:[%s1437_s19 + $0x70] sm:$0xff] %v850_v56  ;;  %946 = vst [vmem:[%s1437_s19 + $0x170] sm:$0xff] %v882_v57  ;;  %v848_v62 = vmax.f32 %v630_v58, 0.0  ;;  %v880_v63 = vmax.f32 %v758_v59, 0.0  ;;  %v641_v0 = vadd.f32 %v1171_v60, %v1429_v40  ;;  %v769_v1 = vadd.f32 %v1203_v61, %v1429_v40 }
 0x10b   : > { %v632_v2 = vpop.f32.mrf.mxu0  ;;  %v760_v3 = vpop.f32.mrf.mxu1 }
 0x10c   : > { %912 = vst [vmem:[%s1437_s19 + $0x60] sm:$0xff] %v848_v62  ;;  %944 = vst [vmem:[%s1437_s19 + $0x160] sm:$0xff] %v880_v63  ;;  %v851_v4 = vmax.f32 %v641_v0, 0.0  ;;  %v883_v5 = vmax.f32 %v769_v1, 0.0  ;;  %v633_v6 = vadd.f32 %v1429_v40, %v632_v2  ;;  %v761_v7 = vadd.f32 %v1429_v40, %v760_v3 }
 0x10d   : > { %v1174_v8 = vpop.f32.mrf.mxu0  ;;  %v1206_v9 = vpop.f32.mrf.mxu1 }
 0x10e   : > { %915 = vst [vmem:[%s1437_s19 + $0x78] sm:$0xff] %v851_v4  ;;  %947 = vst [vmem:[%s1437_s19 + $0x178] sm:$0xff] %v883_v5  ;;  %v849_v10 = vmax.f32 %v633_v6, 0.0  ;;  %v881_v11 = vmax.f32 %v761_v7, 0.0  ;;  %v654_v12 = vadd.f32 %v1174_v8, %v1429_v40  ;;  %v782_v13 = vadd.f32 %v1206_v9, %v1429_v40 }
 0x10f   : > { %v645_v14 = vpop.f32.mrf.mxu0  ;;  %v773_v15 = vpop.f32.mrf.mxu1 }
 0x110   : > { %913 = vst [vmem:[%s1437_s19 + $0x68] sm:$0xff] %v849_v10  ;;  %945 = vst [vmem:[%s1437_s19 + $0x168] sm:$0xff] %v881_v11  ;;  %v854_v16 = vmax.f32 %v654_v12, 0.0  ;;  %v886_v17 = vmax.f32 %v782_v13, 0.0  ;;  %v646_v18 = vadd.f32 %v1429_v40, %v645_v14  ;;  %v774_v19 = vadd.f32 %v1429_v40, %v773_v15 }
 0x111   : > { %v1175_v20 = vpop.f32.mrf.mxu0  ;;  %v1207_v21 = vpop.f32.mrf.mxu1 }
 0x112   : > { %918 = vst [vmem:[%s1437_s19 + $0x90] sm:$0xff] %v854_v16  ;;  %950 = vst [vmem:[%s1437_s19 + $0x190] sm:$0xff] %v886_v17  ;;  %v852_v22 = vmax.f32 %v646_v18, 0.0  ;;  %v884_v23 = vmax.f32 %v774_v19, 0.0  ;;  %v657_v24 = vadd.f32 %v1175_v20, %v1429_v40  ;;  %v785_v25 = vadd.f32 %v1207_v21, %v1429_v40 }
 0x113   : > { %v648_v26 = vpop.f32.mrf.mxu0  ;;  %v776_v27 = vpop.f32.mrf.mxu1 }
 0x114   : > { %916 = vst [vmem:[%s1437_s19 + $0x80] sm:$0xff] %v852_v22  ;;  %948 = vst [vmem:[%s1437_s19 + $0x180] sm:$0xff] %v884_v23  ;;  %v855_v28 = vmax.f32 %v657_v24, 0.0  ;;  %v887_v29 = vmax.f32 %v785_v25, 0.0  ;;  %v649_v30 = vadd.f32 %v1429_v40, %v648_v26  ;;  %v777_v31 = vadd.f32 %v1429_v40, %v776_v27 }
 0x115   : > { %v1178_v32 = vpop.f32.mrf.mxu0  ;;  %v1210_v33 = vpop.f32.mrf.mxu1 }
 0x116   : > { %919 = vst [vmem:[%s1437_s19 + $0x98] sm:$0xff] %v855_v28  ;;  %951 = vst [vmem:[%s1437_s19 + $0x198] sm:$0xff] %v887_v29  ;;  %v853_v34 = vmax.f32 %v649_v30, 0.0  ;;  %v885_v35 = vmax.f32 %v777_v31, 0.0  ;;  %v670_v36 = vadd.f32 %v1178_v32, %v1429_v40  ;;  %v798_v37 = vadd.f32 %v1210_v33, %v1429_v40 }
 0x117   : > { %v661_v38 = vpop.f32.mrf.mxu0  ;;  %v789_v39 = vpop.f32.mrf.mxu1 }
 0x118   : > { %917 = vst [vmem:[%s1437_s19 + $0x88] sm:$0xff] %v853_v34  ;;  %949 = vst [vmem:[%s1437_s19 + $0x188] sm:$0xff] %v885_v35  ;;  %v858_v41 = vmax.f32 %v670_v36, 0.0  ;;  %v890_v42 = vmax.f32 %v798_v37, 0.0  ;;  %v662_v43 = vadd.f32 %v1429_v40, %v661_v38  ;;  %v790_v44 = vadd.f32 %v1429_v40, %v789_v39 }
 0x119   : > { %v1179_v45 = vpop.f32.mrf.mxu0  ;;  %v1211_v46 = vpop.f32.mrf.mxu1 }
 0x11a   : > { %922 = vst [vmem:[%s1437_s19 + $0xb0] sm:$0xff] %v858_v41  ;;  %954 = vst [vmem:[%s1437_s19 + $0x1b0] sm:$0xff] %v890_v42  ;;  %v856_v47 = vmax.f32 %v662_v43, 0.0  ;;  %v888_v48 = vmax.f32 %v790_v44, 0.0  ;;  %v673_v49 = vadd.f32 %v1179_v45, %v1429_v40  ;;  %v801_v50 = vadd.f32 %v1211_v46, %v1429_v40 }
 0x11b   : > { %v664_v51 = vpop.f32.mrf.mxu0  ;;  %v792_v52 = vpop.f32.mrf.mxu1 }
 0x11c   : > { %920 = vst [vmem:[%s1437_s19 + $0xa0] sm:$0xff] %v856_v47  ;;  %952 = vst [vmem:[%s1437_s19 + $0x1a0] sm:$0xff] %v888_v48  ;;  %v859_v53 = vmax.f32 %v673_v49, 0.0  ;;  %v891_v54 = vmax.f32 %v801_v50, 0.0  ;;  %v665_v55 = vadd.f32 %v1429_v40, %v664_v51  ;;  %v793_v56 = vadd.f32 %v1429_v40, %v792_v52 }
 0x11d   : > { %v1182_v57 = vpop.f32.mrf.mxu0  ;;  %v1214_v58 = vpop.f32.mrf.mxu1 }
 0x11e   : > { %923 = vst [vmem:[%s1437_s19 + $0xb8] sm:$0xff] %v859_v53  ;;  %955 = vst [vmem:[%s1437_s19 + $0x1b8] sm:$0xff] %v891_v54  ;;  %v857_v59 = vmax.f32 %v665_v55, 0.0  ;;  %v889_v60 = vmax.f32 %v793_v56, 0.0  ;;  %v686_v61 = vadd.f32 %v1182_v57, %v1429_v40  ;;  %v814_v62 = vadd.f32 %v1214_v58, %v1429_v40 }
 0x11f   : > { %v677_v63 = vpop.f32.mrf.mxu0  ;;  %v805_v0 = vpop.f32.mrf.mxu1 }
 0x120   : > { %921 = vst [vmem:[%s1437_s19 + $0xa8] sm:$0xff] %v857_v59  ;;  %953 = vst [vmem:[%s1437_s19 + $0x1a8] sm:$0xff] %v889_v60  ;;  %v862_v1 = vmax.f32 %v686_v61, 0.0  ;;  %v894_v2 = vmax.f32 %v814_v62, 0.0  ;;  %v678_v3 = vadd.f32 %v1429_v40, %v677_v63  ;;  %v806_v4 = vadd.f32 %v1429_v40, %v805_v0 }
 0x121   : > { %v1183_v5 = vpop.f32.mrf.mxu0  ;;  %v1215_v6 = vpop.f32.mrf.mxu1 }
 0x122   : > { %926 = vst [vmem:[%s1437_s19 + $0xd0] sm:$0xff] %v862_v1  ;;  %958 = vst [vmem:[%s1437_s19 + $0x1d0] sm:$0xff] %v894_v2  ;;  %v860_v7 = vmax.f32 %v678_v3, 0.0  ;;  %v892_v8 = vmax.f32 %v806_v4, 0.0  ;;  %v689_v9 = vadd.f32 %v1183_v5, %v1429_v40  ;;  %v817_v10 = vadd.f32 %v1215_v6, %v1429_v40 }
 0x123   : > { %v680_v11 = vpop.f32.mrf.mxu0  ;;  %v808_v12 = vpop.f32.mrf.mxu1 }
 0x124   : > { %924 = vst [vmem:[%s1437_s19 + $0xc0] sm:$0xff] %v860_v7  ;;  %956 = vst [vmem:[%s1437_s19 + $0x1c0] sm:$0xff] %v892_v8  ;;  %v863_v13 = vmax.f32 %v689_v9, 0.0  ;;  %v895_v14 = vmax.f32 %v817_v10, 0.0  ;;  %v681_v15 = vadd.f32 %v1429_v40, %v680_v11  ;;  %v809_v16 = vadd.f32 %v1429_v40, %v808_v12 }
 0x125   : > { %v1186_v17 = vpop.f32.mrf.mxu0  ;;  %v1218_v18 = vpop.f32.mrf.mxu1 }
 0x126   : > { %927 = vst [vmem:[%s1437_s19 + $0xd8] sm:$0xff] %v863_v13  ;;  %959 = vst [vmem:[%s1437_s19 + $0x1d8] sm:$0xff] %v895_v14  ;;  %v861_v19 = vmax.f32 %v681_v15, 0.0  ;;  %v893_v20 = vmax.f32 %v809_v16, 0.0  ;;  %v702_v21 = vadd.f32 %v1186_v17, %v1429_v40  ;;  %v830_v22 = vadd.f32 %v1218_v18, %v1429_v40 }
 0x127   : > { %v693_v23 = vpop.f32.mrf.mxu0  ;;  %v821_v24 = vpop.f32.mrf.mxu1 }
 0x128   : > { %925 = vst [vmem:[%s1437_s19 + $0xc8] sm:$0xff] %v861_v19  ;;  %957 = vst [vmem:[%s1437_s19 + $0x1c8] sm:$0xff] %v893_v20  ;;  %v866_v25 = vmax.f32 %v702_v21, 0.0  ;;  %v898_v26 = vmax.f32 %v830_v22, 0.0  ;;  %v694_v27 = vadd.f32 %v1429_v40, %v693_v23  ;;  %v822_v28 = vadd.f32 %v1429_v40, %v821_v24 }
 0x129   : > { %v1187_v29 = vpop.f32.mrf.mxu0  ;;  %v1219_v30 = vpop.f32.mrf.mxu1 }
 0x12a   : > { %930 = vst [vmem:[%s1437_s19 + $0xf0] sm:$0xff] %v866_v25  ;;  %962 = vst [vmem:[%s1437_s19 + $0x1f0] sm:$0xff] %v898_v26  ;;  %v864_v31 = vmax.f32 %v694_v27, 0.0  ;;  %v896_v32 = vmax.f32 %v822_v28, 0.0  ;;  %v705_v33 = vadd.f32 %v1187_v29, %v1429_v40  ;;  %v833_v34 = vadd.f32 %v1219_v30, %v1429_v40 }
 0x12b   : > { %v696_v35 = vpop.f32.mrf.mxu0  ;;  %v824_v36 = vpop.f32.mrf.mxu1 }
 0x12c   : > { %928 = vst [vmem:[%s1437_s19 + $0xe0] sm:$0xff] %v864_v31  ;;  %960 = vst [vmem:[%s1437_s19 + $0x1e0] sm:$0xff] %v896_v32  ;;  %v867_v37 = vmax.f32 %v705_v33, 0.0  ;;  %v899_v38 = vmax.f32 %v833_v34, 0.0  ;;  %v697_v39 = vadd.f32 %v1429_v40, %v696_v35  ;;  %v825_v41 = vadd.f32 %v1429_v40, %v824_v36 }
 0x12e   : > { %931 = vst [vmem:[%s1437_s19 + $0xf8] sm:$0xff] %v867_v37  ;;  %963 = vst [vmem:[%s1437_s19 + $0x1f8] sm:$0xff] %v899_v38  ;;  %v865_v42 = vmax.f32 %v697_v39, 0.0  ;;  %v897_v43 = vmax.f32 %v825_v41, 0.0 }
 0x130   : > { %929 = vst [vmem:[%s1437_s19 + $0xe8] sm:$0xff] %v865_v42  ;;  %961 = vst [vmem:[%s1437_s19 + $0x1e8] sm:$0xff] %v897_v43 }
 0x131 PF: > { %s13_s14 = sadd.s32 1, %s1322_s14   ;;  %s1578_s12 = smov %s1318_s13 }
 0x132   : > { %p10_p5 = scmp.ge.s32.totalorder %s13_s14, 6   ;;  %s1579_s13 = smov %s1581_s15 }
 0x134   :  { %12 = sbr.rel (!%p10_p5) target bundleno = 2 (0x2), region = 65 }

</bundles_post_ra>
